<compile_context>
chip_gen: v6e
topology: v6e:2x2x1
jax: 0.10.0
libtpu: 0.0.40
codegen_flags: <defaults>
</compile_context>

<pallas_src>
import functools
import math

import numpy as np

import jax
import jax.numpy as jnp
from jax.experimental import pallas as pl
from jax.experimental.pallas import tpu as pltpu


def _round_up(x, m):
    return (x + m - 1) // m * m


def _largest_div(total, cap, quantum):
    """Largest divisor of `total` that is <= cap and a multiple of `quantum`."""
    d = (min(cap, total) // quantum) * quantum
    while d >= quantum:
        if total % d == 0:
            return d
        d -= quantum
    return total


def _vmem_limit_bytes():
    cap = 128 * 1024 * 1024
    try:
        info = pltpu.get_tpu_info()
        cap = int(getattr(info, "vmem_capacity_bytes", cap))
    except Exception:
        pass
    # ~96-100 MiB on 128-MiB parts (v5e/v6e), ~48 MiB on 64-MiB parts (v7x).
    return min(int(cap * 3 // 4), 100 * 1024 * 1024)


_VMEM_LIMIT = _vmem_limit_bytes()


# ---------------------------------------------------------------------------
# Tiled matmul with fused epilogue (affine / residual / activation / LayerNorm)
# ---------------------------------------------------------------------------

def _mm_kernel(*refs, k_axis, use_acc, has_scale, has_shift, has_res, has_ln,
               activation, ln_eps):
    it = iter(refs)
    x_ref = next(it)
    w_ref = next(it)
    scale_ref = next(it) if has_scale else None
    shift_ref = next(it) if has_shift else None
    res_ref = next(it) if has_res else None
    g_ref = next(it) if has_ln else None
    b_ref = next(it) if has_ln else None
    o_ref = next(it)
    acc_ref = next(it) if use_acc else None

    def epilogue(y):
        if has_scale:
            y = y * scale_ref[...]
        if has_shift:
            y = y + shift_ref[...]
        if has_res:
            y = y + res_ref[...].astype(jnp.float32)
        if activation == "relu":
            y = jnp.maximum(y, 0.0)
        elif activation == "tanh":
            y = jnp.tanh(y)
        if has_ln:
            mu = jnp.mean(y, axis=-1, keepdims=True)
            var = jnp.mean((y - mu) ** 2, axis=-1, keepdims=True)
            y = (y - mu) * jax.lax.rsqrt(var + ln_eps) * g_ref[...] + b_ref[...]
        return y

    if not use_acc:
        # Single K step: no f32 accumulator scratch, write output directly.
        y = jnp.dot(x_ref[...], w_ref[...], preferred_element_type=jnp.float32)
        o_ref[...] = epilogue(y).astype(o_ref.dtype)
    else:
        k = pl.program_id(k_axis)

        @pl.when(k == 0)
        def _init():
            acc_ref[...] = jnp.zeros_like(acc_ref)

        acc_ref[...] += jnp.dot(x_ref[...], w_ref[...],
                                preferred_element_type=jnp.float32)

        @pl.when(k == pl.num_programs(k_axis) - 1)
        def _finalize():
            o_ref[...] = epilogue(acc_ref[...]).astype(o_ref.dtype)


def _matmul_tiles(M, K, N, has_res, has_ln, vmem_limit):
    """Pick (TM, TN, TK) from the VMEM budget, preferring whole-M tiles so the
    weight matrix is streamed from HBM exactly once for inference-sized M."""
    budget = int(vmem_limit * 0.7)
    TK = K if K <= 512 else _largest_div(K, 512, 128)
    n_k = K // TK

    if has_ln or N <= 1536:
        tn_cands = [N]          # LayerNorm epilogue requires the full row.
    else:
        tn_cands = [N]
        for cap in (1536, 1024):
            d = _largest_div(N, cap, 128)
            if d < N and d not in tn_cands:
                tn_cands.append(d)

    m_need = _round_up(M, 8)
    for TN in tn_cands:
        # bytes/TM-row: double-buffered bf16 x + out (+res) + f32 acc (if any)
        per_row = 4 * TK + 4 * TN
        if n_k > 1:
            per_row += 4 * TN
        if has_res:
            per_row += 4 * TN
        fixed = 4 * TK * TN     # double-buffered bf16 weight block
        if budget <= fixed:
            continue
        tm_fit = (budget - fixed) // per_row
        TM = min(m_need, 1024, (tm_fit // 8) * 8)
        TM = max(TM, 8)
        if TM >= min(m_need, 256) or TN == tn_cands[-1]:
            return TM, TN, TK
    return 8, tn_cands[-1], TK


def matmul_fused(x, w, *, scale=None, shift=None, residual=None, ln_params=None,
                 activation="none", out_dtype=jnp.bfloat16, ln_eps=1e-5):
    """out = maybe_LN(act(((x @ w) * scale + shift) + residual)).

    x: (M, K), w: (K, N).  bf16 MXU inputs, f32 accumulation.  LayerNorm can
    only be fused when N is kept whole (enforced by the tile chooser).
    """
    M, K = x.shape
    K2, N = w.shape
    assert K == K2
    has_scale = scale is not None
    has_shift = shift is not None
    has_res = residual is not None
    has_ln = ln_params is not None

    TM, TN, TK = _matmul_tiles(M, K, N, has_res, has_ln, _VMEM_LIMIT)
    TM = min(TM, _round_up(M, 8))
    Mp = _round_up(M, TM)
    n_m, n_n, n_k = Mp // TM, N // TN, K // TK
    tiled_n, tiled_k = n_n > 1, n_k > 1
    use_acc = tiled_k

    x = x.astype(jnp.bfloat16)
    if Mp != M:
        x = jnp.pad(x, ((0, Mp - M), (0, 0)))
    w = w.astype(jnp.bfloat16)

    if tiled_n and tiled_k:
        grid = (n_m, n_n, n_k)
        sem = ("parallel", "parallel", "arbitrary")
        k_axis = 2
        x_map = lambda i, j, k: (i, k)
        w_map = lambda i, j, k: (k, j)
        v_map = lambda i, j, k: (0, j)
        o_map = lambda i, j, k: (i, j)
    elif tiled_n:
        grid = (n_m, n_n)
        sem = ("parallel", "parallel")
        k_axis = None
        x_map = lambda i, j: (i, 0)
        w_map = lambda i, j: (0, j)
        v_map = lambda i, j: (0, j)
        o_map = lambda i, j: (i, j)
    elif tiled_k:
        grid = (n_m, n_k)
        sem = ("parallel", "arbitrary")
        k_axis = 1
        x_map = lambda i, k: (i, k)
        w_map = lambda i, k: (k, 0)
        v_map = lambda i, k: (0, 0)
        o_map = lambda i, k: (i, 0)
    else:
        grid = (n_m,)
        sem = ("parallel",)
        k_axis = None
        x_map = lambda i: (i, 0)
        w_map = lambda i: (0, 0)
        v_map = lambda i: (0, 0)
        o_map = lambda i: (i, 0)

    inputs = [x, w]
    in_specs = [pl.BlockSpec((TM, TK), x_map), pl.BlockSpec((TK, TN), w_map)]
    if has_scale:
        inputs.append(scale.reshape(1, N).astype(jnp.float32))
        in_specs.append(pl.BlockSpec((1, TN), v_map))
    if has_shift:
        inputs.append(shift.reshape(1, N).astype(jnp.float32))
        in_specs.append(pl.BlockSpec((1, TN), v_map))
    if has_res:
        r = residual.astype(jnp.bfloat16)
        if Mp != M:
            r = jnp.pad(r, ((0, Mp - M), (0, 0)))
        inputs.append(r)
        in_specs.append(pl.BlockSpec((TM, TN), o_map))
    if has_ln:
        g, b = ln_params
        inputs.append(g.reshape(1, N).astype(jnp.float32))
        in_specs.append(pl.BlockSpec((1, TN), v_map))
        inputs.append(b.reshape(1, N).astype(jnp.float32))
        in_specs.append(pl.BlockSpec((1, TN), v_map))

    kernel = functools.partial(
        _mm_kernel, k_axis=k_axis, use_acc=use_acc, has_scale=has_scale,
        has_shift=has_shift, has_res=has_res, has_ln=has_ln,
        activation=activation, ln_eps=ln_eps)
    scratch = [pltpu.VMEM((TM, TN), jnp.float32)] if use_acc else []

    out = pl.pallas_call(
        kernel,
        grid=grid,
        in_specs=in_specs,
        out_specs=pl.BlockSpec((TM, TN), o_map),
        out_shape=jax.ShapeDtypeStruct((Mp, N), out_dtype),
        scratch_shapes=scratch,
        compiler_params=pltpu.CompilerParams(
            dimension_semantics=sem, vmem_limit_bytes=_VMEM_LIMIT),
    )(*inputs)
    return out[:M] if Mp != M else out


# ---------------------------------------------------------------------------
# Conv1d(k=3, pad=1) + folded-BN (+ residual) + ReLU, as 3 shifted dots
# ---------------------------------------------------------------------------

def _conv3_kernel(x_ref, w_ref, scale_ref, shift_ref, *rest, has_res, activation):
    if has_res:
        res_ref, o_ref = rest
    else:
        (o_ref,) = rest
    T = o_ref.shape[1]
    # TODO(synk): the sublane-shifted reads at offsets 1/2 force a relayout
    # copy; an XLU sublane roll or Element-offset BlockSpecs would hide it.
    y = jnp.dot(x_ref[0, pl.ds(0, T), :], w_ref[0],
                preferred_element_type=jnp.float32)
    y += jnp.dot(x_ref[0, pl.ds(1, T), :], w_ref[1],
                 preferred_element_type=jnp.float32)
    y += jnp.dot(x_ref[0, pl.ds(2, T), :], w_ref[2],
                 preferred_element_type=jnp.float32)
    y = y * scale_ref[...] + shift_ref[...]
    if has_res:
        y = y + res_ref[0].astype(jnp.float32)
    if activation == "relu":
        y = jnp.maximum(y, 0.0)
    o_ref[0] = y.astype(o_ref.dtype)


def conv3_bn_act(x_btc, w3, scale, shift, residual=None, activation="relu",
                 out_dtype=jnp.bfloat16):
    """Conv1d(kernel=3, pad=1) over time, BN folded into (scale, shift)."""
    B, T, C = x_btc.shape
    H = w3.shape[-1]
    xp = jnp.pad(x_btc.astype(jnp.bfloat16), ((0, 0), (1, 1), (0, 0)))
    inputs = [xp, w3.astype(jnp.bfloat16),
              scale.reshape(1, H).astype(jnp.float32),
              shift.reshape(1, H).astype(jnp.float32)]
    in_specs = [pl.BlockSpec((1, T + 2, C), lambda b: (b, 0, 0)),
                pl.BlockSpec((3, C, H), lambda b: (0, 0, 0)),
                pl.BlockSpec((1, H), lambda b: (0, 0)),
                pl.BlockSpec((1, H), lambda b: (0, 0))]
    if residual is not None:
        inputs.append(residual.astype(jnp.bfloat16))
        in_specs.append(pl.BlockSpec((1, T, H), lambda b: (b, 0, 0)))
    kernel = functools.partial(_conv3_kernel, has_res=residual is not None,
                               activation=activation)
    return pl.pallas_call(
        kernel,
        grid=(B,),
        in_specs=in_specs,
        out_specs=pl.BlockSpec((1, T, H), lambda b: (b, 0, 0)),
        out_shape=jax.ShapeDtypeStruct((B, T, H), out_dtype),
        compiler_params=pltpu.CompilerParams(
            dimension_semantics=("parallel",),
            vmem_limit_bytes=_VMEM_LIMIT),
    )(*inputs)


# ---------------------------------------------------------------------------
# Relative-position self-attention, (batch, query-tile) grid, in-kernel bias
# ---------------------------------------------------------------------------

def _attn_kernel(q_ref, k_ref, v_ref, relpos_ref, o_ref, *, n_head, scale,
                 n_q, L, inkernel_rel, shift0):
    TQ = q_ref.shape[1]
    F = q_ref.shape[2]
    A = F // n_head
    W = 2 * L - 1

    for h in range(n_head):                       # static loop over heads
        qh = q_ref[0, :, h * A:(h + 1) * A]       # (TQ, A)
        kh = k_ref[0, :, h * A:(h + 1) * A]       # (L, A)
        vh = v_ref[0, :, h * A:(h + 1) * A]       # (L, A)
        logits = jax.lax.dot_general(
            qh, kh, (((1,), (1,)), ((), ())),
            preferred_element_type=jnp.float32) * scale          # (TQ, L)
        if inkernel_rel:
            # rel[t, m] = <q_t, E[m]>, m = relative index in [0, 2L-2]
            relh = jax.lax.dot_general(
                qh, relpos_ref[h], (((1,), (1,)), ((), ())),
                preferred_element_type=jnp.float32)              # (TQ, 2L-1)
            if n_q == 1:
                sh = shift0                                      # static
            else:
                sh = (pl.program_id(1) * TQ + L) % W             # dynamic
            # Music-Transformer skew: row t rolled by (q_global + L) mod W
            rolled = pltpu.roll(relh, sh, axis=1, stride=1, stride_axis=0)
            logits = logits + rolled[:, :L]
        else:
            logits = logits + relpos_ref[0, h].astype(jnp.float32)
        m = jnp.max(logits, axis=-1, keepdims=True)
        e = jnp.exp(logits - m)
        p = e * pl.reciprocal(jnp.sum(e, axis=-1, keepdims=True), approx=True)
        o_ref[0, :, h * A:(h + 1) * A] = jnp.dot(
            p.astype(vh.dtype), vh,
            preferred_element_type=jnp.float32).astype(o_ref.dtype)


def _pick_tq(L):
    return L if L <= 256 else _largest_div(L, 256, 8)


def rel_attention(qkv3, relpos, n_head, scale, L, inkernel_rel):
    """qkv3: (B, L, 3F) fused QKV activation (bf16).
    relpos: (H, 2L-1, A) rel embeddings (in-kernel path) or (B, H, L, L)
    precomputed bias (fallback path)."""
    B, _, F3 = qkv3.shape
    F = F3 // 3
    A = F // n_head
    TQ = _pick_tq(L)
    n_q = L // TQ
    W = 2 * L - 1

    kernel = functools.partial(
        _attn_kernel, n_head=n_head, scale=scale, n_q=n_q, L=L,
        inkernel_rel=inkernel_rel, shift0=L % W)

    qkv3 = qkv3.astype(jnp.bfloat16)
    q_spec = pl.BlockSpec((1, TQ, F), lambda b, qi: (b, qi, 0))
    k_spec = pl.BlockSpec((1, L, F), lambda b, qi: (b, 0, 1))
    v_spec = pl.BlockSpec((1, L, F), lambda b, qi: (b, 0, 2))
    if inkernel_rel:
        rp_spec = pl.BlockSpec((n_head, W, A), lambda b, qi: (0, 0, 0))
    else:
        rp_spec = pl.BlockSpec((1, n_head, TQ, L), lambda b, qi: (b, 0, qi, 0))

    return pl.pallas_call(
        kernel,
        grid=(B, n_q),
        in_specs=[q_spec, k_spec, v_spec, rp_spec],
        out_specs=pl.BlockSpec((1, TQ, F), lambda b, qi: (b, qi, 0)),
        out_shape=jax.ShapeDtypeStruct((B, L, F), jnp.bfloat16),
        compiler_params=pltpu.CompilerParams(
            dimension_semantics=("parallel", "parallel"),
            vmem_limit_bytes=_VMEM_LIMIT),
    )(qkv3, qkv3, qkv3, relpos.astype(jnp.bfloat16))


def _skew_probe(L):
    """Verify the strided-roll skew convention on this backend; on any
    mismatch / lowering failure we fall back to the JAX-side skew."""
    if L < 2:
        return False
    W = 2 * L - 1

    def kern(x_ref, o_ref):
        rolled = pltpu.roll(x_ref[...], L % W, axis=1, stride=1, stride_axis=0)
        o_ref[...] = rolled[:, :L]

    x = jnp.arange(L * W, dtype=jnp.float32).reshape(L, W)
    try:
        out = pl.pallas_call(
            kern, out_shape=jax.ShapeDtypeStruct((L, L), jnp.float32))(x)
        out = np.asarray(jax.device_get(out))
    except Exception:
        return False
    xs = np.asarray(jax.device_get(x))
    q = np.arange(L)[:, None]
    k = np.arange(L)[None, :]
    expected = xs[q, k - q + L - 1]
    return bool(np.allclose(out, expected))


# ---------------------------------------------------------------------------
# Plain-JAX glue: BN folding, fallback skew, layer wiring
# ---------------------------------------------------------------------------

def bn_fold(bn, eps=1e-5):
    s = bn["gamma"] * jax.lax.rsqrt(bn["rvar"] + eps)
    t = bn["beta"] - bn["rmean"] * s
    return s, t


def rel_pos_bias(q_blf, rel_used, L, n_head):
    """Fallback: pos[b,h,q,k] = <q[b,q,h], rel_used[h, k-q+L-1]> via XLA."""
    B = q_blf.shape[0]
    A = rel_used.shape[-1]
    q4 = q_blf.reshape(B, L, n_head, A).astype(jnp.float32)
    rel = jnp.einsum("blha,hma->bhlm", q4, rel_used.astype(jnp.float32))
    idx = jnp.arange(L)[None, :] - jnp.arange(L)[:, None] + (L - 1)
    return rel[:, :, jnp.arange(L)[:, None], idx]                 # (B,H,L,L)


def resblock_forward(x_btc, p):
    B, T, C = x_btc.shape
    if "res_w" in p:      # 1x1 conv + BN shortcut (channel change)
        H = p["conv1_w"].shape[-1]
        res = matmul_fused(x_btc.reshape(B * T, C), p["res_w"],
                           scale=p["res_scale"],
                           shift=p["res_shift"]).reshape(B, T, H)
    else:                 # identity shortcut
        res = x_btc
    h = conv3_bn_act(x_btc, p["conv1_w"], p["conv1_scale"], p["conv1_shift"],
                     activation="relu")
    return conv3_bn_act(h, p["conv2_w"], p["conv2_scale"], p["conv2_shift"],
                        residual=res, activation="relu")


def encoder_layer_forward(x2d, p, n_head, max_rel, B, L, inkernel_rel):
    F = x2d.shape[-1]
    A = F // n_head
    # fused QKV projection (no bias, as in the reference attention weights)
    qkv = matmul_fused(x2d, p["w_qkv"])                           # (B*L, 3F)
    qkv3 = qkv.reshape(B, L, 3 * F)
    # TODO(synk): out-of-range (-1e8) masking for seq_len > relative_positional_distance.
    assert L <= max_rel
    rel_used = p["rel_emb"][:, max_rel - L: max_rel + L - 1, :]   # (H,2L-1,A)
    if inkernel_rel:
        relpos = rel_used
    else:
        relpos = rel_pos_bias(qkv3[:, :, :F], rel_used, L, n_head)
    o = rel_attention(qkv3, relpos, n_head, 1.0 / math.sqrt(A), L,
                      inkernel_rel)                               # (B, L, F)
    # wo projection with fused residual-add + LayerNorm (dropout = identity)
    x2d = matmul_fused(o.reshape(B * L, F), p["wo"], residual=x2d,
                       ln_params=(p["ln1_g"], p["ln1_b"]))
    h = matmul_fused(x2d, p["ff1_w"], shift=p["ff1_b"], activation="relu")
    x2d = matmul_fused(h, p["ff2_w"], shift=p["ff2_b"], residual=x2d,
                       ln_params=(p["ln2_g"], p["ln2_b"]))
    return x2d


def transformer_forward(params, x_bct, *, n_head, max_rel, out_channels,
                        inkernel_rel):
    """x: (B, in_channels, T)  ->  out: (B, out_channels, T)."""
    B, C, T = x_bct.shape
    x = jnp.transpose(x_bct, (0, 2, 1))                     # (B, T, C)
    for rb in params["resblocks"]:
        x = resblock_forward(x, rb)
    H = x.shape[-1]
    x2d = matmul_fused(x.reshape(B * T, H), params["w_raw_in_w"],
                       shift=params["w_raw_in_b"])
    for lp in params["layers"]:
        x2d = encoder_layer_forward(x2d, lp, n_head, max_rel, B, T,
                                    inkernel_rel)
    out2d = matmul_fused(x2d, params["w_out_w"], shift=params["w_out_b"],
                         out_dtype=jnp.float32)
    out2d = out2d[:, :out_channels]
    return out2d.reshape(B, T, out_channels).transpose(0, 2, 1)


# ---------------------------------------------------------------------------
# Parameter preparation (run once, outside jit): fold BN, fuse QKV, pad w_out
# ---------------------------------------------------------------------------

def prepare_params(params, eps=1e-5):
    prep = {}
    rbs = []
    for p in params["resblocks"]:
        s1, t1 = bn_fold(p["bn1"], eps)
        s2, t2 = bn_fold(p["bn2"], eps)
        rb = dict(conv1_w=p["conv1_w"], conv1_scale=s1,
                  conv1_shift=p["conv1_b"] * s1 + t1,
                  conv2_w=p["conv2_w"], conv2_scale=s2,
                  conv2_shift=p["conv2_b"] * s2 + t2)
        if "res_w" in p:
            rs, rt = bn_fold(p["res_bn"], eps)
            rb["res_w"] = p["res_w"]
            rb["res_scale"] = rs
            rb["res_shift"] = p["res_b"] * rs + rt
        rbs.append(rb)
    prep["resblocks"] = rbs
    prep["w_raw_in_w"] = params["w_raw_in_w"]
    prep["w_raw_in_b"] = params["w_raw_in_b"]
    layers = []
    for lp in params["layers"]:
        layer = {k: v for k, v in lp.items() if k not in ("wq", "wk", "wv")}
        layer["w_qkv"] = jnp.concatenate([lp["wq"], lp["wk"], lp["wv"]], axis=1)
        layers.append(layer)
    prep["layers"] = layers
    n_out = params["w_out_w"].shape[1]
    n_pad = _round_up(n_out, 128)
    prep["w_out_w"] = jnp.pad(params["w_out_w"], ((0, 0), (0, n_pad - n_out)))
    prep["w_out_b"] = jnp.pad(params["w_out_b"], (0, n_pad - n_out))
    return prep


# ---------------------------------------------------------------------------
# Deterministic synthetic parameter init (shapes follow the PyTorch __init__;
# matmul weights stored (in, out), i.e. transposed vs. torch Linear).
# ---------------------------------------------------------------------------

def init_params(key, c_in, hidden, out_ch, elayers, n_head, d_ff, max_rel):
    d_qkv = hidden // n_head
    keys = iter(jax.random.split(key, 4096))

    def nrm(shape, std=0.05):
        return std * jax.random.normal(next(keys), shape, dtype=jnp.float32)

    def bn(c):
        return dict(gamma=1.0 + nrm((c,), 0.1), beta=nrm((c,), 0.1),
                    rmean=nrm((c,), 0.1), rvar=1.0 + jnp.abs(nrm((c,), 0.1)))

    def resblock(cin, cout):
        p = dict(conv1_w=nrm((3, cin, cout)), conv1_b=nrm((cout,)), bn1=bn(cout),
                 conv2_w=nrm((3, cout, cout)), conv2_b=nrm((cout,)), bn2=bn(cout))
        if cin != cout:
            p["res_w"] = nrm((cin, cout))
            p["res_b"] = nrm((cout,))
            p["res_bn"] = bn(cout)
        return p

    def enc_layer():
        return dict(
            wq=nrm((hidden, n_head * d_qkv)), wk=nrm((hidden, n_head * d_qkv)),
            wv=nrm((hidden, n_head * d_qkv)), wo=nrm((n_head * d_qkv, hidden)),
            rel_emb=nrm((n_head, 2 * max_rel - 1, d_qkv), d_qkv ** -0.5),
            ln1_g=1.0 + nrm((hidden,), 0.05), ln1_b=nrm((hidden,), 0.05),
            ln2_g=1.0 + nrm((hidden,), 0.05), ln2_b=nrm((hidden,), 0.05),
            ff1_w=nrm((hidden, d_ff)), ff1_b=nrm((d_ff,)),
            ff2_w=nrm((d_ff, hidden)), ff2_b=nrm((hidden,)),
        )

    return dict(
        resblocks=[resblock(c_in, hidden), resblock(hidden, hidden),
                   resblock(hidden, hidden)],
        w_raw_in_w=nrm((hidden, hidden)), w_raw_in_b=nrm((hidden,)),
        layers=[enc_layer() for _ in range(elayers)],
        w_out_w=nrm((hidden, out_ch)), w_out_b=nrm((out_ch,)),
    )


# ---------------------------------------------------------------------------

if __name__ == "__main__":
    B, C_IN, T = 2, 8, 16
    HIDDEN, OUT_CH, N_HEAD = 128, 80, 8
    D_FF = 3072        # hardcoded in TransformerEncoderLayer(...) of the module
    ELAYERS = 2        # constructor arg (default 6); reduced for a small demo
    MAX_REL = 100      # relative_positional_distance

    key = jax.random.PRNGKey(0)
    pkey, xkey = jax.random.split(key)
    raw_params = init_params(pkey, C_IN, HIDDEN, OUT_CH, ELAYERS, N_HEAD,
                             D_FF, MAX_REL)
    params = prepare_params(raw_params)
    x = jax.random.normal(xkey, (B, C_IN, T), dtype=jnp.float32)

    # Probe the strided-roll skew once (outside jit); fall back to the
    # JAX-side relative-position bias if it doesn't hold on this backend.
    use_inkernel_rel = _skew_probe(T)

    fwd = jax.jit(functools.partial(
        transformer_forward, n_head=N_HEAD, max_rel=MAX_REL,
        out_channels=OUT_CH, inkernel_rel=use_inkernel_rel))
    out = jax.block_until_ready(fwd(params, x))
    assert out.shape == (B, OUT_CH, T), out.shape
    assert bool(jnp.all(jnp.isfinite(out)))
    print("KERNEL_OK")
</pallas_src>

<mosaic_0001>
module attributes {stable_mosaic.version = 11 : i64} {
  func.func @kern(%arg0: memref<16x31xf32, #tpu.memory_space<vmem>>, %arg1: memref<16x16xf32, #tpu.memory_space<vmem>>) attributes {dimension_semantics = [], scalar_prefetch = 0 : i64, scratch_operands = 0 : i64, tpu.core_type = #tpu.core_type<tc>} {
    %c0 = arith.constant 0 : index
    %c0_0 = arith.constant 0 : index
    %0 = vector.load %arg0[%c0, %c0_0] : memref<16x31xf32, #tpu.memory_space<vmem>>, vector<16x31xf32>
    %c16_i32 = arith.constant 16 : i32
    %1 = tpu.dynamic_rotate %0 by %c16_i32 dim 1 {stride = 1 : si32, stride_dimension = 0 : si32} : vector<16x31xf32>, i32 -> vector<16x31xf32>
    %2 = vector.extract_strided_slice %1 {offsets = [0, 0], sizes = [16, 16], strides = [1, 1]} : vector<16x31xf32> to vector<16x16xf32>
    %c0_1 = arith.constant 0 : index
    %c0_2 = arith.constant 0 : index
    %3 = vector.load %arg1[%c0_1, %c0_2] : memref<16x16xf32, #tpu.memory_space<vmem>>, vector<16x16xf32>
    tpu.vector_store %arg1[%c0_1, %c0_2], %2 {strides = array<i32>} : memref<16x16xf32, #tpu.memory_space<vmem>>, vector<16x16xf32>,
    return
  }
}

module attributes {stable_mosaic.version = 11 : i64} {
  func.func @_conv3_kernel(%arg0: i32, %arg1: memref<1x18x128xbf16, #tpu.memory_space<vmem>>, %arg2: memref<3x128x128xbf16, #tpu.memory_space<vmem>>, %arg3: memref<1x128xf32, #tpu.memory_space<vmem>>, %arg4: memref<1x128xf32, #tpu.memory_space<vmem>>, %arg5: memref<1x16x128xbf16, #tpu.memory_space<vmem>>, %arg6: memref<1x16x128xbf16, #tpu.memory_space<vmem>>) attributes {dimension_semantics = [#tpu.dimension_semantics<parallel>], iteration_bounds = array<i64: 2>, scalar_prefetch = 0 : i64, scratch_operands = 0 : i64, tpu.core_type = #tpu.core_type<tc>, window_params = [{transform_indices = @transform_0, window_bounds = array<i64: 1, 18, 128>}, {pipeline_mode = #tpu.pipeline_mode<synchronous>, transform_indices = @transform_1, window_bounds = array<i64: 3, 128, 128>}, {pipeline_mode = #tpu.pipeline_mode<synchronous>, transform_indices = @transform_2, window_bounds = array<i64: 1, 128>}, {pipeline_mode = #tpu.pipeline_mode<synchronous>, transform_indices = @transform_3, window_bounds = array<i64: 1, 128>}, {transform_indices = @transform_4, window_bounds = array<i64: 1, 16, 128>}, {transform_indices = @transform_5, window_bounds = array<i64: 1, 16, 128>}]} {
    %c0 = arith.constant 0 : index
    %c0_0 = arith.constant 0 : index
    %c0_1 = arith.constant 0 : index
    %0 = vector.load %arg1[%c0, %c0_0, %c0_1] : memref<1x18x128xbf16, #tpu.memory_space<vmem>>, vector<1x16x128xbf16>
    %1 = vector.shape_cast %0 : vector<1x16x128xbf16> to vector<16x128xbf16>
    %c0_2 = arith.constant 0 : index
    %c0_3 = arith.constant 0 : index
    %c0_4 = arith.constant 0 : index
    %2 = vector.load %arg2[%c0_2, %c0_3, %c0_4] : memref<3x128x128xbf16, #tpu.memory_space<vmem>>, vector<1x128x128xbf16>
    %3 = vector.shape_cast %2 : vector<1x128x128xbf16> to vector<128x128xbf16>
    %cst = arith.constant dense<0.000000e+00> : vector<16x128xf32>
    %4 = tpu.matmul %1, %3, %cst {dimension_numbers = #tpu.dot_dimension_numbers<[1], [0], [0], [1], [0, 0, 1, 1], [], []>} : vector<16x128xbf16>, vector<128x128xbf16>, vector<16x128xf32> -> vector<16x128xf32>
    %c0_5 = arith.constant 0 : index
    %c1 = arith.constant 1 : index
    %c0_6 = arith.constant 0 : index
    %5 = vector.load %arg1[%c0_5, %c1, %c0_6] : memref<1x18x128xbf16, #tpu.memory_space<vmem>>, vector<1x16x128xbf16>
    %6 = vector.shape_cast %5 : vector<1x16x128xbf16> to vector<16x128xbf16>
    %c1_7 = arith.constant 1 : index
    %c0_8 = arith.constant 0 : index
    %c0_9 = arith.constant 0 : index
    %7 = vector.load %arg2[%c1_7, %c0_8, %c0_9] : memref<3x128x128xbf16, #tpu.memory_space<vmem>>, vector<1x128x128xbf16>
    %8 = vector.shape_cast %7 : vector<1x128x128xbf16> to vector<128x128xbf16>
    %cst_10 = arith.constant dense<0.000000e+00> : vector<16x128xf32>
    %9 = tpu.matmul %6, %8, %cst_10 {dimension_numbers = #tpu.dot_dimension_numbers<[1], [0], [0], [1], [0, 0, 1, 1], [], []>} : vector<16x128xbf16>, vector<128x128xbf16>, vector<16x128xf32> -> vector<16x128xf32>
    %10 = arith.addf %4, %9 : vector<16x128xf32>
    %c0_11 = arith.constant 0 : index
    %c2 = arith.constant 2 : index
    %c0_12 = arith.constant 0 : index
    %11 = vector.load %arg1[%c0_11, %c2, %c0_12] : memref<1x18x128xbf16, #tpu.memory_space<vmem>>, vector<1x16x128xbf16>
    %12 = vector.shape_cast %11 : vector<1x16x128xbf16> to vector<16x128xbf16>
    %c2_13 = arith.constant 2 : index
    %c0_14 = arith.constant 0 : index
    %c0_15 = arith.constant 0 : index
    %13 = vector.load %arg2[%c2_13, %c0_14, %c0_15] : memref<3x128x128xbf16, #tpu.memory_space<vmem>>, vector<1x128x128xbf16>
    %14 = vector.shape_cast %13 : vector<1x128x128xbf16> to vector<128x128xbf16>
    %cst_16 = arith.constant dense<0.000000e+00> : vector<16x128xf32>
    %15 = tpu.matmul %12, %14, %cst_16 {dimension_numbers = #tpu.dot_dimension_numbers<[1], [0], [0], [1], [0, 0, 1, 1], [], []>} : vector<16x128xbf16>, vector<128x128xbf16>, vector<16x128xf32> -> vector<16x128xf32>
    %16 = arith.addf %10, %15 : vector<16x128xf32>
    %c0_17 = arith.constant 0 : index
    %c0_18 = arith.constant 0 : index
    %17 = vector.load %arg3[%c0_17, %c0_18] : memref<1x128xf32, #tpu.memory_space<vmem>>, vector<1x128xf32>
    %18 = vector.broadcast %17 : vector<1x128xf32> to vector<16x128xf32>
    %19 = arith.mulf %16, %18 : vector<16x128xf32>
    %c0_19 = arith.constant 0 : index
    %c0_20 = arith.constant 0 : index
    %20 = vector.load %arg4[%c0_19, %c0_20] : memref<1x128xf32, #tpu.memory_space<vmem>>, vector<1x128xf32>
    %21 = vector.broadcast %20 : vector<1x128xf32> to vector<16x128xf32>
    %22 = arith.addf %19, %21 : vector<16x128xf32>
    %c0_21 = arith.constant 0 : index
    %c0_22 = arith.constant 0 : index
    %c0_23 = arith.constant 0 : index
    %23 = vector.load %arg5[%c0_21, %c0_22, %c0_23] : memref<1x16x128xbf16, #tpu.memory_space<vmem>>, vector<1x16x128xbf16>
    %24 = vector.shape_cast %23 : vector<1x16x128xbf16> to vector<16x128xbf16>
    %25 = arith.extf %24 : vector<16x128xbf16> to vector<16x128xf32>
    %26 = arith.addf %22, %25 : vector<16x128xf32>
    %cst_24 = arith.constant 0.000000e+00 : f32
    %27 = vector.broadcast %cst_24 : f32 to vector<16x128xf32>
    %28 = arith.maximumf %26, %27 : vector<16x128xf32>
    %29 = arith.truncf %28 : vector<16x128xf32> to vector<16x128xbf16>
    %c0_25 = arith.constant 0 : index
    %c0_26 = arith.constant 0 : index
    %c0_27 = arith.constant 0 : index
    %30 = vector.load %arg6[%c0_25, %c0_26, %c0_27] : memref<1x16x128xbf16, #tpu.memory_space<vmem>>, vector<1x16x128xbf16>
    %31 = vector.shape_cast %30 : vector<1x16x128xbf16> to vector<16x128xbf16>
    %32 = vector.shape_cast %29 : vector<16x128xbf16> to vector<1x16x128xbf16>
    tpu.vector_store %arg6[%c0_25, %c0_26, %c0_27], %32 {strides = array<i32>} : memref<1x16x128xbf16, #tpu.memory_space<vmem>>, vector<1x16x128xbf16>,
    return
  }
  func.func @transform_0(%arg0: i32) -> (i32, i32, i32) {
    %c0_i32 = arith.constant 0 : i32
    %c0_i32_0 = arith.constant 0 : i32
    %c0_i32_1 = arith.constant 0 : i32
    return %arg0, %c0_i32, %c0_i32_0 : i32, i32, i32
  }
  func.func @transform_1(%arg0: i32) -> (i32, i32, i32) {
    %c0_i32 = arith.constant 0 : i32
    %c0_i32_0 = arith.constant 0 : i32
    %c0_i32_1 = arith.constant 0 : i32
    %c0_i32_2 = arith.constant 0 : i32
    return %c0_i32, %c0_i32_0, %c0_i32_1 : i32, i32, i32
  }
  func.func @transform_2(%arg0: i32) -> (i32, i32) {
    %c0_i32 = arith.constant 0 : i32
    %c0_i32_0 = arith.constant 0 : i32
    %c0_i32_1 = arith.constant 0 : i32
    return %c0_i32, %c0_i32_0 : i32, i32
  }
  func.func @transform_3(%arg0: i32) -> (i32, i32) {
    %c0_i32 = arith.constant 0 : i32
    %c0_i32_0 = arith.constant 0 : i32
    %c0_i32_1 = arith.constant 0 : i32
    return %c0_i32, %c0_i32_0 : i32, i32
  }
  func.func @transform_4(%arg0: i32) -> (i32, i32, i32) {
    %c0_i32 = arith.constant 0 : i32
    %c0_i32_0 = arith.constant 0 : i32
    %c0_i32_1 = arith.constant 0 : i32
    return %arg0, %c0_i32, %c0_i32_0 : i32, i32, i32
  }
  func.func @transform_5(%arg0: i32) -> (i32, i32, i32) {
    %c0_i32 = arith.constant 0 : i32
    %c0_i32_0 = arith.constant 0 : i32
    %c0_i32_1 = arith.constant 0 : i32
    return %arg0, %c0_i32, %c0_i32_0 : i32, i32, i32
  }
}

module attributes {stable_mosaic.version = 11 : i64} {
  func.func @_conv3_kernel(%arg0: i32, %arg1: memref<1x18x8xbf16, #tpu.memory_space<vmem>>, %arg2: memref<3x8x128xbf16, #tpu.memory_space<vmem>>, %arg3: memref<1x128xf32, #tpu.memory_space<vmem>>, %arg4: memref<1x128xf32, #tpu.memory_space<vmem>>, %arg5: memref<1x16x128xbf16, #tpu.memory_space<vmem>>) attributes {dimension_semantics = [#tpu.dimension_semantics<parallel>], iteration_bounds = array<i64: 2>, scalar_prefetch = 0 : i64, scratch_operands = 0 : i64, tpu.core_type = #tpu.core_type<tc>, window_params = [{transform_indices = @transform_0, window_bounds = array<i64: 1, 18, 8>}, {pipeline_mode = #tpu.pipeline_mode<synchronous>, transform_indices = @transform_1, window_bounds = array<i64: 3, 8, 128>}, {pipeline_mode = #tpu.pipeline_mode<synchronous>, transform_indices = @transform_2, window_bounds = array<i64: 1, 128>}, {pipeline_mode = #tpu.pipeline_mode<synchronous>, transform_indices = @transform_3, window_bounds = array<i64: 1, 128>}, {transform_indices = @transform_4, window_bounds = array<i64: 1, 16, 128>}]} {
    %c0 = arith.constant 0 : index
    %c0_0 = arith.constant 0 : index
    %c0_1 = arith.constant 0 : index
    %0 = vector.load %arg1[%c0, %c0_0, %c0_1] : memref<1x18x8xbf16, #tpu.memory_space<vmem>>, vector<1x16x8xbf16>
    %1 = vector.shape_cast %0 : vector<1x16x8xbf16> to vector<16x8xbf16>
    %c0_2 = arith.constant 0 : index
    %c0_3 = arith.constant 0 : index
    %c0_4 = arith.constant 0 : index
    %2 = vector.load %arg2[%c0_2, %c0_3, %c0_4] : memref<3x8x128xbf16, #tpu.memory_space<vmem>>, vector<1x8x128xbf16>
    %3 = vector.shape_cast %2 : vector<1x8x128xbf16> to vector<8x128xbf16>
    %cst = arith.constant dense<0.000000e+00> : vector<16x128xf32>
    %4 = tpu.matmul %1, %3, %cst {dimension_numbers = #tpu.dot_dimension_numbers<[1], [0], [0], [1], [0, 0, 1, 1], [], []>} : vector<16x8xbf16>, vector<8x128xbf16>, vector<16x128xf32> -> vector<16x128xf32>
    %c0_5 = arith.constant 0 : index
    %c1 = arith.constant 1 : index
    %c0_6 = arith.constant 0 : index
    %5 = vector.load %arg1[%c0_5, %c1, %c0_6] : memref<1x18x8xbf16, #tpu.memory_space<vmem>>, vector<1x16x8xbf16>
    %6 = vector.shape_cast %5 : vector<1x16x8xbf16> to vector<16x8xbf16>
    %c1_7 = arith.constant 1 : index
    %c0_8 = arith.constant 0 : index
    %c0_9 = arith.constant 0 : index
    %7 = vector.load %arg2[%c1_7, %c0_8, %c0_9] : memref<3x8x128xbf16, #tpu.memory_space<vmem>>, vector<1x8x128xbf16>
    %8 = vector.shape_cast %7 : vector<1x8x128xbf16> to vector<8x128xbf16>
    %cst_10 = arith.constant dense<0.000000e+00> : vector<16x128xf32>
    %9 = tpu.matmul %6, %8, %cst_10 {dimension_numbers = #tpu.dot_dimension_numbers<[1], [0], [0], [1], [0, 0, 1, 1], [], []>} : vector<16x8xbf16>, vector<8x128xbf16>, vector<16x128xf32> -> vector<16x128xf32>
    %10 = arith.addf %4, %9 : vector<16x128xf32>
    %c0_11 = arith.constant 0 : index
    %c2 = arith.constant 2 : index
    %c0_12 = arith.constant 0 : index
    %11 = vector.load %arg1[%c0_11, %c2, %c0_12] : memref<1x18x8xbf16, #tpu.memory_space<vmem>>, vector<1x16x8xbf16>
    %12 = vector.shape_cast %11 : vector<1x16x8xbf16> to vector<16x8xbf16>
    %c2_13 = arith.constant 2 : index
    %c0_14 = arith.constant 0 : index
    %c0_15 = arith.constant 0 : index
    %13 = vector.load %arg2[%c2_13, %c0_14, %c0_15] : memref<3x8x128xbf16, #tpu.memory_space<vmem>>, vector<1x8x128xbf16>
    %14 = vector.shape_cast %13 : vector<1x8x128xbf16> to vector<8x128xbf16>
    %cst_16 = arith.constant dense<0.000000e+00> : vector<16x128xf32>
    %15 = tpu.matmul %12, %14, %cst_16 {dimension_numbers = #tpu.dot_dimension_numbers<[1], [0], [0], [1], [0, 0, 1, 1], [], []>} : vector<16x8xbf16>, vector<8x128xbf16>, vector<16x128xf32> -> vector<16x128xf32>
    %16 = arith.addf %10, %15 : vector<16x128xf32>
    %c0_17 = arith.constant 0 : index
    %c0_18 = arith.constant 0 : index
    %17 = vector.load %arg3[%c0_17, %c0_18] : memref<1x128xf32, #tpu.memory_space<vmem>>, vector<1x128xf32>
    %18 = vector.broadcast %17 : vector<1x128xf32> to vector<16x128xf32>
    %19 = arith.mulf %16, %18 : vector<16x128xf32>
    %c0_19 = arith.constant 0 : index
    %c0_20 = arith.constant 0 : index
    %20 = vector.load %arg4[%c0_19, %c0_20] : memref<1x128xf32, #tpu.memory_space<vmem>>, vector<1x128xf32>
    %21 = vector.broadcast %20 : vector<1x128xf32> to vector<16x128xf32>
    %22 = arith.addf %19, %21 : vector<16x128xf32>
    %cst_21 = arith.constant 0.000000e+00 : f32
    %23 = vector.broadcast %cst_21 : f32 to vector<16x128xf32>
    %24 = arith.maximumf %22, %23 : vector<16x128xf32>
    %25 = arith.truncf %24 : vector<16x128xf32> to vector<16x128xbf16>
    %c0_22 = arith.constant 0 : index
    %c0_23 = arith.constant 0 : index
    %c0_24 = arith.constant 0 : index
    %26 = vector.load %arg5[%c0_22, %c0_23, %c0_24] : memref<1x16x128xbf16, #tpu.memory_space<vmem>>, vector<1x16x128xbf16>
    %27 = vector.shape_cast %26 : vector<1x16x128xbf16> to vector<16x128xbf16>
    %28 = vector.shape_cast %25 : vector<16x128xbf16> to vector<1x16x128xbf16>
    tpu.vector_store %arg5[%c0_22, %c0_23, %c0_24], %28 {strides = array<i32>} : memref<1x16x128xbf16, #tpu.memory_space<vmem>>, vector<1x16x128xbf16>,
    return
  }
  func.func @transform_0(%arg0: i32) -> (i32, i32, i32) {
    %c0_i32 = arith.constant 0 : i32
    %c0_i32_0 = arith.constant 0 : i32
    %c0_i32_1 = arith.constant 0 : i32
    return %arg0, %c0_i32, %c0_i32_0 : i32, i32, i32
  }
  func.func @transform_1(%arg0: i32) -> (i32, i32, i32) {
    %c0_i32 = arith.constant 0 : i32
    %c0_i32_0 = arith.constant 0 : i32
    %c0_i32_1 = arith.constant 0 : i32
    %c0_i32_2 = arith.constant 0 : i32
    return %c0_i32, %c0_i32_0, %c0_i32_1 : i32, i32, i32
  }
  func.func @transform_2(%arg0: i32) -> (i32, i32) {
    %c0_i32 = arith.constant 0 : i32
    %c0_i32_0 = arith.constant 0 : i32
    %c0_i32_1 = arith.constant 0 : i32
    return %c0_i32, %c0_i32_0 : i32, i32
  }
  func.func @transform_3(%arg0: i32) -> (i32, i32) {
    %c0_i32 = arith.constant 0 : i32
    %c0_i32_0 = arith.constant 0 : i32
    %c0_i32_1 = arith.constant 0 : i32
    return %c0_i32, %c0_i32_0 : i32, i32
  }
  func.func @transform_4(%arg0: i32) -> (i32, i32, i32) {
    %c0_i32 = arith.constant 0 : i32
    %c0_i32_0 = arith.constant 0 : i32
    %c0_i32_1 = arith.constant 0 : i32
    return %arg0, %c0_i32, %c0_i32_0 : i32, i32, i32
  }
}

module attributes {stable_mosaic.version = 11 : i64} {
  func.func @_mm_kernel(%arg0: i32, %arg1: memref<32x8xbf16, #tpu.memory_space<vmem>>, %arg2: memref<8x128xbf16, #tpu.memory_space<vmem>>, %arg3: memref<1x128xf32, #tpu.memory_space<vmem>>, %arg4: memref<1x128xf32, #tpu.memory_space<vmem>>, %arg5: memref<32x128xbf16, #tpu.memory_space<vmem>>) attributes {dimension_semantics = [#tpu.dimension_semantics<parallel>], iteration_bounds = array<i64: 1>, scalar_prefetch = 0 : i64, scratch_operands = 0 : i64, tpu.core_type = #tpu.core_type<tc>, window_params = [{transform_indices = @transform_0, window_bounds = array<i64: 32, 8>}, {pipeline_mode = #tpu.pipeline_mode<synchronous>, transform_indices = @transform_1, window_bounds = array<i64: 8, 128>}, {pipeline_mode = #tpu.pipeline_mode<synchronous>, transform_indices = @transform_2, window_bounds = array<i64: 1, 128>}, {pipeline_mode = #tpu.pipeline_mode<synchronous>, transform_indices = @transform_3, window_bounds = array<i64: 1, 128>}, {transform_indices = @transform_4, window_bounds = array<i64: 32, 128>}]} {
    %c0 = arith.constant 0 : index
    %c0_0 = arith.constant 0 : index
    %0 = vector.load %arg1[%c0, %c0_0] : memref<32x8xbf16, #tpu.memory_space<vmem>>, vector<32x8xbf16>
    %c0_1 = arith.constant 0 : index
    %c0_2 = arith.constant 0 : index
    %1 = vector.load %arg2[%c0_1, %c0_2] : memref<8x128xbf16, #tpu.memory_space<vmem>>, vector<8x128xbf16>
    %cst = arith.constant dense<0.000000e+00> : vector<32x128xf32>
    %2 = tpu.matmul %0, %1, %cst {dimension_numbers = #tpu.dot_dimension_numbers<[1], [0], [0], [1], [0, 0, 1, 1], [], []>} : vector<32x8xbf16>, vector<8x128xbf16>, vector<32x128xf32> -> vector<32x128xf32>
    %c0_3 = arith.constant 0 : index
    %c0_4 = arith.constant 0 : index
    %3 = vector.load %arg3[%c0_3, %c0_4] : memref<1x128xf32, #tpu.memory_space<vmem>>, vector<1x128xf32>
    %4 = vector.broadcast %3 : vector<1x128xf32> to vector<32x128xf32>
    %5 = arith.mulf %2, %4 : vector<32x128xf32>
    %c0_5 = arith.constant 0 : index
    %c0_6 = arith.constant 0 : index
    %6 = vector.load %arg4[%c0_5, %c0_6] : memref<1x128xf32, #tpu.memory_space<vmem>>, vector<1x128xf32>
    %7 = vector.broadcast %6 : vector<1x128xf32> to vector<32x128xf32>
    %8 = arith.addf %5, %7 : vector<32x128xf32>
    %9 = arith.truncf %8 : vector<32x128xf32> to vector<32x128xbf16>
    %c0_7 = arith.constant 0 : index
    %c0_8 = arith.constant 0 : index
    %10 = vector.load %arg5[%c0_7, %c0_8] : memref<32x128xbf16, #tpu.memory_space<vmem>>, vector<32x128xbf16>
    tpu.vector_store %arg5[%c0_7, %c0_8], %9 {strides = array<i32>} : memref<32x128xbf16, #tpu.memory_space<vmem>>, vector<32x128xbf16>,
    return
  }
  func.func @transform_0(%arg0: i32) -> (i32, i32) {
    %c0_i32 = arith.constant 0 : i32
    %c0_i32_0 = arith.constant 0 : i32
    return %arg0, %c0_i32 : i32, i32
  }
  func.func @transform_1(%arg0: i32) -> (i32, i32) {
    %c0_i32 = arith.constant 0 : i32
    %c0_i32_0 = arith.constant 0 : i32
    %c0_i32_1 = arith.constant 0 : i32
    return %c0_i32, %c0_i32_0 : i32, i32
  }
  func.func @transform_2(%arg0: i32) -> (i32, i32) {
    %c0_i32 = arith.constant 0 : i32
    %c0_i32_0 = arith.constant 0 : i32
    %c0_i32_1 = arith.constant 0 : i32
    return %c0_i32, %c0_i32_0 : i32, i32
  }
  func.func @transform_3(%arg0: i32) -> (i32, i32) {
    %c0_i32 = arith.constant 0 : i32
    %c0_i32_0 = arith.constant 0 : i32
    %c0_i32_1 = arith.constant 0 : i32
    return %c0_i32, %c0_i32_0 : i32, i32
  }
  func.func @transform_4(%arg0: i32) -> (i32, i32) {
    %c0_i32 = arith.constant 0 : i32
    %c0_i32_0 = arith.constant 0 : i32
    return %arg0, %c0_i32 : i32, i32
  }
}

module attributes {stable_mosaic.version = 11 : i64} {
  func.func @_conv3_kernel(%arg0: i32, %arg1: memref<1x18x128xbf16, #tpu.memory_space<vmem>>, %arg2: memref<3x128x128xbf16, #tpu.memory_space<vmem>>, %arg3: memref<1x128xf32, #tpu.memory_space<vmem>>, %arg4: memref<1x128xf32, #tpu.memory_space<vmem>>, %arg5: memref<1x16x128xbf16, #tpu.memory_space<vmem>>) attributes {dimension_semantics = [#tpu.dimension_semantics<parallel>], iteration_bounds = array<i64: 2>, scalar_prefetch = 0 : i64, scratch_operands = 0 : i64, tpu.core_type = #tpu.core_type<tc>, window_params = [{transform_indices = @transform_0, window_bounds = array<i64: 1, 18, 128>}, {pipeline_mode = #tpu.pipeline_mode<synchronous>, transform_indices = @transform_1, window_bounds = array<i64: 3, 128, 128>}, {pipeline_mode = #tpu.pipeline_mode<synchronous>, transform_indices = @transform_2, window_bounds = array<i64: 1, 128>}, {pipeline_mode = #tpu.pipeline_mode<synchronous>, transform_indices = @transform_3, window_bounds = array<i64: 1, 128>}, {transform_indices = @transform_4, window_bounds = array<i64: 1, 16, 128>}]} {
    %c0 = arith.constant 0 : index
    %c0_0 = arith.constant 0 : index
    %c0_1 = arith.constant 0 : index
    %0 = vector.load %arg1[%c0, %c0_0, %c0_1] : memref<1x18x128xbf16, #tpu.memory_space<vmem>>, vector<1x16x128xbf16>
    %1 = vector.shape_cast %0 : vector<1x16x128xbf16> to vector<16x128xbf16>
    %c0_2 = arith.constant 0 : index
    %c0_3 = arith.constant 0 : index
    %c0_4 = arith.constant 0 : index
    %2 = vector.load %arg2[%c0_2, %c0_3, %c0_4] : memref<3x128x128xbf16, #tpu.memory_space<vmem>>, vector<1x128x128xbf16>
    %3 = vector.shape_cast %2 : vector<1x128x128xbf16> to vector<128x128xbf16>
    %cst = arith.constant dense<0.000000e+00> : vector<16x128xf32>
    %4 = tpu.matmul %1, %3, %cst {dimension_numbers = #tpu.dot_dimension_numbers<[1], [0], [0], [1], [0, 0, 1, 1], [], []>} : vector<16x128xbf16>, vector<128x128xbf16>, vector<16x128xf32> -> vector<16x128xf32>
    %c0_5 = arith.constant 0 : index
    %c1 = arith.constant 1 : index
    %c0_6 = arith.constant 0 : index
    %5 = vector.load %arg1[%c0_5, %c1, %c0_6] : memref<1x18x128xbf16, #tpu.memory_space<vmem>>, vector<1x16x128xbf16>
    %6 = vector.shape_cast %5 : vector<1x16x128xbf16> to vector<16x128xbf16>
    %c1_7 = arith.constant 1 : index
    %c0_8 = arith.constant 0 : index
    %c0_9 = arith.constant 0 : index
    %7 = vector.load %arg2[%c1_7, %c0_8, %c0_9] : memref<3x128x128xbf16, #tpu.memory_space<vmem>>, vector<1x128x128xbf16>
    %8 = vector.shape_cast %7 : vector<1x128x128xbf16> to vector<128x128xbf16>
    %cst_10 = arith.constant dense<0.000000e+00> : vector<16x128xf32>
    %9 = tpu.matmul %6, %8, %cst_10 {dimension_numbers = #tpu.dot_dimension_numbers<[1], [0], [0], [1], [0, 0, 1, 1], [], []>} : vector<16x128xbf16>, vector<128x128xbf16>, vector<16x128xf32> -> vector<16x128xf32>
    %10 = arith.addf %4, %9 : vector<16x128xf32>
    %c0_11 = arith.constant 0 : index
    %c2 = arith.constant 2 : index
    %c0_12 = arith.constant 0 : index
    %11 = vector.load %arg1[%c0_11, %c2, %c0_12] : memref<1x18x128xbf16, #tpu.memory_space<vmem>>, vector<1x16x128xbf16>
    %12 = vector.shape_cast %11 : vector<1x16x128xbf16> to vector<16x128xbf16>
    %c2_13 = arith.constant 2 : index
    %c0_14 = arith.constant 0 : index
    %c0_15 = arith.constant 0 : index
    %13 = vector.load %arg2[%c2_13, %c0_14, %c0_15] : memref<3x128x128xbf16, #tpu.memory_space<vmem>>, vector<1x128x128xbf16>
    %14 = vector.shape_cast %13 : vector<1x128x128xbf16> to vector<128x128xbf16>
    %cst_16 = arith.constant dense<0.000000e+00> : vector<16x128xf32>
    %15 = tpu.matmul %12, %14, %cst_16 {dimension_numbers = #tpu.dot_dimension_numbers<[1], [0], [0], [1], [0, 0, 1, 1], [], []>} : vector<16x128xbf16>, vector<128x128xbf16>, vector<16x128xf32> -> vector<16x128xf32>
    %16 = arith.addf %10, %15 : vector<16x128xf32>
    %c0_17 = arith.constant 0 : index
    %c0_18 = arith.constant 0 : index
    %17 = vector.load %arg3[%c0_17, %c0_18] : memref<1x128xf32, #tpu.memory_space<vmem>>, vector<1x128xf32>
    %18 = vector.broadcast %17 : vector<1x128xf32> to vector<16x128xf32>
    %19 = arith.mulf %16, %18 : vector<16x128xf32>
    %c0_19 = arith.constant 0 : index
    %c0_20 = arith.constant 0 : index
    %20 = vector.load %arg4[%c0_19, %c0_20] : memref<1x128xf32, #tpu.memory_space<vmem>>, vector<1x128xf32>
    %21 = vector.broadcast %20 : vector<1x128xf32> to vector<16x128xf32>
    %22 = arith.addf %19, %21 : vector<16x128xf32>
    %cst_21 = arith.constant 0.000000e+00 : f32
    %23 = vector.broadcast %cst_21 : f32 to vector<16x128xf32>
    %24 = arith.maximumf %22, %23 : vector<16x128xf32>
    %25 = arith.truncf %24 : vector<16x128xf32> to vector<16x128xbf16>
    %c0_22 = arith.constant 0 : index
    %c0_23 = arith.constant 0 : index
    %c0_24 = arith.constant 0 : index
    %26 = vector.load %arg5[%c0_22, %c0_23, %c0_24] : memref<1x16x128xbf16, #tpu.memory_space<vmem>>, vector<1x16x128xbf16>
    %27 = vector.shape_cast %26 : vector<1x16x128xbf16> to vector<16x128xbf16>
    %28 = vector.shape_cast %25 : vector<16x128xbf16> to vector<1x16x128xbf16>
    tpu.vector_store %arg5[%c0_22, %c0_23, %c0_24], %28 {strides = array<i32>} : memref<1x16x128xbf16, #tpu.memory_space<vmem>>, vector<1x16x128xbf16>,
    return
  }
  func.func @transform_0(%arg0: i32) -> (i32, i32, i32) {
    %c0_i32 = arith.constant 0 : i32
    %c0_i32_0 = arith.constant 0 : i32
    %c0_i32_1 = arith.constant 0 : i32
    return %arg0, %c0_i32, %c0_i32_0 : i32, i32, i32
  }
  func.func @transform_1(%arg0: i32) -> (i32, i32, i32) {
    %c0_i32 = arith.constant 0 : i32
    %c0_i32_0 = arith.constant 0 : i32
    %c0_i32_1 = arith.constant 0 : i32
    %c0_i32_2 = arith.constant 0 : i32
    return %c0_i32, %c0_i32_0, %c0_i32_1 : i32, i32, i32
  }
  func.func @transform_2(%arg0: i32) -> (i32, i32) {
    %c0_i32 = arith.constant 0 : i32
    %c0_i32_0 = arith.constant 0 : i32
    %c0_i32_1 = arith.constant 0 : i32
    return %c0_i32, %c0_i32_0 : i32, i32
  }
  func.func @transform_3(%arg0: i32) -> (i32, i32) {
    %c0_i32 = arith.constant 0 : i32
    %c0_i32_0 = arith.constant 0 : i32
    %c0_i32_1 = arith.constant 0 : i32
    return %c0_i32, %c0_i32_0 : i32, i32
  }
  func.func @transform_4(%arg0: i32) -> (i32, i32, i32) {
    %c0_i32 = arith.constant 0 : i32
    %c0_i32_0 = arith.constant 0 : i32
    %c0_i32_1 = arith.constant 0 : i32
    return %arg0, %c0_i32, %c0_i32_0 : i32, i32, i32
  }
}

module attributes {stable_mosaic.version = 11 : i64} {
  func.func @_conv3_kernel(%arg0: i32, %arg1: memref<1x18x128xbf16, #tpu.memory_space<vmem>>, %arg2: memref<3x128x128xbf16, #tpu.memory_space<vmem>>, %arg3: memref<1x128xf32, #tpu.memory_space<vmem>>, %arg4: memref<1x128xf32, #tpu.memory_space<vmem>>, %arg5: memref<1x16x128xbf16, #tpu.memory_space<vmem>>) attributes {dimension_semantics = [#tpu.dimension_semantics<parallel>], iteration_bounds = array<i64: 2>, scalar_prefetch = 0 : i64, scratch_operands = 0 : i64, tpu.core_type = #tpu.core_type<tc>, window_params = [{transform_indices = @transform_0, window_bounds = array<i64: 1, 18, 128>}, {pipeline_mode = #tpu.pipeline_mode<synchronous>, transform_indices = @transform_1, window_bounds = array<i64: 3, 128, 128>}, {pipeline_mode = #tpu.pipeline_mode<synchronous>, transform_indices = @transform_2, window_bounds = array<i64: 1, 128>}, {pipeline_mode = #tpu.pipeline_mode<synchronous>, transform_indices = @transform_3, window_bounds = array<i64: 1, 128>}, {transform_indices = @transform_4, window_bounds = array<i64: 1, 16, 128>}]} {
    %c0 = arith.constant 0 : index
    %c0_0 = arith.constant 0 : index
    %c0_1 = arith.constant 0 : index
    %0 = vector.load %arg1[%c0, %c0_0, %c0_1] : memref<1x18x128xbf16, #tpu.memory_space<vmem>>, vector<1x16x128xbf16>
    %1 = vector.shape_cast %0 : vector<1x16x128xbf16> to vector<16x128xbf16>
    %c0_2 = arith.constant 0 : index
    %c0_3 = arith.constant 0 : index
    %c0_4 = arith.constant 0 : index
    %2 = vector.load %arg2[%c0_2, %c0_3, %c0_4] : memref<3x128x128xbf16, #tpu.memory_space<vmem>>, vector<1x128x128xbf16>
    %3 = vector.shape_cast %2 : vector<1x128x128xbf16> to vector<128x128xbf16>
    %cst = arith.constant dense<0.000000e+00> : vector<16x128xf32>
    %4 = tpu.matmul %1, %3, %cst {dimension_numbers = #tpu.dot_dimension_numbers<[1], [0], [0], [1], [0, 0, 1, 1], [], []>} : vector<16x128xbf16>, vector<128x128xbf16>, vector<16x128xf32> -> vector<16x128xf32>
    %c0_5 = arith.constant 0 : index
    %c1 = arith.constant 1 : index
    %c0_6 = arith.constant 0 : index
    %5 = vector.load %arg1[%c0_5, %c1, %c0_6] : memref<1x18x128xbf16, #tpu.memory_space<vmem>>, vector<1x16x128xbf16>
    %6 = vector.shape_cast %5 : vector<1x16x128xbf16> to vector<16x128xbf16>
    %c1_7 = arith.constant 1 : index
    %c0_8 = arith.constant 0 : index
    %c0_9 = arith.constant 0 : index
    %7 = vector.load %arg2[%c1_7, %c0_8, %c0_9] : memref<3x128x128xbf16, #tpu.memory_space<vmem>>, vector<1x128x128xbf16>
    %8 = vector.shape_cast %7 : vector<1x128x128xbf16> to vector<128x128xbf16>
    %cst_10 = arith.constant dense<0.000000e+00> : vector<16x128xf32>
    %9 = tpu.matmul %6, %8, %cst_10 {dimension_numbers = #tpu.dot_dimension_numbers<[1], [0], [0], [1], [0, 0, 1, 1], [], []>} : vector<16x128xbf16>, vector<128x128xbf16>, vector<16x128xf32> -> vector<16x128xf32>
    %10 = arith.addf %4, %9 : vector<16x128xf32>
    %c0_11 = arith.constant 0 : index
    %c2 = arith.constant 2 : index
    %c0_12 = arith.constant 0 : index
    %11 = vector.load %arg1[%c0_11, %c2, %c0_12] : memref<1x18x128xbf16, #tpu.memory_space<vmem>>, vector<1x16x128xbf16>
    %12 = vector.shape_cast %11 : vector<1x16x128xbf16> to vector<16x128xbf16>
    %c2_13 = arith.constant 2 : index
    %c0_14 = arith.constant 0 : index
    %c0_15 = arith.constant 0 : index
    %13 = vector.load %arg2[%c2_13, %c0_14, %c0_15] : memref<3x128x128xbf16, #tpu.memory_space<vmem>>, vector<1x128x128xbf16>
    %14 = vector.shape_cast %13 : vector<1x128x128xbf16> to vector<128x128xbf16>
    %cst_16 = arith.constant dense<0.000000e+00> : vector<16x128xf32>
    %15 = tpu.matmul %12, %14, %cst_16 {dimension_numbers = #tpu.dot_dimension_numbers<[1], [0], [0], [1], [0, 0, 1, 1], [], []>} : vector<16x128xbf16>, vector<128x128xbf16>, vector<16x128xf32> -> vector<16x128xf32>
    %16 = arith.addf %10, %15 : vector<16x128xf32>
    %c0_17 = arith.constant 0 : index
    %c0_18 = arith.constant 0 : index
    %17 = vector.load %arg3[%c0_17, %c0_18] : memref<1x128xf32, #tpu.memory_space<vmem>>, vector<1x128xf32>
    %18 = vector.broadcast %17 : vector<1x128xf32> to vector<16x128xf32>
    %19 = arith.mulf %16, %18 : vector<16x128xf32>
    %c0_19 = arith.constant 0 : index
    %c0_20 = arith.constant 0 : index
    %20 = vector.load %arg4[%c0_19, %c0_20] : memref<1x128xf32, #tpu.memory_space<vmem>>, vector<1x128xf32>
    %21 = vector.broadcast %20 : vector<1x128xf32> to vector<16x128xf32>
    %22 = arith.addf %19, %21 : vector<16x128xf32>
    %cst_21 = arith.constant 0.000000e+00 : f32
    %23 = vector.broadcast %cst_21 : f32 to vector<16x128xf32>
    %24 = arith.maximumf %22, %23 : vector<16x128xf32>
    %25 = arith.truncf %24 : vector<16x128xf32> to vector<16x128xbf16>
    %c0_22 = arith.constant 0 : index
    %c0_23 = arith.constant 0 : index
    %c0_24 = arith.constant 0 : index
    %26 = vector.load %arg5[%c0_22, %c0_23, %c0_24] : memref<1x16x128xbf16, #tpu.memory_space<vmem>>, vector<1x16x128xbf16>
    %27 = vector.shape_cast %26 : vector<1x16x128xbf16> to vector<16x128xbf16>
    %28 = vector.shape_cast %25 : vector<16x128xbf16> to vector<1x16x128xbf16>
    tpu.vector_store %arg5[%c0_22, %c0_23, %c0_24], %28 {strides = array<i32>} : memref<1x16x128xbf16, #tpu.memory_space<vmem>>, vector<1x16x128xbf16>,
    return
  }
  func.func @transform_0(%arg0: i32) -> (i32, i32, i32) {
    %c0_i32 = arith.constant 0 : i32
    %c0_i32_0 = arith.constant 0 : i32
    %c0_i32_1 = arith.constant 0 : i32
    return %arg0, %c0_i32, %c0_i32_0 : i32, i32, i32
  }
  func.func @transform_1(%arg0: i32) -> (i32, i32, i32) {
    %c0_i32 = arith.constant 0 : i32
    %c0_i32_0 = arith.constant 0 : i32
    %c0_i32_1 = arith.constant 0 : i32
    %c0_i32_2 = arith.constant 0 : i32
    return %c0_i32, %c0_i32_0, %c0_i32_1 : i32, i32, i32
  }
  func.func @transform_2(%arg0: i32) -> (i32, i32) {
    %c0_i32 = arith.constant 0 : i32
    %c0_i32_0 = arith.constant 0 : i32
    %c0_i32_1 = arith.constant 0 : i32
    return %c0_i32, %c0_i32_0 : i32, i32
  }
  func.func @transform_3(%arg0: i32) -> (i32, i32) {
    %c0_i32 = arith.constant 0 : i32
    %c0_i32_0 = arith.constant 0 : i32
    %c0_i32_1 = arith.constant 0 : i32
    return %c0_i32, %c0_i32_0 : i32, i32
  }
  func.func @transform_4(%arg0: i32) -> (i32, i32, i32) {
    %c0_i32 = arith.constant 0 : i32
    %c0_i32_0 = arith.constant 0 : i32
    %c0_i32_1 = arith.constant 0 : i32
    return %arg0, %c0_i32, %c0_i32_0 : i32, i32, i32
  }
}

module attributes {stable_mosaic.version = 11 : i64} {
  func.func @_mm_kernel(%arg0: i32, %arg1: memref<32x128xbf16, #tpu.memory_space<vmem>>, %arg2: memref<128x128xbf16, #tpu.memory_space<vmem>>, %arg3: memref<1x128xf32, #tpu.memory_space<vmem>>, %arg4: memref<32x128xbf16, #tpu.memory_space<vmem>>) attributes {dimension_semantics = [#tpu.dimension_semantics<parallel>], iteration_bounds = array<i64: 1>, scalar_prefetch = 0 : i64, scratch_operands = 0 : i64, tpu.core_type = #tpu.core_type<tc>, window_params = [{transform_indices = @transform_0, window_bounds = array<i64: 32, 128>}, {pipeline_mode = #tpu.pipeline_mode<synchronous>, transform_indices = @transform_1, window_bounds = array<i64: 128, 128>}, {pipeline_mode = #tpu.pipeline_mode<synchronous>, transform_indices = @transform_2, window_bounds = array<i64: 1, 128>}, {transform_indices = @transform_3, window_bounds = array<i64: 32, 128>}]} {
    %c0 = arith.constant 0 : index
    %c0_0 = arith.constant 0 : index
    %0 = vector.load %arg1[%c0, %c0_0] : memref<32x128xbf16, #tpu.memory_space<vmem>>, vector<32x128xbf16>
    %c0_1 = arith.constant 0 : index
    %c0_2 = arith.constant 0 : index
    %1 = vector.load %arg2[%c0_1, %c0_2] : memref<128x128xbf16, #tpu.memory_space<vmem>>, vector<128x128xbf16>
    %cst = arith.constant dense<0.000000e+00> : vector<32x128xf32>
    %2 = tpu.matmul %0, %1, %cst {dimension_numbers = #tpu.dot_dimension_numbers<[1], [0], [0], [1], [0, 0, 1, 1], [], []>} : vector<32x128xbf16>, vector<128x128xbf16>, vector<32x128xf32> -> vector<32x128xf32>
    %c0_3 = arith.constant 0 : index
    %c0_4 = arith.constant 0 : index
    %3 = vector.load %arg3[%c0_3, %c0_4] : memref<1x128xf32, #tpu.memory_space<vmem>>, vector<1x128xf32>
    %4 = vector.broadcast %3 : vector<1x128xf32> to vector<32x128xf32>
    %5 = arith.addf %2, %4 : vector<32x128xf32>
    %6 = arith.truncf %5 : vector<32x128xf32> to vector<32x128xbf16>
    %c0_5 = arith.constant 0 : index
    %c0_6 = arith.constant 0 : index
    %7 = vector.load %arg4[%c0_5, %c0_6] : memref<32x128xbf16, #tpu.memory_space<vmem>>, vector<32x128xbf16>
    tpu.vector_store %arg4[%c0_5, %c0_6], %6 {strides = array<i32>} : memref<32x128xbf16, #tpu.memory_space<vmem>>, vector<32x128xbf16>,
    return
  }
  func.func @transform_0(%arg0: i32) -> (i32, i32) {
    %c0_i32 = arith.constant 0 : i32
    %c0_i32_0 = arith.constant 0 : i32
    return %arg0, %c0_i32 : i32, i32
  }
  func.func @transform_1(%arg0: i32) -> (i32, i32) {
    %c0_i32 = arith.constant 0 : i32
    %c0_i32_0 = arith.constant 0 : i32
    %c0_i32_1 = arith.constant 0 : i32
    return %c0_i32, %c0_i32_0 : i32, i32
  }
  func.func @transform_2(%arg0: i32) -> (i32, i32) {
    %c0_i32 = arith.constant 0 : i32
    %c0_i32_0 = arith.constant 0 : i32
    %c0_i32_1 = arith.constant 0 : i32
    return %c0_i32, %c0_i32_0 : i32, i32
  }
  func.func @transform_3(%arg0: i32) -> (i32, i32) {
    %c0_i32 = arith.constant 0 : i32
    %c0_i32_0 = arith.constant 0 : i32
    return %arg0, %c0_i32 : i32, i32
  }
}

module attributes {stable_mosaic.version = 11 : i64} {
  func.func @_conv3_kernel(%arg0: i32, %arg1: memref<1x18x128xbf16, #tpu.memory_space<vmem>>, %arg2: memref<3x128x128xbf16, #tpu.memory_space<vmem>>, %arg3: memref<1x128xf32, #tpu.memory_space<vmem>>, %arg4: memref<1x128xf32, #tpu.memory_space<vmem>>, %arg5: memref<1x16x128xbf16, #tpu.memory_space<vmem>>, %arg6: memref<1x16x128xbf16, #tpu.memory_space<vmem>>) attributes {dimension_semantics = [#tpu.dimension_semantics<parallel>], iteration_bounds = array<i64: 2>, scalar_prefetch = 0 : i64, scratch_operands = 0 : i64, tpu.core_type = #tpu.core_type<tc>, window_params = [{transform_indices = @transform_0, window_bounds = array<i64: 1, 18, 128>}, {pipeline_mode = #tpu.pipeline_mode<synchronous>, transform_indices = @transform_1, window_bounds = array<i64: 3, 128, 128>}, {pipeline_mode = #tpu.pipeline_mode<synchronous>, transform_indices = @transform_2, window_bounds = array<i64: 1, 128>}, {pipeline_mode = #tpu.pipeline_mode<synchronous>, transform_indices = @transform_3, window_bounds = array<i64: 1, 128>}, {transform_indices = @transform_4, window_bounds = array<i64: 1, 16, 128>}, {transform_indices = @transform_5, window_bounds = array<i64: 1, 16, 128>}]} {
    %c0 = arith.constant 0 : index
    %c0_0 = arith.constant 0 : index
    %c0_1 = arith.constant 0 : index
    %0 = vector.load %arg1[%c0, %c0_0, %c0_1] : memref<1x18x128xbf16, #tpu.memory_space<vmem>>, vector<1x16x128xbf16>
    %1 = vector.shape_cast %0 : vector<1x16x128xbf16> to vector<16x128xbf16>
    %c0_2 = arith.constant 0 : index
    %c0_3 = arith.constant 0 : index
    %c0_4 = arith.constant 0 : index
    %2 = vector.load %arg2[%c0_2, %c0_3, %c0_4] : memref<3x128x128xbf16, #tpu.memory_space<vmem>>, vector<1x128x128xbf16>
    %3 = vector.shape_cast %2 : vector<1x128x128xbf16> to vector<128x128xbf16>
    %cst = arith.constant dense<0.000000e+00> : vector<16x128xf32>
    %4 = tpu.matmul %1, %3, %cst {dimension_numbers = #tpu.dot_dimension_numbers<[1], [0], [0], [1], [0, 0, 1, 1], [], []>} : vector<16x128xbf16>, vector<128x128xbf16>, vector<16x128xf32> -> vector<16x128xf32>
    %c0_5 = arith.constant 0 : index
    %c1 = arith.constant 1 : index
    %c0_6 = arith.constant 0 : index
    %5 = vector.load %arg1[%c0_5, %c1, %c0_6] : memref<1x18x128xbf16, #tpu.memory_space<vmem>>, vector<1x16x128xbf16>
    %6 = vector.shape_cast %5 : vector<1x16x128xbf16> to vector<16x128xbf16>
    %c1_7 = arith.constant 1 : index
    %c0_8 = arith.constant 0 : index
    %c0_9 = arith.constant 0 : index
    %7 = vector.load %arg2[%c1_7, %c0_8, %c0_9] : memref<3x128x128xbf16, #tpu.memory_space<vmem>>, vector<1x128x128xbf16>
    %8 = vector.shape_cast %7 : vector<1x128x128xbf16> to vector<128x128xbf16>
    %cst_10 = arith.constant dense<0.000000e+00> : vector<16x128xf32>
    %9 = tpu.matmul %6, %8, %cst_10 {dimension_numbers = #tpu.dot_dimension_numbers<[1], [0], [0], [1], [0, 0, 1, 1], [], []>} : vector<16x128xbf16>, vector<128x128xbf16>, vector<16x128xf32> -> vector<16x128xf32>
    %10 = arith.addf %4, %9 : vector<16x128xf32>
    %c0_11 = arith.constant 0 : index
    %c2 = arith.constant 2 : index
    %c0_12 = arith.constant 0 : index
    %11 = vector.load %arg1[%c0_11, %c2, %c0_12] : memref<1x18x128xbf16, #tpu.memory_space<vmem>>, vector<1x16x128xbf16>
    %12 = vector.shape_cast %11 : vector<1x16x128xbf16> to vector<16x128xbf16>
    %c2_13 = arith.constant 2 : index
    %c0_14 = arith.constant 0 : index
    %c0_15 = arith.constant 0 : index
    %13 = vector.load %arg2[%c2_13, %c0_14, %c0_15] : memref<3x128x128xbf16, #tpu.memory_space<vmem>>, vector<1x128x128xbf16>
    %14 = vector.shape_cast %13 : vector<1x128x128xbf16> to vector<128x128xbf16>
    %cst_16 = arith.constant dense<0.000000e+00> : vector<16x128xf32>
    %15 = tpu.matmul %12, %14, %cst_16 {dimension_numbers = #tpu.dot_dimension_numbers<[1], [0], [0], [1], [0, 0, 1, 1], [], []>} : vector<16x128xbf16>, vector<128x128xbf16>, vector<16x128xf32> -> vector<16x128xf32>
    %16 = arith.addf %10, %15 : vector<16x128xf32>
    %c0_17 = arith.constant 0 : index
    %c0_18 = arith.constant 0 : index
    %17 = vector.load %arg3[%c0_17, %c0_18] : memref<1x128xf32, #tpu.memory_space<vmem>>, vector<1x128xf32>
    %18 = vector.broadcast %17 : vector<1x128xf32> to vector<16x128xf32>
    %19 = arith.mulf %16, %18 : vector<16x128xf32>
    %c0_19 = arith.constant 0 : index
    %c0_20 = arith.constant 0 : index
    %20 = vector.load %arg4[%c0_19, %c0_20] : memref<1x128xf32, #tpu.memory_space<vmem>>, vector<1x128xf32>
    %21 = vector.broadcast %20 : vector<1x128xf32> to vector<16x128xf32>
    %22 = arith.addf %19, %21 : vector<16x128xf32>
    %c0_21 = arith.constant 0 : index
    %c0_22 = arith.constant 0 : index
    %c0_23 = arith.constant 0 : index
    %23 = vector.load %arg5[%c0_21, %c0_22, %c0_23] : memref<1x16x128xbf16, #tpu.memory_space<vmem>>, vector<1x16x128xbf16>
    %24 = vector.shape_cast %23 : vector<1x16x128xbf16> to vector<16x128xbf16>
    %25 = arith.extf %24 : vector<16x128xbf16> to vector<16x128xf32>
    %26 = arith.addf %22, %25 : vector<16x128xf32>
    %cst_24 = arith.constant 0.000000e+00 : f32
    %27 = vector.broadcast %cst_24 : f32 to vector<16x128xf32>
    %28 = arith.maximumf %26, %27 : vector<16x128xf32>
    %29 = arith.truncf %28 : vector<16x128xf32> to vector<16x128xbf16>
    %c0_25 = arith.constant 0 : index
    %c0_26 = arith.constant 0 : index
    %c0_27 = arith.constant 0 : index
    %30 = vector.load %arg6[%c0_25, %c0_26, %c0_27] : memref<1x16x128xbf16, #tpu.memory_space<vmem>>, vector<1x16x128xbf16>
    %31 = vector.shape_cast %30 : vector<1x16x128xbf16> to vector<16x128xbf16>
    %32 = vector.shape_cast %29 : vector<16x128xbf16> to vector<1x16x128xbf16>
    tpu.vector_store %arg6[%c0_25, %c0_26, %c0_27], %32 {strides = array<i32>} : memref<1x16x128xbf16, #tpu.memory_space<vmem>>, vector<1x16x128xbf16>,
    return
  }
  func.func @transform_0(%arg0: i32) -> (i32, i32, i32) {
    %c0_i32 = arith.constant 0 : i32
    %c0_i32_0 = arith.constant 0 : i32
    %c0_i32_1 = arith.constant 0 : i32
    return %arg0, %c0_i32, %c0_i32_0 : i32, i32, i32
  }
  func.func @transform_1(%arg0: i32) -> (i32, i32, i32) {
    %c0_i32 = arith.constant 0 : i32
    %c0_i32_0 = arith.constant 0 : i32
    %c0_i32_1 = arith.constant 0 : i32
    %c0_i32_2 = arith.constant 0 : i32
    return %c0_i32, %c0_i32_0, %c0_i32_1 : i32, i32, i32
  }
  func.func @transform_2(%arg0: i32) -> (i32, i32) {
    %c0_i32 = arith.constant 0 : i32
    %c0_i32_0 = arith.constant 0 : i32
    %c0_i32_1 = arith.constant 0 : i32
    return %c0_i32, %c0_i32_0 : i32, i32
  }
  func.func @transform_3(%arg0: i32) -> (i32, i32) {
    %c0_i32 = arith.constant 0 : i32
    %c0_i32_0 = arith.constant 0 : i32
    %c0_i32_1 = arith.constant 0 : i32
    return %c0_i32, %c0_i32_0 : i32, i32
  }
  func.func @transform_4(%arg0: i32) -> (i32, i32, i32) {
    %c0_i32 = arith.constant 0 : i32
    %c0_i32_0 = arith.constant 0 : i32
    %c0_i32_1 = arith.constant 0 : i32
    return %arg0, %c0_i32, %c0_i32_0 : i32, i32, i32
  }
  func.func @transform_5(%arg0: i32) -> (i32, i32, i32) {
    %c0_i32 = arith.constant 0 : i32
    %c0_i32_0 = arith.constant 0 : i32
    %c0_i32_1 = arith.constant 0 : i32
    return %arg0, %c0_i32, %c0_i32_0 : i32, i32, i32
  }
}

module attributes {stable_mosaic.version = 11 : i64} {
  func.func @_mm_kernel(%arg0: i32, %arg1: memref<32x128xbf16, #tpu.memory_space<vmem>>, %arg2: memref<128x384xbf16, #tpu.memory_space<vmem>>, %arg3: memref<32x384xbf16, #tpu.memory_space<vmem>>) attributes {dimension_semantics = [#tpu.dimension_semantics<parallel>], iteration_bounds = array<i64: 1>, scalar_prefetch = 0 : i64, scratch_operands = 0 : i64, tpu.core_type = #tpu.core_type<tc>, window_params = [{transform_indices = @transform_0, window_bounds = array<i64: 32, 128>}, {pipeline_mode = #tpu.pipeline_mode<synchronous>, transform_indices = @transform_1, window_bounds = array<i64: 128, 384>}, {transform_indices = @transform_2, window_bounds = array<i64: 32, 384>}]} {
    %c0 = arith.constant 0 : index
    %c0_0 = arith.constant 0 : index
    %0 = vector.load %arg1[%c0, %c0_0] : memref<32x128xbf16, #tpu.memory_space<vmem>>, vector<32x128xbf16>
    %c0_1 = arith.constant 0 : index
    %c0_2 = arith.constant 0 : index
    %1 = vector.load %arg2[%c0_1, %c0_2] : memref<128x384xbf16, #tpu.memory_space<vmem>>, vector<128x384xbf16>
    %cst = arith.constant dense<0.000000e+00> : vector<32x384xf32>
    %2 = tpu.matmul %0, %1, %cst {dimension_numbers = #tpu.dot_dimension_numbers<[1], [0], [0], [1], [0, 0, 1, 1], [], []>} : vector<32x128xbf16>, vector<128x384xbf16>, vector<32x384xf32> -> vector<32x384xf32>
    %3 = arith.truncf %2 : vector<32x384xf32> to vector<32x384xbf16>
    %c0_3 = arith.constant 0 : index
    %c0_4 = arith.constant 0 : index
    %4 = vector.load %arg3[%c0_3, %c0_4] : memref<32x384xbf16, #tpu.memory_space<vmem>>, vector<32x384xbf16>
    tpu.vector_store %arg3[%c0_3, %c0_4], %3 {strides = array<i32>} : memref<32x384xbf16, #tpu.memory_space<vmem>>, vector<32x384xbf16>,
    return
  }
  func.func @transform_0(%arg0: i32) -> (i32, i32) {
    %c0_i32 = arith.constant 0 : i32
    %c0_i32_0 = arith.constant 0 : i32
    return %arg0, %c0_i32 : i32, i32
  }
  func.func @transform_1(%arg0: i32) -> (i32, i32) {
    %c0_i32 = arith.constant 0 : i32
    %c0_i32_0 = arith.constant 0 : i32
    %c0_i32_1 = arith.constant 0 : i32
    return %c0_i32, %c0_i32_0 : i32, i32
  }
  func.func @transform_2(%arg0: i32) -> (i32, i32) {
    %c0_i32 = arith.constant 0 : i32
    %c0_i32_0 = arith.constant 0 : i32
    return %arg0, %c0_i32 : i32, i32
  }
}

module attributes {stable_mosaic.version = 11 : i64} {
  func.func @_mm_kernel(%arg0: i32, %arg1: memref<32x128xbf16, #tpu.memory_space<vmem>>, %arg2: memref<128x128xbf16, #tpu.memory_space<vmem>>, %arg3: memref<32x128xbf16, #tpu.memory_space<vmem>>, %arg4: memref<1x128xf32, #tpu.memory_space<vmem>>, %arg5: memref<1x128xf32, #tpu.memory_space<vmem>>, %arg6: memref<32x128xbf16, #tpu.memory_space<vmem>>) attributes {dimension_semantics = [#tpu.dimension_semantics<parallel>], iteration_bounds = array<i64: 1>, scalar_prefetch = 0 : i64, scratch_operands = 0 : i64, tpu.core_type = #tpu.core_type<tc>, window_params = [{transform_indices = @transform_0, window_bounds = array<i64: 32, 128>}, {pipeline_mode = #tpu.pipeline_mode<synchronous>, transform_indices = @transform_1, window_bounds = array<i64: 128, 128>}, {transform_indices = @transform_2, window_bounds = array<i64: 32, 128>}, {pipeline_mode = #tpu.pipeline_mode<synchronous>, transform_indices = @transform_3, window_bounds = array<i64: 1, 128>}, {pipeline_mode = #tpu.pipeline_mode<synchronous>, transform_indices = @transform_4, window_bounds = array<i64: 1, 128>}, {transform_indices = @transform_5, window_bounds = array<i64: 32, 128>}]} {
    %c0 = arith.constant 0 : index
    %c0_0 = arith.constant 0 : index
    %0 = vector.load %arg1[%c0, %c0_0] : memref<32x128xbf16, #tpu.memory_space<vmem>>, vector<32x128xbf16>
    %c0_1 = arith.constant 0 : index
    %c0_2 = arith.constant 0 : index
    %1 = vector.load %arg2[%c0_1, %c0_2] : memref<128x128xbf16, #tpu.memory_space<vmem>>, vector<128x128xbf16>
    %cst = arith.constant dense<0.000000e+00> : vector<32x128xf32>
    %2 = tpu.matmul %0, %1, %cst {dimension_numbers = #tpu.dot_dimension_numbers<[1], [0], [0], [1], [0, 0, 1, 1], [], []>} : vector<32x128xbf16>, vector<128x128xbf16>, vector<32x128xf32> -> vector<32x128xf32>
    %c0_3 = arith.constant 0 : index
    %c0_4 = arith.constant 0 : index
    %3 = vector.load %arg3[%c0_3, %c0_4] : memref<32x128xbf16, #tpu.memory_space<vmem>>, vector<32x128xbf16>
    %4 = arith.extf %3 : vector<32x128xbf16> to vector<32x128xf32>
    %5 = arith.addf %2, %4 : vector<32x128xf32>
    %cst_5 = arith.constant dense<0.000000e+00> : vector<32xf32>
    %6 = vector.multi_reduction <add>, %5, %cst_5 [1] : vector<32x128xf32> to vector<32xf32>
    %7 = vector.shape_cast %6 : vector<32xf32> to vector<32x1xf32>
    %cst_6 = arith.constant 1.280000e+02 : f32
    %8 = vector.broadcast %cst_6 : f32 to vector<32x1xf32>
    %9 = arith.divf %7, %8 : vector<32x1xf32>
    %10 = vector.broadcast %9 : vector<32x1xf32> to vector<32x128xf32>
    %11 = arith.subf %5, %10 : vector<32x128xf32>
    %12 = arith.mulf %11, %11 : vector<32x128xf32>
    %cst_7 = arith.constant dense<0.000000e+00> : vector<32xf32>
    %13 = vector.multi_reduction <add>, %12, %cst_7 [1] : vector<32x128xf32> to vector<32xf32>
    %14 = vector.shape_cast %13 : vector<32xf32> to vector<32x1xf32>
    %cst_8 = arith.constant 1.280000e+02 : f32
    %15 = vector.broadcast %cst_8 : f32 to vector<32x1xf32>
    %16 = arith.divf %14, %15 : vector<32x1xf32>
    %17 = vector.broadcast %9 : vector<32x1xf32> to vector<32x128xf32>
    %18 = arith.subf %5, %17 : vector<32x128xf32>
    %cst_9 = arith.constant 9.99999974E-6 : f32
    %19 = vector.broadcast %cst_9 : f32 to vector<32x1xf32>
    %20 = arith.addf %16, %19 : vector<32x1xf32>
    %21 = math.rsqrt %20 : vector<32x1xf32>
    %22 = vector.broadcast %21 : vector<32x1xf32> to vector<32x128xf32>
    %23 = arith.mulf %18, %22 : vector<32x128xf32>
    %c0_10 = arith.constant 0 : index
    %c0_11 = arith.constant 0 : index
    %24 = vector.load %arg4[%c0_10, %c0_11] : memref<1x128xf32, #tpu.memory_space<vmem>>, vector<1x128xf32>
    %25 = vector.broadcast %24 : vector<1x128xf32> to vector<32x128xf32>
    %26 = arith.mulf %23, %25 : vector<32x128xf32>
    %c0_12 = arith.constant 0 : index
    %c0_13 = arith.constant 0 : index
    %27 = vector.load %arg5[%c0_12, %c0_13] : memref<1x128xf32, #tpu.memory_space<vmem>>, vector<1x128xf32>
    %28 = vector.broadcast %27 : vector<1x128xf32> to vector<32x128xf32>
    %29 = arith.addf %26, %28 : vector<32x128xf32>
    %30 = arith.truncf %29 : vector<32x128xf32> to vector<32x128xbf16>
    %c0_14 = arith.constant 0 : index
    %c0_15 = arith.constant 0 : index
    %31 = vector.load %arg6[%c0_14, %c0_15] : memref<32x128xbf16, #tpu.memory_space<vmem>>, vector<32x128xbf16>
    tpu.vector_store %arg6[%c0_14, %c0_15], %30 {strides = array<i32>} : memref<32x128xbf16, #tpu.memory_space<vmem>>, vector<32x128xbf16>,
    return
  }
  func.func @transform_0(%arg0: i32) -> (i32, i32) {
    %c0_i32 = arith.constant 0 : i32
    %c0_i32_0 = arith.constant 0 : i32
    return %arg0, %c0_i32 : i32, i32
  }
  func.func @transform_1(%arg0: i32) -> (i32, i32) {
    %c0_i32 = arith.constant 0 : i32
    %c0_i32_0 = arith.constant 0 : i32
    %c0_i32_1 = arith.constant 0 : i32
    return %c0_i32, %c0_i32_0 : i32, i32
  }
  func.func @transform_2(%arg0: i32) -> (i32, i32) {
    %c0_i32 = arith.constant 0 : i32
    %c0_i32_0 = arith.constant 0 : i32
    return %arg0, %c0_i32 : i32, i32
  }
  func.func @transform_3(%arg0: i32) -> (i32, i32) {
    %c0_i32 = arith.constant 0 : i32
    %c0_i32_0 = arith.constant 0 : i32
    %c0_i32_1 = arith.constant 0 : i32
    return %c0_i32, %c0_i32_0 : i32, i32
  }
  func.func @transform_4(%arg0: i32) -> (i32, i32) {
    %c0_i32 = arith.constant 0 : i32
    %c0_i32_0 = arith.constant 0 : i32
    %c0_i32_1 = arith.constant 0 : i32
    return %c0_i32, %c0_i32_0 : i32, i32
  }
  func.func @transform_5(%arg0: i32) -> (i32, i32) {
    %c0_i32 = arith.constant 0 : i32
    %c0_i32_0 = arith.constant 0 : i32
    return %arg0, %c0_i32 : i32, i32
  }
}

module attributes {stable_mosaic.version = 11 : i64} {
  func.func @_attn_kernel(%arg0: i32, %arg1: i32, %arg2: memref<1x16x128xbf16, #tpu.memory_space<vmem>>, %arg3: memref<1x16x128xbf16, #tpu.memory_space<vmem>>, %arg4: memref<1x16x128xbf16, #tpu.memory_space<vmem>>, %arg5: memref<1x8x16x16xbf16, #tpu.memory_space<vmem>>, %arg6: memref<1x16x128xbf16, #tpu.memory_space<vmem>>) attributes {dimension_semantics = [#tpu.dimension_semantics<parallel>, #tpu.dimension_semantics<parallel>], iteration_bounds = array<i64: 2, 1>, scalar_prefetch = 0 : i64, scratch_operands = 0 : i64, tpu.core_type = #tpu.core_type<tc>, window_params = [{transform_indices = @transform_0, window_bounds = array<i64: 1, 16, 128>}, {transform_indices = @transform_1, window_bounds = array<i64: 1, 16, 128>}, {transform_indices = @transform_2, window_bounds = array<i64: 1, 16, 128>}, {transform_indices = @transform_3, window_bounds = array<i64: 1, 8, 16, 16>}, {transform_indices = @transform_4, window_bounds = array<i64: 1, 16, 128>}]} {
    %c0 = arith.constant 0 : index
    %c0_0 = arith.constant 0 : index
    %c0_1 = arith.constant 0 : index
    %0 = vector.load %arg2[%c0, %c0_0, %c0_1] : memref<1x16x128xbf16, #tpu.memory_space<vmem>>, vector<1x16x16xbf16>
    %1 = vector.shape_cast %0 : vector<1x16x16xbf16> to vector<16x16xbf16>
    %c0_2 = arith.constant 0 : index
    %c0_3 = arith.constant 0 : index
    %c0_4 = arith.constant 0 : index
    %2 = vector.load %arg3[%c0_2, %c0_3, %c0_4] : memref<1x16x128xbf16, #tpu.memory_space<vmem>>, vector<1x16x16xbf16>
    %3 = vector.shape_cast %2 : vector<1x16x16xbf16> to vector<16x16xbf16>
    %c0_5 = arith.constant 0 : index
    %c0_6 = arith.constant 0 : index
    %c0_7 = arith.constant 0 : index
    %4 = vector.load %arg4[%c0_5, %c0_6, %c0_7] : memref<1x16x128xbf16, #tpu.memory_space<vmem>>, vector<1x16x16xbf16>
    %5 = vector.shape_cast %4 : vector<1x16x16xbf16> to vector<16x16xbf16>
    %cst = arith.constant dense<0.000000e+00> : vector<16x16xf32>
    %6 = tpu.matmul %1, %3, %cst {dimension_numbers = #tpu.dot_dimension_numbers<[1], [1], [0], [0], [0, 0, 1, 0], [], []>} : vector<16x16xbf16>, vector<16x16xbf16>, vector<16x16xf32> -> vector<16x16xf32>
    %cst_8 = arith.constant 2.500000e-01 : f32
    %7 = vector.broadcast %cst_8 : f32 to vector<16x16xf32>
    %8 = arith.mulf %6, %7 : vector<16x16xf32>
    %c0_9 = arith.constant 0 : index
    %c0_10 = arith.constant 0 : index
    %c0_11 = arith.constant 0 : index
    %c0_12 = arith.constant 0 : index
    %9 = vector.load %arg5[%c0_9, %c0_10, %c0_11, %c0_12] : memref<1x8x16x16xbf16, #tpu.memory_space<vmem>>, vector<1x1x16x16xbf16>
    %10 = vector.shape_cast %9 : vector<1x1x16x16xbf16> to vector<16x16xbf16>
    %11 = arith.extf %10 : vector<16x16xbf16> to vector<16x16xf32>
    %12 = arith.addf %8, %11 : vector<16x16xf32>
    %cst_13 = arith.constant dense<0xFF800000> : vector<16xf32>
    %13 = vector.multi_reduction <maximumf>, %12, %cst_13 [1] : vector<16x16xf32> to vector<16xf32>
    %14 = vector.shape_cast %13 : vector<16xf32> to vector<16x1xf32>
    %15 = vector.broadcast %14 : vector<16x1xf32> to vector<16x16xf32>
    %16 = arith.subf %12, %15 : vector<16x16xf32>
    %17 = math.exp %16 : vector<16x16xf32>
    %cst_14 = arith.constant dense<0.000000e+00> : vector<16xf32>
    %18 = vector.multi_reduction <add>, %17, %cst_14 [1] : vector<16x16xf32> to vector<16xf32>
    %19 = vector.shape_cast %18 : vector<16xf32> to vector<16x1xf32>
    %20 = tpu.reciprocal %19 {approx = true} : vector<16x1xf32> -> vector<16x1xf32>
    %21 = vector.broadcast %20 : vector<16x1xf32> to vector<16x16xf32>
    %22 = arith.mulf %17, %21 : vector<16x16xf32>
    %23 = arith.truncf %22 : vector<16x16xf32> to vector<16x16xbf16>
    %cst_15 = arith.constant dense<0.000000e+00> : vector<16x16xf32>
    %24 = tpu.matmul %23, %5, %cst_15 {dimension_numbers = #tpu.dot_dimension_numbers<[1], [0], [0], [1], [0, 0, 1, 1], [], []>} : vector<16x16xbf16>, vector<16x16xbf16>, vector<16x16xf32> -> vector<16x16xf32>
    %25 = arith.truncf %24 : vector<16x16xf32> to vector<16x16xbf16>
    %c0_16 = arith.constant 0 : index
    %c0_17 = arith.constant 0 : index
    %c0_18 = arith.constant 0 : index
    %26 = vector.load %arg6[%c0_16, %c0_17, %c0_18] : memref<1x16x128xbf16, #tpu.memory_space<vmem>>, vector<1x16x16xbf16>
    %27 = vector.shape_cast %26 : vector<1x16x16xbf16> to vector<16x16xbf16>
    %28 = vector.shape_cast %25 : vector<16x16xbf16> to vector<1x16x16xbf16>
    tpu.vector_store %arg6[%c0_16, %c0_17, %c0_18], %28 {strides = array<i32>} : memref<1x16x128xbf16, #tpu.memory_space<vmem>>, vector<1x16x16xbf16>,
    %c0_19 = arith.constant 0 : index
    %c0_20 = arith.constant 0 : index
    %c16 = arith.constant 16 : index
    %29 = vector.load %arg2[%c0_19, %c0_20, %c16] : memref<1x16x128xbf16, #tpu.memory_space<vmem>>, vector<1x16x16xbf16>
    %30 = vector.shape_cast %29 : vector<1x16x16xbf16> to vector<16x16xbf16>
    %c0_21 = arith.constant 0 : index
    %c0_22 = arith.constant 0 : index
    %c16_23 = arith.constant 16 : index
    %31 = vector.load %arg3[%c0_21, %c0_22, %c16_23] : memref<1x16x128xbf16, #tpu.memory_space<vmem>>, vector<1x16x16xbf16>
    %32 = vector.shape_cast %31 : vector<1x16x16xbf16> to vector<16x16xbf16>
    %c0_24 = arith.constant 0 : index
    %c0_25 = arith.constant 0 : index
    %c16_26 = arith.constant 16 : index
    %33 = vector.load %arg4[%c0_24, %c0_25, %c16_26] : memref<1x16x128xbf16, #tpu.memory_space<vmem>>, vector<1x16x16xbf16>
    %34 = vector.shape_cast %33 : vector<1x16x16xbf16> to vector<16x16xbf16>
    %cst_27 = arith.constant dense<0.000000e+00> : vector<16x16xf32>
    %35 = tpu.matmul %30, %32, %cst_27 {dimension_numbers = #tpu.dot_dimension_numbers<[1], [1], [0], [0], [0, 0, 1, 0], [], []>} : vector<16x16xbf16>, vector<16x16xbf16>, vector<16x16xf32> -> vector<16x16xf32>
    %cst_28 = arith.constant 2.500000e-01 : f32
    %36 = vector.broadcast %cst_28 : f32 to vector<16x16xf32>
    %37 = arith.mulf %35, %36 : vector<16x16xf32>
    %c0_29 = arith.constant 0 : index
    %c1 = arith.constant 1 : index
    %c0_30 = arith.constant 0 : index
    %c0_31 = arith.constant 0 : index
    %38 = vector.load %arg5[%c0_29, %c1, %c0_30, %c0_31] : memref<1x8x16x16xbf16, #tpu.memory_space<vmem>>, vector<1x1x16x16xbf16>
    %39 = vector.shape_cast %38 : vector<1x1x16x16xbf16> to vector<16x16xbf16>
    %40 = arith.extf %39 : vector<16x16xbf16> to vector<16x16xf32>
    %41 = arith.addf %37, %40 : vector<16x16xf32>
    %cst_32 = arith.constant dense<0xFF800000> : vector<16xf32>
    %42 = vector.multi_reduction <maximumf>, %41, %cst_32 [1] : vector<16x16xf32> to vector<16xf32>
    %43 = vector.shape_cast %42 : vector<16xf32> to vector<16x1xf32>
    %44 = vector.broadcast %43 : vector<16x1xf32> to vector<16x16xf32>
    %45 = arith.subf %41, %44 : vector<16x16xf32>
    %46 = math.exp %45 : vector<16x16xf32>
    %cst_33 = arith.constant dense<0.000000e+00> : vector<16xf32>
    %47 = vector.multi_reduction <add>, %46, %cst_33 [1] : vector<16x16xf32> to vector<16xf32>
    %48 = vector.shape_cast %47 : vector<16xf32> to vector<16x1xf32>
    %49 = tpu.reciprocal %48 {approx = true} : vector<16x1xf32> -> vector<16x1xf32>
    %50 = vector.broadcast %49 : vector<16x1xf32> to vector<16x16xf32>
    %51 = arith.mulf %46, %50 : vector<16x16xf32>
    %52 = arith.truncf %51 : vector<16x16xf32> to vector<16x16xbf16>
    %cst_34 = arith.constant dense<0.000000e+00> : vector<16x16xf32>
    %53 = tpu.matmul %52, %34, %cst_34 {dimension_numbers = #tpu.dot_dimension_numbers<[1], [0], [0], [1], [0, 0, 1, 1], [], []>} : vector<16x16xbf16>, vector<16x16xbf16>, vector<16x16xf32> -> vector<16x16xf32>
    %54 = arith.truncf %53 : vector<16x16xf32> to vector<16x16xbf16>
    %c0_35 = arith.constant 0 : index
    %c0_36 = arith.constant 0 : index
    %c16_37 = arith.constant 16 : index
    %55 = vector.load %arg6[%c0_35, %c0_36, %c16_37] : memref<1x16x128xbf16, #tpu.memory_space<vmem>>, vector<1x16x16xbf16>
    %56 = vector.shape_cast %55 : vector<1x16x16xbf16> to vector<16x16xbf16>
    %57 = vector.shape_cast %54 : vector<16x16xbf16> to vector<1x16x16xbf16>
    tpu.vector_store %arg6[%c0_35, %c0_36, %c16_37], %57 {strides = array<i32>} : memref<1x16x128xbf16, #tpu.memory_space<vmem>>, vector<1x16x16xbf16>,
    %c0_38 = arith.constant 0 : index
    %c0_39 = arith.constant 0 : index
    %c32 = arith.constant 32 : index
    %58 = vector.load %arg2[%c0_38, %c0_39, %c32] : memref<1x16x128xbf16, #tpu.memory_space<vmem>>, vector<1x16x16xbf16>
    %59 = vector.shape_cast %58 : vector<1x16x16xbf16> to vector<16x16xbf16>
    %c0_40 = arith.constant 0 : index
    %c0_41 = arith.constant 0 : index
    %c32_42 = arith.constant 32 : index
    %60 = vector.load %arg3[%c0_40, %c0_41, %c32_42] : memref<1x16x128xbf16, #tpu.memory_space<vmem>>, vector<1x16x16xbf16>
    %61 = vector.shape_cast %60 : vector<1x16x16xbf16> to vector<16x16xbf16>
    %c0_43 = arith.constant 0 : index
    %c0_44 = arith.constant 0 : index
    %c32_45 = arith.constant 32 : index
    %62 = vector.load %arg4[%c0_43, %c0_44, %c32_45] : memref<1x16x128xbf16, #tpu.memory_space<vmem>>, vector<1x16x16xbf16>
    %63 = vector.shape_cast %62 : vector<1x16x16xbf16> to vector<16x16xbf16>
    %cst_46 = arith.constant dense<0.000000e+00> : vector<16x16xf32>
    %64 = tpu.matmul %59, %61, %cst_46 {dimension_numbers = #tpu.dot_dimension_numbers<[1], [1], [0], [0], [0, 0, 1, 0], [], []>} : vector<16x16xbf16>, vector<16x16xbf16>, vector<16x16xf32> -> vector<16x16xf32>
    %cst_47 = arith.constant 2.500000e-01 : f32
    %65 = vector.broadcast %cst_47 : f32 to vector<16x16xf32>
    %66 = arith.mulf %64, %65 : vector<16x16xf32>
    %c0_48 = arith.constant 0 : index
    %c2 = arith.constant 2 : index
    %c0_49 = arith.constant 0 : index
    %c0_50 = arith.constant 0 : index
    %67 = vector.load %arg5[%c0_48, %c2, %c0_49, %c0_50] : memref<1x8x16x16xbf16, #tpu.memory_space<vmem>>, vector<1x1x16x16xbf16>
    %68 = vector.shape_cast %67 : vector<1x1x16x16xbf16> to vector<16x16xbf16>
    %69 = arith.extf %68 : vector<16x16xbf16> to vector<16x16xf32>
    %70 = arith.addf %66, %69 : vector<16x16xf32>
    %cst_51 = arith.constant dense<0xFF800000> : vector<16xf32>
    %71 = vector.multi_reduction <maximumf>, %70, %cst_51 [1] : vector<16x16xf32> to vector<16xf32>
    %72 = vector.shape_cast %71 : vector<16xf32> to vector<16x1xf32>
    %73 = vector.broadcast %72 : vector<16x1xf32> to vector<16x16xf32>
    %74 = arith.subf %70, %73 : vector<16x16xf32>
    %75 = math.exp %74 : vector<16x16xf32>
    %cst_52 = arith.constant dense<0.000000e+00> : vector<16xf32>
    %76 = vector.multi_reduction <add>, %75, %cst_52 [1] : vector<16x16xf32> to vector<16xf32>
    %77 = vector.shape_cast %76 : vector<16xf32> to vector<16x1xf32>
    %78 = tpu.reciprocal %77 {approx = true} : vector<16x1xf32> -> vector<16x1xf32>
    %79 = vector.broadcast %78 : vector<16x1xf32> to vector<16x16xf32>
    %80 = arith.mulf %75, %79 : vector<16x16xf32>
    %81 = arith.truncf %80 : vector<16x16xf32> to vector<16x16xbf16>
    %cst_53 = arith.constant dense<0.000000e+00> : vector<16x16xf32>
    %82 = tpu.matmul %81, %63, %cst_53 {dimension_numbers = #tpu.dot_dimension_numbers<[1], [0], [0], [1], [0, 0, 1, 1], [], []>} : vector<16x16xbf16>, vector<16x16xbf16>, vector<16x16xf32> -> vector<16x16xf32>
    %83 = arith.truncf %82 : vector<16x16xf32> to vector<16x16xbf16>
    %c0_54 = arith.constant 0 : index
    %c0_55 = arith.constant 0 : index
    %c32_56 = arith.constant 32 : index
    %84 = vector.load %arg6[%c0_54, %c0_55, %c32_56] : memref<1x16x128xbf16, #tpu.memory_space<vmem>>, vector<1x16x16xbf16>
    %85 = vector.shape_cast %84 : vector<1x16x16xbf16> to vector<16x16xbf16>
    %86 = vector.shape_cast %83 : vector<16x16xbf16> to vector<1x16x16xbf16>
    tpu.vector_store %arg6[%c0_54, %c0_55, %c32_56], %86 {strides = array<i32>} : memref<1x16x128xbf16, #tpu.memory_space<vmem>>, vector<1x16x16xbf16>,
    %c0_57 = arith.constant 0 : index
    %c0_58 = arith.constant 0 : index
    %c48 = arith.constant 48 : index
    %87 = vector.load %arg2[%c0_57, %c0_58, %c48] : memref<1x16x128xbf16, #tpu.memory_space<vmem>>, vector<1x16x16xbf16>
    %88 = vector.shape_cast %87 : vector<1x16x16xbf16> to vector<16x16xbf16>
    %c0_59 = arith.constant 0 : index
    %c0_60 = arith.constant 0 : index
    %c48_61 = arith.constant 48 : index
    %89 = vector.load %arg3[%c0_59, %c0_60, %c48_61] : memref<1x16x128xbf16, #tpu.memory_space<vmem>>, vector<1x16x16xbf16>
    %90 = vector.shape_cast %89 : vector<1x16x16xbf16> to vector<16x16xbf16>
    %c0_62 = arith.constant 0 : index
    %c0_63 = arith.constant 0 : index
    %c48_64 = arith.constant 48 : index
    %91 = vector.load %arg4[%c0_62, %c0_63, %c48_64] : memref<1x16x128xbf16, #tpu.memory_space<vmem>>, vector<1x16x16xbf16>
    %92 = vector.shape_cast %91 : vector<1x16x16xbf16> to vector<16x16xbf16>
    %cst_65 = arith.constant dense<0.000000e+00> : vector<16x16xf32>
    %93 = tpu.matmul %88, %90, %cst_65 {dimension_numbers = #tpu.dot_dimension_numbers<[1], [1], [0], [0], [0, 0, 1, 0], [], []>} : vector<16x16xbf16>, vector<16x16xbf16>, vector<16x16xf32> -> vector<16x16xf32>
    %cst_66 = arith.constant 2.500000e-01 : f32
    %94 = vector.broadcast %cst_66 : f32 to vector<16x16xf32>
    %95 = arith.mulf %93, %94 : vector<16x16xf32>
    %c0_67 = arith.constant 0 : index
    %c3 = arith.constant 3 : index
    %c0_68 = arith.constant 0 : index
    %c0_69 = arith.constant 0 : index
    %96 = vector.load %arg5[%c0_67, %c3, %c0_68, %c0_69] : memref<1x8x16x16xbf16, #tpu.memory_space<vmem>>, vector<1x1x16x16xbf16>
    %97 = vector.shape_cast %96 : vector<1x1x16x16xbf16> to vector<16x16xbf16>
    %98 = arith.extf %97 : vector<16x16xbf16> to vector<16x16xf32>
    %99 = arith.addf %95, %98 : vector<16x16xf32>
    %cst_70 = arith.constant dense<0xFF800000> : vector<16xf32>
    %100 = vector.multi_reduction <maximumf>, %99, %cst_70 [1] : vector<16x16xf32> to vector<16xf32>
    %101 = vector.shape_cast %100 : vector<16xf32> to vector<16x1xf32>
    %102 = vector.broadcast %101 : vector<16x1xf32> to vector<16x16xf32>
    %103 = arith.subf %99, %102 : vector<16x16xf32>
    %104 = math.exp %103 : vector<16x16xf32>
    %cst_71 = arith.constant dense<0.000000e+00> : vector<16xf32>
    %105 = vector.multi_reduction <add>, %104, %cst_71 [1] : vector<16x16xf32> to vector<16xf32>
    %106 = vector.shape_cast %105 : vector<16xf32> to vector<16x1xf32>
    %107 = tpu.reciprocal %106 {approx = true} : vector<16x1xf32> -> vector<16x1xf32>
    %108 = vector.broadcast %107 : vector<16x1xf32> to vector<16x16xf32>
    %109 = arith.mulf %104, %108 : vector<16x16xf32>
    %110 = arith.truncf %109 : vector<16x16xf32> to vector<16x16xbf16>
    %cst_72 = arith.constant dense<0.000000e+00> : vector<16x16xf32>
    %111 = tpu.matmul %110, %92, %cst_72 {dimension_numbers = #tpu.dot_dimension_numbers<[1], [0], [0], [1], [0, 0, 1, 1], [], []>} : vector<16x16xbf16>, vector<16x16xbf16>, vector<16x16xf32> -> vector<16x16xf32>
    %112 = arith.truncf %111 : vector<16x16xf32> to vector<16x16xbf16>
    %c0_73 = arith.constant 0 : index
    %c0_74 = arith.constant 0 : index
    %c48_75 = arith.constant 48 : index
    %113 = vector.load %arg6[%c0_73, %c0_74, %c48_75] : memref<1x16x128xbf16, #tpu.memory_space<vmem>>, vector<1x16x16xbf16>
    %114 = vector.shape_cast %113 : vector<1x16x16xbf16> to vector<16x16xbf16>
    %115 = vector.shape_cast %112 : vector<16x16xbf16> to vector<1x16x16xbf16>
    tpu.vector_store %arg6[%c0_73, %c0_74, %c48_75], %115 {strides = array<i32>} : memref<1x16x128xbf16, #tpu.memory_space<vmem>>, vector<1x16x16xbf16>,
    %c0_76 = arith.constant 0 : index
    %c0_77 = arith.constant 0 : index
    %c64 = arith.constant 64 : index
    %116 = vector.load %arg2[%c0_76, %c0_77, %c64] : memref<1x16x128xbf16, #tpu.memory_space<vmem>>, vector<1x16x16xbf16>
    %117 = vector.shape_cast %116 : vector<1x16x16xbf16> to vector<16x16xbf16>
    %c0_78 = arith.constant 0 : index
    %c0_79 = arith.constant 0 : index
    %c64_80 = arith.constant 64 : index
    %118 = vector.load %arg3[%c0_78, %c0_79, %c64_80] : memref<1x16x128xbf16, #tpu.memory_space<vmem>>, vector<1x16x16xbf16>
    %119 = vector.shape_cast %118 : vector<1x16x16xbf16> to vector<16x16xbf16>
    %c0_81 = arith.constant 0 : index
    %c0_82 = arith.constant 0 : index
    %c64_83 = arith.constant 64 : index
    %120 = vector.load %arg4[%c0_81, %c0_82, %c64_83] : memref<1x16x128xbf16, #tpu.memory_space<vmem>>, vector<1x16x16xbf16>
    %121 = vector.shape_cast %120 : vector<1x16x16xbf16> to vector<16x16xbf16>
    %cst_84 = arith.constant dense<0.000000e+00> : vector<16x16xf32>
    %122 = tpu.matmul %117, %119, %cst_84 {dimension_numbers = #tpu.dot_dimension_numbers<[1], [1], [0], [0], [0, 0, 1, 0], [], []>} : vector<16x16xbf16>, vector<16x16xbf16>, vector<16x16xf32> -> vector<16x16xf32>
    %cst_85 = arith.constant 2.500000e-01 : f32
    %123 = vector.broadcast %cst_85 : f32 to vector<16x16xf32>
    %124 = arith.mulf %122, %123 : vector<16x16xf32>
    %c0_86 = arith.constant 0 : index
    %c4 = arith.constant 4 : index
    %c0_87 = arith.constant 0 : index
    %c0_88 = arith.constant 0 : index
    %125 = vector.load %arg5[%c0_86, %c4, %c0_87, %c0_88] : memref<1x8x16x16xbf16, #tpu.memory_space<vmem>>, vector<1x1x16x16xbf16>
    %126 = vector.shape_cast %125 : vector<1x1x16x16xbf16> to vector<16x16xbf16>
    %127 = arith.extf %126 : vector<16x16xbf16> to vector<16x16xf32>
    %128 = arith.addf %124, %127 : vector<16x16xf32>
    %cst_89 = arith.constant dense<0xFF800000> : vector<16xf32>
    %129 = vector.multi_reduction <maximumf>, %128, %cst_89 [1] : vector<16x16xf32> to vector<16xf32>
    %130 = vector.shape_cast %129 : vector<16xf32> to vector<16x1xf32>
    %131 = vector.broadcast %130 : vector<16x1xf32> to vector<16x16xf32>
    %132 = arith.subf %128, %131 : vector<16x16xf32>
    %133 = math.exp %132 : vector<16x16xf32>
    %cst_90 = arith.constant dense<0.000000e+00> : vector<16xf32>
    %134 = vector.multi_reduction <add>, %133, %cst_90 [1] : vector<16x16xf32> to vector<16xf32>
    %135 = vector.shape_cast %134 : vector<16xf32> to vector<16x1xf32>
    %136 = tpu.reciprocal %135 {approx = true} : vector<16x1xf32> -> vector<16x1xf32>
    %137 = vector.broadcast %136 : vector<16x1xf32> to vector<16x16xf32>
    %138 = arith.mulf %133, %137 : vector<16x16xf32>
    %139 = arith.truncf %138 : vector<16x16xf32> to vector<16x16xbf16>
    %cst_91 = arith.constant dense<0.000000e+00> : vector<16x16xf32>
    %140 = tpu.matmul %139, %121, %cst_91 {dimension_numbers = #tpu.dot_dimension_numbers<[1], [0], [0], [1], [0, 0, 1, 1], [], []>} : vector<16x16xbf16>, vector<16x16xbf16>, vector<16x16xf32> -> vector<16x16xf32>
    %141 = arith.truncf %140 : vector<16x16xf32> to vector<16x16xbf16>
    %c0_92 = arith.constant 0 : index
    %c0_93 = arith.constant 0 : index
    %c64_94 = arith.constant 64 : index
    %142 = vector.load %arg6[%c0_92, %c0_93, %c64_94] : memref<1x16x128xbf16, #tpu.memory_space<vmem>>, vector<1x16x16xbf16>
    %143 = vector.shape_cast %142 : vector<1x16x16xbf16> to vector<16x16xbf16>
    %144 = vector.shape_cast %141 : vector<16x16xbf16> to vector<1x16x16xbf16>
    tpu.vector_store %arg6[%c0_92, %c0_93, %c64_94], %144 {strides = array<i32>} : memref<1x16x128xbf16, #tpu.memory_space<vmem>>, vector<1x16x16xbf16>,
    %c0_95 = arith.constant 0 : index
    %c0_96 = arith.constant 0 : index
    %c80 = arith.constant 80 : index
    %145 = vector.load %arg2[%c0_95, %c0_96, %c80] : memref<1x16x128xbf16, #tpu.memory_space<vmem>>, vector<1x16x16xbf16>
    %146 = vector.shape_cast %145 : vector<1x16x16xbf16> to vector<16x16xbf16>
    %c0_97 = arith.constant 0 : index
    %c0_98 = arith.constant 0 : index
    %c80_99 = arith.constant 80 : index
    %147 = vector.load %arg3[%c0_97, %c0_98, %c80_99] : memref<1x16x128xbf16, #tpu.memory_space<vmem>>, vector<1x16x16xbf16>
    %148 = vector.shape_cast %147 : vector<1x16x16xbf16> to vector<16x16xbf16>
    %c0_100 = arith.constant 0 : index
    %c0_101 = arith.constant 0 : index
    %c80_102 = arith.constant 80 : index
    %149 = vector.load %arg4[%c0_100, %c0_101, %c80_102] : memref<1x16x128xbf16, #tpu.memory_space<vmem>>, vector<1x16x16xbf16>
    %150 = vector.shape_cast %149 : vector<1x16x16xbf16> to vector<16x16xbf16>
    %cst_103 = arith.constant dense<0.000000e+00> : vector<16x16xf32>
    %151 = tpu.matmul %146, %148, %cst_103 {dimension_numbers = #tpu.dot_dimension_numbers<[1], [1], [0], [0], [0, 0, 1, 0], [], []>} : vector<16x16xbf16>, vector<16x16xbf16>, vector<16x16xf32> -> vector<16x16xf32>
    %cst_104 = arith.constant 2.500000e-01 : f32
    %152 = vector.broadcast %cst_104 : f32 to vector<16x16xf32>
    %153 = arith.mulf %151, %152 : vector<16x16xf32>
    %c0_105 = arith.constant 0 : index
    %c5 = arith.constant 5 : index
    %c0_106 = arith.constant 0 : index
    %c0_107 = arith.constant 0 : index
    %154 = vector.load %arg5[%c0_105, %c5, %c0_106, %c0_107] : memref<1x8x16x16xbf16, #tpu.memory_space<vmem>>, vector<1x1x16x16xbf16>
    %155 = vector.shape_cast %154 : vector<1x1x16x16xbf16> to vector<16x16xbf16>
    %156 = arith.extf %155 : vector<16x16xbf16> to vector<16x16xf32>
    %157 = arith.addf %153, %156 : vector<16x16xf32>
    %cst_108 = arith.constant dense<0xFF800000> : vector<16xf32>
    %158 = vector.multi_reduction <maximumf>, %157, %cst_108 [1] : vector<16x16xf32> to vector<16xf32>
    %159 = vector.shape_cast %158 : vector<16xf32> to vector<16x1xf32>
    %160 = vector.broadcast %159 : vector<16x1xf32> to vector<16x16xf32>
    %161 = arith.subf %157, %160 : vector<16x16xf32>
    %162 = math.exp %161 : vector<16x16xf32>
    %cst_109 = arith.constant dense<0.000000e+00> : vector<16xf32>
    %163 = vector.multi_reduction <add>, %162, %cst_109 [1] : vector<16x16xf32> to vector<16xf32>
    %164 = vector.shape_cast %163 : vector<16xf32> to vector<16x1xf32>
    %165 = tpu.reciprocal %164 {approx = true} : vector<16x1xf32> -> vector<16x1xf32>
    %166 = vector.broadcast %165 : vector<16x1xf32> to vector<16x16xf32>
    %167 = arith.mulf %162, %166 : vector<16x16xf32>
    %168 = arith.truncf %167 : vector<16x16xf32> to vector<16x16xbf16>
    %cst_110 = arith.constant dense<0.000000e+00> : vector<16x16xf32>
    %169 = tpu.matmul %168, %150, %cst_110 {dimension_numbers = #tpu.dot_dimension_numbers<[1], [0], [0], [1], [0, 0, 1, 1], [], []>} : vector<16x16xbf16>, vector<16x16xbf16>, vector<16x16xf32> -> vector<16x16xf32>
    %170 = arith.truncf %169 : vector<16x16xf32> to vector<16x16xbf16>
    %c0_111 = arith.constant 0 : index
    %c0_112 = arith.constant 0 : index
    %c80_113 = arith.constant 80 : index
    %171 = vector.load %arg6[%c0_111, %c0_112, %c80_113] : memref<1x16x128xbf16, #tpu.memory_space<vmem>>, vector<1x16x16xbf16>
    %172 = vector.shape_cast %171 : vector<1x16x16xbf16> to vector<16x16xbf16>
    %173 = vector.shape_cast %170 : vector<16x16xbf16> to vector<1x16x16xbf16>
    tpu.vector_store %arg6[%c0_111, %c0_112, %c80_113], %173 {strides = array<i32>} : memref<1x16x128xbf16, #tpu.memory_space<vmem>>, vector<1x16x16xbf16>,
    %c0_114 = arith.constant 0 : index
    %c0_115 = arith.constant 0 : index
    %c96 = arith.constant 96 : index
    %174 = vector.load %arg2[%c0_114, %c0_115, %c96] : memref<1x16x128xbf16, #tpu.memory_space<vmem>>, vector<1x16x16xbf16>
    %175 = vector.shape_cast %174 : vector<1x16x16xbf16> to vector<16x16xbf16>
    %c0_116 = arith.constant 0 : index
    %c0_117 = arith.constant 0 : index
    %c96_118 = arith.constant 96 : index
    %176 = vector.load %arg3[%c0_116, %c0_117, %c96_118] : memref<1x16x128xbf16, #tpu.memory_space<vmem>>, vector<1x16x16xbf16>
    %177 = vector.shape_cast %176 : vector<1x16x16xbf16> to vector<16x16xbf16>
    %c0_119 = arith.constant 0 : index
    %c0_120 = arith.constant 0 : index
    %c96_121 = arith.constant 96 : index
    %178 = vector.load %arg4[%c0_119, %c0_120, %c96_121] : memref<1x16x128xbf16, #tpu.memory_space<vmem>>, vector<1x16x16xbf16>
    %179 = vector.shape_cast %178 : vector<1x16x16xbf16> to vector<16x16xbf16>
    %cst_122 = arith.constant dense<0.000000e+00> : vector<16x16xf32>
    %180 = tpu.matmul %175, %177, %cst_122 {dimension_numbers = #tpu.dot_dimension_numbers<[1], [1], [0], [0], [0, 0, 1, 0], [], []>} : vector<16x16xbf16>, vector<16x16xbf16>, vector<16x16xf32> -> vector<16x16xf32>
    %cst_123 = arith.constant 2.500000e-01 : f32
    %181 = vector.broadcast %cst_123 : f32 to vector<16x16xf32>
    %182 = arith.mulf %180, %181 : vector<16x16xf32>
    %c0_124 = arith.constant 0 : index
    %c6 = arith.constant 6 : index
    %c0_125 = arith.constant 0 : index
    %c0_126 = arith.constant 0 : index
    %183 = vector.load %arg5[%c0_124, %c6, %c0_125, %c0_126] : memref<1x8x16x16xbf16, #tpu.memory_space<vmem>>, vector<1x1x16x16xbf16>
    %184 = vector.shape_cast %183 : vector<1x1x16x16xbf16> to vector<16x16xbf16>
    %185 = arith.extf %184 : vector<16x16xbf16> to vector<16x16xf32>
    %186 = arith.addf %182, %185 : vector<16x16xf32>
    %cst_127 = arith.constant dense<0xFF800000> : vector<16xf32>
    %187 = vector.multi_reduction <maximumf>, %186, %cst_127 [1] : vector<16x16xf32> to vector<16xf32>
    %188 = vector.shape_cast %187 : vector<16xf32> to vector<16x1xf32>
    %189 = vector.broadcast %188 : vector<16x1xf32> to vector<16x16xf32>
    %190 = arith.subf %186, %189 : vector<16x16xf32>
    %191 = math.exp %190 : vector<16x16xf32>
    %cst_128 = arith.constant dense<0.000000e+00> : vector<16xf32>
    %192 = vector.multi_reduction <add>, %191, %cst_128 [1] : vector<16x16xf32> to vector<16xf32>
    %193 = vector.shape_cast %192 : vector<16xf32> to vector<16x1xf32>
    %194 = tpu.reciprocal %193 {approx = true} : vector<16x1xf32> -> vector<16x1xf32>
    %195 = vector.broadcast %194 : vector<16x1xf32> to vector<16x16xf32>
    %196 = arith.mulf %191, %195 : vector<16x16xf32>
    %197 = arith.truncf %196 : vector<16x16xf32> to vector<16x16xbf16>
    %cst_129 = arith.constant dense<0.000000e+00> : vector<16x16xf32>
    %198 = tpu.matmul %197, %179, %cst_129 {dimension_numbers = #tpu.dot_dimension_numbers<[1], [0], [0], [1], [0, 0, 1, 1], [], []>} : vector<16x16xbf16>, vector<16x16xbf16>, vector<16x16xf32> -> vector<16x16xf32>
    %199 = arith.truncf %198 : vector<16x16xf32> to vector<16x16xbf16>
    %c0_130 = arith.constant 0 : index
    %c0_131 = arith.constant 0 : index
    %c96_132 = arith.constant 96 : index
    %200 = vector.load %arg6[%c0_130, %c0_131, %c96_132] : memref<1x16x128xbf16, #tpu.memory_space<vmem>>, vector<1x16x16xbf16>
    %201 = vector.shape_cast %200 : vector<1x16x16xbf16> to vector<16x16xbf16>
    %202 = vector.shape_cast %199 : vector<16x16xbf16> to vector<1x16x16xbf16>
    tpu.vector_store %arg6[%c0_130, %c0_131, %c96_132], %202 {strides = array<i32>} : memref<1x16x128xbf16, #tpu.memory_space<vmem>>, vector<1x16x16xbf16>,
    %c0_133 = arith.constant 0 : index
    %c0_134 = arith.constant 0 : index
    %c112 = arith.constant 112 : index
    %203 = vector.load %arg2[%c0_133, %c0_134, %c112] : memref<1x16x128xbf16, #tpu.memory_space<vmem>>, vector<1x16x16xbf16>
    %204 = vector.shape_cast %203 : vector<1x16x16xbf16> to vector<16x16xbf16>
    %c0_135 = arith.constant 0 : index
    %c0_136 = arith.constant 0 : index
    %c112_137 = arith.constant 112 : index
    %205 = vector.load %arg3[%c0_135, %c0_136, %c112_137] : memref<1x16x128xbf16, #tpu.memory_space<vmem>>, vector<1x16x16xbf16>
    %206 = vector.shape_cast %205 : vector<1x16x16xbf16> to vector<16x16xbf16>
    %c0_138 = arith.constant 0 : index
    %c0_139 = arith.constant 0 : index
    %c112_140 = arith.constant 112 : index
    %207 = vector.load %arg4[%c0_138, %c0_139, %c112_140] : memref<1x16x128xbf16, #tpu.memory_space<vmem>>, vector<1x16x16xbf16>
    %208 = vector.shape_cast %207 : vector<1x16x16xbf16> to vector<16x16xbf16>
    %cst_141 = arith.constant dense<0.000000e+00> : vector<16x16xf32>
    %209 = tpu.matmul %204, %206, %cst_141 {dimension_numbers = #tpu.dot_dimension_numbers<[1], [1], [0], [0], [0, 0, 1, 0], [], []>} : vector<16x16xbf16>, vector<16x16xbf16>, vector<16x16xf32> -> vector<16x16xf32>
    %cst_142 = arith.constant 2.500000e-01 : f32
    %210 = vector.broadcast %cst_142 : f32 to vector<16x16xf32>
    %211 = arith.mulf %209, %210 : vector<16x16xf32>
    %c0_143 = arith.constant 0 : index
    %c7 = arith.constant 7 : index
    %c0_144 = arith.constant 0 : index
    %c0_145 = arith.constant 0 : index
    %212 = vector.load %arg5[%c0_143, %c7, %c0_144, %c0_145] : memref<1x8x16x16xbf16, #tpu.memory_space<vmem>>, vector<1x1x16x16xbf16>
    %213 = vector.shape_cast %212 : vector<1x1x16x16xbf16> to vector<16x16xbf16>
    %214 = arith.extf %213 : vector<16x16xbf16> to vector<16x16xf32>
    %215 = arith.addf %211, %214 : vector<16x16xf32>
    %cst_146 = arith.constant dense<0xFF800000> : vector<16xf32>
    %216 = vector.multi_reduction <maximumf>, %215, %cst_146 [1] : vector<16x16xf32> to vector<16xf32>
    %217 = vector.shape_cast %216 : vector<16xf32> to vector<16x1xf32>
    %218 = vector.broadcast %217 : vector<16x1xf32> to vector<16x16xf32>
    %219 = arith.subf %215, %218 : vector<16x16xf32>
    %220 = math.exp %219 : vector<16x16xf32>
    %cst_147 = arith.constant dense<0.000000e+00> : vector<16xf32>
    %221 = vector.multi_reduction <add>, %220, %cst_147 [1] : vector<16x16xf32> to vector<16xf32>
    %222 = vector.shape_cast %221 : vector<16xf32> to vector<16x1xf32>
    %223 = tpu.reciprocal %222 {approx = true} : vector<16x1xf32> -> vector<16x1xf32>
    %224 = vector.broadcast %223 : vector<16x1xf32> to vector<16x16xf32>
    %225 = arith.mulf %220, %224 : vector<16x16xf32>
    %226 = arith.truncf %225 : vector<16x16xf32> to vector<16x16xbf16>
    %cst_148 = arith.constant dense<0.000000e+00> : vector<16x16xf32>
    %227 = tpu.matmul %226, %208, %cst_148 {dimension_numbers = #tpu.dot_dimension_numbers<[1], [0], [0], [1], [0, 0, 1, 1], [], []>} : vector<16x16xbf16>, vector<16x16xbf16>, vector<16x16xf32> -> vector<16x16xf32>
    %228 = arith.truncf %227 : vector<16x16xf32> to vector<16x16xbf16>
    %c0_149 = arith.constant 0 : index
    %c0_150 = arith.constant 0 : index
    %c112_151 = arith.constant 112 : index
    %229 = vector.load %arg6[%c0_149, %c0_150, %c112_151] : memref<1x16x128xbf16, #tpu.memory_space<vmem>>, vector<1x16x16xbf16>
    %230 = vector.shape_cast %229 : vector<1x16x16xbf16> to vector<16x16xbf16>
    %231 = vector.shape_cast %228 : vector<16x16xbf16> to vector<1x16x16xbf16>
    tpu.vector_store %arg6[%c0_149, %c0_150, %c112_151], %231 {strides = array<i32>} : memref<1x16x128xbf16, #tpu.memory_space<vmem>>, vector<1x16x16xbf16>,
    return
  }
  func.func @transform_0(%arg0: i32, %arg1: i32) -> (i32, i32, i32) {
    %c0_i32 = arith.constant 0 : i32
    %c0_i32_0 = arith.constant 0 : i32
    return %arg0, %arg1, %c0_i32 : i32, i32, i32
  }
  func.func @transform_1(%arg0: i32, %arg1: i32) -> (i32, i32, i32) {
    %c0_i32 = arith.constant 0 : i32
    %c1_i32 = arith.constant 1 : i32
    %c0_i32_0 = arith.constant 0 : i32
    return %arg0, %c0_i32, %c1_i32 : i32, i32, i32
  }
  func.func @transform_2(%arg0: i32, %arg1: i32) -> (i32, i32, i32) {
    %c0_i32 = arith.constant 0 : i32
    %c2_i32 = arith.constant 2 : i32
    %c0_i32_0 = arith.constant 0 : i32
    return %arg0, %c0_i32, %c2_i32 : i32, i32, i32
  }
  func.func @transform_3(%arg0: i32, %arg1: i32) -> (i32, i32, i32, i32) {
    %c0_i32 = arith.constant 0 : i32
    %c0_i32_0 = arith.constant 0 : i32
    %c0_i32_1 = arith.constant 0 : i32
    return %arg0, %c0_i32, %arg1, %c0_i32_0 : i32, i32, i32, i32
  }
  func.func @transform_4(%arg0: i32, %arg1: i32) -> (i32, i32, i32) {
    %c0_i32 = arith.constant 0 : i32
    %c0_i32_0 = arith.constant 0 : i32
    return %arg0, %arg1, %c0_i32 : i32, i32, i32
  }
}

module attributes {stable_mosaic.version = 11 : i64} {
  func.func @_mm_kernel(%arg0: i32, %arg1: memref<32x128xbf16, #tpu.memory_space<vmem>>, %arg2: memref<128x3072xbf16, #tpu.memory_space<vmem>>, %arg3: memref<1x3072xf32, #tpu.memory_space<vmem>>, %arg4: memref<32x3072xbf16, #tpu.memory_space<vmem>>) attributes {dimension_semantics = [#tpu.dimension_semantics<parallel>], iteration_bounds = array<i64: 1>, scalar_prefetch = 0 : i64, scratch_operands = 0 : i64, tpu.core_type = #tpu.core_type<tc>, window_params = [{transform_indices = @transform_0, window_bounds = array<i64: 32, 128>}, {pipeline_mode = #tpu.pipeline_mode<synchronous>, transform_indices = @transform_1, window_bounds = array<i64: 128, 3072>}, {pipeline_mode = #tpu.pipeline_mode<synchronous>, transform_indices = @transform_2, window_bounds = array<i64: 1, 3072>}, {transform_indices = @transform_3, window_bounds = array<i64: 32, 3072>}]} {
    %c0 = arith.constant 0 : index
    %c0_0 = arith.constant 0 : index
    %0 = vector.load %arg1[%c0, %c0_0] : memref<32x128xbf16, #tpu.memory_space<vmem>>, vector<32x128xbf16>
    %c0_1 = arith.constant 0 : index
    %c0_2 = arith.constant 0 : index
    %1 = vector.load %arg2[%c0_1, %c0_2] : memref<128x3072xbf16, #tpu.memory_space<vmem>>, vector<128x3072xbf16>
    %cst = arith.constant dense<0.000000e+00> : vector<32x3072xf32>
    %2 = tpu.matmul %0, %1, %cst {dimension_numbers = #tpu.dot_dimension_numbers<[1], [0], [0], [1], [0, 0, 1, 1], [], []>} : vector<32x128xbf16>, vector<128x3072xbf16>, vector<32x3072xf32> -> vector<32x3072xf32>
    %c0_3 = arith.constant 0 : index
    %c0_4 = arith.constant 0 : index
    %3 = vector.load %arg3[%c0_3, %c0_4] : memref<1x3072xf32, #tpu.memory_space<vmem>>, vector<1x3072xf32>
    %4 = vector.broadcast %3 : vector<1x3072xf32> to vector<32x3072xf32>
    %5 = arith.addf %2, %4 : vector<32x3072xf32>
    %cst_5 = arith.constant 0.000000e+00 : f32
    %6 = vector.broadcast %cst_5 : f32 to vector<32x3072xf32>
    %7 = arith.maximumf %5, %6 : vector<32x3072xf32>
    %8 = arith.truncf %7 : vector<32x3072xf32> to vector<32x3072xbf16>
    %c0_6 = arith.constant 0 : index
    %c0_7 = arith.constant 0 : index
    %9 = vector.load %arg4[%c0_6, %c0_7] : memref<32x3072xbf16, #tpu.memory_space<vmem>>, vector<32x3072xbf16>
    tpu.vector_store %arg4[%c0_6, %c0_7], %8 {strides = array<i32>} : memref<32x3072xbf16, #tpu.memory_space<vmem>>, vector<32x3072xbf16>,
    return
  }
  func.func @transform_0(%arg0: i32) -> (i32, i32) {
    %c0_i32 = arith.constant 0 : i32
    %c0_i32_0 = arith.constant 0 : i32
    return %arg0, %c0_i32 : i32, i32
  }
  func.func @transform_1(%arg0: i32) -> (i32, i32) {
    %c0_i32 = arith.constant 0 : i32
    %c0_i32_0 = arith.constant 0 : i32
    %c0_i32_1 = arith.constant 0 : i32
    return %c0_i32, %c0_i32_0 : i32, i32
  }
  func.func @transform_2(%arg0: i32) -> (i32, i32) {
    %c0_i32 = arith.constant 0 : i32
    %c0_i32_0 = arith.constant 0 : i32
    %c0_i32_1 = arith.constant 0 : i32
    return %c0_i32, %c0_i32_0 : i32, i32
  }
  func.func @transform_3(%arg0: i32) -> (i32, i32) {
    %c0_i32 = arith.constant 0 : i32
    %c0_i32_0 = arith.constant 0 : i32
    return %arg0, %c0_i32 : i32, i32
  }
}

module attributes {stable_mosaic.version = 11 : i64} {
  func.func @_mm_kernel(%arg0: i32, %arg1: i32, %arg2: memref<32x512xbf16, #tpu.memory_space<vmem>>, %arg3: memref<512x128xbf16, #tpu.memory_space<vmem>>, %arg4: memref<1x128xf32, #tpu.memory_space<vmem>>, %arg5: memref<32x128xbf16, #tpu.memory_space<vmem>>, %arg6: memref<1x128xf32, #tpu.memory_space<vmem>>, %arg7: memref<1x128xf32, #tpu.memory_space<vmem>>, %arg8: memref<32x128xbf16, #tpu.memory_space<vmem>>, %arg9: memref<32x128xf32, #tpu.memory_space<vmem>>) attributes {dimension_semantics = [#tpu.dimension_semantics<parallel>, #tpu.dimension_semantics<arbitrary>], iteration_bounds = array<i64: 1, 6>, scalar_prefetch = 0 : i64, scratch_operands = 1 : i64, tpu.core_type = #tpu.core_type<tc>, window_params = [{transform_indices = @transform_0, window_bounds = array<i64: 32, 512>}, {transform_indices = @transform_1, window_bounds = array<i64: 512, 128>}, {pipeline_mode = #tpu.pipeline_mode<synchronous>, transform_indices = @transform_2, window_bounds = array<i64: 1, 128>}, {transform_indices = @transform_3, window_bounds = array<i64: 32, 128>}, {pipeline_mode = #tpu.pipeline_mode<synchronous>, transform_indices = @transform_4, window_bounds = array<i64: 1, 128>}, {pipeline_mode = #tpu.pipeline_mode<synchronous>, transform_indices = @transform_5, window_bounds = array<i64: 1, 128>}, {transform_indices = @transform_6, window_bounds = array<i64: 32, 128>}]} {
    %c0_i32 = arith.constant 0 : i32
    %0 = arith.cmpi eq, %arg1, %c0_i32 : i32
    %1 = arith.extui %0 : i1 to i32
    %c0_i32_0 = arith.constant 0 : i32
    %2 = arith.cmpi ne, %1, %c0_i32_0 : i32
    scf.if %2 {
      %cst_9 = arith.constant 0.000000e+00 : f32
      %12 = vector.broadcast %cst_9 : f32 to vector<32x128xf32>
      %c0_10 = arith.constant 0 : index
      %c0_11 = arith.constant 0 : index
      %13 = vector.load %arg9[%c0_10, %c0_11] : memref<32x128xf32, #tpu.memory_space<vmem>>, vector<32x128xf32>
      tpu.vector_store %arg9[%c0_10, %c0_11], %12 {strides = array<i32>} : memref<32x128xf32, #tpu.memory_space<vmem>>, vector<32x128xf32>,
    } else {
    }
    %c0 = arith.constant 0 : index
    %c0_1 = arith.constant 0 : index
    %3 = vector.load %arg9[%c0, %c0_1] : memref<32x128xf32, #tpu.memory_space<vmem>>, vector<32x128xf32>
    %c0_2 = arith.constant 0 : index
    %c0_3 = arith.constant 0 : index
    %4 = vector.load %arg2[%c0_2, %c0_3] : memref<32x512xbf16, #tpu.memory_space<vmem>>, vector<32x512xbf16>
    %c0_4 = arith.constant 0 : index
    %c0_5 = arith.constant 0 : index
    %5 = vector.load %arg3[%c0_4, %c0_5] : memref<512x128xbf16, #tpu.memory_space<vmem>>, vector<512x128xbf16>
    %cst = arith.constant dense<0.000000e+00> : vector<32x128xf32>
    %6 = tpu.matmul %4, %5, %cst {dimension_numbers = #tpu.dot_dimension_numbers<[1], [0], [0], [1], [0, 0, 1, 1], [], []>} : vector<32x512xbf16>, vector<512x128xbf16>, vector<32x128xf32> -> vector<32x128xf32>
    %7 = arith.addf %3, %6 : vector<32x128xf32>
    %c0_6 = arith.constant 0 : index
    %c0_7 = arith.constant 0 : index
    %8 = vector.load %arg9[%c0_6, %c0_7] : memref<32x128xf32, #tpu.memory_space<vmem>>, vector<32x128xf32>
    tpu.vector_store %arg9[%c0_6, %c0_7], %7 {strides = array<i32>} : memref<32x128xf32, #tpu.memory_space<vmem>>, vector<32x128xf32>,
    %c5_i32 = arith.constant 5 : i32
    %9 = arith.cmpi eq, %arg1, %c5_i32 : i32
    %10 = arith.extui %9 : i1 to i32
    %c0_i32_8 = arith.constant 0 : i32
    %11 = arith.cmpi ne, %10, %c0_i32_8 : i32
    scf.if %11 {
      %c0_9 = arith.constant 0 : index
      %c0_10 = arith.constant 0 : index
      %12 = vector.load %arg9[%c0_9, %c0_10] : memref<32x128xf32, #tpu.memory_space<vmem>>, vector<32x128xf32>
      %c0_11 = arith.constant 0 : index
      %c0_12 = arith.constant 0 : index
      %13 = vector.load %arg4[%c0_11, %c0_12] : memref<1x128xf32, #tpu.memory_space<vmem>>, vector<1x128xf32>
      %14 = vector.broadcast %13 : vector<1x128xf32> to vector<32x128xf32>
      %15 = arith.addf %12, %14 : vector<32x128xf32>
      %c0_13 = arith.constant 0 : index
      %c0_14 = arith.constant 0 : index
      %16 = vector.load %arg5[%c0_13, %c0_14] : memref<32x128xbf16, #tpu.memory_space<vmem>>, vector<32x128xbf16>
      %17 = arith.extf %16 : vector<32x128xbf16> to vector<32x128xf32>
      %18 = arith.addf %15, %17 : vector<32x128xf32>
      %cst_15 = arith.constant dense<0.000000e+00> : vector<32xf32>
      %19 = vector.multi_reduction <add>, %18, %cst_15 [1] : vector<32x128xf32> to vector<32xf32>
      %20 = vector.shape_cast %19 : vector<32xf32> to vector<32x1xf32>
      %cst_16 = arith.constant 1.280000e+02 : f32
      %21 = vector.broadcast %cst_16 : f32 to vector<32x1xf32>
      %22 = arith.divf %20, %21 : vector<32x1xf32>
      %23 = vector.broadcast %22 : vector<32x1xf32> to vector<32x128xf32>
      %24 = arith.subf %18, %23 : vector<32x128xf32>
      %25 = arith.mulf %24, %24 : vector<32x128xf32>
      %cst_17 = arith.constant dense<0.000000e+00> : vector<32xf32>
      %26 = vector.multi_reduction <add>, %25, %cst_17 [1] : vector<32x128xf32> to vector<32xf32>
      %27 = vector.shape_cast %26 : vector<32xf32> to vector<32x1xf32>
      %cst_18 = arith.constant 1.280000e+02 : f32
      %28 = vector.broadcast %cst_18 : f32 to vector<32x1xf32>
      %29 = arith.divf %27, %28 : vector<32x1xf32>
      %30 = vector.broadcast %22 : vector<32x1xf32> to vector<32x128xf32>
      %31 = arith.subf %18, %30 : vector<32x128xf32>
      %cst_19 = arith.constant 9.99999974E-6 : f32
      %32 = vector.broadcast %cst_19 : f32 to vector<32x1xf32>
      %33 = arith.addf %29, %32 : vector<32x1xf32>
      %34 = math.rsqrt %33 : vector<32x1xf32>
      %35 = vector.broadcast %34 : vector<32x1xf32> to vector<32x128xf32>
      %36 = arith.mulf %31, %35 : vector<32x128xf32>
      %c0_20 = arith.constant 0 : index
      %c0_21 = arith.constant 0 : index
      %37 = vector.load %arg6[%c0_20, %c0_21] : memref<1x128xf32, #tpu.memory_space<vmem>>, vector<1x128xf32>
      %38 = vector.broadcast %37 : vector<1x128xf32> to vector<32x128xf32>
      %39 = arith.mulf %36, %38 : vector<32x128xf32>
      %c0_22 = arith.constant 0 : index
      %c0_23 = arith.constant 0 : index
      %40 = vector.load %arg7[%c0_22, %c0_23] : memref<1x128xf32, #tpu.memory_space<vmem>>, vector<1x128xf32>
      %41 = vector.broadcast %40 : vector<1x128xf32> to vector<32x128xf32>
      %42 = arith.addf %39, %41 : vector<32x128xf32>
      %43 = arith.truncf %42 : vector<32x128xf32> to vector<32x128xbf16>
      %c0_24 = arith.constant 0 : index
      %c0_25 = arith.constant 0 : index
      %44 = vector.load %arg8[%c0_24, %c0_25] : memref<32x128xbf16, #tpu.memory_space<vmem>>, vector<32x128xbf16>
      tpu.vector_store %arg8[%c0_24, %c0_25], %43 {strides = array<i32>} : memref<32x128xbf16, #tpu.memory_space<vmem>>, vector<32x128xbf16>,
    } else {
    }
    return
  }
  func.func @transform_0(%arg0: i32, %arg1: i32) -> (i32, i32) {
    %c0_i32 = arith.constant 0 : i32
    return %arg0, %arg1 : i32, i32
  }
  func.func @transform_1(%arg0: i32, %arg1: i32) -> (i32, i32) {
    %c0_i32 = arith.constant 0 : i32
    %c0_i32_0 = arith.constant 0 : i32
    return %arg1, %c0_i32 : i32, i32
  }
  func.func @transform_2(%arg0: i32, %arg1: i32) -> (i32, i32) {
    %c0_i32 = arith.constant 0 : i32
    %c0_i32_0 = arith.constant 0 : i32
    %c0_i32_1 = arith.constant 0 : i32
    return %c0_i32, %c0_i32_0 : i32, i32
  }
  func.func @transform_3(%arg0: i32, %arg1: i32) -> (i32, i32) {
    %c0_i32 = arith.constant 0 : i32
    %c0_i32_0 = arith.constant 0 : i32
    return %arg0, %c0_i32 : i32, i32
  }
  func.func @transform_4(%arg0: i32, %arg1: i32) -> (i32, i32) {
    %c0_i32 = arith.constant 0 : i32
    %c0_i32_0 = arith.constant 0 : i32
    %c0_i32_1 = arith.constant 0 : i32
    return %c0_i32, %c0_i32_0 : i32, i32
  }
  func.func @transform_5(%arg0: i32, %arg1: i32) -> (i32, i32) {
    %c0_i32 = arith.constant 0 : i32
    %c0_i32_0 = arith.constant 0 : i32
    %c0_i32_1 = arith.constant 0 : i32
    return %c0_i32, %c0_i32_0 : i32, i32
  }
  func.func @transform_6(%arg0: i32, %arg1: i32) -> (i32, i32) {
    %c0_i32 = arith.constant 0 : i32
    %c0_i32_0 = arith.constant 0 : i32
    return %arg0, %c0_i32 : i32, i32
  }
}

module attributes {stable_mosaic.version = 11 : i64} {
  func.func @_mm_kernel(%arg0: i32, %arg1: memref<32x128xbf16, #tpu.memory_space<vmem>>, %arg2: memref<128x128xbf16, #tpu.memory_space<vmem>>, %arg3: memref<1x128xf32, #tpu.memory_space<vmem>>, %arg4: memref<32x128xf32, #tpu.memory_space<vmem>>) attributes {dimension_semantics = [#tpu.dimension_semantics<parallel>], iteration_bounds = array<i64: 1>, scalar_prefetch = 0 : i64, scratch_operands = 0 : i64, tpu.core_type = #tpu.core_type<tc>, window_params = [{transform_indices = @transform_0, window_bounds = array<i64: 32, 128>}, {pipeline_mode = #tpu.pipeline_mode<synchronous>, transform_indices = @transform_1, window_bounds = array<i64: 128, 128>}, {pipeline_mode = #tpu.pipeline_mode<synchronous>, transform_indices = @transform_2, window_bounds = array<i64: 1, 128>}, {transform_indices = @transform_3, window_bounds = array<i64: 32, 128>}]} {
    %c0 = arith.constant 0 : index
    %c0_0 = arith.constant 0 : index
    %0 = vector.load %arg1[%c0, %c0_0] : memref<32x128xbf16, #tpu.memory_space<vmem>>, vector<32x128xbf16>
    %c0_1 = arith.constant 0 : index
    %c0_2 = arith.constant 0 : index
    %1 = vector.load %arg2[%c0_1, %c0_2] : memref<128x128xbf16, #tpu.memory_space<vmem>>, vector<128x128xbf16>
    %cst = arith.constant dense<0.000000e+00> : vector<32x128xf32>
    %2 = tpu.matmul %0, %1, %cst {dimension_numbers = #tpu.dot_dimension_numbers<[1], [0], [0], [1], [0, 0, 1, 1], [], []>} : vector<32x128xbf16>, vector<128x128xbf16>, vector<32x128xf32> -> vector<32x128xf32>
    %c0_3 = arith.constant 0 : index
    %c0_4 = arith.constant 0 : index
    %3 = vector.load %arg3[%c0_3, %c0_4] : memref<1x128xf32, #tpu.memory_space<vmem>>, vector<1x128xf32>
    %4 = vector.broadcast %3 : vector<1x128xf32> to vector<32x128xf32>
    %5 = arith.addf %2, %4 : vector<32x128xf32>
    %c0_5 = arith.constant 0 : index
    %c0_6 = arith.constant 0 : index
    %6 = vector.load %arg4[%c0_5, %c0_6] : memref<32x128xf32, #tpu.memory_space<vmem>>, vector<32x128xf32>
    tpu.vector_store %arg4[%c0_5, %c0_6], %5 {strides = array<i32>} : memref<32x128xf32, #tpu.memory_space<vmem>>, vector<32x128xf32>,
    return
  }
  func.func @transform_0(%arg0: i32) -> (i32, i32) {
    %c0_i32 = arith.constant 0 : i32
    %c0_i32_0 = arith.constant 0 : i32
    return %arg0, %c0_i32 : i32, i32
  }
  func.func @transform_1(%arg0: i32) -> (i32, i32) {
    %c0_i32 = arith.constant 0 : i32
    %c0_i32_0 = arith.constant 0 : i32
    %c0_i32_1 = arith.constant 0 : i32
    return %c0_i32, %c0_i32_0 : i32, i32
  }
  func.func @transform_2(%arg0: i32) -> (i32, i32) {
    %c0_i32 = arith.constant 0 : i32
    %c0_i32_0 = arith.constant 0 : i32
    %c0_i32_1 = arith.constant 0 : i32
    return %c0_i32, %c0_i32_0 : i32, i32
  }
  func.func @transform_3(%arg0: i32) -> (i32, i32) {
    %c0_i32 = arith.constant 0 : i32
    %c0_i32_0 = arith.constant 0 : i32
    return %arg0, %c0_i32 : i32, i32
  }
}

</mosaic_0001>

<bundles_post_ra>
// kernel: transformer_forward.20
= control target key start
LH: loop header
LB: loop body
LE: loop exit
PB: predicated region body
PF: predicated region fallthrough
CT: control target
= control target key end

     0   :  { %9 = vsyncpa [#allocation3], 0  ;;  %s787_s0 = inlined_call_operand.vmem [shape: bf16[2,18,8], index: 0, kind: input, shape index: {}]   ;;  %s788_s1 = inlined_call_operand.vmem [shape: bf16[3,8,128], index: 1, kind: input, shape index: {}]   ;;  %s789_s2 = inlined_call_operand.hbm [shape: f32[1,128], index: 2, kind: input, shape index: {}]   ;;  %s790_s3 = inlined_call_operand.hbm [shape: f32[1,128], index: 3, kind: input, shape index: {}]   ;;  %s791_s4 = inlined_call_operand.vmem [shape: bf16[2,16,128], index: 4, kind: output, shape index: {}]  }
   0x1   :  { %10 = vsyncpa [#allocation5], 0  ;;  %s703_s15 = smov 0  }
   0x2 LB: > { %s709_s16 = sadd.s32 4294967295, %s672_s15   ;;  %p515_p0 = scmp.ge.s32.totalorder %s672_s15, 1  ;;  %s672_s15 = sphi %s703_s15, %s16_s15  }
   0x3   : > { %p136_p1 = scmp.lt.s32.totalorder %s672_s15, 3  ;;  %p792_p2 = scmp.eq.s32.totalorder %s709_s16, 0 }
   0x4   : > { %s674_s18 = smov [#allocation2]   ;;  %s675_s20 = smov [#allocation4]  }
   0x5   : > { %p714_p3 = pnand %p515_p0, %p136_p1  ;;  %s152_s19 = sshll.u32 %s674_s18, 4  ;;  %s153_s19 = int_to_ptr.vmem [resolvable:$true] %s152_s19 }
   0x6   : > { %s163_s21 = sshll.u32 %s675_s20, 4  ;;  %s617_s23 = scalar_lea.vmem %s153_s19, 16  ;;  %s164_s21 = int_to_ptr.vmem [resolvable:$true] %s163_s21 }
   0x7   : > { %p580_p4 = pneg %p714_p3  ;;  %p618_p7 = scmp.ne.s32.totalorder %s153_s19, %s617_s23 }
   0x8   : > { %s624_s24 = scalar_lea.vmem %s153_s19, 32  ;;  %p625_p10 = scmp.lt.s32.totalorder %s153_s19, %s153_s19 }
   0x9   : > { %p722_p5 = pnand %p792_p2, %p580_p4  ;;  %p626_p11 = scmp.lt.s32.totalorder %s624_s24, %s617_s23 }
   0xb   : > { %p608_p6 = pneg %p722_p5  ;;  %p627_p12 = por %p626_p11, %p625_p10 }
   0xd   : > { %p620_p8 = pnand %p618_p7, %p608_p6 }
   0xf   : > { %p621_p9 = pneg %p620_p8 }
  0x11   : > { %p628_p13 = pnand %p627_p12, %p621_p9 }
  0x13   : > { %631 = shalt.err (!%p628_p13)
}
  0x14   : > { %583 = dma.hbm_to_vmem [thread:$0]  (!%p722_p5), %s789_s2, 16, %s153_s19, [#allocation3]  }
  0x15   : > { %s643_s27 = scalar_lea.vmem %s164_s21, 16  ;;  %s650_s28 = scalar_lea.vmem %s164_s21, 32 }
  0x16   : > { %p644_p0 = scmp.ne.s32.totalorder %s164_s21, %s643_s27  ;;  %p651_p7 = scmp.lt.s32.totalorder %s164_s21, %s164_s21 }
  0x17   : > { %p652_p8 = scmp.lt.s32.totalorder %s650_s28, %s643_s27 }
  0x18   : > { %p646_p1 = pnand %p644_p0, %p608_p6 }
  0x19   : > { %p653_p2 = por %p652_p8, %p651_p7 }
  0x1a   : > { %p647_p4 = pneg %p646_p1 }
  0x1c   : > { %p654_p10 = pnand %p653_p2, %p647_p4 }
  0x1e   : > { %657 = shalt.err (!%p654_p10)
}
  0x1f   : > { %586 = dma.hbm_to_vmem [thread:$0]  (!%p722_p5), %s790_s3, 16, %s164_s21, [#allocation5]  }
  0x20   : > { %184 = sbr.rel (%p714_p3) target bundleno = 274 (0x112), region = 36  ;;  %p795_p9 = scmp.eq.s32.totalorder (!%p714_p3), %s709_s16, 0 }
  0x25   : > { %663 = dma.done.wait (%p795_p9), [#allocation3], 16   ;;  %p796_p6 = pmov %p795_p9 }
  0x27   : > { %665 = vsyncadd (%p796_p6), [#allocation3], 4294967280  ;;  %p797_p11 = pmov %p796_p6 }
  0x28   : > { %p798_p2 = pmov %p796_p6 }
  0x29   : > { %667 = dma.done.wait (%p797_p11), [#allocation5], 16  }
  0x2a   : > { %669 = vsyncadd (%p798_p2), [#allocation5], 4294967280  ;;  %p214_p12 = scmp.lt.s32.totalorder %s709_s16, 1  ;;  %v676_v0 = vmov 0.0   ;;  %vm677_vm0 = vmmov 0   ;;  %vm256_vm1 = vcmask 1043456  }
  0x2b   : > { %553 = vmatprep.subr.bf16.mxu0 %v676_v0  ;;  %559 = vmatprep.subr.bf16.mxu1 %v676_v0  ;;  %v525_v1 = vld [vmem:[%s788_s1 + $0x4] sm:$0xf]  ;;  %v227_v2 = vld [vmem:[%s788_s1] sm:$0xf]  ;;  %vm252_vm2 = vcmask 64512   ;;  %vm353_vm4 = vcmask 1046528  }
  0x2c   : > { %555 = vmatprep.mubr.msk.bf16.mxu0 %vm677_vm0, %v676_v0  ;;  %561 = vmatprep.mubr.msk.bf16.mxu1 %vm677_vm0, %v676_v0  ;;  %s800_s16 = smov (!%p214_p12, %s709_s16), 1  ;;  %v258_v4 = vsel %vm256_vm1, %v525_v1, 0  ;;  %v304_v5 = vsel %vm256_vm1, %v227_v2, 0  ;;  %v530_v15 = vld [vmem:[%s788_s1 + $0x8] sm:$0xf] }
  0x2d   : > { %s571_s5 = smul.u32 12, %s800_s16  ;;  %554 = vmatpush3.bf16.msra.mxu0 %v258_v4  ;;  %560 = vmatpush3.bf16.msra.mxu1 %v304_v5  ;;  %vm239_vm3 = vsmask.f32 7424  ;;  %v361_v18 = vsel %vm256_vm1, %v530_v15, 0  ;;  %v533_v33 = vld [vmem:[#allocation2] ss:$0 sm:$0xff] }
  0x2e   : > { %565 = vmatprep.subr.bf16.mxu0 %v676_v0  ;;  %v534_v38 = vld [vmem:[#allocation4] ss:$0 sm:$0xff]  ;;  %s539_s17 = sshll.u32 %s800_s16, 3 }
  0x2f   : > { %s218_s8 = scalar_lea.vmem %s787_s0, %s571_s5  ;;  %s223_s20 = scalar_lea.vmem %s791_s4, %s539_s17 }
  0x30   : > { %v225_v3 = vld [vmem:[%s218_s8] sm:$0xf]  ;;  %v226_v6 = vld [vmem:[%s218_s8 + $0x4] sm:$0xf] }
  0x31   : > { %v526_v7 = vcombine.low %v225_v3, %v226_v6  ;;  %v604_v8 = vld [vmem:[%s218_s8 + $0x8] ss:$0 sps:$4 sm:$0x11]   ;;  %v347_v12 = vld [vmem:[%s218_s8] sm:$0xe] }
  0x32   : > { %v248_v11 = vshll.u32 %v604_v8, 16  ;;  %v531_v17 = vcombine.low %v347_v12, %v226_v6  ;;  %v355_v21 = vrot.slane %v604_v8, 1 }
  0x33   : > { %v241_v9 = vshrl.u32 %v526_v7, 16  ;;  %v243_v10 = vshll.u32 %v526_v7, 16  ;;  %562 = vmatmul.mubr.msk.bf16.vlgmr.msra.gmra.mxu1 %vm252_vm2, %v526_v7 }
  0x34   : > { %v250_v14 = vrot.slane %v248_v11, 1  ;;  %v354_v20 = vrot.slane %v531_v17, 1 }
  0x35   : > { %v245_v13 = vrot.slane %v243_v10, 1 }
  0x36   : > { %v356_v22 = vsel %vm353_vm4, %v354_v20, %v355_v21 }
  0x37   : > { %v246_v16 = vor.u32 %v245_v13, %v241_v9 }
  0x39   : > { %v251_v19 = vsel %vm239_vm3, %v246_v16, %v250_v14 }
  0x3a   : > { %556 = vmatmul.mubr.msk.bf16.vlgmr.msra.gmra.mxu0 %vm252_vm2, %v251_v19 }
  0x3b   : > { %566 = vmatpush3.bf16.msra.mxu0 %v361_v18  ;;  %567 = vmatprep.mubr.msk.bf16.mxu0 %vm677_vm0, %v676_v0 }
  0x42   : > { %568 = vmatmul.mubr.msk.bf16.vlgmr.msra.gmra.mxu0 %vm252_vm2, %v356_v22 }
  0xf3   : > { %v340_v23 = vpop.f32.mrf.mxu1 }
  0xf5   : > { %v563_v24 = vpop.f32.mrf.mxu1 }
  0xf7   : > { %v343_v25 = vpop.f32.mrf.mxu1 }
  0xf9   : > { %v564_v27 = vpop.f32.mrf.mxu1 }
  0xfa   : > { %v294_v26 = vpop.f32.mrf.mxu0 }
  0xfb   : > { %v341_v31 = vadd.f32 %v340_v23, %v294_v26 }
  0xfc   : > { %v557_v28 = vpop.f32.mrf.mxu0 }
  0xfe   : > { %v297_v29 = vpop.f32.mrf.mxu0 }
  0xff   : > { %v344_v36 = vadd.f32 %v343_v25, %v297_v29 }
 0x100   : > { %v558_v30 = vpop.f32.mrf.mxu0 }
 0x102   : > { %v397_v32 = vpop.f32.mrf.mxu0 }
 0x103   : > { %v404_v34 = vadd.f32 %v397_v32, %v341_v31 }
 0x104   : > { %v569_v35 = vpop.f32.mrf.mxu0 }
 0x105   : > { %v413_v37 = vmul.f32 %v533_v33, %v404_v34 }
 0x106   : > { %v400_v39 = vpop.f32.mrf.mxu0 }
 0x107   : > { %v405_v40 = vadd.f32 %v400_v39, %v344_v36  ;;  %v422_v42 = vadd.f32 %v534_v38, %v413_v37 }
 0x108   : > { %v570_v41 = vpop.f32.mrf.mxu0 }
 0x109   : > { %v414_v43 = vmul.f32 %v533_v33, %v405_v40  ;;  %v424_v45 = vmax.f32 %v422_v42, 0.0 }
 0x10b   : > { %v423_v44 = vadd.f32 %v534_v38, %v414_v43 }
 0x10d   : > { %v425_v46 = vmax.f32 %v423_v44, 0.0 }
 0x10f   : > { %v545_v47 = vpack.c.bf16 %v425_v46, %v424_v45 }
 0x111   : > { %546 = vst [vmem:[%s223_s20] sm:$0xff] %v545_v47  }
 0x112 PF: > { %s16_s15 = sadd.s32 1, %s672_s15  }
 0x113   : > { %p13_p3 = scmp.ge.s32.totalorder %s16_s15, 4  }
 0x115   :  { %15 = sbr.rel (!%p13_p3) target bundleno = 2 (0x2), region = 77 }
 0x11a   :  { %457 = vsyncpa [#allocation3], 1 }
 0x11b   :  { %459 = vsyncpa [#allocation3 + $0x1], 1 }
 0x11c   :  { %460 = vsyncpa [#allocation5], 1 }

// kernel: transformer_forward.19
= control target key start
LH: loop header
LB: loop body
LE: loop exit
PB: predicated region body
PF: predicated region fallthrough
CT: control target
= control target key end

     0   :  { %9 = vsyncpa [#allocation3], 0  ;;  %s296_s0 = inlined_call_operand.vmem [shape: bf16[32,8], index: 0, kind: input, shape index: {}]   ;;  %s297_s1 = inlined_call_operand.vmem [shape: bf16[8,128], index: 1, kind: input, shape index: {}]   ;;  %s298_s2 = inlined_call_operand.hbm [shape: f32[1,128], index: 2, kind: input, shape index: {}]   ;;  %s299_s3 = inlined_call_operand.hbm [shape: f32[1,128], index: 3, kind: input, shape index: {}]   ;;  %s300_s4 = inlined_call_operand.vmem [shape: bf16[32,128], index: 4, kind: output, shape index: {}]  }
   0x1   :  { %10 = vsyncpa [#allocation5], 0  ;;  %s248_s15 = smov [#allocation2]   ;;  %s249_s17 = smov [#allocation4]  }
   0x2   :  { %s21_s16 = sshll.u32 %s248_s15, 4  ;;  %s31_s18 = sshll.u32 %s249_s17, 4  ;;  %s22_s16 = int_to_ptr.vmem [resolvable:$true] %s21_s16  ;;  %s32_s18 = int_to_ptr.vmem [resolvable:$true] %s31_s18 }
   0x3   :  { %s212_s19 = scalar_lea.vmem %s22_s16, 16  ;;  %s216_s20 = scalar_lea.vmem %s22_s16, 32 }
   0x4   :  { %p213_p0 = scmp.ne.s32.totalorder %s22_s16, %s212_s19  ;;  %p217_p1 = scmp.lt.s32.totalorder %s22_s16, %s22_s16 }
   0x5   :  { %p218_p2 = scmp.lt.s32.totalorder %s216_s20, %s212_s19 }
   0x7   :  { %p219_p3 = por %p218_p2, %p217_p1 }
   0x9   :  { %p220_p4 = pnand %p219_p3, %p213_p0 }
   0xb   :  { %223 = shalt.err (!%p220_p4)
}
   0xc   :  { %24 = dma.hbm_to_vmem [thread:$0]  %s298_s2, 16, %s22_s16, [#allocation3]  }
   0xd   :  { %s232_s23 = scalar_lea.vmem %s32_s18, 16  ;;  %s236_s24 = scalar_lea.vmem %s32_s18, 32 }
   0xe   :  { %p233_p5 = scmp.ne.s32.totalorder %s32_s18, %s232_s23  ;;  %p237_p6 = scmp.lt.s32.totalorder %s32_s18, %s32_s18 }
   0xf   :  { %p238_p7 = scmp.lt.s32.totalorder %s236_s24, %s232_s23 }
  0x11   :  { %p239_p8 = por %p238_p7, %p237_p6 }
  0x13   :  { %p240_p9 = pnand %p239_p8, %p233_p5 }
  0x15   :  { %243 = shalt.err (!%p240_p9)
}
  0x16   :  { %34 = dma.hbm_to_vmem [thread:$0]  %s299_s3, 16, %s32_s18, [#allocation5]  }
  0x17   :  { %244 = dma.done.wait [#allocation3], 16  }
  0x18   :  { %245 = vsyncadd [#allocation3], 4294967280 }
  0x19   :  { %246 = dma.done.wait [#allocation5], 16  }
  0x1a   :  { %247 = vsyncadd [#allocation5], 4294967280  ;;  %vm64_vm0 = vcmask 1043456   ;;  %vm57_vm1 = vcmask 64512   ;;  %v46_v0 = vld [vmem:[%s297_s1] sm:$0xf] }
  0x1b   :  { %199 = vmatprep.subr.msk.bf16.mxu0 %vm64_vm0, %v46_v0  ;;  %v66_v1 = vsel %vm64_vm0, %v46_v0, 0  ;;  %v202_v2 = vld [vmem:[%s296_s0] sm:$0xff]   ;;  %v203_v3 = vld [vmem:[%s296_s0 + $0x8] sm:$0xff]  }
  0x1c   :  { %194 = vmatpush3.bf16.msra.mxu0 %v66_v1  ;;  %195 = vmatprep.mubr.msk.bf16.mxu0 %vm57_vm1, %v202_v2  ;;  %v169_v5 = vld [vmem:[#allocation2] ss:$0 sm:$0xff]  ;;  %v170_v8 = vld [vmem:[#allocation4] ss:$0 sm:$0xff] }
  0x1f   :  { %196 = vmatmul.mubr.msk.bf16.vlgmr.msra.gmra.mxu0 %vm57_vm1, %v203_v3 }
  0xdf   :  { %v197_v4 = vpop.f32.mrf.mxu0 }
  0xe0   :  { %v126_v7 = vmul.f32 %v197_v4, %v169_v5 }
  0xe1   :  { %v102_v6 = vpop.f32.mrf.mxu0 }
  0xe2   :  { %v124_v10 = vmul.f32 %v169_v5, %v102_v6  ;;  %v137_v13 = vadd.f32 %v170_v8, %v126_v7 }
  0xe3   :  { %v198_v9 = vpop.f32.mrf.mxu0 }
  0xe4   :  { %v127_v11 = vmul.f32 %v198_v9, %v169_v5  ;;  %v135_v16 = vadd.f32 %v170_v8, %v124_v10 }
  0xe5   :  { %v105_v12 = vpop.f32.mrf.mxu0 }
  0xe6   :  { %v138_v14 = vadd.f32 %v170_v8, %v127_v11  ;;  %v125_v15 = vmul.f32 %v169_v5, %v105_v12 }
  0xe8   :  { %v187_v17 = vpack.c.bf16 %v138_v14, %v137_v13  ;;  %v136_v18 = vadd.f32 %v170_v8, %v125_v15 }
  0xea   :  { %189 = vst [vmem:[%s300_s4 + $0x8] sm:$0xff] %v187_v17   ;;  %v182_v19 = vpack.c.bf16 %v136_v18, %v135_v16 }
  0xec   :  { %183 = vst [vmem:[%s300_s4] sm:$0xff] %v182_v19  }
  0xed   :  { %163 = vsyncpa [#allocation3], 1 }
  0xee   :  { %164 = vsyncpa [#allocation5], 1 }

// kernel: transformer_forward.21
= control target key start
LH: loop header
LB: loop body
LE: loop exit
PB: predicated region body
PF: predicated region fallthrough
CT: control target
= control target key end

     0   :  { %10 = vsyncpa [#allocation3], 0  ;;  %s1268_s0 = inlined_call_operand.vmem [shape: bf16[2,18,128], index: 0, kind: input, shape index: {}]   ;;  %s1269_s1 = inlined_call_operand.vmem [shape: bf16[3,128,128], index: 1, kind: input, shape index: {}]   ;;  %s1270_s2 = inlined_call_operand.hbm [shape: f32[1,128], index: 2, kind: input, shape index: {}]   ;;  %s1271_s3 = inlined_call_operand.hbm [shape: f32[1,128], index: 3, kind: input, shape index: {}]   ;;  %s1272_s4 = inlined_call_operand.vmem [shape: bf16[2,16,128], index: 4, kind: input, shape index: {}]   ;;  %s1273_s5 = inlined_call_operand.vmem [shape: bf16[2,16,128], index: 5, kind: output, shape index: {}]  }
   0x1   :  { %11 = vsyncpa [#allocation5], 0  ;;  %s1091_s18 = smov 0  }
   0x2 LB: > { %s1097_s19 = sadd.s32 4294967295, %s1055_s18   ;;  %p753_p0 = scmp.ge.s32.totalorder %s1055_s18, 1  ;;  %s1055_s18 = sphi %s1091_s18, %s17_s18  }
   0x3   : > { %p163_p1 = scmp.lt.s32.totalorder %s1055_s18, 3  ;;  %p1274_p2 = scmp.eq.s32.totalorder %s1097_s19, 0 }
   0x4   : > { %s1057_s21 = smov [#allocation2]   ;;  %s1058_s23 = smov [#allocation4]  }
   0x5   : > { %p1102_p3 = pnand %p753_p0, %p163_p1  ;;  %s179_s22 = sshll.u32 %s1057_s21, 4  ;;  %s180_s22 = int_to_ptr.vmem [resolvable:$true] %s179_s22 }
   0x6   : > { %s190_s24 = sshll.u32 %s1058_s23, 4  ;;  %s1000_s26 = scalar_lea.vmem %s180_s22, 16  ;;  %s191_s24 = int_to_ptr.vmem [resolvable:$true] %s190_s24 }
   0x7   : > { %p939_p4 = pneg %p1102_p3  ;;  %p1001_p7 = scmp.ne.s32.totalorder %s180_s22, %s1000_s26 }
   0x8   : > { %s1007_s27 = scalar_lea.vmem %s180_s22, 32  ;;  %p1008_p10 = scmp.lt.s32.totalorder %s180_s22, %s180_s22 }
   0x9   : > { %p1110_p5 = pnand %p1274_p2, %p939_p4  ;;  %p1009_p11 = scmp.lt.s32.totalorder %s1007_s27, %s1000_s26 }
   0xb   : > { %p991_p6 = pneg %p1110_p5  ;;  %p1010_p12 = por %p1009_p11, %p1008_p10 }
   0xd   : > { %p1003_p8 = pnand %p1001_p7, %p991_p6 }
   0xf   : > { %p1004_p9 = pneg %p1003_p8 }
  0x11   : > { %p1011_p13 = pnand %p1010_p12, %p1004_p9 }
  0x13   : > { %1014 = shalt.err (!%p1011_p13)
}
  0x14   : > { %942 = dma.hbm_to_vmem [thread:$0]  (!%p1110_p5), %s1270_s2, 16, %s180_s22, [#allocation3]  }
  0x15   : > { %s1026_s30 = scalar_lea.vmem %s191_s24, 16  ;;  %s1033_s6 = scalar_lea.vmem %s191_s24, 32 }
  0x16   : > { %p1027_p0 = scmp.ne.s32.totalorder %s191_s24, %s1026_s30  ;;  %p1034_p7 = scmp.lt.s32.totalorder %s191_s24, %s191_s24 }
  0x17   : > { %p1035_p8 = scmp.lt.s32.totalorder %s1033_s6, %s1026_s30 }
  0x18   : > { %p1029_p1 = pnand %p1027_p0, %p991_p6 }
  0x19   : > { %p1036_p2 = por %p1035_p8, %p1034_p7 }
  0x1a   : > { %p1030_p4 = pneg %p1029_p1 }
  0x1c   : > { %p1037_p10 = pnand %p1036_p2, %p1030_p4 }
  0x1e   : > { %1040 = shalt.err (!%p1037_p10)
}
  0x1f   : > { %945 = dma.hbm_to_vmem [thread:$0]  (!%p1110_p5), %s1271_s3, 16, %s191_s24, [#allocation5]  }
  0x20   : > { %219 = sbr.rel (%p1102_p3) target bundleno = 318 (0x13e), region = 40  ;;  %p1277_p9 = scmp.eq.s32.totalorder (!%p1102_p3), %s1097_s19, 0 }
  0x25   : > { %1046 = dma.done.wait (%p1277_p9), [#allocation3], 16   ;;  %p1278_p6 = pmov %p1277_p9 }
  0x27   : > { %1048 = vsyncadd (%p1278_p6), [#allocation3], 4294967280  ;;  %p1279_p11 = pmov %p1278_p6 }
  0x28   : > { %p1280_p2 = pmov %p1278_p6 }
  0x29   : > { %1050 = dma.done.wait (%p1279_p11), [#allocation5], 16  }
  0x2a   : > { %1052 = vsyncadd (%p1280_p2), [#allocation5], 4294967280  ;;  %v1059_v0 = vmov 0.0   ;;  %vm1060_vm0 = vmmov 0   ;;  %v962_v1 = vld [vmem:[%s1269_s1 + $0x78] sm:$0xff]   ;;  %p256_p3 = scmp.lt.s32.totalorder %s1097_s19, 1 }
  0x2b   : > { %870 = vmatprep.subr.bf16.mxu0 %v1059_v0  ;;  %890 = vmatprep.subr.bf16.mxu1 %v1059_v0  ;;  %v963_v2 = vld [vmem:[%s1269_s1 + $0x38] sm:$0xff]   ;;  %v964_v3 = vld [vmem:[%s1269_s1 + $0x70] sm:$0xff]   ;;  %v966_v5 = vld [vmem:[%s1269_s1 + $0x68] sm:$0xff]   ;;  %vm316_vm1 = vsmask.f32 7424  ;;  %vm530_vm2 = vcmask 1046528  }
  0x2c   : > { %886 = vmatprep.mubr.msk.bf16.mxu0 %vm1060_vm0, %v1059_v0  ;;  %906 = vmatprep.mubr.msk.bf16.mxu1 %vm1060_vm0, %v1059_v0  ;;  %v965_v4 = vld [vmem:[%s1269_s1 + $0x30] sm:$0xff]   ;;  %s1282_s19 = smov (!%p256_p3, %s1097_s19), 1  ;;  %v967_v6 = vld [vmem:[%s1269_s1 + $0x28] sm:$0xff]   ;;  %v968_v7 = vld [vmem:[%s1269_s1 + $0x60] sm:$0xff]  }
  0x2d   : > { %871 = vmatpush3.bf16.msra.mxu0 %v962_v1  ;;  %891 = vmatpush3.bf16.msra.mxu1 %v963_v2  ;;  %s930_s23 = smul.u32 12, %s1282_s19  ;;  %v969_v8 = vld [vmem:[%s1269_s1 + $0x20] sm:$0xff]   ;;  %v970_v9 = vld [vmem:[%s1269_s1 + $0x58] sm:$0xff]   ;;  %v972_v13 = vld [vmem:[%s1269_s1 + $0x50] sm:$0xff]  }
  0x2e   : > { %872 = vmatprep.subr.bf16.mxu0 %v1059_v0  ;;  %892 = vmatprep.subr.bf16.mxu1 %v1059_v0  ;;  %v971_v10 = vld [vmem:[%s1269_s1 + $0x18] sm:$0xff]   ;;  %v973_v16 = vld [vmem:[%s1269_s1 + $0x10] sm:$0xff]   ;;  %v974_v18 = vld [vmem:[%s1269_s1 + $0x48] sm:$0xff]  }
  0x2f   : > { %s1186_s30 = scalar_lea.vmem %s1268_s0, %s930_s23  ;;  %v975_v22 = vld [vmem:[%s1269_s1 + $0x8] sm:$0xff]   ;;  %v976_v23 = vld [vmem:[%s1269_s1 + $0x40] sm:$0xff]   ;;  %v980_v28 = vld [vmem:[%s1269_s1 + $0xb8] sm:$0xff]  }
  0x30   : > { %v272_v11 = vld [vmem:[%s1186_s30] sm:$0xf]  ;;  %v273_v12 = vld [vmem:[%s1186_s30 + $0x4] sm:$0xf]  ;;  %v981_v29 = vld [vmem:[%s1269_s1 + $0xb0] sm:$0xff]  }
  0x31   : > { %873 = vmatpush3.bf16.msra.mxu0 %v964_v3  ;;  %893 = vmatpush3.bf16.msra.mxu1 %v965_v4  ;;  %v781_v14 = vcombine.low %v272_v11, %v273_v12  ;;  %v979_v15 = vld [vmem:[%s1186_s30 + $0x8] ss:$0 sps:$4 sm:$0x11]   ;;  %v977_v26 = vld [vmem:[%s1269_s1] sm:$0xff]   ;;  %v984_v32 = vld [vmem:[%s1269_s1 + $0x98] sm:$0xff]  }
  0x32   : > { %874 = vmatprep.subr.bf16.mxu0 %v1059_v0  ;;  %894 = vmatprep.subr.bf16.mxu1 %v1059_v0  ;;  %v325_v21 = vshll.u32 %v979_v15, 16  ;;  %v982_v30 = vld [vmem:[%s1269_s1 + $0xa8] sm:$0xff]   ;;  %v983_v31 = vld [vmem:[%s1269_s1 + $0xa0] sm:$0xff]   ;;  %v985_v33 = vld [vmem:[%s1269_s1 + $0x90] sm:$0xff]   ;;  %v532_v39 = vrot.slane %v979_v15, 1 }
  0x33   : > { %v320_v17 = vshll.u32 %v781_v14, 16  ;;  %v318_v19 = vshrl.u32 %v781_v14, 16  ;;  %v509_v34 = vld [vmem:[%s1186_s30] sm:$0xe]  ;;  %v986_v35 = vld [vmem:[%s1269_s1 + $0x88] sm:$0xff]   ;;  %s830_s30 = sshll.u32 %s1282_s19, 3 }
  0x34   : > { %v327_v25 = vrot.slane %v325_v21, 1  ;;  %v815_v36 = vcombine.low %v509_v34, %v273_v12  ;;  %v987_v37 = vld [vmem:[%s1269_s1 + $0x80] sm:$0xff]   ;;  %s265_s20 = scalar_lea.vmem %s1272_s4, %s830_s30  ;;  %s270_s22 = scalar_lea.vmem %s1273_s5, %s830_s30 }
  0x35   : > { %875 = vmatpush3.bf16.msra.mxu0 %v966_v5  ;;  %895 = vmatpush3.bf16.msra.mxu1 %v967_v6  ;;  %v322_v20 = vrot.slane %v320_v17, 1  ;;  %v824_v51 = vld [vmem:[#allocation2] ss:$0 sm:$0xff]  ;;  %v825_v53 = vld [vmem:[#allocation4] ss:$0 sm:$0xff] }
  0x36   : > { %876 = vmatprep.subr.bf16.mxu0 %v1059_v0  ;;  %896 = vmatprep.subr.bf16.mxu1 %v1059_v0  ;;  %v531_v38 = vrot.slane %v815_v36, 1  ;;  %v835_v54 = vld [vmem:[%s265_s20] sm:$0xff]  }
  0x37   : > { %v323_v24 = vor.u32 %v322_v20, %v318_v19  ;;  %v836_v60 = vunpack.c.l.bf16 %v835_v54 }
  0x38   : > { %v533_v40 = vsel %vm530_vm2, %v531_v38, %v532_v39 }
  0x39   : > { %877 = vmatpush3.bf16.msra.mxu0 %v968_v7  ;;  %897 = vmatpush3.bf16.msra.mxu1 %v969_v8  ;;  %v328_v27 = vsel %vm316_vm1, %v323_v24, %v327_v25 }
  0x3a   : > { %878 = vmatprep.subr.bf16.mxu0 %v1059_v0  ;;  %898 = vmatprep.subr.bf16.mxu1 %v1059_v0 }
  0x3d   : > { %879 = vmatpush3.bf16.msra.mxu0 %v970_v9  ;;  %899 = vmatpush3.bf16.msra.mxu1 %v971_v10 }
  0x3e   : > { %880 = vmatprep.subr.bf16.mxu0 %v1059_v0  ;;  %900 = vmatprep.subr.bf16.mxu1 %v1059_v0 }
  0x41   : > { %881 = vmatpush3.bf16.msra.mxu0 %v972_v13  ;;  %901 = vmatpush3.bf16.msra.mxu1 %v973_v16 }
  0x42   : > { %882 = vmatprep.subr.bf16.mxu0 %v1059_v0  ;;  %902 = vmatprep.subr.bf16.mxu1 %v1059_v0 }
  0x45   : > { %883 = vmatpush3.bf16.msra.mxu0 %v974_v18  ;;  %903 = vmatpush3.bf16.msra.mxu1 %v975_v22 }
  0x46   : > { %884 = vmatprep.subr.bf16.mxu0 %v1059_v0  ;;  %904 = vmatprep.subr.bf16.mxu1 %v1059_v0 }
  0x49   : > { %885 = vmatpush3.bf16.msra.mxu0 %v976_v23  ;;  %905 = vmatpush3.bf16.msra.mxu1 %v977_v26 }
  0x4a   : > { %910 = vmatprep.subr.bf16.mxu0 %v1059_v0 }
  0x4c   : > { %887 = vmatmul.mubr.bf16.vlgmr.msra.gmra.mxu0 %v328_v27  ;;  %907 = vmatmul.mubr.bf16.vlgmr.msra.gmra.mxu1 %v781_v14 }
  0x4d   : > { %911 = vmatpush3.bf16.msra.mxu0 %v980_v28  ;;  %926 = vmatprep.mubr.msk.bf16.mxu0 %vm1060_vm0, %v1059_v0 }
  0x4e   : > { %912 = vmatprep.subr.bf16.mxu0 %v1059_v0 }
  0x51   : > { %913 = vmatpush3.bf16.msra.mxu0 %v981_v29 }
  0x52   : > { %914 = vmatprep.subr.bf16.mxu0 %v1059_v0 }
  0x55   : > { %915 = vmatpush3.bf16.msra.mxu0 %v982_v30 }
  0x56   : > { %916 = vmatprep.subr.bf16.mxu0 %v1059_v0 }
  0x59   : > { %917 = vmatpush3.bf16.msra.mxu0 %v983_v31 }
  0x5a   : > { %918 = vmatprep.subr.bf16.mxu0 %v1059_v0 }
  0x5d   : > { %919 = vmatpush3.bf16.msra.mxu0 %v984_v32 }
  0x5e   : > { %920 = vmatprep.subr.bf16.mxu0 %v1059_v0 }
  0x61   : > { %921 = vmatpush3.bf16.msra.mxu0 %v985_v33 }
  0x62   : > { %922 = vmatprep.subr.bf16.mxu0 %v1059_v0 }
  0x65   : > { %923 = vmatpush3.bf16.msra.mxu0 %v986_v35 }
  0x66   : > { %924 = vmatprep.subr.bf16.mxu0 %v1059_v0  ;;  %v837_v0 = vunpack.c.h.bf16 %v835_v54 }
  0x69   : > { %925 = vmatpush3.bf16.msra.mxu0 %v987_v37 }
  0x6c   : > { %927 = vmatmul.mubr.bf16.vlgmr.msra.gmra.mxu0 %v533_v40 }
 0x10c   : > { %v412_v41 = vpop.f32.mrf.mxu0  ;;  %v502_v42 = vpop.f32.mrf.mxu1 }
 0x10d   : > { %v503_v49 = vadd.f32 %v502_v42, %v412_v41 }
 0x10e   : > { %v888_v43 = vpop.f32.mrf.mxu0  ;;  %v908_v44 = vpop.f32.mrf.mxu1 }
 0x110   : > { %v415_v45 = vpop.f32.mrf.mxu0  ;;  %v505_v46 = vpop.f32.mrf.mxu1 }
 0x111   : > { %v506_v56 = vadd.f32 %v505_v46, %v415_v45 }
 0x112   : > { %v889_v47 = vpop.f32.mrf.mxu0  ;;  %v909_v48 = vpop.f32.mrf.mxu1 }
 0x12c   : > { %v617_v50 = vpop.f32.mrf.mxu0 }
 0x12d   : > { %v624_v52 = vadd.f32 %v617_v50, %v503_v49 }
 0x12e   : > { %v928_v55 = vpop.f32.mrf.mxu0 }
 0x12f   : > { %v633_v57 = vmul.f32 %v824_v51, %v624_v52 }
 0x130   : > { %v620_v58 = vpop.f32.mrf.mxu0 }
 0x131   : > { %v642_v59 = vadd.f32 %v825_v53, %v633_v57  ;;  %v625_v61 = vadd.f32 %v620_v58, %v506_v56 }
 0x132   : > { %v929_v62 = vpop.f32.mrf.mxu0 }
 0x133   : > { %v634_v63 = vmul.f32 %v824_v51, %v625_v61  ;;  %v648_v1 = vadd.f32 %v836_v60, %v642_v59 }
 0x135   : > { %v643_v2 = vadd.f32 %v825_v53, %v634_v63  ;;  %v650_v4 = vmax.f32 %v648_v1, 0.0 }
 0x137   : > { %v649_v3 = vadd.f32 %v837_v0, %v643_v2 }
 0x139   : > { %v651_v5 = vmax.f32 %v649_v3, 0.0 }
 0x13b   : > { %v841_v6 = vpack.c.bf16 %v651_v5, %v650_v4 }
 0x13d   : > { %842 = vst [vmem:[%s270_s22] sm:$0xff] %v841_v6  }
 0x13e PF: > { %s17_s18 = sadd.s32 1, %s1055_s18  }
 0x13f   : > { %p14_p5 = scmp.ge.s32.totalorder %s17_s18, 4  }
 0x141   :  { %16 = sbr.rel (!%p14_p5) target bundleno = 2 (0x2), region = 84 }
 0x146   :  { %683 = vsyncpa [#allocation3], 1 }
 0x147   :  { %685 = vsyncpa [#allocation3 + $0x1], 1 }
 0x148   :  { %686 = vsyncpa [#allocation5], 1 }

// kernel: transformer_forward.22
= control target key start
LH: loop header
LB: loop body
LE: loop exit
PB: predicated region body
PF: predicated region fallthrough
CT: control target
= control target key end

     0   :  { %9 = vsyncpa [#allocation3], 0  ;;  %s1188_s0 = inlined_call_operand.vmem [shape: bf16[2,18,128], index: 0, kind: input, shape index: {}]   ;;  %s1189_s1 = inlined_call_operand.vmem [shape: bf16[3,128,128], index: 1, kind: input, shape index: {}]   ;;  %s1190_s2 = inlined_call_operand.hbm [shape: f32[1,128], index: 2, kind: input, shape index: {}]   ;;  %s1191_s3 = inlined_call_operand.hbm [shape: f32[1,128], index: 3, kind: input, shape index: {}]   ;;  %s1192_s4 = inlined_call_operand.vmem [shape: bf16[2,16,128], index: 4, kind: output, shape index: {}]  }
   0x1   :  { %10 = vsyncpa [#allocation5], 0  ;;  %s1014_s15 = smov 0  }
   0x2 LB: > { %s1020_s16 = sadd.s32 4294967295, %s983_s15   ;;  %p688_p0 = scmp.ge.s32.totalorder %s983_s15, 1  ;;  %s983_s15 = sphi %s1014_s15, %s16_s15  }
   0x3   : > { %p136_p1 = scmp.lt.s32.totalorder %s983_s15, 3  ;;  %p1193_p2 = scmp.eq.s32.totalorder %s1020_s16, 0 }
   0x4   : > { %s985_s18 = smov [#allocation2]   ;;  %s986_s20 = smov [#allocation4]  }
   0x5   : > { %p1025_p3 = pnand %p688_p0, %p136_p1  ;;  %s152_s19 = sshll.u32 %s985_s18, 4  ;;  %s153_s19 = int_to_ptr.vmem [resolvable:$true] %s152_s19 }
   0x6   : > { %s163_s21 = sshll.u32 %s986_s20, 4  ;;  %s928_s23 = scalar_lea.vmem %s153_s19, 16  ;;  %s164_s21 = int_to_ptr.vmem [resolvable:$true] %s163_s21 }
   0x7   : > { %p867_p4 = pneg %p1025_p3  ;;  %p929_p7 = scmp.ne.s32.totalorder %s153_s19, %s928_s23 }
   0x8   : > { %s935_s24 = scalar_lea.vmem %s153_s19, 32  ;;  %p936_p10 = scmp.lt.s32.totalorder %s153_s19, %s153_s19 }
   0x9   : > { %p1033_p5 = pnand %p1193_p2, %p867_p4  ;;  %p937_p11 = scmp.lt.s32.totalorder %s935_s24, %s928_s23 }
   0xb   : > { %p919_p6 = pneg %p1033_p5  ;;  %p938_p12 = por %p937_p11, %p936_p10 }
   0xd   : > { %p931_p8 = pnand %p929_p7, %p919_p6 }
   0xf   : > { %p932_p9 = pneg %p931_p8 }
  0x11   : > { %p939_p13 = pnand %p938_p12, %p932_p9 }
  0x13   : > { %942 = shalt.err (!%p939_p13)
}
  0x14   : > { %870 = dma.hbm_to_vmem [thread:$0]  (!%p1033_p5), %s1190_s2, 16, %s153_s19, [#allocation3]  }
  0x15   : > { %s954_s27 = scalar_lea.vmem %s164_s21, 16  ;;  %s961_s28 = scalar_lea.vmem %s164_s21, 32 }
  0x16   : > { %p955_p0 = scmp.ne.s32.totalorder %s164_s21, %s954_s27  ;;  %p962_p7 = scmp.lt.s32.totalorder %s164_s21, %s164_s21 }
  0x17   : > { %p963_p8 = scmp.lt.s32.totalorder %s961_s28, %s954_s27 }
  0x18   : > { %p957_p1 = pnand %p955_p0, %p919_p6 }
  0x19   : > { %p964_p2 = por %p963_p8, %p962_p7 }
  0x1a   : > { %p958_p4 = pneg %p957_p1 }
  0x1c   : > { %p965_p10 = pnand %p964_p2, %p958_p4 }
  0x1e   : > { %968 = shalt.err (!%p965_p10)
}
  0x1f   : > { %873 = dma.hbm_to_vmem [thread:$0]  (!%p1033_p5), %s1191_s3, 16, %s164_s21, [#allocation5]  }
  0x20   : > { %184 = sbr.rel (%p1025_p3) target bundleno = 316 (0x13c), region = 36  ;;  %p1196_p9 = scmp.eq.s32.totalorder (!%p1025_p3), %s1020_s16, 0 }
  0x25   : > { %974 = dma.done.wait (%p1196_p9), [#allocation3], 16   ;;  %p1197_p6 = pmov %p1196_p9 }
  0x27   : > { %976 = vsyncadd (%p1197_p6), [#allocation3], 4294967280  ;;  %p1198_p11 = pmov %p1197_p6 }
  0x28   : > { %p1199_p2 = pmov %p1197_p6 }
  0x29   : > { %978 = dma.done.wait (%p1198_p11), [#allocation5], 16  }
  0x2a   : > { %980 = vsyncadd (%p1199_p2), [#allocation5], 4294967280  ;;  %v987_v0 = vmov 0.0   ;;  %vm988_vm0 = vmmov 0   ;;  %v890_v1 = vld [vmem:[%s1189_s1 + $0x78] sm:$0xff]   ;;  %p214_p3 = scmp.lt.s32.totalorder %s1020_s16, 1 }
  0x2b   : > { %798 = vmatprep.subr.bf16.mxu0 %v987_v0  ;;  %818 = vmatprep.subr.bf16.mxu1 %v987_v0  ;;  %v891_v2 = vld [vmem:[%s1189_s1 + $0x38] sm:$0xff]   ;;  %v892_v3 = vld [vmem:[%s1189_s1 + $0x70] sm:$0xff]   ;;  %v894_v5 = vld [vmem:[%s1189_s1 + $0x68] sm:$0xff]   ;;  %vm269_vm1 = vsmask.f32 7424  ;;  %vm483_vm2 = vcmask 1046528  }
  0x2c   : > { %814 = vmatprep.mubr.msk.bf16.mxu0 %vm988_vm0, %v987_v0  ;;  %834 = vmatprep.mubr.msk.bf16.mxu1 %vm988_vm0, %v987_v0  ;;  %v893_v4 = vld [vmem:[%s1189_s1 + $0x30] sm:$0xff]   ;;  %s1201_s16 = smov (!%p214_p3, %s1020_s16), 1  ;;  %v895_v6 = vld [vmem:[%s1189_s1 + $0x28] sm:$0xff]   ;;  %v896_v7 = vld [vmem:[%s1189_s1 + $0x60] sm:$0xff]  }
  0x2d   : > { %799 = vmatpush3.bf16.msra.mxu0 %v890_v1  ;;  %819 = vmatpush3.bf16.msra.mxu1 %v891_v2  ;;  %s858_s19 = smul.u32 12, %s1201_s16  ;;  %v897_v8 = vld [vmem:[%s1189_s1 + $0x20] sm:$0xff]   ;;  %v898_v9 = vld [vmem:[%s1189_s1 + $0x58] sm:$0xff]   ;;  %v900_v13 = vld [vmem:[%s1189_s1 + $0x50] sm:$0xff]  }
  0x2e   : > { %800 = vmatprep.subr.bf16.mxu0 %v987_v0  ;;  %820 = vmatprep.subr.bf16.mxu1 %v987_v0  ;;  %v899_v10 = vld [vmem:[%s1189_s1 + $0x18] sm:$0xff]   ;;  %v901_v16 = vld [vmem:[%s1189_s1 + $0x10] sm:$0xff]   ;;  %v902_v18 = vld [vmem:[%s1189_s1 + $0x48] sm:$0xff]  }
  0x2f   : > { %s1109_s26 = scalar_lea.vmem %s1188_s0, %s858_s19  ;;  %v903_v22 = vld [vmem:[%s1189_s1 + $0x8] sm:$0xff]   ;;  %v904_v23 = vld [vmem:[%s1189_s1 + $0x40] sm:$0xff]   ;;  %v908_v28 = vld [vmem:[%s1189_s1 + $0xb8] sm:$0xff]  }
  0x30   : > { %v225_v11 = vld [vmem:[%s1109_s26] sm:$0xf]  ;;  %v226_v12 = vld [vmem:[%s1109_s26 + $0x4] sm:$0xf]  ;;  %v909_v29 = vld [vmem:[%s1189_s1 + $0xb0] sm:$0xff]  }
  0x31   : > { %801 = vmatpush3.bf16.msra.mxu0 %v892_v3  ;;  %821 = vmatpush3.bf16.msra.mxu1 %v893_v4  ;;  %v714_v14 = vcombine.low %v225_v11, %v226_v12  ;;  %v907_v15 = vld [vmem:[%s1109_s26 + $0x8] ss:$0 sps:$4 sm:$0x11]   ;;  %v905_v26 = vld [vmem:[%s1189_s1] sm:$0xff]   ;;  %v912_v32 = vld [vmem:[%s1189_s1 + $0x98] sm:$0xff]  }
  0x32   : > { %802 = vmatprep.subr.bf16.mxu0 %v987_v0  ;;  %822 = vmatprep.subr.bf16.mxu1 %v987_v0  ;;  %v278_v21 = vshll.u32 %v907_v15, 16  ;;  %v910_v30 = vld [vmem:[%s1189_s1 + $0xa8] sm:$0xff]   ;;  %v911_v31 = vld [vmem:[%s1189_s1 + $0xa0] sm:$0xff]   ;;  %v913_v33 = vld [vmem:[%s1189_s1 + $0x90] sm:$0xff]   ;;  %v485_v39 = vrot.slane %v907_v15, 1 }
  0x33   : > { %v273_v17 = vshll.u32 %v714_v14, 16  ;;  %v271_v19 = vshrl.u32 %v714_v14, 16  ;;  %v462_v34 = vld [vmem:[%s1109_s26] sm:$0xe]  ;;  %v914_v35 = vld [vmem:[%s1189_s1 + $0x88] sm:$0xff]   ;;  %s763_s26 = sshll.u32 %s1201_s16, 3 }
  0x34   : > { %v280_v25 = vrot.slane %v278_v21, 1  ;;  %v748_v36 = vcombine.low %v462_v34, %v226_v12  ;;  %v915_v37 = vld [vmem:[%s1189_s1 + $0x80] sm:$0xff]   ;;  %s223_s12 = scalar_lea.vmem %s1192_s4, %s763_s26 }
  0x35   : > { %803 = vmatpush3.bf16.msra.mxu0 %v894_v5  ;;  %823 = vmatpush3.bf16.msra.mxu1 %v895_v6  ;;  %v275_v20 = vrot.slane %v273_v17, 1  ;;  %v757_v51 = vld [vmem:[#allocation2] ss:$0 sm:$0xff]  ;;  %v758_v56 = vld [vmem:[#allocation4] ss:$0 sm:$0xff] }
  0x36   : > { %804 = vmatprep.subr.bf16.mxu0 %v987_v0  ;;  %824 = vmatprep.subr.bf16.mxu1 %v987_v0  ;;  %v484_v38 = vrot.slane %v748_v36, 1 }
  0x37   : > { %v276_v24 = vor.u32 %v275_v20, %v271_v19 }
  0x38   : > { %v486_v40 = vsel %vm483_vm2, %v484_v38, %v485_v39 }
  0x39   : > { %805 = vmatpush3.bf16.msra.mxu0 %v896_v7  ;;  %825 = vmatpush3.bf16.msra.mxu1 %v897_v8  ;;  %v281_v27 = vsel %vm269_vm1, %v276_v24, %v280_v25 }
  0x3a   : > { %806 = vmatprep.subr.bf16.mxu0 %v987_v0  ;;  %826 = vmatprep.subr.bf16.mxu1 %v987_v0 }
  0x3d   : > { %807 = vmatpush3.bf16.msra.mxu0 %v898_v9  ;;  %827 = vmatpush3.bf16.msra.mxu1 %v899_v10 }
  0x3e   : > { %808 = vmatprep.subr.bf16.mxu0 %v987_v0  ;;  %828 = vmatprep.subr.bf16.mxu1 %v987_v0 }
  0x41   : > { %809 = vmatpush3.bf16.msra.mxu0 %v900_v13  ;;  %829 = vmatpush3.bf16.msra.mxu1 %v901_v16 }
  0x42   : > { %810 = vmatprep.subr.bf16.mxu0 %v987_v0  ;;  %830 = vmatprep.subr.bf16.mxu1 %v987_v0 }
  0x45   : > { %811 = vmatpush3.bf16.msra.mxu0 %v902_v18  ;;  %831 = vmatpush3.bf16.msra.mxu1 %v903_v22 }
  0x46   : > { %812 = vmatprep.subr.bf16.mxu0 %v987_v0  ;;  %832 = vmatprep.subr.bf16.mxu1 %v987_v0 }
  0x49   : > { %813 = vmatpush3.bf16.msra.mxu0 %v904_v23  ;;  %833 = vmatpush3.bf16.msra.mxu1 %v905_v26 }
  0x4a   : > { %838 = vmatprep.subr.bf16.mxu0 %v987_v0 }
  0x4c   : > { %815 = vmatmul.mubr.bf16.vlgmr.msra.gmra.mxu0 %v281_v27  ;;  %835 = vmatmul.mubr.bf16.vlgmr.msra.gmra.mxu1 %v714_v14 }
  0x4d   : > { %839 = vmatpush3.bf16.msra.mxu0 %v908_v28  ;;  %854 = vmatprep.mubr.msk.bf16.mxu0 %vm988_vm0, %v987_v0 }
  0x4e   : > { %840 = vmatprep.subr.bf16.mxu0 %v987_v0 }
  0x51   : > { %841 = vmatpush3.bf16.msra.mxu0 %v909_v29 }
  0x52   : > { %842 = vmatprep.subr.bf16.mxu0 %v987_v0 }
  0x55   : > { %843 = vmatpush3.bf16.msra.mxu0 %v910_v30 }
  0x56   : > { %844 = vmatprep.subr.bf16.mxu0 %v987_v0 }
  0x59   : > { %845 = vmatpush3.bf16.msra.mxu0 %v911_v31 }
  0x5a   : > { %846 = vmatprep.subr.bf16.mxu0 %v987_v0 }
  0x5d   : > { %847 = vmatpush3.bf16.msra.mxu0 %v912_v32 }
  0x5e   : > { %848 = vmatprep.subr.bf16.mxu0 %v987_v0 }
  0x61   : > { %849 = vmatpush3.bf16.msra.mxu0 %v913_v33 }
  0x62   : > { %850 = vmatprep.subr.bf16.mxu0 %v987_v0 }
  0x65   : > { %851 = vmatpush3.bf16.msra.mxu0 %v914_v35 }
  0x66   : > { %852 = vmatprep.subr.bf16.mxu0 %v987_v0 }
  0x69   : > { %853 = vmatpush3.bf16.msra.mxu0 %v915_v37 }
  0x6c   : > { %855 = vmatmul.mubr.bf16.vlgmr.msra.gmra.mxu0 %v486_v40 }
 0x10c   : > { %v365_v41 = vpop.f32.mrf.mxu0  ;;  %v455_v42 = vpop.f32.mrf.mxu1 }
 0x10d   : > { %v456_v49 = vadd.f32 %v455_v42, %v365_v41 }
 0x10e   : > { %v816_v43 = vpop.f32.mrf.mxu0  ;;  %v836_v44 = vpop.f32.mrf.mxu1 }
 0x110   : > { %v368_v45 = vpop.f32.mrf.mxu0  ;;  %v458_v46 = vpop.f32.mrf.mxu1 }
 0x111   : > { %v459_v54 = vadd.f32 %v458_v46, %v368_v45 }
 0x112   : > { %v817_v47 = vpop.f32.mrf.mxu0  ;;  %v837_v48 = vpop.f32.mrf.mxu1 }
 0x12c   : > { %v570_v50 = vpop.f32.mrf.mxu0 }
 0x12d   : > { %v577_v52 = vadd.f32 %v570_v50, %v456_v49 }
 0x12e   : > { %v856_v53 = vpop.f32.mrf.mxu0 }
 0x12f   : > { %v586_v55 = vmul.f32 %v757_v51, %v577_v52 }
 0x130   : > { %v573_v57 = vpop.f32.mrf.mxu0 }
 0x131   : > { %v578_v58 = vadd.f32 %v573_v57, %v459_v54  ;;  %v595_v60 = vadd.f32 %v758_v56, %v586_v55 }
 0x132   : > { %v857_v59 = vpop.f32.mrf.mxu0 }
 0x133   : > { %v587_v61 = vmul.f32 %v757_v51, %v578_v58  ;;  %v597_v63 = vmax.f32 %v595_v60, 0.0 }
 0x135   : > { %v596_v62 = vadd.f32 %v758_v56, %v587_v61 }
 0x137   : > { %v598_v0 = vmax.f32 %v596_v62, 0.0 }
 0x139   : > { %v769_v1 = vpack.c.bf16 %v598_v0, %v597_v63 }
 0x13b   : > { %770 = vst [vmem:[%s223_s12] sm:$0xff] %v769_v1  }
 0x13c PF: > { %s16_s15 = sadd.s32 1, %s983_s15  }
 0x13d   : > { %p13_p5 = scmp.ge.s32.totalorder %s16_s15, 4  }
 0x13f   :  { %15 = sbr.rel (!%p13_p5) target bundleno = 2 (0x2), region = 77 }
 0x144   :  { %630 = vsyncpa [#allocation3], 1 }
 0x145   :  { %632 = vsyncpa [#allocation3 + $0x1], 1 }
 0x146   :  { %633 = vsyncpa [#allocation5], 1 }

// kernel: transformer_forward.26
= control target key start
LH: loop header
LB: loop body
LE: loop exit
PB: predicated region body
PF: predicated region fallthrough
CT: control target
= control target key end

     0   :  { %s304_s1 = inlined_call_operand.vmem [shape: bf16[128,128], index: 1, kind: input, shape index: {}]   ;;  %s305_s0 = inlined_call_operand.vmem [shape: bf16[32,128], index: 0, kind: input, shape index: {}]   ;;  %s306_s2 = inlined_call_operand.vmem [shape: f32[1,128], index: 2, kind: input, shape index: {}]   ;;  %s307_s3 = inlined_call_operand.vmem [shape: bf16[32,128], index: 3, kind: output, shape index: {}]  }
   0x1   :  { %v235_v0 = vld [vmem:[%s304_s1 + $0x38] sm:$0xff]   ;;  %v236_v1 = vld [vmem:[%s304_s1 + $0x30] sm:$0xff]   ;;  %v237_v2 = vld [vmem:[%s304_s1 + $0x28] sm:$0xff]  }
   0x2   :  { %215 = vmatprep.subr.bf16.mxu0 %v235_v0  ;;  %v238_v3 = vld [vmem:[%s304_s1 + $0x20] sm:$0xff]   ;;  %v239_v5 = vld [vmem:[%s304_s1 + $0x18] sm:$0xff]   ;;  %v240_v6 = vld [vmem:[%s304_s1 + $0x10] sm:$0xff]  }
   0x3   :  { %216 = vmatpush3.bf16.msra.mxu0 %v235_v0  ;;  %v243_v4 = vld [vmem:[%s305_s0] sm:$0xff]   ;;  %v241_v7 = vld [vmem:[%s304_s1 + $0x8] sm:$0xff]  }
   0x4   :  { %217 = vmatprep.subr.bf16.mxu0 %v236_v1  ;;  %231 = vmatprep.mubr.bf16.mxu0 %v243_v4  ;;  %v242_v8 = vld [vmem:[%s304_s1] sm:$0xff]   ;;  %v244_v9 = vld [vmem:[%s305_s0 + $0x8] sm:$0xff]  }
   0x5   :  { %v175_v11 = vld [vmem:[%s306_s2] ss:$0 sm:$0xff] }
   0x7   :  { %218 = vmatpush3.bf16.msra.mxu0 %v236_v1 }
   0x8   :  { %219 = vmatprep.subr.bf16.mxu0 %v237_v2 }
   0xb   :  { %220 = vmatpush3.bf16.msra.mxu0 %v237_v2 }
   0xc   :  { %221 = vmatprep.subr.bf16.mxu0 %v238_v3 }
   0xf   :  { %222 = vmatpush3.bf16.msra.mxu0 %v238_v3 }
  0x10   :  { %223 = vmatprep.subr.bf16.mxu0 %v239_v5 }
  0x13   :  { %224 = vmatpush3.bf16.msra.mxu0 %v239_v5 }
  0x14   :  { %225 = vmatprep.subr.bf16.mxu0 %v240_v6 }
  0x17   :  { %226 = vmatpush3.bf16.msra.mxu0 %v240_v6 }
  0x18   :  { %227 = vmatprep.subr.bf16.mxu0 %v241_v7 }
  0x1b   :  { %228 = vmatpush3.bf16.msra.mxu0 %v241_v7 }
  0x1c   :  { %229 = vmatprep.subr.bf16.mxu0 %v242_v8 }
  0x1f   :  { %230 = vmatpush3.bf16.msra.mxu0 %v242_v8 }
  0x22   :  { %232 = vmatmul.mubr.bf16.vlgmr.msra.gmra.mxu0 %v244_v9 }
  0xe2   :  { %v233_v10 = vpop.f32.mrf.mxu0 }
  0xe3   :  { %v145_v14 = vadd.f32 %v233_v10, %v175_v11 }
  0xe4   :  { %v136_v12 = vpop.f32.mrf.mxu0 }
  0xe5   :  { %v137_v17 = vadd.f32 %v175_v11, %v136_v12 }
  0xe6   :  { %v234_v13 = vpop.f32.mrf.mxu0 }
  0xe7   :  { %v148_v15 = vadd.f32 %v234_v13, %v175_v11 }
  0xe8   :  { %v139_v16 = vpop.f32.mrf.mxu0 }
  0xe9   :  { %v202_v18 = vpack.c.bf16 %v148_v15, %v145_v14  ;;  %v140_v19 = vadd.f32 %v175_v11, %v139_v16 }
  0xeb   :  { %204 = vst [vmem:[%s307_s3 + $0x8] sm:$0xff] %v202_v18   ;;  %v197_v20 = vpack.c.bf16 %v140_v19, %v137_v17 }
  0xed   :  { %198 = vst [vmem:[%s307_s3] sm:$0xff] %v197_v20  }

// kernel: transformer_forward.24
= control target key start
LH: loop header
LB: loop body
LE: loop exit
PB: predicated region body
PF: predicated region fallthrough
CT: control target
= control target key end

     0   :  { %s879_s15 = smov 0   ;;  %s1014_s0 = inlined_call_operand.vmem [shape: bf16[2,18,128], index: 0, kind: input, shape index: {}]   ;;  %s1015_s1 = inlined_call_operand.vmem [shape: bf16[3,128,128], index: 1, kind: input, shape index: {}]   ;;  %s1016_s2 = inlined_call_operand.vmem [shape: f32[1,128], index: 2, kind: input, shape index: {}]   ;;  %s1017_s3 = inlined_call_operand.vmem [shape: f32[1,128], index: 3, kind: input, shape index: {}]   ;;  %s1018_s4 = inlined_call_operand.vmem [shape: bf16[2,16,128], index: 4, kind: output, shape index: {}]  }
   0x1 LB: > { %s638_s16 = sadd.s32 4294967295, %s850_s15   ;;  %p642_p0 = scmp.ge.s32.totalorder %s850_s15, 1  ;;  %s850_s15 = sphi %s879_s15, %s14_s15  }
   0x2   : > { %p162_p1 = scmp.lt.s32.totalorder %s850_s15, 3 }
   0x4   : > { %p163_p2 = pnand %p642_p0, %p162_p1 }
   0x5   : > { %p188_p3 = scmp.lt.s32.totalorder (!%p163_p2), %s638_s16, 1 }
   0x6   : > { %166 = sbr.rel (%p163_p2) target bundleno = 284 (0x11c), region = 36 }
   0xb   : > { %v817_v0 = vld [vmem:[%s1015_s1 + $0x78] sm:$0xff]   ;;  %v852_v1 = vmov 0.0   ;;  %v819_v3 = vld [vmem:[%s1015_s1 + $0x70] sm:$0xff]   ;;  %vm853_vm0 = vmmov 0   ;;  %s1020_s16 = smov (!%p188_p3, %s638_s16), 1  ;;  %v821_v5 = vld [vmem:[%s1015_s1 + $0x68] sm:$0xff]  }
   0xc   : > { %746 = vmatprep.subr.bf16.mxu0 %v852_v1  ;;  %766 = vmatprep.subr.bf16.mxu1 %v852_v1  ;;  %v818_v2 = vld [vmem:[%s1015_s1 + $0x38] sm:$0xff]   ;;  %v820_v4 = vld [vmem:[%s1015_s1 + $0x30] sm:$0xff]   ;;  %v822_v6 = vld [vmem:[%s1015_s1 + $0x28] sm:$0xff]   ;;  %s806_s29 = smul.u32 12, %s1020_s16  ;;  %vm243_vm1 = vsmask.f32 7424 }
   0xd   : > { %747 = vmatpush3.bf16.msra.mxu0 %v817_v0  ;;  %762 = vmatprep.mubr.msk.bf16.mxu0 %vm853_vm0, %v852_v1  ;;  %v823_v7 = vld [vmem:[%s1015_s1 + $0x60] sm:$0xff]   ;;  %v825_v9 = vld [vmem:[%s1015_s1 + $0x58] sm:$0xff]   ;;  %v827_v13 = vld [vmem:[%s1015_s1 + $0x50] sm:$0xff]   ;;  %vm457_vm2 = vcmask 1046528   ;;  %s711_s25 = sshll.u32 %s1020_s16, 3 }
   0xe   : > { %767 = vmatpush3.bf16.msra.mxu1 %v818_v2  ;;  %748 = vmatprep.subr.bf16.mxu0 %v852_v1  ;;  %v824_v8 = vld [vmem:[%s1015_s1 + $0x20] sm:$0xff]   ;;  %s929_s10 = scalar_lea.vmem %s1014_s0, %s806_s29  ;;  %v826_v10 = vld [vmem:[%s1015_s1 + $0x18] sm:$0xff]   ;;  %v828_v16 = vld [vmem:[%s1015_s1 + $0x10] sm:$0xff]   ;;  %s197_s28 = scalar_lea.vmem %s1018_s4, %s711_s25 }
   0xf   : > { %768 = vmatprep.subr.bf16.mxu1 %v852_v1  ;;  %782 = vmatprep.mubr.msk.bf16.mxu1 %vm853_vm0, %v852_v1  ;;  %v199_v11 = vld [vmem:[%s929_s10] sm:$0xf]  ;;  %v200_v12 = vld [vmem:[%s929_s10 + $0x4] sm:$0xf]  ;;  %v829_v18 = vld [vmem:[%s1015_s1 + $0x48] sm:$0xff]  }
  0x10   : > { %v662_v14 = vcombine.low %v199_v11, %v200_v12  ;;  %v834_v15 = vld [vmem:[%s929_s10 + $0x8] ss:$0 sps:$4 sm:$0x11]   ;;  %v831_v23 = vld [vmem:[%s1015_s1 + $0x40] sm:$0xff]   ;;  %v835_v28 = vld [vmem:[%s1015_s1 + $0xb8] sm:$0xff]  }
  0x11   : > { %749 = vmatpush3.bf16.msra.mxu0 %v819_v3  ;;  %v252_v21 = vshll.u32 %v834_v15, 16  ;;  %v830_v22 = vld [vmem:[%s1015_s1 + $0x8] sm:$0xff]   ;;  %v832_v26 = vld [vmem:[%s1015_s1] sm:$0xff]   ;;  %v836_v29 = vld [vmem:[%s1015_s1 + $0xb0] sm:$0xff]   ;;  %v459_v39 = vrot.slane %v834_v15, 1 }
  0x12   : > { %769 = vmatpush3.bf16.msra.mxu1 %v820_v4  ;;  %750 = vmatprep.subr.bf16.mxu0 %v852_v1  ;;  %v247_v17 = vshll.u32 %v662_v14, 16  ;;  %v245_v19 = vshrl.u32 %v662_v14, 16  ;;  %v837_v30 = vld [vmem:[%s1015_s1 + $0xa8] sm:$0xff]   ;;  %v838_v31 = vld [vmem:[%s1015_s1 + $0xa0] sm:$0xff]   ;;  %v839_v32 = vld [vmem:[%s1015_s1 + $0x98] sm:$0xff]  }
  0x13   : > { %770 = vmatprep.subr.bf16.mxu1 %v852_v1  ;;  %v254_v25 = vrot.slane %v252_v21, 1  ;;  %v840_v33 = vld [vmem:[%s1015_s1 + $0x90] sm:$0xff]   ;;  %v436_v34 = vld [vmem:[%s929_s10] sm:$0xe]  ;;  %v841_v35 = vld [vmem:[%s1015_s1 + $0x88] sm:$0xff]  }
  0x14   : > { %v249_v20 = vrot.slane %v247_v17, 1  ;;  %v696_v36 = vcombine.low %v436_v34, %v200_v12  ;;  %v842_v37 = vld [vmem:[%s1015_s1 + $0x80] sm:$0xff]  }
  0x15   : > { %751 = vmatpush3.bf16.msra.mxu0 %v821_v5  ;;  %v705_v51 = vld [vmem:[%s1016_s2] ss:$0 sm:$0xff] }
  0x16   : > { %771 = vmatpush3.bf16.msra.mxu1 %v822_v6  ;;  %752 = vmatprep.subr.bf16.mxu0 %v852_v1  ;;  %v250_v24 = vor.u32 %v249_v20, %v245_v19  ;;  %v458_v38 = vrot.slane %v696_v36, 1  ;;  %v706_v56 = vld [vmem:[%s1017_s3] ss:$0 sm:$0xff] }
  0x17   : > { %772 = vmatprep.subr.bf16.mxu1 %v852_v1 }
  0x18   : > { %v255_v27 = vsel %vm243_vm1, %v250_v24, %v254_v25  ;;  %v460_v40 = vsel %vm457_vm2, %v458_v38, %v459_v39 }
  0x19   : > { %753 = vmatpush3.bf16.msra.mxu0 %v823_v7 }
  0x1a   : > { %773 = vmatpush3.bf16.msra.mxu1 %v824_v8  ;;  %754 = vmatprep.subr.bf16.mxu0 %v852_v1 }
  0x1b   : > { %774 = vmatprep.subr.bf16.mxu1 %v852_v1 }
  0x1d   : > { %755 = vmatpush3.bf16.msra.mxu0 %v825_v9 }
  0x1e   : > { %775 = vmatpush3.bf16.msra.mxu1 %v826_v10  ;;  %756 = vmatprep.subr.bf16.mxu0 %v852_v1 }
  0x1f   : > { %776 = vmatprep.subr.bf16.mxu1 %v852_v1 }
  0x21   : > { %757 = vmatpush3.bf16.msra.mxu0 %v827_v13 }
  0x22   : > { %777 = vmatpush3.bf16.msra.mxu1 %v828_v16  ;;  %758 = vmatprep.subr.bf16.mxu0 %v852_v1 }
  0x23   : > { %778 = vmatprep.subr.bf16.mxu1 %v852_v1 }
  0x25   : > { %759 = vmatpush3.bf16.msra.mxu0 %v829_v18 }
  0x26   : > { %779 = vmatpush3.bf16.msra.mxu1 %v830_v22  ;;  %760 = vmatprep.subr.bf16.mxu0 %v852_v1 }
  0x27   : > { %780 = vmatprep.subr.bf16.mxu1 %v852_v1 }
  0x29   : > { %761 = vmatpush3.bf16.msra.mxu0 %v831_v23 }
  0x2a   : > { %781 = vmatpush3.bf16.msra.mxu1 %v832_v26  ;;  %786 = vmatprep.subr.bf16.mxu0 %v852_v1 }
  0x2c   : > { %763 = vmatmul.mubr.bf16.vlgmr.msra.gmra.mxu0 %v255_v27 }
  0x2d   : > { %783 = vmatmul.mubr.bf16.vlgmr.msra.gmra.mxu1 %v662_v14  ;;  %787 = vmatpush3.bf16.msra.mxu0 %v835_v28 }
  0x2e   : > { %788 = vmatprep.subr.bf16.mxu0 %v852_v1  ;;  %802 = vmatprep.mubr.msk.bf16.mxu0 %vm853_vm0, %v852_v1 }
  0x31   : > { %789 = vmatpush3.bf16.msra.mxu0 %v836_v29 }
  0x32   : > { %790 = vmatprep.subr.bf16.mxu0 %v852_v1 }
  0x35   : > { %791 = vmatpush3.bf16.msra.mxu0 %v837_v30 }
  0x36   : > { %792 = vmatprep.subr.bf16.mxu0 %v852_v1 }
  0x39   : > { %793 = vmatpush3.bf16.msra.mxu0 %v838_v31 }
  0x3a   : > { %794 = vmatprep.subr.bf16.mxu0 %v852_v1 }
  0x3d   : > { %795 = vmatpush3.bf16.msra.mxu0 %v839_v32 }
  0x3e   : > { %796 = vmatprep.subr.bf16.mxu0 %v852_v1 }
  0x41   : > { %797 = vmatpush3.bf16.msra.mxu0 %v840_v33 }
  0x42   : > { %798 = vmatprep.subr.bf16.mxu0 %v852_v1 }
  0x45   : > { %799 = vmatpush3.bf16.msra.mxu0 %v841_v35 }
  0x46   : > { %800 = vmatprep.subr.bf16.mxu0 %v852_v1 }
  0x49   : > { %801 = vmatpush3.bf16.msra.mxu0 %v842_v37 }
  0x4c   : > { %803 = vmatmul.mubr.bf16.vlgmr.msra.gmra.mxu0 %v460_v40 }
  0xec   : > { %v339_v41 = vpop.f32.mrf.mxu0 }
  0xed   : > { %v429_v42 = vpop.f32.mrf.mxu1 }
  0xee   : > { %v764_v43 = vpop.f32.mrf.mxu0  ;;  %v430_v49 = vadd.f32 %v429_v42, %v339_v41 }
  0xef   : > { %v784_v44 = vpop.f32.mrf.mxu1 }
  0xf0   : > { %v342_v45 = vpop.f32.mrf.mxu0 }
  0xf1   : > { %v432_v46 = vpop.f32.mrf.mxu1 }
  0xf2   : > { %v765_v47 = vpop.f32.mrf.mxu0  ;;  %v433_v54 = vadd.f32 %v432_v46, %v342_v45 }
  0xf3   : > { %v785_v48 = vpop.f32.mrf.mxu1 }
 0x10c   : > { %v544_v50 = vpop.f32.mrf.mxu0 }
 0x10d   : > { %v551_v52 = vadd.f32 %v544_v50, %v430_v49 }
 0x10e   : > { %v804_v53 = vpop.f32.mrf.mxu0 }
 0x10f   : > { %v560_v55 = vmul.f32 %v705_v51, %v551_v52 }
 0x110   : > { %v547_v57 = vpop.f32.mrf.mxu0 }
 0x111   : > { %v552_v58 = vadd.f32 %v547_v57, %v433_v54  ;;  %v569_v60 = vadd.f32 %v706_v56, %v560_v55 }
 0x112   : > { %v805_v59 = vpop.f32.mrf.mxu0 }
 0x113   : > { %v561_v61 = vmul.f32 %v705_v51, %v552_v58  ;;  %v571_v63 = vmax.f32 %v569_v60, 0.0 }
 0x115   : > { %v570_v62 = vadd.f32 %v706_v56, %v561_v61 }
 0x117   : > { %v572_v0 = vmax.f32 %v570_v62, 0.0 }
 0x119   : > { %v717_v1 = vpack.c.bf16 %v572_v0, %v571_v63 }
 0x11b   : > { %718 = vst [vmem:[%s197_s28] sm:$0xff] %v717_v1  }
 0x11c PF: > { %s14_s15 = sadd.s32 1, %s850_s15  }
 0x11d   : > { %p11_p4 = scmp.ge.s32.totalorder %s14_s15, 4  }
 0x11f   :  { %13 = sbr.rel (!%p11_p4) target bundleno = 1 (0x1), region = 68 }

// kernel: transformer_forward.25
= control target key start
LH: loop header
LB: loop body
LE: loop exit
PB: predicated region body
PF: predicated region fallthrough
CT: control target
= control target key end

     0   :  { %s956_s18 = smov 0   ;;  %s1094_s0 = inlined_call_operand.vmem [shape: bf16[2,18,128], index: 0, kind: input, shape index: {}]   ;;  %s1095_s1 = inlined_call_operand.vmem [shape: bf16[3,128,128], index: 1, kind: input, shape index: {}]   ;;  %s1096_s2 = inlined_call_operand.vmem [shape: f32[1,128], index: 2, kind: input, shape index: {}]   ;;  %s1097_s3 = inlined_call_operand.vmem [shape: f32[1,128], index: 3, kind: input, shape index: {}]   ;;  %s1098_s4 = inlined_call_operand.vmem [shape: bf16[2,16,128], index: 4, kind: input, shape index: {}]   ;;  %s1099_s5 = inlined_call_operand.vmem [shape: bf16[2,16,128], index: 5, kind: output, shape index: {}]  }
   0x1 LB: > { %s703_s19 = sadd.s32 4294967295, %s922_s18   ;;  %p707_p0 = scmp.ge.s32.totalorder %s922_s18, 1  ;;  %s922_s18 = sphi %s956_s18, %s15_s18  }
   0x2   : > { %p197_p1 = scmp.lt.s32.totalorder %s922_s18, 3 }
   0x4   : > { %p198_p2 = pnand %p707_p0, %p197_p1 }
   0x5   : > { %p230_p3 = scmp.lt.s32.totalorder (!%p198_p2), %s703_s19, 1 }
   0x6   : > { %201 = sbr.rel (%p198_p2) target bundleno = 286 (0x11e), region = 40 }
   0xb   : > { %v889_v0 = vld [vmem:[%s1095_s1 + $0x78] sm:$0xff]   ;;  %v924_v1 = vmov 0.0   ;;  %v891_v3 = vld [vmem:[%s1095_s1 + $0x70] sm:$0xff]   ;;  %vm925_vm0 = vmmov 0   ;;  %s1101_s19 = smov (!%p230_p3, %s703_s19), 1  ;;  %v893_v5 = vld [vmem:[%s1095_s1 + $0x68] sm:$0xff]  }
   0xc   : > { %818 = vmatprep.subr.bf16.mxu0 %v924_v1  ;;  %838 = vmatprep.subr.bf16.mxu1 %v924_v1  ;;  %v890_v2 = vld [vmem:[%s1095_s1 + $0x38] sm:$0xff]   ;;  %v892_v4 = vld [vmem:[%s1095_s1 + $0x30] sm:$0xff]   ;;  %v894_v6 = vld [vmem:[%s1095_s1 + $0x28] sm:$0xff]   ;;  %s878_s7 = smul.u32 12, %s1101_s19  ;;  %vm290_vm1 = vsmask.f32 7424 }
   0xd   : > { %819 = vmatpush3.bf16.msra.mxu0 %v889_v0  ;;  %834 = vmatprep.mubr.msk.bf16.mxu0 %vm925_vm0, %v924_v1  ;;  %v895_v7 = vld [vmem:[%s1095_s1 + $0x60] sm:$0xff]   ;;  %v897_v9 = vld [vmem:[%s1095_s1 + $0x58] sm:$0xff]   ;;  %v899_v13 = vld [vmem:[%s1095_s1 + $0x50] sm:$0xff]   ;;  %vm504_vm2 = vcmask 1046528  }
   0xe   : > { %839 = vmatpush3.bf16.msra.mxu1 %v890_v2  ;;  %820 = vmatprep.subr.bf16.mxu0 %v924_v1  ;;  %v896_v8 = vld [vmem:[%s1095_s1 + $0x20] sm:$0xff]   ;;  %s1006_s14 = scalar_lea.vmem %s1094_s0, %s878_s7  ;;  %v898_v10 = vld [vmem:[%s1095_s1 + $0x18] sm:$0xff]   ;;  %v900_v16 = vld [vmem:[%s1095_s1 + $0x10] sm:$0xff]  }
   0xf   : > { %840 = vmatprep.subr.bf16.mxu1 %v924_v1  ;;  %854 = vmatprep.mubr.msk.bf16.mxu1 %vm925_vm0, %v924_v1  ;;  %v246_v11 = vld [vmem:[%s1006_s14] sm:$0xf]  ;;  %v247_v12 = vld [vmem:[%s1006_s14 + $0x4] sm:$0xf]  ;;  %v901_v18 = vld [vmem:[%s1095_s1 + $0x48] sm:$0xff]  }
  0x10   : > { %v729_v14 = vcombine.low %v246_v11, %v247_v12  ;;  %v906_v15 = vld [vmem:[%s1006_s14 + $0x8] ss:$0 sps:$4 sm:$0x11]   ;;  %v903_v23 = vld [vmem:[%s1095_s1 + $0x40] sm:$0xff]   ;;  %v907_v28 = vld [vmem:[%s1095_s1 + $0xb8] sm:$0xff]  }
  0x11   : > { %821 = vmatpush3.bf16.msra.mxu0 %v891_v3  ;;  %v299_v21 = vshll.u32 %v906_v15, 16  ;;  %v902_v22 = vld [vmem:[%s1095_s1 + $0x8] sm:$0xff]   ;;  %v904_v26 = vld [vmem:[%s1095_s1] sm:$0xff]   ;;  %v908_v29 = vld [vmem:[%s1095_s1 + $0xb0] sm:$0xff]   ;;  %v506_v39 = vrot.slane %v906_v15, 1 }
  0x12   : > { %841 = vmatpush3.bf16.msra.mxu1 %v892_v4  ;;  %822 = vmatprep.subr.bf16.mxu0 %v924_v1  ;;  %v294_v17 = vshll.u32 %v729_v14, 16  ;;  %v292_v19 = vshrl.u32 %v729_v14, 16  ;;  %v909_v30 = vld [vmem:[%s1095_s1 + $0xa8] sm:$0xff]   ;;  %v910_v31 = vld [vmem:[%s1095_s1 + $0xa0] sm:$0xff]   ;;  %v911_v32 = vld [vmem:[%s1095_s1 + $0x98] sm:$0xff]  }
  0x13   : > { %842 = vmatprep.subr.bf16.mxu1 %v924_v1  ;;  %v301_v25 = vrot.slane %v299_v21, 1  ;;  %v912_v33 = vld [vmem:[%s1095_s1 + $0x90] sm:$0xff]   ;;  %v483_v34 = vld [vmem:[%s1006_s14] sm:$0xe]  ;;  %v913_v35 = vld [vmem:[%s1095_s1 + $0x88] sm:$0xff]   ;;  %s778_s14 = sshll.u32 %s1101_s19, 3 }
  0x14   : > { %v296_v20 = vrot.slane %v294_v17, 1  ;;  %v763_v36 = vcombine.low %v483_v34, %v247_v12  ;;  %v914_v37 = vld [vmem:[%s1095_s1 + $0x80] sm:$0xff]   ;;  %s239_s29 = scalar_lea.vmem %s1098_s4, %s778_s14  ;;  %s244_s10 = scalar_lea.vmem %s1099_s5, %s778_s14 }
  0x15   : > { %823 = vmatpush3.bf16.msra.mxu0 %v893_v5  ;;  %v772_v51 = vld [vmem:[%s1096_s2] ss:$0 sm:$0xff] }
  0x16   : > { %843 = vmatpush3.bf16.msra.mxu1 %v894_v6  ;;  %824 = vmatprep.subr.bf16.mxu0 %v924_v1  ;;  %v297_v24 = vor.u32 %v296_v20, %v292_v19  ;;  %v505_v38 = vrot.slane %v763_v36, 1  ;;  %v773_v53 = vld [vmem:[%s1097_s3] ss:$0 sm:$0xff] }
  0x17   : > { %844 = vmatprep.subr.bf16.mxu1 %v924_v1  ;;  %v783_v54 = vld [vmem:[%s239_s29] sm:$0xff]  }
  0x18   : > { %v302_v27 = vsel %vm290_vm1, %v297_v24, %v301_v25  ;;  %v507_v40 = vsel %vm504_vm2, %v505_v38, %v506_v39  ;;  %v784_v60 = vunpack.c.l.bf16 %v783_v54  ;;  %v785_v0 = vunpack.c.h.bf16 %v783_v54 }
  0x19   : > { %825 = vmatpush3.bf16.msra.mxu0 %v895_v7 }
  0x1a   : > { %845 = vmatpush3.bf16.msra.mxu1 %v896_v8  ;;  %826 = vmatprep.subr.bf16.mxu0 %v924_v1 }
  0x1b   : > { %846 = vmatprep.subr.bf16.mxu1 %v924_v1 }
  0x1d   : > { %827 = vmatpush3.bf16.msra.mxu0 %v897_v9 }
  0x1e   : > { %847 = vmatpush3.bf16.msra.mxu1 %v898_v10  ;;  %828 = vmatprep.subr.bf16.mxu0 %v924_v1 }
  0x1f   : > { %848 = vmatprep.subr.bf16.mxu1 %v924_v1 }
  0x21   : > { %829 = vmatpush3.bf16.msra.mxu0 %v899_v13 }
  0x22   : > { %849 = vmatpush3.bf16.msra.mxu1 %v900_v16  ;;  %830 = vmatprep.subr.bf16.mxu0 %v924_v1 }
  0x23   : > { %850 = vmatprep.subr.bf16.mxu1 %v924_v1 }
  0x25   : > { %831 = vmatpush3.bf16.msra.mxu0 %v901_v18 }
  0x26   : > { %851 = vmatpush3.bf16.msra.mxu1 %v902_v22  ;;  %832 = vmatprep.subr.bf16.mxu0 %v924_v1 }
  0x27   : > { %852 = vmatprep.subr.bf16.mxu1 %v924_v1 }
  0x29   : > { %833 = vmatpush3.bf16.msra.mxu0 %v903_v23 }
  0x2a   : > { %853 = vmatpush3.bf16.msra.mxu1 %v904_v26  ;;  %858 = vmatprep.subr.bf16.mxu0 %v924_v1 }
  0x2c   : > { %835 = vmatmul.mubr.bf16.vlgmr.msra.gmra.mxu0 %v302_v27 }
  0x2d   : > { %855 = vmatmul.mubr.bf16.vlgmr.msra.gmra.mxu1 %v729_v14  ;;  %859 = vmatpush3.bf16.msra.mxu0 %v907_v28 }
  0x2e   : > { %860 = vmatprep.subr.bf16.mxu0 %v924_v1  ;;  %874 = vmatprep.mubr.msk.bf16.mxu0 %vm925_vm0, %v924_v1 }
  0x31   : > { %861 = vmatpush3.bf16.msra.mxu0 %v908_v29 }
  0x32   : > { %862 = vmatprep.subr.bf16.mxu0 %v924_v1 }
  0x35   : > { %863 = vmatpush3.bf16.msra.mxu0 %v909_v30 }
  0x36   : > { %864 = vmatprep.subr.bf16.mxu0 %v924_v1 }
  0x39   : > { %865 = vmatpush3.bf16.msra.mxu0 %v910_v31 }
  0x3a   : > { %866 = vmatprep.subr.bf16.mxu0 %v924_v1 }
  0x3d   : > { %867 = vmatpush3.bf16.msra.mxu0 %v911_v32 }
  0x3e   : > { %868 = vmatprep.subr.bf16.mxu0 %v924_v1 }
  0x41   : > { %869 = vmatpush3.bf16.msra.mxu0 %v912_v33 }
  0x42   : > { %870 = vmatprep.subr.bf16.mxu0 %v924_v1 }
  0x45   : > { %871 = vmatpush3.bf16.msra.mxu0 %v913_v35 }
  0x46   : > { %872 = vmatprep.subr.bf16.mxu0 %v924_v1 }
  0x49   : > { %873 = vmatpush3.bf16.msra.mxu0 %v914_v37 }
  0x4c   : > { %875 = vmatmul.mubr.bf16.vlgmr.msra.gmra.mxu0 %v507_v40 }
  0xec   : > { %v386_v41 = vpop.f32.mrf.mxu0 }
  0xed   : > { %v476_v42 = vpop.f32.mrf.mxu1 }
  0xee   : > { %v836_v43 = vpop.f32.mrf.mxu0  ;;  %v477_v49 = vadd.f32 %v476_v42, %v386_v41 }
  0xef   : > { %v856_v44 = vpop.f32.mrf.mxu1 }
  0xf0   : > { %v389_v45 = vpop.f32.mrf.mxu0 }
  0xf1   : > { %v479_v46 = vpop.f32.mrf.mxu1 }
  0xf2   : > { %v837_v47 = vpop.f32.mrf.mxu0  ;;  %v480_v56 = vadd.f32 %v479_v46, %v389_v45 }
  0xf3   : > { %v857_v48 = vpop.f32.mrf.mxu1 }
 0x10c   : > { %v591_v50 = vpop.f32.mrf.mxu0 }
 0x10d   : > { %v598_v52 = vadd.f32 %v591_v50, %v477_v49 }
 0x10e   : > { %v876_v55 = vpop.f32.mrf.mxu0 }
 0x10f   : > { %v607_v57 = vmul.f32 %v772_v51, %v598_v52 }
 0x110   : > { %v594_v58 = vpop.f32.mrf.mxu0 }
 0x111   : > { %v616_v59 = vadd.f32 %v773_v53, %v607_v57  ;;  %v599_v61 = vadd.f32 %v594_v58, %v480_v56 }
 0x112   : > { %v877_v62 = vpop.f32.mrf.mxu0 }
 0x113   : > { %v608_v63 = vmul.f32 %v772_v51, %v599_v61  ;;  %v622_v1 = vadd.f32 %v784_v60, %v616_v59 }
 0x115   : > { %v617_v2 = vadd.f32 %v773_v53, %v608_v63  ;;  %v624_v4 = vmax.f32 %v622_v1, 0.0 }
 0x117   : > { %v623_v3 = vadd.f32 %v785_v0, %v617_v2 }
 0x119   : > { %v625_v5 = vmax.f32 %v623_v3, 0.0 }
 0x11b   : > { %v789_v6 = vpack.c.bf16 %v625_v5, %v624_v4 }
 0x11d   : > { %790 = vst [vmem:[%s244_s10] sm:$0xff] %v789_v6  }
 0x11e PF: > { %s15_s18 = sadd.s32 1, %s922_s18  }
 0x11f   : > { %p12_p4 = scmp.ge.s32.totalorder %s15_s18, 4  }
 0x121   :  { %14 = sbr.rel (!%p12_p4) target bundleno = 1 (0x1), region = 75 }

// kernel: transformer_forward.27
= control target key start
LH: loop header
LB: loop body
LE: loop exit
PB: predicated region body
PF: predicated region fallthrough
CT: control target
= control target key end

     0   :  { %v449_v1 = vmov 0   ;;  %s567_s1 = inlined_call_operand.vmem [shape: bf16[128,384], index: 1, kind: input, shape index: {}]   ;;  %s568_s0 = inlined_call_operand.vmem [shape: bf16[32,128], index: 0, kind: input, shape index: {}]   ;;  %s569_s2 = inlined_call_operand.vmem [shape: bf16[32,384], index: 2, kind: output, shape index: {}]  }
   0x1   :  { %v415_v0 = vld [vmem:[%s567_s1 + $0xac] ss:$12 sps:$4 sm:$0xff]   ;;  %220 = vmatprep.mubr.bf16.mxu0 %v449_v1  ;;  %v417_v2 = vld [vmem:[%s567_s1 + $0xa8] ss:$12 sps:$4 sm:$0xff]   ;;  %v418_v3 = vld [vmem:[%s567_s1 + $0xb0] ss:$12 sps:$4 sm:$0xff]  }
   0x2   :  { %188 = vmatprep.subr.bf16.mxu0 %v415_v0  ;;  %v419_v4 = vld [vmem:[%s567_s1 + $0x94] ss:$12 sps:$4 sm:$0xff]   ;;  %v421_v5 = vld [vmem:[%s567_s1 + $0x90] ss:$12 sps:$4 sm:$0xff]   ;;  %394 = vmatprep.subr.bf16.mxu1 %v418_v3  ;;  %v422_v6 = vld [vmem:[%s567_s1 + $0x98] ss:$12 sps:$4 sm:$0xff]  }
   0x3   :  { %189 = vmatpush1.bf16.msra.mxu0 %v417_v2  ;;  %395 = vmatpush3.bf16.msra.mxu1 %v418_v3  ;;  %v423_v7 = vld [vmem:[%s567_s1 + $0x7c] ss:$12 sps:$4 sm:$0xff]   ;;  %v426_v8 = vld [vmem:[%s567_s1 + $0x80] ss:$12 sps:$4 sm:$0xff]   ;;  %v425_v9 = vld [vmem:[%s567_s1 + $0x78] ss:$12 sps:$4 sm:$0xff]  }
   0x4   :  { %190 = vmatprep.subr.bf16.mxu0 %v419_v4  ;;  %396 = vmatprep.subr.bf16.mxu1 %v422_v6  ;;  %v427_v10 = vld [vmem:[%s567_s1 + $0x64] ss:$12 sps:$4 sm:$0xff]   ;;  %v430_v11 = vld [vmem:[%s567_s1 + $0x68] ss:$12 sps:$4 sm:$0xff]   ;;  %v429_v12 = vld [vmem:[%s567_s1 + $0x60] ss:$12 sps:$4 sm:$0xff]  }
   0x5   :  { %v431_v13 = vld [vmem:[%s567_s1 + $0x4c] ss:$12 sps:$4 sm:$0xff]   ;;  %v434_v14 = vld [vmem:[%s567_s1 + $0x50] ss:$12 sps:$4 sm:$0xff]   ;;  %v433_v15 = vld [vmem:[%s567_s1 + $0x48] ss:$12 sps:$4 sm:$0xff]  }
   0x6   :  { %v435_v16 = vld [vmem:[%s567_s1 + $0x34] ss:$12 sps:$4 sm:$0xff]   ;;  %v437_v17 = vld [vmem:[%s567_s1 + $0x30] ss:$12 sps:$4 sm:$0xff]   ;;  %v438_v18 = vld [vmem:[%s567_s1 + $0x38] ss:$12 sps:$4 sm:$0xff]  }
   0x7   :  { %191 = vmatpush1.bf16.msra.mxu0 %v421_v5  ;;  %397 = vmatpush3.bf16.msra.mxu1 %v422_v6  ;;  %v447_v19 = vld [vmem:[%s568_s0] sm:$0xff]   ;;  %v439_v20 = vld [vmem:[%s567_s1 + $0x1c] ss:$12 sps:$4 sm:$0xff]  }
   0x8   :  { %192 = vmatprep.subr.bf16.mxu0 %v423_v7  ;;  %398 = vmatprep.subr.bf16.mxu1 %v426_v8  ;;  %v442_v21 = vld [vmem:[%s567_s1 + $0x20] ss:$12 sps:$4 sm:$0xff]   ;;  %v441_v22 = vld [vmem:[%s567_s1 + $0x18] ss:$12 sps:$4 sm:$0xff]   ;;  %v446_v24 = vld [vmem:[%s567_s1 + $0x8] ss:$12 sps:$4 sm:$0xff]  }
   0x9   :  { %410 = vmatprep.mubr.bf16.mxu1 %v447_v19  ;;  %v443_v23 = vld [vmem:[%s567_s1 + $0x4] ss:$12 sps:$4 sm:$0xff]   ;;  %v445_v25 = vld [vmem:[%s567_s1] ss:$12 sps:$4 sm:$0xff]  }
   0xa   :  { %v448_v26 = vld [vmem:[%s568_s0 + $0x8] sm:$0xff]  }
   0xb   :  { %193 = vmatpush1.bf16.msra.mxu0 %v425_v9  ;;  %399 = vmatpush3.bf16.msra.mxu1 %v426_v8 }
   0xc   :  { %194 = vmatprep.subr.bf16.mxu0 %v427_v10  ;;  %400 = vmatprep.subr.bf16.mxu1 %v430_v11 }
   0xf   :  { %195 = vmatpush1.bf16.msra.mxu0 %v429_v12  ;;  %401 = vmatpush3.bf16.msra.mxu1 %v430_v11 }
  0x10   :  { %196 = vmatprep.subr.bf16.mxu0 %v431_v13  ;;  %402 = vmatprep.subr.bf16.mxu1 %v434_v14 }
  0x13   :  { %197 = vmatpush1.bf16.msra.mxu0 %v433_v15  ;;  %403 = vmatpush3.bf16.msra.mxu1 %v434_v14 }
  0x14   :  { %198 = vmatprep.subr.bf16.mxu0 %v435_v16  ;;  %404 = vmatprep.subr.bf16.mxu1 %v438_v18 }
  0x17   :  { %199 = vmatpush1.bf16.msra.mxu0 %v437_v17  ;;  %405 = vmatpush3.bf16.msra.mxu1 %v438_v18 }
  0x18   :  { %200 = vmatprep.subr.bf16.mxu0 %v439_v20  ;;  %406 = vmatprep.subr.bf16.mxu1 %v442_v21 }
  0x1b   :  { %201 = vmatpush1.bf16.msra.mxu0 %v441_v22  ;;  %407 = vmatpush3.bf16.msra.mxu1 %v442_v21 }
  0x1c   :  { %202 = vmatprep.subr.bf16.mxu0 %v443_v23  ;;  %408 = vmatprep.subr.bf16.mxu1 %v446_v24 }
  0x1f   :  { %203 = vmatpush1.bf16.msra.mxu0 %v445_v25  ;;  %409 = vmatpush3.bf16.msra.mxu1 %v446_v24 }
  0x22   :  { %221 = vmatmul.mubr.bf16.vlgmr.msra.gmra.mxu0 %v447_v19  ;;  %411 = vmatmul.mubr.bf16.vlgmr.msra.gmra.mxu1 %v448_v26 }
  0x23   :  { %230 = vmatprep.mubr.bf16.mxu0 %v449_v1 }
  0x2a   :  { %231 = vmatmul.mubr.bf16.gmra.mxu0 %v448_v26 }
  0xe2   :  { %v222_v27 = vpop.f32.mrf.mxu0  ;;  %v412_v29 = vpop.f32.mrf.mxu1 }
  0xe3   :  { %v381_v31 = vpack.c.bf16 %v412_v29, %v412_v29 }
  0xe4   :  { %v224_v28 = vpop.f32.mrf.mxu0  ;;  %v275_v33 = vpop.f32.mrf.mxu1 }
  0xe5   :  { %v376_v30 = vpack.c.bf16 %v224_v28, %v222_v27  ;;  %335 = vst [vmem:[%s569_s2 + $0x20] sm:$0xf] %v381_v31  ;;  %v377_v34 = vpack.c.bf16 %v275_v33, %v275_v33 }
  0xe6   :  { %v226_v32 = vpop.f32.mrf.mxu0  ;;  %v413_v36 = vpop.f32.mrf.mxu1 }
  0xe7   :  { %330 = vst [vmem:[%s569_s2] sm:$0xff] %v376_v30  ;;  %331 = vst [vmem:[%s569_s2 + $0x8] sm:$0xf] %v377_v34  ;;  %v383_v38 = vpack.c.bf16 %v413_v36, %v413_v36 }
  0xe8   :  { %v228_v35 = vpop.f32.mrf.mxu0  ;;  %v278_v40 = vpop.f32.mrf.mxu1 }
  0xe9   :  { %v378_v37 = vpack.c.bf16 %v228_v35, %v226_v32  ;;  %337 = vst [vmem:[%s569_s2 + $0x2c] sm:$0xf] %v383_v38  ;;  %v379_v41 = vpack.c.bf16 %v278_v40, %v278_v40 }
  0xea   :  { %v232_v39 = vpop.f32.mrf.mxu0 }
  0xeb   :  { %332 = vst [vmem:[%s569_s2 + $0xc] sm:$0xff] %v378_v37  ;;  %333 = vst [vmem:[%s569_s2 + $0x14] sm:$0xf] %v379_v41 }
  0xec   :  { %v234_v42 = vpop.f32.mrf.mxu0 }
  0xed   :  { %v380_v43 = vpack.c.bf16 %v234_v42, %v232_v39 }
  0xee   :  { %v236_v44 = vpop.f32.mrf.mxu0 }
  0xef   :  { %334 = vst [vmem:[%s569_s2 + $0x18] sm:$0xff] %v380_v43 }
  0xf0   :  { %v238_v45 = vpop.f32.mrf.mxu0 }
  0xf1   :  { %v382_v46 = vpack.c.bf16 %v238_v45, %v236_v44 }
  0xf3   :  { %336 = vst [vmem:[%s569_s2 + $0x24] sm:$0xff] %v382_v46 }

// kernel: transformer_forward.29
= control target key start
LH: loop header
LB: loop body
LE: loop exit
PB: predicated region body
PF: predicated region fallthrough
CT: control target
= control target key end

     0   :  { %s415_s1 = inlined_call_operand.vmem [shape: bf16[128,128], index: 1, kind: input, shape index: {}]   ;;  %s416_s0 = inlined_call_operand.vmem [shape: bf16[32,128], index: 0, kind: input, shape index: {}]   ;;  %s417_s2 = inlined_call_operand.vmem [shape: bf16[32,128], index: 2, kind: input, shape index: {}]   ;;  %s418_s3 = inlined_call_operand.vmem [shape: f32[1,128], index: 3, kind: input, shape index: {}]   ;;  %s419_s4 = inlined_call_operand.vmem [shape: f32[1,128], index: 4, kind: input, shape index: {}]   ;;  %s420_s5 = inlined_call_operand.vmem [shape: bf16[32,128], index: 5, kind: output, shape index: {}]  }
   0x1   :  { %v319_v0 = vld [vmem:[%s415_s1 + $0x38] sm:$0xff]   ;;  %v320_v1 = vld [vmem:[%s415_s1 + $0x30] sm:$0xff]   ;;  %v321_v2 = vld [vmem:[%s415_s1 + $0x28] sm:$0xff]  }
   0x2   :  { %299 = vmatprep.subr.bf16.mxu0 %v319_v0  ;;  %v322_v3 = vld [vmem:[%s415_s1 + $0x20] sm:$0xff]   ;;  %v323_v5 = vld [vmem:[%s415_s1 + $0x18] sm:$0xff]   ;;  %v324_v6 = vld [vmem:[%s415_s1 + $0x10] sm:$0xff]  }
   0x3   :  { %300 = vmatpush3.bf16.msra.mxu0 %v319_v0  ;;  %v327_v4 = vld [vmem:[%s416_s0] sm:$0xff]   ;;  %v325_v7 = vld [vmem:[%s415_s1 + $0x8] sm:$0xff]  }
   0x4   :  { %301 = vmatprep.subr.bf16.mxu0 %v320_v1  ;;  %315 = vmatprep.mubr.bf16.mxu0 %v327_v4  ;;  %v326_v8 = vld [vmem:[%s415_s1] sm:$0xff]   ;;  %v328_v9 = vld [vmem:[%s416_s0 + $0x8] sm:$0xff]  }
   0x5   :  { %v287_v10 = vld [vmem:[%s417_s2 + $0x8] sm:$0xff]   ;;  %v270_v11 = vld [vmem:[%s417_s2] sm:$0xff]  }
   0x6   :  { %v275_v12 = vunpack.c.l.bf16 %v287_v10  ;;  %v271_v13 = vunpack.c.l.bf16 %v270_v11  ;;  %v276_v16 = vunpack.c.h.bf16 %v287_v10  ;;  %v272_v19 = vunpack.c.h.bf16 %v270_v11  ;;  %v259_v54 = vld [vmem:[%s418_s3] ss:$0 sm:$0xff] }
   0x7   :  { %302 = vmatpush3.bf16.msra.mxu0 %v320_v1  ;;  %v260_v59 = vld [vmem:[%s419_s4] ss:$0 sm:$0xff] }
   0x8   :  { %303 = vmatprep.subr.bf16.mxu0 %v321_v2 }
   0xb   :  { %304 = vmatpush3.bf16.msra.mxu0 %v321_v2 }
   0xc   :  { %305 = vmatprep.subr.bf16.mxu0 %v322_v3 }
   0xf   :  { %306 = vmatpush3.bf16.msra.mxu0 %v322_v3 }
  0x10   :  { %307 = vmatprep.subr.bf16.mxu0 %v323_v5 }
  0x13   :  { %308 = vmatpush3.bf16.msra.mxu0 %v323_v5 }
  0x14   :  { %309 = vmatprep.subr.bf16.mxu0 %v324_v6 }
  0x17   :  { %310 = vmatpush3.bf16.msra.mxu0 %v324_v6 }
  0x18   :  { %311 = vmatprep.subr.bf16.mxu0 %v325_v7 }
  0x1b   :  { %312 = vmatpush3.bf16.msra.mxu0 %v325_v7 }
  0x1c   :  { %313 = vmatprep.subr.bf16.mxu0 %v326_v8 }
  0x1f   :  { %314 = vmatpush3.bf16.msra.mxu0 %v326_v8 }
  0x22   :  { %316 = vmatmul.mubr.bf16.vlgmr.msra.gmra.mxu0 %v328_v9 }
  0xe2   :  { %v317_v14 = vpop.f32.mrf.mxu0 }
  0xe3   :  { %v152_v15 = vadd.f32 %v317_v14, %v275_v12 }
  0xe4   :  { %v143_v17 = vpop.f32.mrf.mxu0 }
  0xe5   :  { %v144_v18 = vadd.f32 %v271_v13, %v143_v17  ;;  %162 = vadd.xlane.f32.xlu1 %v152_v15 }
  0xe6   :  { %v318_v20 = vpop.f32.mrf.mxu0 }
  0xe7   :  { %v155_v21 = vadd.f32 %v318_v20, %v276_v16  ;;  %158 = vadd.xlane.f32.xlu0 %v144_v18 }
  0xe8   :  { %v146_v22 = vpop.f32.mrf.mxu0 }
  0xe9   :  { %v147_v23 = vadd.f32 %v272_v19, %v146_v22  ;;  %164 = vadd.xlane.f32.xlu1 %v155_v21 }
  0xeb   :  { %160 = vadd.xlane.f32.xlu0 %v147_v23 }
 0x16e   :  { %v163_v24 = vpop.xlane.xlu1 %162 }
 0x16f   :  { %v169_v26 = vmul.f32 0.0078125, %v163_v24 }
 0x170   :  { %v159_v25 = vpop.xlane.xlu0 %158 }
 0x171   :  { %v167_v27 = vmul.f32 0.0078125, %v159_v25  ;;  %v173_v31 = vsub.f32 %v152_v15, %v169_v26 }
 0x172   :  { %v165_v28 = vpop.xlane.xlu1 %164 }
 0x173   :  { %v171_v29 = vsub.f32 %v144_v18, %v167_v27  ;;  %v170_v32 = vmul.f32 0.0078125, %v165_v28  ;;  %v177_v37 = vmul.f32 %v173_v31, %v173_v31 }
 0x174   :  { %v161_v30 = vpop.xlane.xlu0 %160 }
 0x175   :  { %v168_v33 = vmul.f32 0.0078125, %v161_v30  ;;  %v175_v34 = vmul.f32 %v171_v29, %v171_v29  ;;  %v174_v36 = vsub.f32 %v155_v21, %v170_v32 }
 0x177   :  { %v172_v35 = vsub.f32 %v147_v23, %v168_v33  ;;  %179 = vadd.xlane.f32.xlu0 %v175_v34  ;;  %v178_v39 = vmul.f32 %v174_v36, %v174_v36 }
 0x179   :  { %v176_v38 = vmul.f32 %v172_v35, %v172_v35 }
 0x17b   :  { %183 = vadd.xlane.f32.xlu0 %v177_v37  ;;  %181 = vadd.xlane.f32.xlu1 %v176_v38 }
 0x17f   :  { %185 = vadd.xlane.f32.xlu1 %v178_v39 }
 0x200   :  { %v180_v40 = vpop.xlane.xlu0 %179 }
 0x201   :  { %v187_v41 = vmul.f32 0.0078125, %v180_v40 }
 0x203   :  { %v191_v42 = vadd.f32 1e-05, %v187_v41 }
 0x204   :  { %v182_v43 = vpop.xlane.xlu1 %181  ;;  %v184_v44 = vpop.xlane.xlu0 %183 }
 0x205   :  { %329 = vrsqrt.f32 %v191_v42  ;;  %v188_v45 = vmul.f32 0.0078125, %v182_v43  ;;  %v189_v46 = vmul.f32 0.0078125, %v184_v44 }
 0x207   :  { %v192_v47 = vadd.f32 1e-05, %v188_v45  ;;  %v193_v48 = vadd.f32 1e-05, %v189_v46 }
 0x208   :  { %v186_v49 = vpop.xlane.xlu1 %185 }
 0x209   :  { %331 = vrsqrt.f32 %v192_v47  ;;  %v190_v50 = vmul.f32 0.0078125, %v186_v49 }
 0x20a   :  { %333 = vrsqrt.f32 %v193_v48 }
 0x20b   :  { %v194_v51 = vadd.f32 1e-05, %v190_v50 }
 0x20d   :  { %335 = vrsqrt.f32 %v194_v51 }
 0x212   :  { %v330_v52 = vpop.eup %329 }
 0x213   :  { %v199_v53 = vmul.f32 %v330_v52, %v171_v29 }
 0x215   :  { %v210_v57 = vmul.f32 %v259_v54, %v199_v53 }
 0x216   :  { %v332_v55 = vpop.eup %331 }
 0x217   :  { %v334_v56 = vpop.eup %333  ;;  %v200_v58 = vmul.f32 %v332_v55, %v172_v35  ;;  %v221_v63 = vadd.f32 %v260_v59, %v210_v57 }
 0x218   :  { %v201_v60 = vmul.f32 %v334_v56, %v173_v31 }
 0x219   :  { %v211_v61 = vmul.f32 %v259_v54, %v200_v58 }
 0x21a   :  { %v336_v62 = vpop.eup %335  ;;  %v212_v1 = vmul.f32 %v259_v54, %v201_v60 }
 0x21b   :  { %v222_v0 = vadd.f32 %v260_v59, %v211_v61  ;;  %v202_v2 = vmul.f32 %v336_v62, %v174_v36 }
 0x21c   :  { %v223_v5 = vadd.f32 %v260_v59, %v212_v1 }
 0x21d   :  { %v280_v3 = vpack.c.bf16 %v222_v0, %v221_v63  ;;  %v213_v4 = vmul.f32 %v259_v54, %v202_v2 }
 0x21f   :  { %281 = vst [vmem:[%s420_s5] sm:$0xff] %v280_v3   ;;  %v224_v6 = vadd.f32 %v260_v59, %v213_v4 }
 0x221   :  { %v285_v7 = vpack.c.bf16 %v224_v6, %v223_v5 }
 0x223   :  { %288 = vst [vmem:[%s420_s5 + $0x8] sm:$0xff] %v285_v7  }

// kernel: transformer_forward.28
= control target key start
LH: loop header
LB: loop body
LE: loop exit
PB: predicated region body
PF: predicated region fallthrough
CT: control target
= control target key end

     0   :  { %s2407_s15 = smov 0   ;;  %s2409_s16 = smov 0   ;;  %s2814_s0 = inlined_call_operand.vmem [shape: bf16[2,16,384], index: 0, kind: input, shape index: {}, may-alias: {0,1,2}]   ;;  %s2815_s1 = inlined_call_operand.vmem [shape: bf16[2,16,384], index: 1, kind: input, shape index: {}, may-alias: {0,1,2}]   ;;  %s2816_s2 = inlined_call_operand.vmem [shape: bf16[2,16,384], index: 2, kind: input, shape index: {}, may-alias: {0,1,2}]   ;;  %s2817_s3 = inlined_call_operand.vmem [shape: bf16[2,8,16,16], index: 3, kind: input, shape index: {}]   ;;  %s2818_s4 = inlined_call_operand.vmem [shape: bf16[2,16,128], index: 4, kind: output, shape index: {}]  }
   0x1   :  { %s2411_s17 = smov 0   ;;  %s2413_s18 = smov 0  }
   0x2   :  { %s2415_s19 = smov 0  }
   0x3 LB: > { %s26_s20 = sadd.s32 1, %s2367_s18  ;;  %p42_p1 = scmp.ne.s32.totalorder %s2359_s16, %s2355_s15  ;;  %s2371_s19 = sphi %s2415_s19, %s14_s19   ;;  %s2367_s18 = sphi %s2413_s18, %s2823_s18   ;;  %s2363_s17 = sphi %s2411_s17, %s2822_s17   ;;  %s2359_s16 = sphi %s2409_s16, %s2821_s16   ;;  %s2355_s15 = sphi %s2407_s15, %s2820_s15  }
   0x4   : > { %p28_p0 = scmp.ge.s32.totalorder %s26_s20, 2  ;;  %p43_p2 = scmp.eq.s32.totalorder %s2371_s19, 0 }
   0x5   : > { %s35_s23 = sadd.s32 1, %s2359_s16  ;;  %p1919_p5 = scmp.ge.s32.totalorder %s2371_s19, 2 }
   0x6   : > { %s2825_s20 = smov (%p28_p0, %s26_s20), 0  ;;  %p2438_p3 = por %p43_p2, %p42_p1 }
   0x7   : > { %s30_s22 = ssub.s32 %s2367_s18, %s2825_s20  ;;  %176 = sbr.rel (%p1919_p5) target bundleno = 30 (0x1e), region = 16 }
   0x8   : > { %p33_p4 = scmp.eq.s32.totalorder %s30_s22, 0 }
   0xa   : > { %s2446_s24 = scalar_select %p33_p4, %s2359_s16, %s35_s23  }
   0xc   : > { %179 = sbr.rel (!%p2438_p3) target bundleno = 18 (0x12), region = 20  ;;  %s181_s25 = sand.u32 (%p2438_p3), 1, %s2359_s16  }
   0xd   : > { %s2195_s26 = smul.u32 (%p2438_p3), 24, %s2367_s18  ;;  %s1920_s27 = sshll.u32 (%p2438_p3), %s181_s25, 3 }
   0xe   : > { %s183_s5 = scalar_lea.vmem (%p2438_p3), [#allocation2], %s1920_s27 }
   0xf   : > { %s189_s30 = scalar_lea.vmem (%p2438_p3), %s2814_s0, %s2195_s26 }
  0x10   : > { %v206_v0 = vld [vmem:[%s189_s30] sm:$0xf] (%p2438_p3)  ;;  %v208_v1 = vld [vmem:[%s189_s30 + $0xc] sm:$0xf] (%p2438_p3) }
  0x11   : > { %207 = vst [vmem:[%s183_s5] sm:$0xf] %v206_v0  ;;  %209 = vst [vmem:[%s183_s5 + $0x4] sm:$0xf] %v208_v1 }
  0x12 PF: > { %237 = sbr.rel (!%p2438_p3) target bundleno = 24 (0x18), region = 61  ;;  %s239_s6 = sand.u32 (%p2438_p3), 1, %s2359_s16  }
  0x13   : > { %s1923_s7 = smul.u32 (%p2438_p3), 24, %s2367_s18  ;;  %s1922_s8 = sshll.u32 (%p2438_p3), %s239_s6, 3 }
  0x14   : > { %s241_s12 = scalar_lea.vmem (%p2438_p3), [#allocation3], %s1922_s8 }
  0x15   : > { %s1809_s11 = scalar_lea.vmem (%p2438_p3), %s2815_s1, %s1923_s7 }
  0x16   : > { %v1924_v2 = vld [vmem:[%s1809_s11 + $0x4] sm:$0xf] (%p2438_p3)  ;;  %v1925_v3 = vld [vmem:[%s1809_s11 + $0x10] sm:$0xf] (%p2438_p3) }
  0x17   : > { %263 = vst [vmem:[%s241_s12] sm:$0xf] %v1924_v2  ;;  %265 = vst [vmem:[%s241_s12 + $0x4] sm:$0xf] %v1925_v3 }
  0x18 PF: > { %293 = sbr.rel (!%p2438_p3) target bundleno = 30 (0x1e), region = 102  ;;  %s295_s13 = sand.u32 (%p2438_p3), 1, %s2359_s16  }
  0x19   : > { %s1927_s14 = smul.u32 (%p2438_p3), 24, %s2367_s18  ;;  %s1926_s22 = sshll.u32 (%p2438_p3), %s295_s13, 3 }
  0x1a   : > { %s297_s27 = scalar_lea.vmem (%p2438_p3), [#allocation4], %s1926_s22 }
  0x1b   : > { %s1815_s26 = scalar_lea.vmem (%p2438_p3), %s2816_s2, %s1927_s14 }
  0x1c   : > { %v1928_v4 = vld [vmem:[%s1815_s26 + $0x8] sm:$0xf] (%p2438_p3)  ;;  %v1929_v5 = vld [vmem:[%s1815_s26 + $0x14] sm:$0xf] (%p2438_p3) }
  0x1d   : > { %319 = vst [vmem:[%s297_s27] sm:$0xf] %v1928_v4  ;;  %321 = vst [vmem:[%s297_s27 + $0x4] sm:$0xf] %v1929_v5 }
  0x1e PF: > { %p1930_p6 = scmp.ge.s32.totalorder %s2371_s19, 1  ;;  %p361_p7 = scmp.lt.s32.totalorder %s2371_s19, 3 }
  0x20   : > { %p362_p8 = pnand %p1930_p6, %p361_p7 }
  0x21   : > { %s368_s21 = sand.u32 (!%p362_p8), 1, %s2355_s15   ;;  %p430_p9 = scmp.lt.s32.totalorder (!%p362_p8), %s2363_s17, 1 }
  0x22   : > { %365 = sbr.rel (%p362_p8) target bundleno = 1508 (0x5e4), region = 147  ;;  %s2474_s28 = sshll.u32 (!%p362_p8), %s368_s21, 3 }
  0x23   : > { %s2482_s15 = scalar_lea.vmem (!%p362_p8), [#allocation3], %s2474_s28  ;;  %s2486_s29 = scalar_lea.vmem (!%p362_p8), [#allocation2], %s2474_s28 }
  0x24   : > { %s2375_s8 = smov (!%p362_p8), 112   ;;  %s2376_s9 = smov (!%p362_p8), 80  }
  0x25   : > { %s2377_s10 = smov (!%p362_p8), 64   ;;  %s2378_s11 = smov (!%p362_p8), 48  }
  0x26   : > { %s2379_s12 = smov (!%p362_p8), 32   ;;  %s2380_s13 = smov (!%p362_p8), 16  }
  0x27   : > { %v2373_v6 = vmov 0.0   ;;  %vm2374_vm0 = vmmov 0   ;;  %vm466_vm1 = vcmask 130048   ;;  %v2245_v7 = vld [vmem:[%s2482_s15] sm:$0xff]   ;;  %v2246_v9 = vld [vmem:[%s2486_s29] sm:$0xff]   ;;  %s2827_s17 = smov (!%p430_p9, %s2363_s17), 1 }
  0x28   : > { %2099 = vmatprep.subr.bf16.mxu0 %v2373_v6  ;;  %2101 = vmatprep.mubr.msk.bf16.mxu0 %vm2374_vm0, %v2373_v6  ;;  %v471_v8 = vsel %vm466_vm1, %v2245_v7, 0  ;;  %s2010_s30 = sshll.u32 %s2827_s17, 6  ;;  %v2247_v23 = vld [vmem:[%s2482_s15] sm:$0xff]   ;;  %v2248_v39 = vld [vmem:[%s2486_s29] sm:$0xff]   ;;  %s2523_s14 = scalar_lea.vmem [#allocation4], %s2474_s28  ;;  %vm603_vm2 = vcmask 125952  }
  0x29   : > { %2105 = vmatprep.subr.bf16.mxu1 %v2373_v6  ;;  %2107 = vmatprep.mubr.msk.bf16.mxu1 %vm2374_vm0, %v2373_v6  ;;  %s2502_s7 = scalar_lea.vmem %s2817_s3, %s2010_s30  ;;  %v2250_v24 = vld [vmem:[%s2482_s15] sm:$0xff]   ;;  %v2261_v40 = vld [vmem:[%s2523_s14] sm:$0xff]   ;;  %s2381_s22 = smov 96   ;;  %vm769_vm3 = vcmask 257152   ;;  %vm935_vm4 = vcmask 388352   ;;  %vm1101_vm5 = vcmask 519552  }
  0x2a   : > { %2100 = vmatpush3.bf16.xpose.msra.mxu0 %v471_v8  ;;  %v2029_v10 = vld [vmem:[%s2502_s7] sm:$0xff]   ;;  %v2252_v25 = vld [vmem:[%s2482_s15] sm:$0xff]   ;;  %2106 = vmatpush3.bf16.msra.mxu1 %v2261_v40  ;;  %s2011_s23 = sshll.u32 %s2827_s17, 3  ;;  %vm1267_vm6 = vcmask 650752   ;;  %vm1433_vm7 = vcmask 781952   ;;  %vm1599_vm8 = vcmask 913152  }
  0x2b   : > { %2117 = vmatprep.subr.bf16.mxu0 %v2373_v6  ;;  %v2030_v11 = vunpack.c.l.bf16 %v2029_v10  ;;  %v2031_v16 = vunpack.c.h.bf16 %v2029_v10  ;;  %v2254_v26 = vld [vmem:[%s2482_s15] sm:$0xff]   ;;  %2111 = vmatprep.subr.bf16.mxu1 %v2373_v6  ;;  %v2251_v42 = vld [vmem:[%s2486_s29] sm:$0xff]   ;;  %s2581_s27 = scalar_lea.vmem %s2818_s4, %s2011_s23  ;;  %vm1765_vm9 = vcmask 1044352  }
  0x2c   : > { %v2256_v27 = vld [vmem:[%s2482_s15] sm:$0xff]   ;;  %v2253_v43 = vld [vmem:[%s2486_s29] sm:$0xff]  }
  0x2d   : > { %v2258_v28 = vld [vmem:[%s2482_s15] sm:$0xff]   ;;  %v2255_v44 = vld [vmem:[%s2486_s29] sm:$0xff]  }
  0x2e   : > { %v2249_v41 = vld [vmem:[%s2482_s15] sm:$0xff]   ;;  %v2257_v45 = vld [vmem:[%s2486_s29] sm:$0xff]  }
  0x2f   : > { %v2259_v46 = vld [vmem:[%s2486_s29] sm:$0xff]   ;;  %v2062_v40 = vld [vmem:[%s2502_s7 + $0x18] sm:$0xff]  }
  0x30   : > { %v2260_v47 = vld [vmem:[%s2486_s29] sm:$0xff]  }
  0x31   : > { %2102 = vmatmul.mubr.msk.bf16.vlgmr.msra.gmra.mxu0 %vm466_vm1, %v2246_v9 }
  0x32   : > { %2119 = vmatprep.mubr.msk.bf16.mxu0 %vm2374_vm0, %v2373_v6 }
  0xf1   : > { %v507_v12 = vpop.f32.mrf.mxu0 }
  0xf2   : > { %v514_v13 = vmul.f32 0.25, %v507_v12 }
  0xf3   : > { %v2103_v14 = vpop.f32.mrf.mxu0 }
  0xf4   : > { %v520_v15 = vadd.f32 %v2030_v11, %v514_v13 }
  0xf5   : > { %v510_v17 = vpop.f32.mrf.mxu0 }
  0xf6   : > { %v515_v18 = vmul.f32 0.25, %v510_v17  ;;  %v522_v19 = vsel %vm466_vm1, %v520_v15, -inf  ;;  %v2060_v17 = vld [vmem:[%s2502_s7 + $0x8] sm:$0xff]  }
  0xf7   : > { %523 = vmax.xlane.f32.xlu0 %v522_v19  ;;  %v2104_v20 = vpop.f32.mrf.mxu0 }
  0xf8   : > { %v521_v21 = vadd.f32 %v2031_v16, %v515_v18  ;;  %v2034_v20 = vunpack.c.l.bf16 %v2060_v17 }
  0xfa   : > { %v525_v22 = vsel %vm466_vm1, %v521_v21, -inf }
  0xfb   : > { %526 = vmax.xlane.f32.xlu0 %v525_v22 }
 0x111   : > { %624 = vrot.lane.b32.xlu0 %v2247_v23, %s2375_s8 }
 0x115   : > { %956 = vrot.lane.b32.xlu0 %v2250_v24, %s2376_s9 }
 0x119   : > { %1122 = vrot.lane.b32.xlu0 %v2252_v25, %s2377_s10  ;;  %v2035_v25 = vunpack.c.h.bf16 %v2060_v17 }
 0x11d   : > { %1288 = vrot.lane.b32.xlu0 %v2254_v26, %s2378_s11 }
 0x121   : > { %1454 = vrot.lane.b32.xlu0 %v2256_v27, %s2379_s12  ;;  %v2061_v27 = vld [vmem:[%s2502_s7 + $0x10] sm:$0xff]  }
 0x125   : > { %1620 = vrot.lane.b32.xlu0 %v2258_v28, %s2380_s13 }
 0x180   : > { %v524_v29 = vpop.xlane.xlu0 %523 }
 0x181   : > { %v528_v30 = vsub.f32 %v520_v15, %v524_v29 }
 0x183   : > { %v530_v31 = vmul.f32 1.442695, %v528_v30 }
 0x184   : > { %v527_v32 = vpop.xlane.xlu0 %526 }
 0x185   : > { %2269 = vpow2.f32 %v530_v31  ;;  %v529_v33 = vsub.f32 %v521_v21, %v527_v32  ;;  %v2038_v32 = vunpack.c.l.bf16 %v2061_v27 }
 0x187   : > { %v532_v34 = vmul.f32 1.442695, %v529_v33 }
 0x188   : > { %v625_v52 = vpop.permute.xlu0 %624 }
 0x189   : > { %2271 = vpow2.f32 %v532_v34  ;;  %v630_v56 = vsel %vm466_vm1, %v625_v52, 0 }
 0x18c   : > { %v957_v60 = vpop.permute.xlu0 %956 }
 0x18d   : > { %v962_v62 = vsel %vm466_vm1, %v957_v60, 0 }
 0x190   : > { %v1123_v63 = vpop.permute.xlu0 %1122 }
 0x191   : > { %v1128_v1 = vsel %vm466_vm1, %v1123_v63, 0 }
 0x192   : > { %v2270_v35 = vpop.eup %2269 }
 0x193   : > { %v534_v36 = vsel %vm466_vm1, %v2270_v35, 0.0 }
 0x194   : > { %535 = vadd.xlane.f32.xlu1 %v534_v36  ;;  %v1289_v2 = vpop.permute.xlu0 %1288 }
 0x195   : > { %v1294_v4 = vsel %vm466_vm1, %v1289_v2, 0  ;;  %v2064_v2 = vld [vmem:[%s2502_s7 + $0x28] sm:$0xff]  }
 0x196   : > { %v2272_v37 = vpop.eup %2271 }
 0x197   : > { %v537_v38 = vsel %vm466_vm1, %v2272_v37, 0.0 }
 0x198   : > { %538 = vadd.xlane.f32.xlu1 %v537_v38  ;;  %v1455_v5 = vpop.permute.xlu0 %1454  ;;  %v2039_v38 = vunpack.c.h.bf16 %v2061_v27 }
 0x199   : > { %v1460_v8 = vsel %vm466_vm1, %v1455_v5, 0 }
 0x19c   : > { %v1621_v9 = vpop.permute.xlu0 %1620 }
 0x19d   : > { %v1626_v11 = vsel %vm466_vm1, %v1621_v9, 0 }
 0x1a9   : > { %617 = vrot.lane.b32.xlu1 %v2248_v39, %s2375_s8 }
 0x1ad   : > { %790 = vrot.lane.b32.xlu1 %v2249_v41, %s2381_s22 }
 0x1b1   : > { %783 = vrot.lane.b32.xlu1 %v2251_v42, %s2381_s22 }
 0x1b5   : > { %949 = vrot.lane.b32.xlu1 %v2253_v43, %s2376_s9 }
 0x1b9   : > { %1115 = vrot.lane.b32.xlu1 %v2255_v44, %s2377_s10 }
 0x1bd   : > { %1281 = vrot.lane.b32.xlu1 %v2257_v45, %s2378_s11  ;;  %v2042_v45 = vunpack.c.l.bf16 %v2062_v40 }
 0x1c1   : > { %1447 = vrot.lane.b32.xlu1 %v2259_v46, %s2379_s12 }
 0x1c5   : > { %1613 = vrot.lane.b32.xlu1 %v2260_v47, %s2380_s13 }
 0x21d   : > { %v536_v48 = vpop.xlane.xlu1 %535 }
 0x21e   : > { %2273 = vrcp.f32 %v536_v48 }
 0x221   : > { %v539_v49 = vpop.xlane.xlu1 %538 }
 0x222   : > { %2275 = vrcp.f32 %v539_v49 }
 0x225   : > { %v618_v55 = vpop.permute.xlu1 %617 }
 0x229   : > { %v791_v58 = vpop.permute.xlu1 %790 }
 0x22a   : > { %v796_v59 = vsel %vm466_vm1, %v791_v58, 0 }
 0x22b   : > { %v2274_v50 = vpop.eup %2273 }
 0x22c   : > { %v542_v53 = vmul.f32 %v2274_v50, %v2270_v35 }
 0x22d   : > { %v784_v61 = vpop.permute.xlu1 %783 }
 0x22f   : > { %v2276_v51 = vpop.eup %2275 }
 0x230   : > { %v543_v54 = vmul.f32 %v2276_v51, %v2272_v37  ;;  %v2043_v51 = vunpack.c.h.bf16 %v2062_v40 }
 0x231   : > { %v950_v0 = vpop.permute.xlu1 %949 }
 0x232   : > { %v544_v57 = vpack.c.bf16 %v543_v54, %v542_v53  ;;  %v2063_v53 = vld [vmem:[%s2502_s7 + $0x20] sm:$0xff]  }
 0x233   : > { %v2046_v58 = vunpack.c.l.bf16 %v2063_v53 }
 0x234   : > { %2108 = vmatmul.mubr.msk.bf16.vlgmr.msra.gmra.mxu1 %vm466_vm1, %v544_v57 }
 0x235   : > { %2112 = vmatpush3.bf16.xpose.msra.mxu1 %v630_v56  ;;  %2113 = vmatprep.mubr.msk.bf16.mxu1 %vm2374_vm0, %v2373_v6  ;;  %v1116_v3 = vpop.permute.xlu1 %1115 }
 0x236   : > { %2123 = vmatprep.subr.bf16.mxu1 %v2373_v6 }
 0x239   : > { %v1282_v7 = vpop.permute.xlu1 %1281 }
 0x23c   : > { %2114 = vmatmul.mubr.msk.bf16.vlgmr.msra.gmra.mxu1 %vm466_vm1, %v618_v55 }
 0x23d   : > { %2124 = vmatpush3.bf16.xpose.msra.mxu1 %v796_v59  ;;  %2125 = vmatprep.mubr.msk.bf16.mxu1 %vm2374_vm0, %v2373_v6  ;;  %v1448_v10 = vpop.permute.xlu1 %1447 }
 0x23e   : > { %2135 = vmatprep.subr.bf16.mxu1 %v2373_v6 }
 0x241   : > { %v1614_v12 = vpop.permute.xlu1 %1613 }
 0x244   : > { %2126 = vmatmul.mubr.msk.bf16.vlgmr.msra.gmra.mxu1 %vm466_vm1, %v784_v61 }
 0x245   : > { %2136 = vmatpush3.bf16.xpose.msra.mxu1 %v962_v62  ;;  %2137 = vmatprep.mubr.msk.bf16.mxu1 %vm2374_vm0, %v2373_v6 }
 0x246   : > { %2147 = vmatprep.subr.bf16.mxu1 %v2373_v6 }
 0x24c   : > { %2138 = vmatmul.mubr.msk.bf16.vlgmr.msra.gmra.mxu1 %vm466_vm1, %v950_v0  ;;  %v2047_v0 = vunpack.c.h.bf16 %v2063_v53 }
 0x24d   : > { %2148 = vmatpush3.bf16.xpose.msra.mxu1 %v1128_v1  ;;  %2149 = vmatprep.mubr.msk.bf16.mxu1 %vm2374_vm0, %v2373_v6 }
 0x24e   : > { %2159 = vmatprep.subr.bf16.mxu1 %v2373_v6 }
 0x254   : > { %2150 = vmatmul.mubr.msk.bf16.vlgmr.msra.gmra.mxu1 %vm466_vm1, %v1116_v3 }
 0x255   : > { %2160 = vmatpush3.bf16.xpose.msra.mxu1 %v1294_v4  ;;  %2161 = vmatprep.mubr.msk.bf16.mxu1 %vm2374_vm0, %v2373_v6 }
 0x256   : > { %2171 = vmatprep.subr.bf16.mxu1 %v2373_v6 }
 0x25c   : > { %2162 = vmatmul.mubr.msk.bf16.vlgmr.msra.gmra.mxu1 %vm466_vm1, %v1282_v7 }
 0x25d   : > { %2172 = vmatpush3.bf16.xpose.msra.mxu1 %v1460_v8  ;;  %2173 = vmatprep.mubr.msk.bf16.mxu1 %vm2374_vm0, %v2373_v6  ;;  %v2050_v8 = vunpack.c.l.bf16 %v2064_v2 }
 0x25e   : > { %2183 = vmatprep.subr.bf16.mxu1 %v2373_v6 }
 0x264   : > { %2174 = vmatmul.mubr.msk.bf16.vlgmr.msra.gmra.mxu1 %vm466_vm1, %v1448_v10 }
 0x265   : > { %2184 = vmatpush3.bf16.xpose.msra.mxu1 %v1626_v11  ;;  %2185 = vmatprep.mubr.msk.bf16.mxu1 %vm2374_vm0, %v2373_v6 }
 0x26c   : > { %2186 = vmatmul.mubr.msk.bf16.vlgmr.msra.gmra.mxu1 %vm466_vm1, %v1614_v12 }
 0x2f4   : > { %v588_v13 = vpop.f32.mrf.mxu1 }
 0x2f5   : > { %v2012_v14 = vpack.c.bf16 %v588_v13, %v588_v13 }
 0x2f6   : > { %v2109_v15 = vpop.f32.mrf.mxu1 }
 0x2f7   : > { %604 = vst.msk [vmem:[%s2581_s27] sm:$0xf] %vm603_vm2, %v2012_v14  ;;  %v2051_v14 = vunpack.c.h.bf16 %v2064_v2 }
 0x2f8   : > { %v591_v16 = vpop.f32.mrf.mxu1 }
 0x2f9   : > { %v2013_v18 = vpack.c.bf16 %v591_v16, %v591_v16  ;;  %v2065_v16 = vld [vmem:[%s2502_s7 + $0x30] sm:$0xff]  }
 0x2fa   : > { %v2110_v19 = vpop.f32.mrf.mxu1 }
 0x2fb   : > { %605 = vst.msk [vmem:[%s2581_s27 + $0x4] sm:$0xf] %vm603_vm2, %v2013_v18 }
 0x2fc   : > { %v666_v21 = vpop.f32.mrf.mxu1 }
 0x2fd   : > { %v673_v22 = vmul.f32 0.25, %v666_v21  ;;  %v2054_v21 = vunpack.c.l.bf16 %v2065_v16 }
 0x2fe   : > { %v2115_v23 = vpop.f32.mrf.mxu1 }
 0x2ff   : > { %v2586_v24 = vadd.f32 %v2034_v20, %v673_v22 }
 0x300   : > { %v669_v26 = vpop.f32.mrf.mxu1 }
 0x301   : > { %v674_v28 = vmul.f32 0.25, %v669_v26  ;;  %v682_v29 = vsel %vm466_vm1, %v2586_v24, -inf }
 0x302   : > { %683 = vmax.xlane.f32.xlu0 %v682_v29  ;;  %v2116_v30 = vpop.f32.mrf.mxu1 }
 0x303   : > { %v2591_v31 = vadd.f32 %v2035_v25, %v674_v28  ;;  %v2055_v28 = vunpack.c.h.bf16 %v2065_v16 }
 0x304   : > { %v832_v33 = vpop.f32.mrf.mxu1 }
 0x305   : > { %v839_v34 = vmul.f32 0.25, %v832_v33  ;;  %v685_v35 = vsel %vm466_vm1, %v2591_v31, -inf }
 0x306   : > { %686 = vmax.xlane.f32.xlu1 %v685_v35  ;;  %v2127_v36 = vpop.f32.mrf.mxu1 }
 0x307   : > { %v2595_v37 = vadd.f32 %v2038_v32, %v839_v34  ;;  %v2066_v36 = vld [vmem:[%s2502_s7 + $0x38] sm:$0xff]  }
 0x308   : > { %v835_v39 = vpop.f32.mrf.mxu1  ;;  %v2059_v40 = vunpack.c.h.bf16 %v2066_v36 }
 0x309   : > { %v840_v41 = vmul.f32 0.25, %v835_v39  ;;  %v848_v42 = vsel %vm466_vm1, %v2595_v37, -inf }
 0x30a   : > { %849 = vmax.xlane.f32.xlu0 %v848_v42  ;;  %v2128_v43 = vpop.f32.mrf.mxu1 }
 0x30b   : > { %v2600_v44 = vadd.f32 %v2039_v38, %v840_v41 }
 0x30c   : > { %v998_v46 = vpop.f32.mrf.mxu1 }
 0x30d   : > { %v1005_v47 = vmul.f32 0.25, %v998_v46  ;;  %v851_v48 = vsel %vm466_vm1, %v2600_v44, -inf }
 0x30e   : > { %852 = vmax.xlane.f32.xlu0 %v851_v48  ;;  %v2139_v49 = vpop.f32.mrf.mxu1  ;;  %v2263_v48 = vld [vmem:[%s2523_s14] sm:$0xff]  }
 0x30f   : > { %v2604_v50 = vadd.f32 %v2042_v45, %v1005_v47  ;;  %v2262_v47 = vld [vmem:[%s2523_s14] sm:$0xff]  }
 0x310   : > { %v1001_v52 = vpop.f32.mrf.mxu1 }
 0x311   : > { %v1006_v54 = vmul.f32 0.25, %v1001_v52  ;;  %v1014_v55 = vsel %vm466_vm1, %v2604_v50, -inf }
 0x312   : > { %1015 = vmax.xlane.f32.xlu0 %v1014_v55  ;;  %v2140_v56 = vpop.f32.mrf.mxu1 }
 0x313   : > { %v2609_v57 = vadd.f32 %v2043_v51, %v1006_v54  ;;  %v2058_v51 = vunpack.c.l.bf16 %v2066_v36 }
 0x314   : > { %v1164_v59 = vpop.f32.mrf.mxu1 }
 0x315   : > { %v1171_v60 = vmul.f32 0.25, %v1164_v59  ;;  %v1017_v61 = vsel %vm466_vm1, %v2609_v57, -inf }
 0x316   : > { %1018 = vmax.xlane.f32.xlu1 %v1017_v61  ;;  %v2151_v62 = vpop.f32.mrf.mxu1 }
 0x317   : > { %v2613_v63 = vadd.f32 %v2046_v58, %v1171_v60 }
 0x318   : > { %v1167_v1 = vpop.f32.mrf.mxu1 }
 0x319   : > { %v1172_v3 = vmul.f32 0.25, %v1167_v1  ;;  %v1180_v4 = vsel %vm466_vm1, %v2613_v63, -inf }
 0x31a   : > { %1181 = vmax.xlane.f32.xlu0 %v1180_v4  ;;  %v2152_v5 = vpop.f32.mrf.mxu1 }
 0x31b   : > { %v2618_v7 = vadd.f32 %v2047_v0, %v1172_v3 }
 0x31c   : > { %v1330_v9 = vpop.f32.mrf.mxu1 }
 0x31d   : > { %v1337_v10 = vmul.f32 0.25, %v1330_v9  ;;  %v1183_v11 = vsel %vm466_vm1, %v2618_v7, -inf }
 0x31e   : > { %1184 = vmax.xlane.f32.xlu1 %v1183_v11  ;;  %v2163_v12 = vpop.f32.mrf.mxu1 }
 0x31f   : > { %v2622_v13 = vadd.f32 %v2050_v8, %v1337_v10 }
 0x320   : > { %v1333_v15 = vpop.f32.mrf.mxu1 }
 0x321   : > { %v1338_v17 = vmul.f32 0.25, %v1333_v15  ;;  %v1346_v18 = vsel %vm466_vm1, %v2622_v13, -inf }
 0x322   : > { %1347 = vmax.xlane.f32.xlu0 %v1346_v18  ;;  %v2164_v19 = vpop.f32.mrf.mxu1 }
 0x323   : > { %v2627_v20 = vadd.f32 %v2051_v14, %v1338_v17 }
 0x324   : > { %v1496_v22 = vpop.f32.mrf.mxu1 }
 0x325   : > { %v1503_v23 = vmul.f32 0.25, %v1496_v22  ;;  %v1349_v25 = vsel %vm466_vm1, %v2627_v20, -inf }
 0x326   : > { %1350 = vmax.xlane.f32.xlu1 %v1349_v25  ;;  %v2175_v26 = vpop.f32.mrf.mxu1 }
 0x327   : > { %v2631_v27 = vadd.f32 %v2054_v21, %v1503_v23 }
 0x328   : > { %v1499_v29 = vpop.f32.mrf.mxu1 }
 0x329   : > { %v1504_v30 = vmul.f32 0.25, %v1499_v29  ;;  %v1512_v32 = vsel %vm466_vm1, %v2631_v27, -inf }
 0x32a   : > { %1513 = vmax.xlane.f32.xlu0 %v1512_v32  ;;  %v2176_v33 = vpop.f32.mrf.mxu1 }
 0x32b   : > { %v2635_v34 = vadd.f32 %v2055_v28, %v1504_v30 }
 0x32c   : > { %v1662_v35 = vpop.f32.mrf.mxu1 }
 0x32d   : > { %v1515_v38 = vsel %vm466_vm1, %v2635_v34, -inf  ;;  %v1669_v49 = vmul.f32 0.25, %v1662_v35 }
 0x32e   : > { %1516 = vmax.xlane.f32.xlu1 %v1515_v38  ;;  %v2187_v39 = vpop.f32.mrf.mxu1 }
 0x32f   : > { %v2648_v52 = vadd.f32 %v2058_v51, %v1669_v49 }
 0x330   : > { %v1665_v41 = vpop.f32.mrf.mxu1 }
 0x331   : > { %v1670_v42 = vmul.f32 0.25, %v1665_v41  ;;  %v1678_v53 = vsel %vm466_vm1, %v2648_v52, -inf }
 0x332   : > { %v2188_v43 = vpop.f32.mrf.mxu1 }
 0x333   : > { %v2640_v45 = vadd.f32 %v2059_v40, %v1670_v42 }
 0x335   : > { %v1681_v46 = vsel %vm466_vm1, %v2640_v45, -inf }
 0x336   : > { %1682 = vmax.xlane.f32.xlu1 %v1681_v46 }
 0x340   : > { %710 = vrot.lane.b32.xlu0 %v2262_v47, %s2375_s8 }
 0x347   : > { %876 = vrot.lane.b32.xlu1 %v2263_v48, %s2381_s22 }
 0x35f   : > { %1679 = vmax.xlane.f32.xlu0 %v1678_v53 }
 0x38b   : > { %v684_v54 = vpop.xlane.xlu0 %683 }
 0x38c   : > { %v688_v55 = vsub.f32 %v2586_v24, %v684_v54 }
 0x38e   : > { %v690_v56 = vmul.f32 1.442695, %v688_v55 }
 0x38f   : > { %v687_v58 = vpop.xlane.xlu1 %686 }
 0x390   : > { %2277 = vpow2.f32 %v690_v56  ;;  %v689_v59 = vsub.f32 %v2591_v31, %v687_v58 }
 0x392   : > { %v692_v60 = vmul.f32 1.442695, %v689_v59 }
 0x393   : > { %v850_v61 = vpop.xlane.xlu0 %849 }
 0x394   : > { %2279 = vpow2.f32 %v692_v60  ;;  %v854_v62 = vsub.f32 %v2595_v37, %v850_v61 }
 0x396   : > { %v856_v0 = vmul.f32 1.442695, %v854_v62 }
 0x397   : > { %v853_v1 = vpop.xlane.xlu0 %852 }
 0x398   : > { %2281 = vpow2.f32 %v856_v0  ;;  %v855_v2 = vsub.f32 %v2600_v44, %v853_v1  ;;  %v2266_v0 = vld [vmem:[%s2523_s14] sm:$0xff]  }
 0x39a   : > { %v858_v3 = vmul.f32 1.442695, %v855_v2  ;;  %v2267_v2 = vld [vmem:[%s2523_s14] sm:$0xff]  }
 0x39b   : > { %v1016_v4 = vpop.xlane.xlu0 %1015 }
 0x39c   : > { %2283 = vpow2.f32 %v858_v3  ;;  %v1020_v24 = vsub.f32 %v2604_v50, %v1016_v4  ;;  %v2268_v3 = vld [vmem:[%s2523_s14] sm:$0xff]  }
 0x39d   : > { %v2657_v5 = vpop.eup %2277  ;;  %v2265_v4 = vld [vmem:[%s2523_s14] sm:$0xff]  }
 0x39e   : > { %v1022_v8 = vmul.f32 1.442695, %v1020_v24  ;;  %v694_v31 = vsel %vm466_vm1, %v2657_v5, 0.0 }
 0x39f   : > { %v1019_v9 = vpop.xlane.xlu1 %1018  ;;  %695 = vadd.xlane.f32.xlu0 %v694_v31 }
 0x3a0   : > { %2285 = vpow2.f32 %v1022_v8  ;;  %v1021_v37 = vsub.f32 %v2609_v57, %v1019_v9 }
 0x3a1   : > { %v2662_v10 = vpop.eup %2279 }
 0x3a2   : > { %v1024_v11 = vmul.f32 1.442695, %v1021_v37  ;;  %v697_v44 = vsel %vm466_vm1, %v2662_v10, 0.0 }
 0x3a3   : > { %698 = vadd.xlane.f32.xlu1 %v697_v44  ;;  %v1182_v14 = vpop.xlane.xlu0 %1181 }
 0x3a4   : > { %2287 = vpow2.f32 %v1024_v11  ;;  %v1186_v47 = vsub.f32 %v2613_v63, %v1182_v14 }
 0x3a5   : > { %v2666_v50 = vpop.eup %2281 }
 0x3a6   : > { %v860_v12 = vsel %vm466_vm1, %v2666_v50, 0.0  ;;  %v1188_v48 = vmul.f32 1.442695, %v1186_v47 }
 0x3a7   : > { %v1185_v15 = vpop.xlane.xlu1 %1184  ;;  %861 = vadd.xlane.f32.xlu0 %v860_v12 }
 0x3a8   : > { %v1187_v16 = vsub.f32 %v2618_v7, %v1185_v15 }
 0x3a9   : > { %v2671_v17 = vpop.eup %2283 }
 0x3aa   : > { %v1190_v57 = vmul.f32 1.442695, %v1187_v16  ;;  %v863_v18 = vsel %vm466_vm1, %v2671_v17, 0.0 }
 0x3ab   : > { %864 = vadd.xlane.f32.xlu1 %v863_v18  ;;  %v1348_v19 = vpop.xlane.xlu0 %1347 }
 0x3ac   : > { %2289 = vpow2.f32 %v1190_v57  ;;  %v1352_v21 = vsub.f32 %v2622_v13, %v1348_v19 }
 0x3ad   : > { %v2676_v22 = vpop.eup %2285 }
 0x3ae   : > { %v1354_v23 = vmul.f32 1.442695, %v1352_v21  ;;  %v1026_v25 = vsel %vm466_vm1, %v2676_v22, 0.0 }
 0x3af   : > { %v1351_v26 = vpop.xlane.xlu1 %1350  ;;  %1027 = vadd.xlane.f32.xlu0 %v1026_v25 }
 0x3b0   : > { %2291 = vpow2.f32 %v1354_v23  ;;  %v1353_v7 = vsub.f32 %v2627_v20, %v1351_v26 }
 0x3b1   : > { %v2681_v28 = vpop.eup %2287 }
 0x3b2   : > { %v1356_v29 = vmul.f32 1.442695, %v1353_v7  ;;  %v1029_v30 = vsel %vm466_vm1, %v2681_v28, 0.0 }
 0x3b3   : > { %1030 = vadd.xlane.f32.xlu1 %v1029_v30  ;;  %v1514_v32 = vpop.xlane.xlu0 %1513 }
 0x3b4   : > { %2293 = vpow2.f32 %v1356_v29  ;;  %v1518_v49 = vsub.f32 %v2631_v27, %v1514_v32 }
 0x3b6   : > { %v1520_v51 = vmul.f32 1.442695, %v1518_v49 }
 0x3b7   : > { %v1517_v13 = vpop.xlane.xlu1 %1516  ;;  %v711_v33 = vpop.permute.xlu0 %710 }
 0x3b8   : > { %v1519_v35 = vsub.f32 %v2635_v34, %v1517_v13  ;;  %2118 = vmatpush3.bf16.msra.mxu0 %v711_v33  ;;  %v2264_v34 = vld [vmem:[%s2523_s14] sm:$0xff]  }
 0x3b9   : > { %v2686_v36 = vpop.eup %2289  ;;  %2129 = vmatprep.subr.bf16.mxu0 %v2373_v6 }
 0x3ba   : > { %v1522_v20 = vmul.f32 1.442695, %v1519_v35  ;;  %v1195_v38 = vsel %vm466_vm1, %v2686_v36, 0.0 }
 0x3bb   : > { %1196 = vadd.xlane.f32.xlu1 %v1195_v38 }
 0x3bc   : > { %2295 = vpow2.f32 %v1522_v20 }
 0x3bd   : > { %v2691_v39 = vpop.eup %2291  ;;  %2297 = vpow2.f32 %v1188_v48 }
 0x3be   : > { %v1358_v40 = vsel %vm466_vm1, %v2691_v39, 0.0  ;;  %2299 = vpow2.f32 %v1520_v51 }
 0x3bf   : > { %1359 = vadd.xlane.f32.xlu1 %v1358_v40  ;;  %v1683_v56 = vpop.xlane.xlu1 %1682 }
 0x3c0   : > { %v1685_v63 = vsub.f32 %v2640_v45, %v1683_v56 }
 0x3c1   : > { %v2695_v41 = vpop.eup %2293 }
 0x3c2   : > { %v1361_v42 = vsel %vm466_vm1, %v2695_v41, 0.0  ;;  %v1688_v60 = vmul.f32 1.442695, %v1685_v63 }
 0x3c3   : > { %1362 = vadd.xlane.f32.xlu1 %v1361_v42  ;;  %v877_v24 = vpop.permute.xlu1 %876 }
 0x3c5   : > { %1042 = vrot.lane.b32.xlu0 %v2264_v34, %s2376_s9 }
 0x3c9   : > { %v2701_v43 = vpop.eup %2295 }
 0x3ca   : > { %v1527_v46 = vsel %vm466_vm1, %v2701_v43, 0.0  ;;  %v2707_v53 = vpop.eup %2297 }
 0x3cb   : > { %1528 = vadd.xlane.f32.xlu1 %v1527_v46  ;;  %v1192_v54 = vsel %vm466_vm1, %v2707_v53, 0.0  ;;  %v2711_v55 = vpop.eup %2299 }
 0x3cc   : > { %v1524_v58 = vsel %vm466_vm1, %v2711_v55, 0.0 }
 0x3e4   : > { %1193 = vadd.xlane.f32.xlu0 %v1192_v54 }
 0x3e8   : > { %1525 = vadd.xlane.f32.xlu0 %v1524_v58  ;;  %v1680_v27 = vpop.xlane.xlu0 %1679 }
 0x3e9   : > { %v1684_v59 = vsub.f32 %v2648_v52, %v1680_v27 }
 0x3eb   : > { %v1686_v61 = vmul.f32 1.442695, %v1684_v59 }
 0x3ed   : > { %2301 = vpow2.f32 %v1686_v61 }
 0x3ee   : > { %2303 = vpow2.f32 %v1688_v60 }
 0x3fa   : > { %v2717_v62 = vpop.eup %2301 }
 0x3fb   : > { %v1690_v1 = vsel %vm466_vm1, %v2717_v62, 0.0  ;;  %v2722_v45 = vpop.eup %2303 }
 0x3fc   : > { %1691 = vadd.xlane.f32.xlu1 %v1690_v1  ;;  %v1693_v52 = vsel %vm466_vm1, %v2722_v45, 0.0 }
 0x3fe   : > { %1374 = vrot.lane.b32.xlu0 %v2266_v0, %s2378_s11 }
 0x400   : > { %1694 = vadd.xlane.f32.xlu1 %v1693_v52 }
 0x402   : > { %1540 = vrot.lane.b32.xlu0 %v2267_v2, %s2379_s12 }
 0x406   : > { %1706 = vrot.lane.b32.xlu0 %v2268_v3, %s2380_s13 }
 0x411   : > { %1208 = vrot.lane.b32.xlu1 %v2265_v4, %s2377_s10 }
 0x428   : > { %v696_v8 = vpop.xlane.xlu0 %695 }
 0x429   : > { %2305 = vrcp.f32 %v696_v8 }
 0x42c   : > { %v699_v31 = vpop.xlane.xlu1 %698 }
 0x42d   : > { %2307 = vrcp.f32 %v699_v31 }
 0x430   : > { %v862_v9 = vpop.xlane.xlu0 %861 }
 0x431   : > { %2309 = vrcp.f32 %v862_v9 }
 0x434   : > { %v865_v37 = vpop.xlane.xlu1 %864 }
 0x435   : > { %2311 = vrcp.f32 %v865_v37 }
 0x436   : > { %v2306_v11 = vpop.eup %2305 }
 0x437   : > { %v702_v14 = vmul.f32 %v2306_v11, %v2657_v5 }
 0x438   : > { %v1028_v44 = vpop.xlane.xlu0 %1027 }
 0x439   : > { %2313 = vrcp.f32 %v1028_v44 }
 0x43a   : > { %v2308_v12 = vpop.eup %2307 }
 0x43b   : > { %v703_v15 = vmul.f32 %v2308_v12, %v2662_v10 }
 0x43c   : > { %v1031_v16 = vpop.xlane.xlu1 %1030  ;;  %v1043_v25 = vpop.permute.xlu0 %1042 }
 0x43d   : > { %2315 = vrcp.f32 %v1031_v16  ;;  %v704_v57 = vpack.c.bf16 %v703_v15, %v702_v14 }
 0x43e   : > { %v2310_v18 = vpop.eup %2309 }
 0x43f   : > { %2120 = vmatmul.mubr.msk.bf16.vlgmr.msra.gmra.mxu0 %vm466_vm1, %v704_v57  ;;  %v868_v21 = vmul.f32 %v2310_v18, %v2666_v50 }
 0x440   : > { %2130 = vmatpush3.bf16.msra.mxu0 %v877_v24  ;;  %2131 = vmatprep.mubr.msk.bf16.mxu0 %vm2374_vm0, %v2373_v6 }
 0x441   : > { %2141 = vmatprep.subr.bf16.mxu0 %v2373_v6 }
 0x442   : > { %v2312_v19 = vpop.eup %2311 }
 0x443   : > { %v869_v23 = vmul.f32 %v2312_v19, %v2671_v17 }
 0x444   : > { %v1197_v50 = vpop.xlane.xlu1 %1196 }
 0x445   : > { %v870_v5 = vpack.c.bf16 %v869_v23, %v868_v21 }
 0x446   : > { %v2314_v10 = vpop.eup %2313 }
 0x447   : > { %2132 = vmatmul.mubr.msk.bf16.vlgmr.msra.gmra.mxu0 %vm466_vm1, %v870_v5  ;;  %v1034_v7 = vmul.f32 %v2314_v10, %v2676_v22 }
 0x448   : > { %2142 = vmatpush3.bf16.msra.mxu0 %v1043_v25  ;;  %2143 = vmatprep.mubr.msk.bf16.mxu0 %vm2374_vm0, %v2373_v6  ;;  %v1360_v17 = vpop.xlane.xlu1 %1359 }
 0x449   : > { %2153 = vmatprep.subr.bf16.mxu0 %v2373_v6 }
 0x44a   : > { %v2316_v26 = vpop.eup %2315 }
 0x44b   : > { %v1035_v29 = vmul.f32 %v2316_v26, %v2681_v28 }
 0x44c   : > { %v1363_v13 = vpop.xlane.xlu1 %1362 }
 0x44d   : > { %v1036_v30 = vpack.c.bf16 %v1035_v29, %v1034_v7 }
 0x44f   : > { %2144 = vmatmul.mubr.msk.bf16.vlgmr.msra.gmra.mxu0 %vm466_vm1, %v1036_v30 }
 0x450   : > { %2155 = vmatprep.mubr.msk.bf16.mxu0 %vm2374_vm0, %v2373_v6 }
 0x454   : > { %v1529_v33 = vpop.xlane.xlu1 %1528 }
 0x46d   : > { %v1194_v32 = vpop.xlane.xlu0 %1193 }
 0x46e   : > { %2317 = vrcp.f32 %v1194_v32 }
 0x46f   : > { %2319 = vrcp.f32 %v1197_v50 }
 0x470   : > { %2321 = vrcp.f32 %v1363_v13 }
 0x471   : > { %2323 = vrcp.f32 %v1360_v17  ;;  %v1526_v22 = vpop.xlane.xlu0 %1525 }
 0x472   : > { %2325 = vrcp.f32 %v1526_v22 }
 0x473   : > { %2327 = vrcp.f32 %v1529_v33 }
 0x475   : > { %v1375_v47 = vpop.permute.xlu0 %1374 }
 0x479   : > { %v1541_v54 = vpop.permute.xlu0 %1540 }
 0x47b   : > { %v2318_v20 = vpop.eup %2317 }
 0x47c   : > { %v2320_v28 = vpop.eup %2319  ;;  %v1200_v40 = vmul.f32 %v2318_v20, %v2707_v53 }
 0x47d   : > { %v1201_v42 = vmul.f32 %v2320_v28, %v2686_v36  ;;  %v2322_v48 = vpop.eup %2321  ;;  %v1707_v59 = vpop.permute.xlu0 %1706 }
 0x47e   : > { %v2324_v49 = vpop.eup %2323  ;;  %v1367_v51 = vmul.f32 %v2322_v48, %v2695_v41 }
 0x47f   : > { %v1202_v46 = vpack.c.bf16 %v1201_v42, %v1200_v40  ;;  %v1366_v36 = vmul.f32 %v2324_v49, %v2691_v39  ;;  %v2326_v56 = vpop.eup %2325 }
 0x480   : > { %v2328_v63 = vpop.eup %2327  ;;  %v1532_v58 = vmul.f32 %v2326_v56, %v2711_v55 }
 0x481   : > { %v1368_v53 = vpack.c.bf16 %v1367_v51, %v1366_v36  ;;  %v1533_v41 = vmul.f32 %v2328_v63, %v2701_v43 }
 0x483   : > { %v1534_v27 = vpack.c.bf16 %v1533_v41, %v1532_v58 }
 0x485   : > { %v1692_v35 = vpop.xlane.xlu1 %1691 }
 0x489   : > { %v1695_v38 = vpop.xlane.xlu1 %1694 }
 0x48a   : > { %2329 = vrcp.f32 %v1695_v38 }
 0x48b   : > { %2331 = vrcp.f32 %v1692_v35 }
 0x48d   : > { %v1209_v34 = vpop.permute.xlu1 %1208 }
 0x48e   : > { %2154 = vmatpush3.bf16.msra.mxu0 %v1209_v34 }
 0x48f   : > { %2165 = vmatprep.subr.bf16.mxu0 %v2373_v6 }
 0x491   : > { %2156 = vmatmul.mubr.msk.bf16.vlgmr.msra.gmra.mxu0 %vm466_vm1, %v1202_v46 }
 0x492   : > { %2166 = vmatpush3.bf16.msra.mxu0 %v1375_v47  ;;  %2167 = vmatprep.mubr.msk.bf16.mxu0 %vm2374_vm0, %v2373_v6 }
 0x493   : > { %2177 = vmatprep.subr.bf16.mxu0 %v2373_v6 }
 0x497   : > { %v2330_v60 = vpop.eup %2329 }
 0x498   : > { %v2332_v39 = vpop.eup %2331  ;;  %v1699_v61 = vmul.f32 %v2330_v60, %v2722_v45 }
 0x499   : > { %2168 = vmatmul.mubr.msk.bf16.vlgmr.msra.gmra.mxu0 %vm466_vm1, %v1368_v53  ;;  %v1698_v0 = vmul.f32 %v2332_v39, %v2717_v62 }
 0x49a   : > { %2178 = vmatpush3.bf16.msra.mxu0 %v1541_v54  ;;  %2179 = vmatprep.mubr.msk.bf16.mxu0 %vm2374_vm0, %v2373_v6 }
 0x49b   : > { %2189 = vmatprep.subr.bf16.mxu0 %v2373_v6  ;;  %v1700_v1 = vpack.c.bf16 %v1699_v61, %v1698_v0 }
 0x4a1   : > { %2180 = vmatmul.mubr.msk.bf16.vlgmr.msra.gmra.mxu0 %vm466_vm1, %v1534_v27 }
 0x4a2   : > { %2190 = vmatpush3.bf16.msra.mxu0 %v1707_v59  ;;  %2191 = vmatprep.mubr.msk.bf16.mxu0 %vm2374_vm0, %v2373_v6 }
 0x4a9   : > { %2192 = vmatmul.mubr.msk.bf16.vlgmr.msra.gmra.mxu0 %vm466_vm1, %v1700_v1 }
 0x4ff   : > { %v750_v55 = vpop.f32.mrf.mxu0 }
 0x500   : > { %v2014_v2 = vpack.c.bf16 %v750_v55, %v750_v55 }
 0x501   : > { %v2121_v43 = vpop.f32.mrf.mxu0 }
 0x502   : > { %763 = vrot.lane.b32.xlu1 %v2014_v2, %s2380_s13 }
 0x503   : > { %v753_v52 = vpop.f32.mrf.mxu0 }
 0x504   : > { %v2015_v3 = vpack.c.bf16 %v753_v52, %v753_v52 }
 0x505   : > { %v2122_v4 = vpop.f32.mrf.mxu0 }
 0x506   : > { %765 = vrot.lane.b32.xlu0 %v2015_v3, %s2380_s13 }
 0x507   : > { %v916_v24 = vpop.f32.mrf.mxu0 }
 0x508   : > { %v2016_v8 = vpack.c.bf16 %v916_v24, %v916_v24 }
 0x509   : > { %v2133_v6 = vpop.f32.mrf.mxu0 }
 0x50a   : > { %929 = vrot.lane.b32.xlu1 %v2016_v8, %s2379_s12 }
 0x50b   : > { %v919_v45 = vpop.f32.mrf.mxu0 }
 0x50c   : > { %v2017_v62 = vpack.c.bf16 %v919_v45, %v919_v45 }
 0x50d   : > { %v2134_v31 = vpop.f32.mrf.mxu0 }
 0x50e   : > { %931 = vrot.lane.b32.xlu0 %v2017_v62, %s2379_s12 }
 0x50f   : > { %v1082_v9 = vpop.f32.mrf.mxu0 }
 0x510   : > { %v2018_v37 = vpack.c.bf16 %v1082_v9, %v1082_v9 }
 0x511   : > { %v2145_v11 = vpop.f32.mrf.mxu0 }
 0x512   : > { %1095 = vrot.lane.b32.xlu1 %v2018_v37, %s2378_s11 }
 0x513   : > { %v1085_v44 = vpop.f32.mrf.mxu0 }
 0x514   : > { %v2019_v12 = vpack.c.bf16 %v1085_v44, %v1085_v44 }
 0x515   : > { %v2146_v14 = vpop.f32.mrf.mxu0 }
 0x516   : > { %1097 = vrot.lane.b32.xlu0 %v2019_v12, %s2378_s11 }
 0x551   : > { %v1248_v15 = vpop.f32.mrf.mxu0 }
 0x552   : > { %v2020_v16 = vpack.c.bf16 %v1248_v15, %v1248_v15 }
 0x553   : > { %v2157_v57 = vpop.f32.mrf.mxu0 }
 0x554   : > { %1261 = vrot.lane.b32.xlu1 %v2020_v16, %s2377_s10 }
 0x555   : > { %v1251_v18 = vpop.f32.mrf.mxu0 }
 0x556   : > { %v2021_v19 = vpack.c.bf16 %v1251_v18, %v1251_v18 }
 0x557   : > { %v2158_v21 = vpop.f32.mrf.mxu0 }
 0x558   : > { %1263 = vrot.lane.b32.xlu0 %v2021_v19, %s2377_s10 }
 0x559   : > { %v1414_v23 = vpop.f32.mrf.mxu0 }
 0x55a   : > { %v2022_v5 = vpack.c.bf16 %v1414_v23, %v1414_v23 }
 0x55b   : > { %v2169_v25 = vpop.f32.mrf.mxu0 }
 0x55c   : > { %1427 = vrot.lane.b32.xlu1 %v2022_v5, %s2376_s9 }
 0x55d   : > { %v1417_v10 = vpop.f32.mrf.mxu0 }
 0x55e   : > { %v2023_v26 = vpack.c.bf16 %v1417_v10, %v1417_v10 }
 0x55f   : > { %v2170_v7 = vpop.f32.mrf.mxu0 }
 0x560   : > { %1429 = vrot.lane.b32.xlu0 %v2023_v26, %s2376_s9 }
 0x561   : > { %v1580_v29 = vpop.f32.mrf.mxu0 }
 0x562   : > { %v2024_v30 = vpack.c.bf16 %v1580_v29, %v1580_v29 }
 0x563   : > { %v2181_v50 = vpop.f32.mrf.mxu0 }
 0x564   : > { %1593 = vrot.lane.b32.xlu1 %v2024_v30, %s2381_s22 }
 0x565   : > { %v1583_v17 = vpop.f32.mrf.mxu0 }
 0x566   : > { %v2025_v32 = vpack.c.bf16 %v1583_v17, %v1583_v17 }
 0x567   : > { %v2182_v13 = vpop.f32.mrf.mxu0 }
 0x568   : > { %1595 = vrot.lane.b32.xlu0 %v2025_v32, %s2381_s22 }
 0x569   : > { %v1746_v33 = vpop.f32.mrf.mxu0 }
 0x56a   : > { %v2026_v35 = vpack.c.bf16 %v1746_v33, %v1746_v33 }
 0x56b   : > { %v2193_v20 = vpop.f32.mrf.mxu0 }
 0x56c   : > { %1759 = vrot.lane.b32.xlu1 %v2026_v35, %s2375_s8 }
 0x56d   : > { %v1749_v22 = vpop.f32.mrf.mxu0 }
 0x56e   : > { %v2027_v38 = vpack.c.bf16 %v1749_v22, %v1749_v22 }
 0x56f   : > { %v2194_v28 = vpop.f32.mrf.mxu0 }
 0x570   : > { %1761 = vrot.lane.b32.xlu0 %v2027_v38, %s2375_s8 }
 0x574   : > { %v764_v40 = vpop.permute.xlu1 %763 }
 0x575   : > { %770 = vst.msk [vmem:[%s2581_s27] sm:$0xf] %vm769_vm3, %v764_v40 }
 0x578   : > { %v766_v34 = vpop.permute.xlu0 %765 }
 0x579   : > { %771 = vst.msk [vmem:[%s2581_s27 + $0x4] sm:$0xf] %vm769_vm3, %v766_v34 }
 0x57c   : > { %v930_v42 = vpop.permute.xlu1 %929 }
 0x57d   : > { %936 = vst.msk [vmem:[%s2581_s27] sm:$0xf] %vm935_vm4, %v930_v42 }
 0x580   : > { %v932_v46 = vpop.permute.xlu0 %931 }
 0x581   : > { %937 = vst.msk [vmem:[%s2581_s27 + $0x4] sm:$0xf] %vm935_vm4, %v932_v46 }
 0x584   : > { %v1096_v47 = vpop.permute.xlu1 %1095 }
 0x585   : > { %1102 = vst.msk [vmem:[%s2581_s27] sm:$0xf] %vm1101_vm5, %v1096_v47 }
 0x588   : > { %v1098_v48 = vpop.permute.xlu0 %1097 }
 0x589   : > { %1103 = vst.msk [vmem:[%s2581_s27 + $0x4] sm:$0xf] %vm1101_vm5, %v1098_v48 }
 0x5c6   : > { %v1262_v49 = vpop.permute.xlu1 %1261 }
 0x5c7   : > { %1268 = vst.msk [vmem:[%s2581_s27] sm:$0xf] %vm1267_vm6, %v1262_v49 }
 0x5ca   : > { %v1264_v51 = vpop.permute.xlu0 %1263 }
 0x5cb   : > { %1269 = vst.msk [vmem:[%s2581_s27 + $0x4] sm:$0xf] %vm1267_vm6, %v1264_v51 }
 0x5ce   : > { %v1428_v36 = vpop.permute.xlu1 %1427 }
 0x5cf   : > { %1434 = vst.msk [vmem:[%s2581_s27] sm:$0xf] %vm1433_vm7, %v1428_v36 }
 0x5d2   : > { %v1430_v53 = vpop.permute.xlu0 %1429 }
 0x5d3   : > { %1435 = vst.msk [vmem:[%s2581_s27 + $0x4] sm:$0xf] %vm1433_vm7, %v1430_v53 }
 0x5d6   : > { %v1594_v54 = vpop.permute.xlu1 %1593 }
 0x5d7   : > { %1600 = vst.msk [vmem:[%s2581_s27] sm:$0xf] %vm1599_vm8, %v1594_v54 }
 0x5da   : > { %v1596_v56 = vpop.permute.xlu0 %1595 }
 0x5db   : > { %1601 = vst.msk [vmem:[%s2581_s27 + $0x4] sm:$0xf] %vm1599_vm8, %v1596_v56 }
 0x5de   : > { %v1760_v63 = vpop.permute.xlu1 %1759 }
 0x5df   : > { %1766 = vst.msk [vmem:[%s2581_s27] sm:$0xf] %vm1765_vm9, %v1760_v63 }
 0x5e2   : > { %v1762_v58 = vpop.permute.xlu0 %1761 }
 0x5e3   : > { %1767 = vst.msk [vmem:[%s2581_s27 + $0x4] sm:$0xf] %vm1765_vm9, %v1762_v58 }
 0x5e4 PF: > { %s14_s19 = sadd.s32 1, %s2371_s19   ;;  %s2820_s15 = smov %s2359_s16 }
 0x5e5   : > { %p11_p10 = scmp.ge.s32.totalorder %s14_s19, 4   ;;  %s2821_s16 = smov %s2446_s24 }
 0x5e6   : > { %s2822_s17 = smov %s2367_s18  ;;  %s2823_s18 = smov %s2825_s20 }
 0x5e7   :  { %13 = sbr.rel (!%p11_p10) target bundleno = 3 (0x3), region = 220 }

// kernel: transformer_forward.30
= control target key start
LH: loop header
LB: loop body
LE: loop exit
PB: predicated region body
PF: predicated region fallthrough
CT: control target
= control target key end

     0   :  { %v2675_v3 = vmov 0   ;;  %s3564_s1 = inlined_call_operand.vmem [shape: bf16[128,3072], index: 1, kind: input, shape index: {}]   ;;  %s3565_s0 = inlined_call_operand.vmem [shape: bf16[32,128], index: 0, kind: input, shape index: {}]   ;;  %s3566_s2 = inlined_call_operand.vmem [shape: f32[1,3072], index: 2, kind: input, shape index: {}]   ;;  %s3567_s3 = inlined_call_operand.vmem [shape: bf16[32,3072], index: 3, kind: output, shape index: {}]  }
   0x1   :  { %v187_v0 = vld [vmem:[%s3564_s1 + $0x540] sm:$0xff]  ;;  %v188_v2 = vld [vmem:[%s3564_s1 + $0x548] sm:$0xff]  ;;  %1341 = vmatprep.mubr.bf16.mxu0 %v2675_v3  ;;  %1394 = vmatprep.mubr.bf16.mxu1 %v2675_v3  ;;  %v189_v63 = vld [vmem:[%s3564_s1 + $0x550] sm:$0xff] }
   0x2   :  { %v199_v1 = vld [vmem:[%s3564_s1 + $0x5a0] sm:$0xff]  ;;  %v200_v5 = vld [vmem:[%s3564_s1 + $0x5a8] sm:$0xff] }
   0x3   :  { %v2552_v4 = vcombine.high %v187_v0, %v199_v1  ;;  %v2551_v6 = vcombine.low %v187_v0, %v199_v1  ;;  %v163_v7 = vld [vmem:[%s3564_s1 + $0x480] sm:$0xff]  ;;  %v2554_v9 = vcombine.high %v188_v2, %v200_v5  ;;  %v2553_v10 = vcombine.low %v188_v2, %v200_v5  ;;  %v164_v12 = vld [vmem:[%s3564_s1 + $0x488] sm:$0xff]  ;;  %v201_v0 = vld [vmem:[%s3564_s1 + $0x5b0] sm:$0xff] }
   0x4   :  { %v175_v8 = vld [vmem:[%s3564_s1 + $0x4e0] sm:$0xff]  ;;  %v176_v13 = vld [vmem:[%s3564_s1 + $0x4e8] sm:$0xff]  ;;  %v190_v1 = vld [vmem:[%s3564_s1 + $0x558] sm:$0xff] }
   0x5   :  { %v2528_v11 = vcombine.high %v163_v7, %v175_v8  ;;  %v139_v14 = vld [vmem:[%s3564_s1 + $0x3c0] sm:$0xff]  ;;  %1309 = vmatprep.subr.bf16.mxu0 %v2552_v4  ;;  %v2530_v15 = vcombine.high %v164_v12, %v176_v13  ;;  %v140_v17 = vld [vmem:[%s3564_s1 + $0x3c8] sm:$0xff]  ;;  %1362 = vmatprep.subr.bf16.mxu1 %v2554_v9  ;;  %v2527_v19 = vcombine.low %v163_v7, %v175_v8  ;;  %v202_v2 = vld [vmem:[%s3564_s1 + $0x5b8] sm:$0xff] }
   0x6   :  { %v151_v16 = vld [vmem:[%s3564_s1 + $0x420] sm:$0xff]  ;;  %v152_v18 = vld [vmem:[%s3564_s1 + $0x428] sm:$0xff]  ;;  %1310 = vmatpush1.bf16.msra.mxu0 %v2551_v6  ;;  %1363 = vmatpush1.bf16.msra.mxu1 %v2553_v10  ;;  %v2529_v20 = vcombine.low %v164_v12, %v176_v13  ;;  %v2556_v6 = vcombine.high %v189_v63, %v201_v0  ;;  %v2558_v7 = vcombine.high %v190_v1, %v202_v2  ;;  %v165_v8 = vld [vmem:[%s3564_s1 + $0x490] sm:$0xff] }
   0x7   :  { %1311 = vmatprep.subr.bf16.mxu0 %v2528_v11  ;;  %v2504_v21 = vcombine.high %v139_v14, %v151_v16  ;;  %1364 = vmatprep.subr.bf16.mxu1 %v2530_v15  ;;  %v2506_v22 = vcombine.high %v140_v17, %v152_v18  ;;  %v115_v23 = vld [vmem:[%s3564_s1 + $0x300] sm:$0xff]  ;;  %v116_v25 = vld [vmem:[%s3564_s1 + $0x308] sm:$0xff]  ;;  %v2503_v27 = vcombine.low %v139_v14, %v151_v16  ;;  %v177_v9 = vld [vmem:[%s3564_s1 + $0x4f0] sm:$0xff] }
   0x8   :  { %v127_v24 = vld [vmem:[%s3564_s1 + $0x360] sm:$0xff]  ;;  %v128_v26 = vld [vmem:[%s3564_s1 + $0x368] sm:$0xff]  ;;  %v2505_v28 = vcombine.low %v140_v17, %v152_v18  ;;  %v166_v11 = vld [vmem:[%s3564_s1 + $0x498] sm:$0xff]  ;;  %v2555_v13 = vcombine.low %v189_v63, %v201_v0  ;;  %v2557_v14 = vcombine.low %v190_v1, %v202_v2  ;;  %v2532_v15 = vcombine.high %v165_v8, %v177_v9 }
   0x9   :  { %v2480_v29 = vcombine.high %v115_v23, %v127_v24  ;;  %v2482_v30 = vcombine.high %v116_v25, %v128_v26  ;;  %v91_v31 = vld [vmem:[%s3564_s1 + $0x240] sm:$0xff]  ;;  %v92_v33 = vld [vmem:[%s3564_s1 + $0x248] sm:$0xff]  ;;  %v2479_v35 = vcombine.low %v115_v23, %v127_v24  ;;  %v2481_v36 = vcombine.low %v116_v25, %v128_v26  ;;  %v178_v12 = vld [vmem:[%s3564_s1 + $0x4f8] sm:$0xff] }
   0xa   :  { %1312 = vmatpush1.bf16.msra.mxu0 %v2527_v19  ;;  %1365 = vmatpush1.bf16.msra.mxu1 %v2529_v20  ;;  %v103_v32 = vld [vmem:[%s3564_s1 + $0x2a0] sm:$0xff]  ;;  %v104_v34 = vld [vmem:[%s3564_s1 + $0x2a8] sm:$0xff]  ;;  %v2534_v16 = vcombine.high %v166_v11, %v178_v12  ;;  %v141_v17 = vld [vmem:[%s3564_s1 + $0x3d0] sm:$0xff] }
   0xb   :  { %1313 = vmatprep.subr.bf16.mxu0 %v2504_v21  ;;  %1366 = vmatprep.subr.bf16.mxu1 %v2506_v22  ;;  %v2456_v37 = vcombine.high %v91_v31, %v103_v32  ;;  %v2458_v38 = vcombine.high %v92_v33, %v104_v34  ;;  %v67_v39 = vld [vmem:[%s3564_s1 + $0x180] sm:$0xff]  ;;  %v68_v41 = vld [vmem:[%s3564_s1 + $0x188] sm:$0xff]  ;;  %v2455_v43 = vcombine.low %v91_v31, %v103_v32  ;;  %v153_v18 = vld [vmem:[%s3564_s1 + $0x430] sm:$0xff] }
   0xc   :  { %v79_v40 = vld [vmem:[%s3564_s1 + $0x1e0] sm:$0xff]  ;;  %v80_v42 = vld [vmem:[%s3564_s1 + $0x1e8] sm:$0xff]  ;;  %v2457_v44 = vcombine.low %v92_v33, %v104_v34  ;;  %v142_v19 = vld [vmem:[%s3564_s1 + $0x3d8] sm:$0xff]  ;;  %v2531_v21 = vcombine.low %v165_v8, %v177_v9  ;;  %v2533_v22 = vcombine.low %v166_v11, %v178_v12  ;;  %v2508_v23 = vcombine.high %v141_v17, %v153_v18 }
   0xd   :  { %v2432_v45 = vcombine.high %v67_v39, %v79_v40  ;;  %v43_v46 = vld [vmem:[%s3564_s1 + $0xc0] sm:$0xff]  ;;  %v2434_v47 = vcombine.high %v68_v41, %v80_v42  ;;  %v44_v49 = vld [vmem:[%s3564_s1 + $0xc8] sm:$0xff]  ;;  %v2431_v51 = vcombine.low %v67_v39, %v79_v40  ;;  %v2433_v52 = vcombine.low %v68_v41, %v80_v42  ;;  %v154_v20 = vld [vmem:[%s3564_s1 + $0x438] sm:$0xff] }
   0xe   :  { %1314 = vmatpush1.bf16.msra.mxu0 %v2503_v27  ;;  %1367 = vmatpush1.bf16.msra.mxu1 %v2505_v28  ;;  %v55_v48 = vld [vmem:[%s3564_s1 + $0x120] sm:$0xff]  ;;  %v56_v50 = vld [vmem:[%s3564_s1 + $0x128] sm:$0xff]  ;;  %v2510_v24 = vcombine.high %v142_v19, %v154_v20  ;;  %v117_v25 = vld [vmem:[%s3564_s1 + $0x310] sm:$0xff]  ;;  %v2509_v31 = vcombine.low %v142_v19, %v154_v20 }
   0xf   :  { %1315 = vmatprep.subr.bf16.mxu0 %v2480_v29  ;;  %1368 = vmatprep.subr.bf16.mxu1 %v2482_v30  ;;  %v2408_v53 = vcombine.high %v43_v46, %v55_v48  ;;  %v2410_v54 = vcombine.high %v44_v49, %v56_v50  ;;  %v19_v55 = vld [vmem:[%s3564_s1] sm:$0xff]  ;;  %v20_v57 = vld [vmem:[%s3564_s1 + $0x8] sm:$0xff]  ;;  %v2407_v59 = vcombine.low %v43_v46, %v55_v48  ;;  %v129_v26 = vld [vmem:[%s3564_s1 + $0x370] sm:$0xff] }
  0x10   :  { %v31_v56 = vld [vmem:[%s3564_s1 + $0x60] sm:$0xff]  ;;  %v32_v58 = vld [vmem:[%s3564_s1 + $0x68] sm:$0xff]  ;;  %v2409_v60 = vcombine.low %v44_v49, %v56_v50  ;;  %v118_v27 = vld [vmem:[%s3564_s1 + $0x318] sm:$0xff]  ;;  %v2507_v30 = vcombine.low %v141_v17, %v153_v18  ;;  %v2484_v32 = vcombine.high %v117_v25, %v129_v26 }
  0x11   :  { %v2384_v61 = vcombine.high %v19_v55, %v31_v56  ;;  %v2386_v62 = vcombine.high %v20_v57, %v32_v58  ;;  %v2383_v4 = vcombine.low %v19_v55, %v31_v56  ;;  %v2385_v5 = vcombine.low %v20_v57, %v32_v58  ;;  %v2815_v10 = vld [vmem:[%s3565_s0] sm:$0xff]   ;;  %v130_v28 = vld [vmem:[%s3564_s1 + $0x378] sm:$0xff]  ;;  %v2854_v29 = vld [vmem:[%s3565_s0 + $0x8] sm:$0xff]  }
  0x12   :  { %1316 = vmatpush1.bf16.msra.mxu0 %v2479_v35  ;;  %1369 = vmatpush1.bf16.msra.mxu1 %v2481_v36  ;;  %v2486_v33 = vcombine.high %v118_v27, %v130_v28  ;;  %v93_v34 = vld [vmem:[%s3564_s1 + $0x250] sm:$0xff]  ;;  %v94_v36 = vld [vmem:[%s3564_s1 + $0x258] sm:$0xff]  ;;  %v2485_v39 = vcombine.low %v118_v27, %v130_v28  ;;  %v191_v2 = vld [vmem:[%s3564_s1 + $0x560] sm:$0xff] }
  0x13   :  { %1317 = vmatprep.subr.bf16.mxu0 %v2456_v37  ;;  %1370 = vmatprep.subr.bf16.mxu1 %v2458_v38  ;;  %v105_v35 = vld [vmem:[%s3564_s1 + $0x2b0] sm:$0xff]  ;;  %v106_v37 = vld [vmem:[%s3564_s1 + $0x2b8] sm:$0xff]  ;;  %v2483_v38 = vcombine.low %v117_v25, %v129_v26  ;;  %v167_v12 = vld [vmem:[%s3564_s1 + $0x4a0] sm:$0xff] }
  0x14   :  { %v2460_v40 = vcombine.high %v93_v34, %v105_v35  ;;  %v2462_v41 = vcombine.high %v94_v36, %v106_v37  ;;  %v69_v42 = vld [vmem:[%s3564_s1 + $0x190] sm:$0xff]  ;;  %v2459_v46 = vcombine.low %v93_v34, %v105_v35  ;;  %v143_v20 = vld [vmem:[%s3564_s1 + $0x3e0] sm:$0xff] }
  0x15   :  { %v45_v50 = vld [vmem:[%s3564_s1 + $0xd0] sm:$0xff]  ;;  %v119_v28 = vld [vmem:[%s3564_s1 + $0x320] sm:$0xff] }
  0x16   :  { %1318 = vmatpush1.bf16.msra.mxu0 %v2455_v43  ;;  %1371 = vmatpush1.bf16.msra.mxu1 %v2457_v44  ;;  %v81_v43 = vld [vmem:[%s3564_s1 + $0x1f0] sm:$0xff]  ;;  %v70_v44 = vld [vmem:[%s3564_s1 + $0x198] sm:$0xff] }
  0x17   :  { %1319 = vmatprep.subr.bf16.mxu0 %v2432_v45  ;;  %1372 = vmatprep.subr.bf16.mxu1 %v2434_v47  ;;  %v82_v45 = vld [vmem:[%s3564_s1 + $0x1f8] sm:$0xff]  ;;  %v2461_v47 = vcombine.low %v94_v36, %v106_v37  ;;  %v2436_v48 = vcombine.high %v69_v42, %v81_v43  ;;  %v21_v58 = vld [vmem:[%s3564_s1 + $0x10] sm:$0xff]  ;;  %v95_v37 = vld [vmem:[%s3564_s1 + $0x260] sm:$0xff] }
  0x18   :  { %v2438_v49 = vcombine.high %v70_v44, %v82_v45  ;;  %v2437_v55 = vcombine.low %v70_v44, %v82_v45  ;;  %v71_v45 = vld [vmem:[%s3564_s1 + $0x1a0] sm:$0xff] }
  0x1a   :  { %1320 = vmatpush1.bf16.msra.mxu0 %v2431_v51  ;;  %1373 = vmatpush1.bf16.msra.mxu1 %v2433_v52  ;;  %v57_v51 = vld [vmem:[%s3564_s1 + $0x130] sm:$0xff]  ;;  %v46_v52 = vld [vmem:[%s3564_s1 + $0xd8] sm:$0xff] }
  0x1b   :  { %1321 = vmatprep.subr.bf16.mxu0 %v2408_v53  ;;  %1374 = vmatprep.subr.bf16.mxu1 %v2410_v54  ;;  %v58_v53 = vld [vmem:[%s3564_s1 + $0x138] sm:$0xff]  ;;  %v2435_v54 = vcombine.low %v69_v42, %v81_v43  ;;  %v2412_v56 = vcombine.high %v45_v50, %v57_v51 }
  0x1c   :  { %v2414_v57 = vcombine.high %v46_v52, %v58_v53  ;;  %v2413_v63 = vcombine.low %v46_v52, %v58_v53  ;;  %v47_v53 = vld [vmem:[%s3564_s1 + $0xe0] sm:$0xff] }
  0x1e   :  { %1322 = vmatpush1.bf16.msra.mxu0 %v2407_v59  ;;  %1375 = vmatpush1.bf16.msra.mxu1 %v2409_v60  ;;  %v33_v59 = vld [vmem:[%s3564_s1 + $0x70] sm:$0xff]  ;;  %v22_v60 = vld [vmem:[%s3564_s1 + $0x18] sm:$0xff] }
  0x1f   :  { %1323 = vmatprep.subr.bf16.mxu0 %v2384_v61  ;;  %1376 = vmatprep.subr.bf16.mxu1 %v2386_v62  ;;  %v34_v61 = vld [vmem:[%s3564_s1 + $0x78] sm:$0xff]  ;;  %v2411_v62 = vcombine.low %v45_v50, %v57_v51  ;;  %v2388_v0 = vcombine.high %v21_v58, %v33_v59 }
  0x20   :  { %v2390_v1 = vcombine.high %v22_v60, %v34_v61  ;;  %v2389_v8 = vcombine.low %v22_v60, %v34_v61  ;;  %v23_v61 = vld [vmem:[%s3564_s1 + $0x20] sm:$0xff] }
  0x22   :  { %1324 = vmatpush1.bf16.msra.mxu0 %v2383_v4  ;;  %1377 = vmatpush1.bf16.msra.mxu1 %v2385_v5  ;;  %v203_v4 = vld [vmem:[%s3564_s1 + $0x5c0] sm:$0xff]  ;;  %v192_v5 = vld [vmem:[%s3564_s1 + $0x568] sm:$0xff] }
  0x23   :  { %1415 = vmatprep.subr.bf16.mxu0 %v2556_v6  ;;  %1468 = vmatprep.subr.bf16.mxu1 %v2558_v7  ;;  %v204_v6 = vld [vmem:[%s3564_s1 + $0x5c8] sm:$0xff]  ;;  %v2387_v7 = vcombine.low %v21_v58, %v33_v59  ;;  %v2560_v9 = vcombine.high %v191_v2, %v203_v4 }
  0x24   :  { %v2562_v11 = vcombine.high %v192_v5, %v204_v6  ;;  %v2561_v17 = vcombine.low %v192_v5, %v204_v6  ;;  %v193_v6 = vld [vmem:[%s3564_s1 + $0x570] sm:$0xff] }
  0x25   :  { %1342 = vmatmul.mubr.bf16.vlgmr.msra.gmra.mxu0 %v2815_v10  ;;  %1395 = vmatmul.mubr.bf16.vlgmr.msra.gmra.mxu1 %v2815_v10 }
  0x26   :  { %1416 = vmatpush1.bf16.msra.mxu0 %v2555_v13  ;;  %1469 = vmatpush1.bf16.msra.mxu1 %v2557_v14  ;;  %v179_v13 = vld [vmem:[%s3564_s1 + $0x500] sm:$0xff]  ;;  %v168_v14 = vld [vmem:[%s3564_s1 + $0x4a8] sm:$0xff] }
  0x27   :  { %1417 = vmatprep.subr.bf16.mxu0 %v2532_v15  ;;  %1470 = vmatprep.subr.bf16.mxu1 %v2534_v16  ;;  %v180_v15 = vld [vmem:[%s3564_s1 + $0x508] sm:$0xff]  ;;  %v2559_v16 = vcombine.low %v191_v2, %v203_v4  ;;  %v2536_v18 = vcombine.high %v167_v12, %v179_v13 }
  0x28   :  { %1351 = vmatprep.mubr.bf16.mxu0 %v2675_v3  ;;  %1404 = vmatprep.mubr.bf16.mxu1 %v2675_v3  ;;  %v2538_v19 = vcombine.high %v168_v14, %v180_v15  ;;  %v2537_v25 = vcombine.low %v168_v14, %v180_v15  ;;  %v169_v15 = vld [vmem:[%s3564_s1 + $0x4b0] sm:$0xff] }
  0x2a   :  { %1418 = vmatpush1.bf16.msra.mxu0 %v2531_v21  ;;  %1471 = vmatpush1.bf16.msra.mxu1 %v2533_v22  ;;  %v155_v21 = vld [vmem:[%s3564_s1 + $0x440] sm:$0xff]  ;;  %v144_v22 = vld [vmem:[%s3564_s1 + $0x3e8] sm:$0xff] }
  0x2b   :  { %1419 = vmatprep.subr.bf16.mxu0 %v2508_v23  ;;  %1472 = vmatprep.subr.bf16.mxu1 %v2510_v24  ;;  %v156_v23 = vld [vmem:[%s3564_s1 + $0x448] sm:$0xff]  ;;  %v2535_v24 = vcombine.low %v167_v12, %v179_v13  ;;  %v2512_v26 = vcombine.high %v143_v20, %v155_v21 }
  0x2c   :  { %v2514_v27 = vcombine.high %v144_v22, %v156_v23  ;;  %v2513_v34 = vcombine.low %v144_v22, %v156_v23  ;;  %v145_v23 = vld [vmem:[%s3564_s1 + $0x3f0] sm:$0xff] }
  0x2d   :  { %1352 = vmatmul.mubr.bf16.gmra.mxu0 %v2854_v29  ;;  %1405 = vmatmul.mubr.bf16.gmra.mxu1 %v2854_v29 }
  0x2e   :  { %1420 = vmatpush1.bf16.msra.mxu0 %v2507_v30  ;;  %1473 = vmatpush1.bf16.msra.mxu1 %v2509_v31  ;;  %v131_v30 = vld [vmem:[%s3564_s1 + $0x380] sm:$0xff]  ;;  %v120_v31 = vld [vmem:[%s3564_s1 + $0x328] sm:$0xff] }
  0x2f   :  { %1421 = vmatprep.subr.bf16.mxu0 %v2484_v32  ;;  %1474 = vmatprep.subr.bf16.mxu1 %v2486_v33  ;;  %v132_v32 = vld [vmem:[%s3564_s1 + $0x388] sm:$0xff]  ;;  %v2511_v33 = vcombine.low %v143_v20, %v155_v21  ;;  %v2488_v35 = vcombine.high %v119_v28, %v131_v30 }
  0x30   :  { %1447 = vmatprep.mubr.bf16.mxu0 %v2675_v3  ;;  %1500 = vmatprep.mubr.bf16.mxu1 %v2675_v3  ;;  %v2490_v36 = vcombine.high %v120_v31, %v132_v32  ;;  %v2489_v42 = vcombine.low %v120_v31, %v132_v32  ;;  %v121_v32 = vld [vmem:[%s3564_s1 + $0x330] sm:$0xff] }
  0x32   :  { %1422 = vmatpush1.bf16.msra.mxu0 %v2483_v38  ;;  %1475 = vmatpush1.bf16.msra.mxu1 %v2485_v39  ;;  %v107_v38 = vld [vmem:[%s3564_s1 + $0x2c0] sm:$0xff]  ;;  %v96_v39 = vld [vmem:[%s3564_s1 + $0x268] sm:$0xff] }
  0x33   :  { %1423 = vmatprep.subr.bf16.mxu0 %v2460_v40  ;;  %1476 = vmatprep.subr.bf16.mxu1 %v2462_v41  ;;  %v108_v40 = vld [vmem:[%s3564_s1 + $0x2c8] sm:$0xff]  ;;  %v2487_v41 = vcombine.low %v119_v28, %v131_v30  ;;  %v2464_v43 = vcombine.high %v95_v37, %v107_v38 }
  0x34   :  { %v2466_v44 = vcombine.high %v96_v39, %v108_v40  ;;  %v2465_v50 = vcombine.low %v96_v39, %v108_v40  ;;  %v97_v40 = vld [vmem:[%s3564_s1 + $0x270] sm:$0xff] }
  0x36   :  { %1424 = vmatpush1.bf16.msra.mxu0 %v2459_v46  ;;  %1477 = vmatpush1.bf16.msra.mxu1 %v2461_v47  ;;  %v83_v46 = vld [vmem:[%s3564_s1 + $0x200] sm:$0xff]  ;;  %v72_v47 = vld [vmem:[%s3564_s1 + $0x1a8] sm:$0xff] }
  0x37   :  { %1425 = vmatprep.subr.bf16.mxu0 %v2436_v48  ;;  %1478 = vmatprep.subr.bf16.mxu1 %v2438_v49  ;;  %v84_v48 = vld [vmem:[%s3564_s1 + $0x208] sm:$0xff]  ;;  %v2463_v49 = vcombine.low %v95_v37, %v107_v38  ;;  %v2440_v51 = vcombine.high %v71_v45, %v83_v46 }
  0x38   :  { %v2442_v52 = vcombine.high %v72_v47, %v84_v48  ;;  %v2441_v58 = vcombine.low %v72_v47, %v84_v48  ;;  %v73_v48 = vld [vmem:[%s3564_s1 + $0x1b0] sm:$0xff] }
  0x3a   :  { %1426 = vmatpush1.bf16.msra.mxu0 %v2435_v54  ;;  %1479 = vmatpush1.bf16.msra.mxu1 %v2437_v55  ;;  %v59_v54 = vld [vmem:[%s3564_s1 + $0x140] sm:$0xff]  ;;  %v48_v55 = vld [vmem:[%s3564_s1 + $0xe8] sm:$0xff] }
  0x3b   :  { %1427 = vmatprep.subr.bf16.mxu0 %v2412_v56  ;;  %1480 = vmatprep.subr.bf16.mxu1 %v2414_v57  ;;  %v60_v56 = vld [vmem:[%s3564_s1 + $0x148] sm:$0xff]  ;;  %v2439_v57 = vcombine.low %v71_v45, %v83_v46  ;;  %v2416_v59 = vcombine.high %v47_v53, %v59_v54 }
  0x3c   :  { %v2418_v60 = vcombine.high %v48_v55, %v60_v56  ;;  %v2417_v2 = vcombine.low %v48_v55, %v60_v56  ;;  %v49_v56 = vld [vmem:[%s3564_s1 + $0xf0] sm:$0xff] }
  0x3e   :  { %1428 = vmatpush1.bf16.msra.mxu0 %v2411_v62  ;;  %1481 = vmatpush1.bf16.msra.mxu1 %v2413_v63  ;;  %v35_v62 = vld [vmem:[%s3564_s1 + $0x80] sm:$0xff]  ;;  %v24_v63 = vld [vmem:[%s3564_s1 + $0x28] sm:$0xff] }
  0x3f   :  { %1429 = vmatprep.subr.bf16.mxu0 %v2388_v0  ;;  %1482 = vmatprep.subr.bf16.mxu1 %v2390_v1  ;;  %v36_v0 = vld [vmem:[%s3564_s1 + $0x88] sm:$0xff]  ;;  %v2415_v1 = vcombine.low %v47_v53, %v59_v54  ;;  %v2392_v4 = vcombine.high %v23_v61, %v35_v62 }
  0x40   :  { %v2394_v5 = vcombine.high %v24_v63, %v36_v0  ;;  %v2393_v12 = vcombine.low %v24_v63, %v36_v0  ;;  %v25_v0 = vld [vmem:[%s3564_s1 + $0x30] sm:$0xff] }
  0x42   :  { %1430 = vmatpush1.bf16.msra.mxu0 %v2387_v7  ;;  %1483 = vmatpush1.bf16.msra.mxu1 %v2389_v8  ;;  %v205_v7 = vld [vmem:[%s3564_s1 + $0x5d0] sm:$0xff]  ;;  %v194_v8 = vld [vmem:[%s3564_s1 + $0x578] sm:$0xff] }
  0x43   :  { %1521 = vmatprep.subr.bf16.mxu0 %v2560_v9  ;;  %1574 = vmatprep.subr.bf16.mxu1 %v2562_v11  ;;  %v206_v9 = vld [vmem:[%s3564_s1 + $0x5d8] sm:$0xff]  ;;  %v2391_v11 = vcombine.low %v23_v61, %v35_v62  ;;  %v2564_v13 = vcombine.high %v193_v6, %v205_v7 }
  0x44   :  { %v2566_v14 = vcombine.high %v194_v8, %v206_v9  ;;  %v2565_v20 = vcombine.low %v194_v8, %v206_v9  ;;  %v195_v9 = vld [vmem:[%s3564_s1 + $0x580] sm:$0xff] }
  0x45   :  { %1448 = vmatmul.mubr.bf16.vlgmr.msra.gmra.mxu0 %v2815_v10  ;;  %1501 = vmatmul.mubr.bf16.vlgmr.msra.gmra.mxu1 %v2815_v10 }
  0x46   :  { %1522 = vmatpush1.bf16.msra.mxu0 %v2559_v16  ;;  %1575 = vmatpush1.bf16.msra.mxu1 %v2561_v17  ;;  %v181_v16 = vld [vmem:[%s3564_s1 + $0x510] sm:$0xff]  ;;  %v170_v17 = vld [vmem:[%s3564_s1 + $0x4b8] sm:$0xff] }
  0x47   :  { %1523 = vmatprep.subr.bf16.mxu0 %v2536_v18  ;;  %1576 = vmatprep.subr.bf16.mxu1 %v2538_v19  ;;  %v182_v18 = vld [vmem:[%s3564_s1 + $0x518] sm:$0xff]  ;;  %v2563_v19 = vcombine.low %v193_v6, %v205_v7  ;;  %v2540_v21 = vcombine.high %v169_v15, %v181_v16 }
  0x48   :  { %1457 = vmatprep.mubr.bf16.mxu0 %v2675_v3  ;;  %1510 = vmatprep.mubr.bf16.mxu1 %v2675_v3  ;;  %v2542_v22 = vcombine.high %v170_v17, %v182_v18  ;;  %v2541_v28 = vcombine.low %v170_v17, %v182_v18  ;;  %v171_v18 = vld [vmem:[%s3564_s1 + $0x4c0] sm:$0xff] }
  0x4a   :  { %1524 = vmatpush1.bf16.msra.mxu0 %v2535_v24  ;;  %1577 = vmatpush1.bf16.msra.mxu1 %v2537_v25  ;;  %v157_v24 = vld [vmem:[%s3564_s1 + $0x450] sm:$0xff]  ;;  %v146_v25 = vld [vmem:[%s3564_s1 + $0x3f8] sm:$0xff] }
  0x4b   :  { %1525 = vmatprep.subr.bf16.mxu0 %v2512_v26  ;;  %1578 = vmatprep.subr.bf16.mxu1 %v2514_v27  ;;  %v158_v26 = vld [vmem:[%s3564_s1 + $0x458] sm:$0xff]  ;;  %v2539_v27 = vcombine.low %v169_v15, %v181_v16  ;;  %v2516_v30 = vcombine.high %v145_v23, %v157_v24 }
  0x4c   :  { %v2518_v31 = vcombine.high %v146_v25, %v158_v26  ;;  %v2517_v37 = vcombine.low %v146_v25, %v158_v26  ;;  %v147_v26 = vld [vmem:[%s3564_s1 + $0x400] sm:$0xff] }
  0x4d   :  { %1458 = vmatmul.mubr.bf16.gmra.mxu0 %v2854_v29  ;;  %1511 = vmatmul.mubr.bf16.gmra.mxu1 %v2854_v29 }
  0x4e   :  { %1526 = vmatpush1.bf16.msra.mxu0 %v2511_v33  ;;  %1579 = vmatpush1.bf16.msra.mxu1 %v2513_v34  ;;  %v133_v33 = vld [vmem:[%s3564_s1 + $0x390] sm:$0xff]  ;;  %v122_v34 = vld [vmem:[%s3564_s1 + $0x338] sm:$0xff] }
  0x4f   :  { %1527 = vmatprep.subr.bf16.mxu0 %v2488_v35  ;;  %1580 = vmatprep.subr.bf16.mxu1 %v2490_v36  ;;  %v134_v35 = vld [vmem:[%s3564_s1 + $0x398] sm:$0xff]  ;;  %v2515_v36 = vcombine.low %v145_v23, %v157_v24  ;;  %v2492_v38 = vcombine.high %v121_v32, %v133_v33 }
  0x50   :  { %1553 = vmatprep.mubr.bf16.mxu0 %v2675_v3  ;;  %1606 = vmatprep.mubr.bf16.mxu1 %v2675_v3  ;;  %v2494_v39 = vcombine.high %v122_v34, %v134_v35  ;;  %v2493_v45 = vcombine.low %v122_v34, %v134_v35  ;;  %v123_v35 = vld [vmem:[%s3564_s1 + $0x340] sm:$0xff] }
  0x52   :  { %1528 = vmatpush1.bf16.msra.mxu0 %v2487_v41  ;;  %1581 = vmatpush1.bf16.msra.mxu1 %v2489_v42  ;;  %v109_v41 = vld [vmem:[%s3564_s1 + $0x2d0] sm:$0xff]  ;;  %v98_v42 = vld [vmem:[%s3564_s1 + $0x278] sm:$0xff] }
  0x53   :  { %1529 = vmatprep.subr.bf16.mxu0 %v2464_v43  ;;  %1582 = vmatprep.subr.bf16.mxu1 %v2466_v44  ;;  %v110_v43 = vld [vmem:[%s3564_s1 + $0x2d8] sm:$0xff]  ;;  %v2491_v44 = vcombine.low %v121_v32, %v133_v33  ;;  %v2468_v46 = vcombine.high %v97_v40, %v109_v41 }
  0x54   :  { %v2470_v47 = vcombine.high %v98_v42, %v110_v43  ;;  %v2469_v53 = vcombine.low %v98_v42, %v110_v43  ;;  %v99_v43 = vld [vmem:[%s3564_s1 + $0x280] sm:$0xff] }
  0x56   :  { %1530 = vmatpush1.bf16.msra.mxu0 %v2463_v49  ;;  %1583 = vmatpush1.bf16.msra.mxu1 %v2465_v50  ;;  %v85_v49 = vld [vmem:[%s3564_s1 + $0x210] sm:$0xff]  ;;  %v74_v50 = vld [vmem:[%s3564_s1 + $0x1b8] sm:$0xff] }
  0x57   :  { %1531 = vmatprep.subr.bf16.mxu0 %v2440_v51  ;;  %1584 = vmatprep.subr.bf16.mxu1 %v2442_v52  ;;  %v86_v51 = vld [vmem:[%s3564_s1 + $0x218] sm:$0xff]  ;;  %v2467_v52 = vcombine.low %v97_v40, %v109_v41  ;;  %v2444_v54 = vcombine.high %v73_v48, %v85_v49 }
  0x58   :  { %v2446_v55 = vcombine.high %v74_v50, %v86_v51  ;;  %v2445_v61 = vcombine.low %v74_v50, %v86_v51  ;;  %v75_v51 = vld [vmem:[%s3564_s1 + $0x1c0] sm:$0xff] }
  0x5a   :  { %1532 = vmatpush1.bf16.msra.mxu0 %v2439_v57  ;;  %1585 = vmatpush1.bf16.msra.mxu1 %v2441_v58  ;;  %v61_v57 = vld [vmem:[%s3564_s1 + $0x150] sm:$0xff]  ;;  %v50_v58 = vld [vmem:[%s3564_s1 + $0xf8] sm:$0xff] }
  0x5b   :  { %1533 = vmatprep.subr.bf16.mxu0 %v2416_v59  ;;  %1586 = vmatprep.subr.bf16.mxu1 %v2418_v60  ;;  %v62_v59 = vld [vmem:[%s3564_s1 + $0x158] sm:$0xff]  ;;  %v2443_v60 = vcombine.low %v73_v48, %v85_v49  ;;  %v2420_v62 = vcombine.high %v49_v56, %v61_v57 }
  0x5c   :  { %v2422_v63 = vcombine.high %v50_v58, %v62_v59  ;;  %v2421_v6 = vcombine.low %v50_v58, %v62_v59  ;;  %v51_v59 = vld [vmem:[%s3564_s1 + $0x100] sm:$0xff] }
  0x5e   :  { %1534 = vmatpush1.bf16.msra.mxu0 %v2415_v1  ;;  %1587 = vmatpush1.bf16.msra.mxu1 %v2417_v2  ;;  %v37_v1 = vld [vmem:[%s3564_s1 + $0x90] sm:$0xff]  ;;  %v26_v2 = vld [vmem:[%s3564_s1 + $0x38] sm:$0xff] }
  0x5f   :  { %1535 = vmatprep.subr.bf16.mxu0 %v2392_v4  ;;  %1588 = vmatprep.subr.bf16.mxu1 %v2394_v5  ;;  %v38_v4 = vld [vmem:[%s3564_s1 + $0x98] sm:$0xff]  ;;  %v2419_v5 = vcombine.low %v49_v56, %v61_v57  ;;  %v2396_v7 = vcombine.high %v25_v0, %v37_v1 }
  0x60   :  { %v2398_v8 = vcombine.high %v26_v2, %v38_v4  ;;  %v2397_v15 = vcombine.low %v26_v2, %v38_v4  ;;  %v27_v4 = vld [vmem:[%s3564_s1 + $0x40] sm:$0xff] }
  0x62   :  { %1536 = vmatpush1.bf16.msra.mxu0 %v2391_v11  ;;  %1589 = vmatpush1.bf16.msra.mxu1 %v2393_v12  ;;  %v207_v11 = vld [vmem:[%s3564_s1 + $0x5e0] sm:$0xff]  ;;  %v196_v12 = vld [vmem:[%s3564_s1 + $0x588] sm:$0xff] }
  0x63   :  { %1627 = vmatprep.subr.bf16.mxu0 %v2564_v13  ;;  %1680 = vmatprep.subr.bf16.mxu1 %v2566_v14  ;;  %v208_v13 = vld [vmem:[%s3564_s1 + $0x5e8] sm:$0xff]  ;;  %v2395_v14 = vcombine.low %v25_v0, %v37_v1  ;;  %v2568_v16 = vcombine.high %v195_v9, %v207_v11 }
  0x64   :  { %v2570_v17 = vcombine.high %v196_v12, %v208_v13  ;;  %v2569_v23 = vcombine.low %v196_v12, %v208_v13  ;;  %v197_v13 = vld [vmem:[%s3564_s1 + $0x590] sm:$0xff] }
  0x65   :  { %1554 = vmatmul.mubr.bf16.vlgmr.msra.gmra.mxu0 %v2815_v10  ;;  %1607 = vmatmul.mubr.bf16.vlgmr.msra.gmra.mxu1 %v2815_v10 }
  0x66   :  { %1628 = vmatpush1.bf16.msra.mxu0 %v2563_v19  ;;  %1681 = vmatpush1.bf16.msra.mxu1 %v2565_v20  ;;  %v183_v19 = vld [vmem:[%s3564_s1 + $0x520] sm:$0xff]  ;;  %v172_v20 = vld [vmem:[%s3564_s1 + $0x4c8] sm:$0xff] }
  0x67   :  { %1629 = vmatprep.subr.bf16.mxu0 %v2540_v21  ;;  %1682 = vmatprep.subr.bf16.mxu1 %v2542_v22  ;;  %v184_v21 = vld [vmem:[%s3564_s1 + $0x528] sm:$0xff]  ;;  %v2567_v22 = vcombine.low %v195_v9, %v207_v11  ;;  %v2544_v24 = vcombine.high %v171_v18, %v183_v19 }
  0x68   :  { %1563 = vmatprep.mubr.bf16.mxu0 %v2675_v3  ;;  %1616 = vmatprep.mubr.bf16.mxu1 %v2675_v3  ;;  %v2546_v25 = vcombine.high %v172_v20, %v184_v21  ;;  %v2545_v32 = vcombine.low %v172_v20, %v184_v21  ;;  %v173_v21 = vld [vmem:[%s3564_s1 + $0x4d0] sm:$0xff] }
  0x6a   :  { %1630 = vmatpush1.bf16.msra.mxu0 %v2539_v27  ;;  %1683 = vmatpush1.bf16.msra.mxu1 %v2541_v28  ;;  %v159_v27 = vld [vmem:[%s3564_s1 + $0x460] sm:$0xff]  ;;  %v148_v28 = vld [vmem:[%s3564_s1 + $0x408] sm:$0xff] }
  0x6b   :  { %1631 = vmatprep.subr.bf16.mxu0 %v2516_v30  ;;  %1684 = vmatprep.subr.bf16.mxu1 %v2518_v31  ;;  %v160_v30 = vld [vmem:[%s3564_s1 + $0x468] sm:$0xff]  ;;  %v2543_v31 = vcombine.low %v171_v18, %v183_v19  ;;  %v2520_v33 = vcombine.high %v147_v26, %v159_v27 }
  0x6c   :  { %v2522_v34 = vcombine.high %v148_v28, %v160_v30  ;;  %v2521_v40 = vcombine.low %v148_v28, %v160_v30  ;;  %v149_v30 = vld [vmem:[%s3564_s1 + $0x410] sm:$0xff] }
  0x6d   :  { %1564 = vmatmul.mubr.bf16.gmra.mxu0 %v2854_v29  ;;  %1617 = vmatmul.mubr.bf16.gmra.mxu1 %v2854_v29 }
  0x6e   :  { %1632 = vmatpush1.bf16.msra.mxu0 %v2515_v36  ;;  %1685 = vmatpush1.bf16.msra.mxu1 %v2517_v37  ;;  %v135_v36 = vld [vmem:[%s3564_s1 + $0x3a0] sm:$0xff]  ;;  %v124_v37 = vld [vmem:[%s3564_s1 + $0x348] sm:$0xff] }
  0x6f   :  { %1633 = vmatprep.subr.bf16.mxu0 %v2492_v38  ;;  %1686 = vmatprep.subr.bf16.mxu1 %v2494_v39  ;;  %v136_v38 = vld [vmem:[%s3564_s1 + $0x3a8] sm:$0xff]  ;;  %v2519_v39 = vcombine.low %v147_v26, %v159_v27  ;;  %v2496_v41 = vcombine.high %v123_v35, %v135_v36 }
  0x70   :  { %1659 = vmatprep.mubr.bf16.mxu0 %v2675_v3  ;;  %1712 = vmatprep.mubr.bf16.mxu1 %v2675_v3  ;;  %v2498_v42 = vcombine.high %v124_v37, %v136_v38  ;;  %v2497_v48 = vcombine.low %v124_v37, %v136_v38  ;;  %v125_v38 = vld [vmem:[%s3564_s1 + $0x350] sm:$0xff] }
  0x72   :  { %1634 = vmatpush1.bf16.msra.mxu0 %v2491_v44  ;;  %1687 = vmatpush1.bf16.msra.mxu1 %v2493_v45  ;;  %v111_v44 = vld [vmem:[%s3564_s1 + $0x2e0] sm:$0xff]  ;;  %v100_v45 = vld [vmem:[%s3564_s1 + $0x288] sm:$0xff] }
  0x73   :  { %1635 = vmatprep.subr.bf16.mxu0 %v2468_v46  ;;  %1688 = vmatprep.subr.bf16.mxu1 %v2470_v47  ;;  %v112_v46 = vld [vmem:[%s3564_s1 + $0x2e8] sm:$0xff]  ;;  %v2495_v47 = vcombine.low %v123_v35, %v135_v36  ;;  %v2472_v49 = vcombine.high %v99_v43, %v111_v44 }
  0x74   :  { %v2474_v50 = vcombine.high %v100_v45, %v112_v46  ;;  %v2473_v56 = vcombine.low %v100_v45, %v112_v46  ;;  %v101_v45 = vld [vmem:[%s3564_s1 + $0x290] sm:$0xff] }
  0x75   :  { %v113_v46 = vld [vmem:[%s3564_s1 + $0x2f0] sm:$0xff] }
  0x76   :  { %1636 = vmatpush1.bf16.msra.mxu0 %v2467_v52  ;;  %1689 = vmatpush1.bf16.msra.mxu1 %v2469_v53  ;;  %v87_v52 = vld [vmem:[%s3564_s1 + $0x220] sm:$0xff]  ;;  %v76_v53 = vld [vmem:[%s3564_s1 + $0x1c8] sm:$0xff] }
  0x77   :  { %1637 = vmatprep.subr.bf16.mxu0 %v2444_v54  ;;  %1690 = vmatprep.subr.bf16.mxu1 %v2446_v55  ;;  %v88_v54 = vld [vmem:[%s3564_s1 + $0x228] sm:$0xff]  ;;  %v2471_v55 = vcombine.low %v99_v43, %v111_v44  ;;  %v2448_v57 = vcombine.high %v75_v51, %v87_v52 }
  0x78   :  { %v2450_v58 = vcombine.high %v76_v53, %v88_v54  ;;  %v2449_v0 = vcombine.low %v76_v53, %v88_v54  ;;  %v77_v53 = vld [vmem:[%s3564_s1 + $0x1d0] sm:$0xff] }
  0x79   :  { %v89_v54 = vld [vmem:[%s3564_s1 + $0x230] sm:$0xff] }
  0x7a   :  { %1638 = vmatpush1.bf16.msra.mxu0 %v2443_v60  ;;  %1691 = vmatpush1.bf16.msra.mxu1 %v2445_v61  ;;  %v63_v60 = vld [vmem:[%s3564_s1 + $0x160] sm:$0xff]  ;;  %v52_v61 = vld [vmem:[%s3564_s1 + $0x108] sm:$0xff] }
  0x7b   :  { %1639 = vmatprep.subr.bf16.mxu0 %v2420_v62  ;;  %1692 = vmatprep.subr.bf16.mxu1 %v2422_v63  ;;  %v64_v62 = vld [vmem:[%s3564_s1 + $0x168] sm:$0xff]  ;;  %v2447_v63 = vcombine.low %v75_v51, %v87_v52  ;;  %v2424_v1 = vcombine.high %v51_v59, %v63_v60  ;;  %v2476_v51 = vcombine.high %v101_v45, %v113_v46 }
  0x7c   :  { %v2426_v2 = vcombine.high %v52_v61, %v64_v62  ;;  %v2425_v9 = vcombine.low %v52_v61, %v64_v62  ;;  %v53_v61 = vld [vmem:[%s3564_s1 + $0x110] sm:$0xff] }
  0x7d   :  { %v65_v62 = vld [vmem:[%s3564_s1 + $0x170] sm:$0xff] }
  0x7e   :  { %1640 = vmatpush1.bf16.msra.mxu0 %v2419_v5  ;;  %1693 = vmatpush1.bf16.msra.mxu1 %v2421_v6  ;;  %v39_v5 = vld [vmem:[%s3564_s1 + $0xa0] sm:$0xff]  ;;  %v28_v6 = vld [vmem:[%s3564_s1 + $0x48] sm:$0xff] }
  0x7f   :  { %1641 = vmatprep.subr.bf16.mxu0 %v2396_v7  ;;  %1694 = vmatprep.subr.bf16.mxu1 %v2398_v8  ;;  %v40_v7 = vld [vmem:[%s3564_s1 + $0xa8] sm:$0xff]  ;;  %v2423_v8 = vcombine.low %v51_v59, %v63_v60  ;;  %v2400_v11 = vcombine.high %v27_v4, %v39_v5  ;;  %v2452_v59 = vcombine.high %v77_v53, %v89_v54 }
  0x80   :  { %v2402_v12 = vcombine.high %v28_v6, %v40_v7  ;;  %v2401_v18 = vcombine.low %v28_v6, %v40_v7  ;;  %v29_v6 = vld [vmem:[%s3564_s1 + $0x50] sm:$0xff] }
  0x81   :  { %v41_v7 = vld [vmem:[%s3564_s1 + $0xb0] sm:$0xff] }
  0x82   :  { %1642 = vmatpush1.bf16.msra.mxu0 %v2395_v14  ;;  %1695 = vmatpush1.bf16.msra.mxu1 %v2397_v15  ;;  %v209_v14 = vld [vmem:[%s3564_s1 + $0x5f0] sm:$0xff]  ;;  %v198_v15 = vld [vmem:[%s3564_s1 + $0x598] sm:$0xff] }
  0x83   :  { %1733 = vmatprep.subr.bf16.mxu0 %v2568_v16  ;;  %1786 = vmatprep.subr.bf16.mxu1 %v2570_v17  ;;  %v210_v16 = vld [vmem:[%s3564_s1 + $0x5f8] sm:$0xff]  ;;  %v2399_v17 = vcombine.low %v27_v4, %v39_v5  ;;  %v2572_v19 = vcombine.high %v197_v13, %v209_v14  ;;  %v2428_v4 = vcombine.high %v53_v61, %v65_v62 }
  0x84   :  { %v2574_v20 = vcombine.high %v198_v15, %v210_v16  ;;  %v2573_v26 = vcombine.low %v198_v15, %v210_v16  ;;  %v2403_v15 = vcombine.low %v29_v6, %v41_v7 }
  0x85   :  { %1660 = vmatmul.mubr.bf16.vlgmr.msra.gmra.mxu0 %v2815_v10  ;;  %1713 = vmatmul.mubr.bf16.vlgmr.msra.gmra.mxu1 %v2815_v10 }
  0x86   :  { %1734 = vmatpush1.bf16.msra.mxu0 %v2567_v22  ;;  %1787 = vmatpush1.bf16.msra.mxu1 %v2569_v23  ;;  %v185_v22 = vld [vmem:[%s3564_s1 + $0x530] sm:$0xff]  ;;  %v174_v23 = vld [vmem:[%s3564_s1 + $0x4d8] sm:$0xff] }
  0x87   :  { %1735 = vmatprep.subr.bf16.mxu0 %v2544_v24  ;;  %1788 = vmatprep.subr.bf16.mxu1 %v2546_v25  ;;  %v186_v24 = vld [vmem:[%s3564_s1 + $0x538] sm:$0xff]  ;;  %v2571_v25 = vcombine.low %v197_v13, %v209_v14  ;;  %v2548_v27 = vcombine.high %v173_v21, %v185_v22  ;;  %v2404_v13 = vcombine.high %v29_v6, %v41_v7 }
  0x88   :  { %1669 = vmatprep.mubr.bf16.mxu0 %v2675_v3  ;;  %1722 = vmatprep.mubr.bf16.mxu1 %v2675_v3  ;;  %v2550_v28 = vcombine.high %v174_v23, %v186_v24  ;;  %v2549_v35 = vcombine.low %v174_v23, %v186_v24 }
  0x8a   :  { %1736 = vmatpush1.bf16.msra.mxu0 %v2543_v31  ;;  %1789 = vmatpush1.bf16.msra.mxu1 %v2545_v32  ;;  %v161_v31 = vld [vmem:[%s3564_s1 + $0x470] sm:$0xff]  ;;  %v150_v32 = vld [vmem:[%s3564_s1 + $0x418] sm:$0xff] }
  0x8b   :  { %1737 = vmatprep.subr.bf16.mxu0 %v2520_v33  ;;  %1790 = vmatprep.subr.bf16.mxu1 %v2522_v34  ;;  %v162_v33 = vld [vmem:[%s3564_s1 + $0x478] sm:$0xff]  ;;  %v2547_v34 = vcombine.low %v173_v21, %v185_v22  ;;  %v2524_v36 = vcombine.high %v149_v30, %v161_v31  ;;  %v3339_v21 = vld [vmem:[%s3566_s2] sm:$0xff] }
  0x8c   :  { %v2526_v37 = vcombine.high %v150_v32, %v162_v33 }
  0x8d   :  { %1670 = vmatmul.mubr.bf16.gmra.mxu0 %v2854_v29  ;;  %1723 = vmatmul.mubr.bf16.gmra.mxu1 %v2854_v29 }
  0x8e   :  { %1738 = vmatpush1.bf16.msra.mxu0 %v2519_v39  ;;  %1791 = vmatpush1.bf16.msra.mxu1 %v2521_v40  ;;  %v137_v39 = vld [vmem:[%s3564_s1 + $0x3b0] sm:$0xff]  ;;  %v138_v40 = vld [vmem:[%s3564_s1 + $0x3b8] sm:$0xff] }
  0x8f   :  { %1739 = vmatprep.subr.bf16.mxu0 %v2496_v41  ;;  %1792 = vmatprep.subr.bf16.mxu1 %v2498_v42  ;;  %v2523_v41 = vcombine.low %v149_v30, %v161_v31  ;;  %v2525_v42 = vcombine.low %v150_v32, %v162_v33  ;;  %v2500_v43 = vcombine.high %v125_v38, %v137_v39 }
  0x90   :  { %1765 = vmatprep.mubr.bf16.mxu0 %v2675_v3  ;;  %1818 = vmatprep.mubr.bf16.mxu1 %v2675_v3 }
  0x92   :  { %1740 = vmatpush1.bf16.msra.mxu0 %v2495_v47  ;;  %1793 = vmatpush1.bf16.msra.mxu1 %v2497_v48  ;;  %v102_v47 = vld [vmem:[%s3564_s1 + $0x298] sm:$0xff] }
  0x93   :  { %1741 = vmatprep.subr.bf16.mxu0 %v2472_v49  ;;  %1794 = vmatprep.subr.bf16.mxu1 %v2474_v50  ;;  %v114_v48 = vld [vmem:[%s3564_s1 + $0x2f8] sm:$0xff]  ;;  %v2499_v49 = vcombine.low %v125_v38, %v137_v39 }
  0x94   :  { %v2478_v52 = vcombine.high %v102_v47, %v114_v48 }
  0x96   :  { %1742 = vmatpush1.bf16.msra.mxu0 %v2471_v55  ;;  %1795 = vmatpush1.bf16.msra.mxu1 %v2473_v56  ;;  %v78_v55 = vld [vmem:[%s3564_s1 + $0x1d8] sm:$0xff] }
  0x97   :  { %1743 = vmatprep.subr.bf16.mxu0 %v2448_v57  ;;  %1796 = vmatprep.subr.bf16.mxu1 %v2450_v58  ;;  %v90_v56 = vld [vmem:[%s3564_s1 + $0x238] sm:$0xff]  ;;  %v2475_v57 = vcombine.low %v101_v45, %v113_v46  ;;  %v2477_v58 = vcombine.low %v102_v47, %v114_v48 }
  0x98   :  { %v2454_v60 = vcombine.high %v78_v55, %v90_v56 }
  0x9a   :  { %1744 = vmatpush1.bf16.msra.mxu0 %v2447_v63  ;;  %1797 = vmatpush1.bf16.msra.mxu1 %v2449_v0  ;;  %v54_v63 = vld [vmem:[%s3564_s1 + $0x118] sm:$0xff] }
  0x9b   :  { %1745 = vmatprep.subr.bf16.mxu0 %v2424_v1  ;;  %1798 = vmatprep.subr.bf16.mxu1 %v2426_v2  ;;  %v66_v0 = vld [vmem:[%s3564_s1 + $0x178] sm:$0xff]  ;;  %v2451_v1 = vcombine.low %v77_v53, %v89_v54  ;;  %v2453_v2 = vcombine.low %v78_v55, %v90_v56 }
  0x9c   :  { %v2430_v5 = vcombine.high %v54_v63, %v66_v0 }
  0x9e   :  { %1746 = vmatpush1.bf16.msra.mxu0 %v2423_v8  ;;  %1799 = vmatpush1.bf16.msra.mxu1 %v2425_v9  ;;  %v30_v8 = vld [vmem:[%s3564_s1 + $0x58] sm:$0xff] }
  0x9f   :  { %1747 = vmatprep.subr.bf16.mxu0 %v2400_v11  ;;  %1800 = vmatprep.subr.bf16.mxu1 %v2402_v12  ;;  %v42_v9 = vld [vmem:[%s3564_s1 + $0xb8] sm:$0xff]  ;;  %v2427_v11 = vcombine.low %v53_v61, %v65_v62  ;;  %v2429_v12 = vcombine.low %v54_v63, %v66_v0 }
  0xa0   :  { %v2406_v14 = vcombine.high %v30_v8, %v42_v9  ;;  %v2405_v16 = vcombine.low %v30_v8, %v42_v9 }
  0xa2   :  { %1748 = vmatpush1.bf16.msra.mxu0 %v2399_v17  ;;  %1801 = vmatpush1.bf16.msra.mxu1 %v2401_v18  ;;  %v2674_v17 = vld [vmem:[%s3565_s0] sm:$0xff]   ;;  %v217_v18 = vlaneseq }
  0xa3   :  { %1839 = vmatprep.subr.bf16.mxu0 %v2572_v19  ;;  %1892 = vmatprep.subr.bf16.mxu1 %v2574_v20 }
  0xa4   :  { %v3331_v19 = vshrl.u32 %v217_v18, 7 }
  0xa5   :  { %1766 = vmatmul.mubr.bf16.vlgmr.msra.gmra.mxu0 %v2815_v10  ;;  %1819 = vmatmul.mubr.bf16.vlgmr.msra.gmra.mxu1 %v2815_v10  ;;  %v126_v10 = vld [vmem:[%s3564_s1 + $0x358] sm:$0xff] }
  0xa6   :  { %1840 = vmatpush1.bf16.msra.mxu0 %v2571_v25  ;;  %1893 = vmatpush1.bf16.msra.mxu1 %v2573_v26  ;;  %v2502_v44 = vcombine.high %v126_v10, %v138_v40  ;;  %v2501_v50 = vcombine.low %v126_v10, %v138_v40  ;;  %v3334_v20 = vsub.s32 0, %v3331_v19  ;;  %v3342_v22 = vsub.s32 2, %v3331_v19 }
  0xa7   :  { %1841 = vmatprep.subr.bf16.mxu0 %v2548_v27  ;;  %1894 = vmatprep.subr.bf16.mxu1 %v2550_v28  ;;  %v3348_v23 = vsub.s32 3, %v3331_v19 }
  0xa8   :  { %1775 = vmatprep.mubr.bf16.mxu0 %v2675_v3  ;;  %1828 = vmatprep.mubr.bf16.mxu1 %v2675_v3  ;;  %v228_v24 = vrot.slane %v3339_v21, %v3342_v22 }
  0xa9   :  { %v232_v27 = vrot.slane %v3339_v21, %v3348_v23 }
  0xaa   :  { %1842 = vmatpush1.bf16.msra.mxu0 %v2547_v34  ;;  %1895 = vmatpush1.bf16.msra.mxu1 %v2549_v35 }
  0xab   :  { %1843 = vmatprep.subr.bf16.mxu0 %v2524_v36  ;;  %1896 = vmatprep.subr.bf16.mxu1 %v2526_v37 }
  0xad   :  { %1776 = vmatmul.mubr.bf16.gmra.mxu0 %v2854_v29  ;;  %1829 = vmatmul.mubr.bf16.gmra.mxu1 %v2854_v29 }
  0xae   :  { %1844 = vmatpush1.bf16.msra.mxu0 %v2523_v41  ;;  %1897 = vmatpush1.bf16.msra.mxu1 %v2525_v42 }
  0xaf   :  { %1845 = vmatprep.subr.bf16.mxu0 %v2500_v43  ;;  %1898 = vmatprep.subr.bf16.mxu1 %v2502_v44 }
  0xb0   :  { %1871 = vmatprep.mubr.bf16.mxu0 %v2675_v3  ;;  %1924 = vmatprep.mubr.bf16.mxu1 %v2675_v3 }
  0xb2   :  { %1846 = vmatpush1.bf16.msra.mxu0 %v2499_v49  ;;  %1899 = vmatpush1.bf16.msra.mxu1 %v2501_v50 }
  0xb3   :  { %1847 = vmatprep.subr.bf16.mxu0 %v2476_v51  ;;  %1900 = vmatprep.subr.bf16.mxu1 %v2478_v52 }
  0xb6   :  { %1848 = vmatpush1.bf16.msra.mxu0 %v2475_v57  ;;  %1901 = vmatpush1.bf16.msra.mxu1 %v2477_v58 }
  0xb7   :  { %1849 = vmatprep.subr.bf16.mxu0 %v2452_v59  ;;  %1902 = vmatprep.subr.bf16.mxu1 %v2454_v60 }
  0xba   :  { %1850 = vmatpush1.bf16.msra.mxu0 %v2451_v1  ;;  %1903 = vmatpush1.bf16.msra.mxu1 %v2453_v2 }
  0xbb   :  { %1851 = vmatprep.subr.bf16.mxu0 %v2428_v4  ;;  %1904 = vmatprep.subr.bf16.mxu1 %v2430_v5 }
  0xbe   :  { %1852 = vmatpush1.bf16.msra.mxu0 %v2427_v11  ;;  %1905 = vmatpush1.bf16.msra.mxu1 %v2429_v12 }
  0xbf   :  { %1853 = vmatprep.subr.bf16.mxu0 %v2404_v13  ;;  %1906 = vmatprep.subr.bf16.mxu1 %v2406_v14 }
  0xc2   :  { %1854 = vmatpush1.bf16.msra.mxu0 %v2403_v15  ;;  %1907 = vmatpush1.bf16.msra.mxu1 %v2405_v16 }
  0xc5   :  { %1872 = vmatmul.mubr.bf16.vlgmr.msra.gmra.mxu0 %v2674_v17  ;;  %1925 = vmatmul.mubr.bf16.vlgmr.msra.gmra.mxu1 %v2674_v17 }
  0xc6   :  { %1881 = vmatprep.mubr.bf16.mxu0 %v2675_v3  ;;  %1934 = vmatprep.mubr.bf16.mxu1 %v2675_v3  ;;  %v3345_v3 = vsub.s32 1, %v3331_v19 }
  0xc8   :  { %v224_v25 = vrot.slane %v3339_v21, %v3345_v3 }
  0xcd   :  { %1882 = vmatmul.mubr.bf16.gmra.mxu0 %v2854_v29  ;;  %1935 = vmatmul.mubr.bf16.gmra.mxu1 %v2854_v29  ;;  %v220_v29 = vrot.slane %v3339_v21, %v3334_v20 }
  0xe5   :  { %v1343_v26 = vpop.f32.mrf.mxu0  ;;  %v1396_v30 = vpop.f32.mrf.mxu1 }
  0xe6   :  { %v1344_v28 = vadd.f32 %v1343_v26, %v220_v29  ;;  %v1397_v31 = vadd.f32 %v1396_v30, %v228_v24  ;;  %v3386_v26 = vsub.s32 6, %v3331_v19 }
  0xe7   :  { %v1345_v32 = vpop.f32.mrf.mxu0  ;;  %v1398_v35 = vpop.f32.mrf.mxu1 }
  0xe8   :  { %v1945_v33 = vmax.f32 %v1344_v28, 0.0  ;;  %v1346_v34 = vadd.f32 %v1345_v32, %v224_v25  ;;  %v1947_v36 = vmax.f32 %v1397_v31, 0.0  ;;  %v1399_v37 = vadd.f32 %v1398_v35, %v232_v27 }
  0xe9   :  { %v1347_v38 = vpop.f32.mrf.mxu0  ;;  %v1400_v40 = vpop.f32.mrf.mxu1  ;;  %v3392_v28 = vsub.s32 7, %v3331_v19  ;;  %v244_v31 = vrot.slane %v3339_v21, %v3386_v26 }
  0xea   :  { %v1946_v39 = vmax.f32 %v1346_v34, 0.0  ;;  %v1348_v10 = vadd.f32 %v1347_v38, %v220_v29  ;;  %v1948_v41 = vmax.f32 %v1399_v37, 0.0  ;;  %v1401_v42 = vadd.f32 %v1400_v40, %v228_v24 }
  0xeb   :  { %v1349_v43 = vpop.f32.mrf.mxu0  ;;  %v1402_v46 = vpop.f32.mrf.mxu1  ;;  %v248_v34 = vrot.slane %v3339_v21, %v3392_v28 }
  0xec   :  { %v2623_v44 = vpack.c.bf16 %v1946_v39, %v1945_v33  ;;  %v1350_v45 = vadd.f32 %v1349_v43, %v224_v25  ;;  %v2624_v47 = vpack.c.bf16 %v1948_v41, %v1947_v36  ;;  %v1403_v48 = vadd.f32 %v1402_v46, %v232_v27 }
  0xed   :  { %v1353_v49 = vpop.f32.mrf.mxu0  ;;  %v1969_v50 = vmax.f32 %v1348_v10, 0.0  ;;  %v1406_v53 = vpop.f32.mrf.mxu1  ;;  %v1971_v54 = vmax.f32 %v1401_v42, 0.0 }
  0xee   :  { %2329 = vst [vmem:[%s3567_s3] sm:$0xff] %v2623_v44  ;;  %v1970_v51 = vmax.f32 %v1350_v45, 0.0  ;;  %v1354_v52 = vadd.f32 %v1353_v49, %v220_v29  ;;  %2330 = vst [vmem:[%s3567_s3 + $0x8] sm:$0xff] %v2624_v47  ;;  %v1972_v55 = vmax.f32 %v1403_v48, 0.0  ;;  %v1407_v56 = vadd.f32 %v1406_v53, %v228_v24 }
  0xef   :  { %v1355_v57 = vpop.f32.mrf.mxu0  ;;  %v1408_v61 = vpop.f32.mrf.mxu1 }
  0xf0   :  { %v2635_v58 = vpack.c.bf16 %v1970_v51, %v1969_v50  ;;  %v1993_v59 = vmax.f32 %v1354_v52, 0.0  ;;  %v1356_v60 = vadd.f32 %v1355_v57, %v224_v25  ;;  %v2636_v62 = vpack.c.bf16 %v1972_v55, %v1971_v54 }
  0xf1   :  { %v1995_v63 = vmax.f32 %v1407_v56, 0.0  ;;  %v1409_v0 = vadd.f32 %v1408_v61, %v232_v27  ;;  %v1357_v1 = vpop.f32.mrf.mxu0  ;;  %v1410_v5 = vpop.f32.mrf.mxu1 }
  0xf2   :  { %2341 = vst [vmem:[%s3567_s3 + $0x60] sm:$0xff] %v2635_v58  ;;  %v1994_v2 = vmax.f32 %v1356_v60, 0.0  ;;  %v1358_v4 = vadd.f32 %v1357_v1, %v220_v29  ;;  %2342 = vst [vmem:[%s3567_s3 + $0x68] sm:$0xff] %v2636_v62  ;;  %v1411_v7 = vadd.f32 %v1410_v5, %v228_v24 }
  0xf3   :  { %v1996_v6 = vmax.f32 %v1409_v0, 0.0  ;;  %v1359_v8 = vpop.f32.mrf.mxu0  ;;  %v1412_v13 = vpop.f32.mrf.mxu1 }
  0xf4   :  { %v2647_v9 = vpack.c.bf16 %v1994_v2, %v1993_v59  ;;  %v2017_v11 = vmax.f32 %v1358_v4, 0.0  ;;  %v1360_v12 = vadd.f32 %v1359_v8, %v224_v25  ;;  %v2019_v15 = vmax.f32 %v1411_v7, 0.0 }
  0xf5   :  { %v2648_v14 = vpack.c.bf16 %v1996_v6, %v1995_v63  ;;  %v1413_v16 = vadd.f32 %v1412_v13, %v232_v27  ;;  %v3383_v25 = vsub.s32 4, %v3331_v19  ;;  %v3389_v27 = vsub.s32 5, %v3331_v19 }
  0xf6   :  { %2353 = vst [vmem:[%s3567_s3 + $0xc0] sm:$0xff] %v2647_v9  ;;  %v2018_v17 = vmax.f32 %v1360_v12, 0.0 }
  0xf7   :  { %2354 = vst [vmem:[%s3567_s3 + $0xc8] sm:$0xff] %v2648_v14  ;;  %v2020_v18 = vmax.f32 %v1413_v16, 0.0  ;;  %v236_v30 = vrot.slane %v3339_v21, %v3383_v25  ;;  %v240_v32 = vrot.slane %v3339_v21, %v3389_v27 }
  0xf8   :  { %v2659_v29 = vpack.c.bf16 %v2018_v17, %v2017_v11 }
  0xf9   :  { %v2660_v24 = vpack.c.bf16 %v2020_v18, %v2019_v15 }
  0xfa   :  { %2365 = vst [vmem:[%s3567_s3 + $0x120] sm:$0xff] %v2659_v29 }
  0xfb   :  { %2366 = vst [vmem:[%s3567_s3 + $0x128] sm:$0xff] %v2660_v24 }
 0x105   :  { %v1449_v33 = vpop.f32.mrf.mxu0  ;;  %v1502_v36 = vpop.f32.mrf.mxu1 }
 0x106   :  { %v1450_v35 = vadd.f32 %v1449_v33, %v236_v30  ;;  %v1503_v37 = vadd.f32 %v1502_v36, %v244_v31 }
 0x107   :  { %v1451_v38 = vpop.f32.mrf.mxu0  ;;  %v1504_v10 = vpop.f32.mrf.mxu1 }
 0x108   :  { %v1949_v39 = vmax.f32 %v1450_v35, 0.0  ;;  %v1452_v19 = vadd.f32 %v1451_v38, %v240_v32  ;;  %v1951_v40 = vmax.f32 %v1503_v37, 0.0  ;;  %v1505_v41 = vadd.f32 %v1504_v10, %v248_v34 }
 0x109   :  { %v1453_v42 = vpop.f32.mrf.mxu0  ;;  %v1506_v45 = vpop.f32.mrf.mxu1 }
 0x10a   :  { %v1950_v43 = vmax.f32 %v1452_v19, 0.0  ;;  %v1454_v44 = vadd.f32 %v1453_v42, %v236_v30  ;;  %v1952_v46 = vmax.f32 %v1505_v41, 0.0  ;;  %v1507_v47 = vadd.f32 %v1506_v45, %v244_v31 }
 0x10b   :  { %v1455_v48 = vpop.f32.mrf.mxu0  ;;  %v1508_v51 = vpop.f32.mrf.mxu1 }
 0x10c   :  { %v2625_v49 = vpack.c.bf16 %v1950_v43, %v1949_v39  ;;  %v1456_v50 = vadd.f32 %v1455_v48, %v240_v32  ;;  %v2626_v21 = vpack.c.bf16 %v1952_v46, %v1951_v40  ;;  %v1509_v52 = vadd.f32 %v1508_v51, %v248_v34 }
 0x10d   :  { %v1459_v53 = vpop.f32.mrf.mxu0  ;;  %v1973_v54 = vmax.f32 %v1454_v44, 0.0  ;;  %v1512_v57 = vpop.f32.mrf.mxu1  ;;  %v1975_v58 = vmax.f32 %v1507_v47, 0.0 }
 0x10e   :  { %2331 = vst [vmem:[%s3567_s3 + $0x10] sm:$0xff] %v2625_v49  ;;  %v1974_v55 = vmax.f32 %v1456_v50, 0.0  ;;  %v1460_v56 = vadd.f32 %v1459_v53, %v236_v30  ;;  %2332 = vst [vmem:[%s3567_s3 + $0x18] sm:$0xff] %v2626_v21  ;;  %v1976_v59 = vmax.f32 %v1509_v52, 0.0  ;;  %v1513_v60 = vadd.f32 %v1512_v57, %v244_v31 }
 0x10f   :  { %v1461_v61 = vpop.f32.mrf.mxu0  ;;  %v1514_v1 = vpop.f32.mrf.mxu1 }
 0x110   :  { %v2637_v62 = vpack.c.bf16 %v1974_v55, %v1973_v54  ;;  %v1997_v63 = vmax.f32 %v1460_v56, 0.0  ;;  %v1462_v0 = vadd.f32 %v1461_v61, %v240_v32  ;;  %v2638_v2 = vpack.c.bf16 %v1976_v59, %v1975_v58 }
 0x111   :  { %v1999_v4 = vmax.f32 %v1513_v60, 0.0  ;;  %v1515_v5 = vadd.f32 %v1514_v1, %v248_v34  ;;  %v1463_v6 = vpop.f32.mrf.mxu0  ;;  %v1516_v9 = vpop.f32.mrf.mxu1 }
 0x112   :  { %2343 = vst [vmem:[%s3567_s3 + $0x70] sm:$0xff] %v2637_v62  ;;  %v1998_v7 = vmax.f32 %v1462_v0, 0.0  ;;  %v1464_v8 = vadd.f32 %v1463_v6, %v236_v30  ;;  %2344 = vst [vmem:[%s3567_s3 + $0x78] sm:$0xff] %v2638_v2  ;;  %v1517_v12 = vadd.f32 %v1516_v9, %v244_v31 }
 0x113   :  { %v2000_v11 = vmax.f32 %v1515_v5, 0.0  ;;  %v1465_v13 = vpop.f32.mrf.mxu0  ;;  %v1518_v17 = vpop.f32.mrf.mxu1 }
 0x114   :  { %v2649_v14 = vpack.c.bf16 %v1998_v7, %v1997_v63  ;;  %v2021_v15 = vmax.f32 %v1464_v8, 0.0  ;;  %v1466_v16 = vadd.f32 %v1465_v13, %v240_v32  ;;  %v2023_v29 = vmax.f32 %v1517_v12, 0.0  ;;  %v3429_v32 = vld [vmem:[%s3566_s2 + $0x8] sm:$0xff] }
 0x115   :  { %v2650_v18 = vpack.c.bf16 %v2000_v11, %v1999_v4  ;;  %v1519_v24 = vadd.f32 %v1518_v17, %v248_v34  ;;  %v252_v34 = vrot.slane %v3429_v32, %v3334_v20  ;;  %v260_v36 = vrot.slane %v3429_v32, %v3342_v22 }
 0x116   :  { %2355 = vst [vmem:[%s3567_s3 + $0xd0] sm:$0xff] %v2649_v14  ;;  %v2022_v30 = vmax.f32 %v1466_v16, 0.0  ;;  %v256_v37 = vrot.slane %v3429_v32, %v3345_v3  ;;  %v264_v39 = vrot.slane %v3429_v32, %v3348_v23 }
 0x117   :  { %2356 = vst [vmem:[%s3567_s3 + $0xd8] sm:$0xff] %v2650_v18  ;;  %v2024_v33 = vmax.f32 %v1519_v24, 0.0 }
 0x118   :  { %v2661_v35 = vpack.c.bf16 %v2022_v30, %v2021_v15 }
 0x119   :  { %v2662_v31 = vpack.c.bf16 %v2024_v33, %v2023_v29 }
 0x11a   :  { %2367 = vst [vmem:[%s3567_s3 + $0x130] sm:$0xff] %v2661_v35 }
 0x11b   :  { %2368 = vst [vmem:[%s3567_s3 + $0x138] sm:$0xff] %v2662_v31 }
 0x125   :  { %v1555_v38 = vpop.f32.mrf.mxu0  ;;  %v1608_v10 = vpop.f32.mrf.mxu1 }
 0x126   :  { %v1556_v19 = vadd.f32 %v1555_v38, %v252_v34  ;;  %v1609_v40 = vadd.f32 %v1608_v10, %v260_v36 }
 0x127   :  { %v1557_v41 = vpop.f32.mrf.mxu0  ;;  %v1610_v44 = vpop.f32.mrf.mxu1 }
 0x128   :  { %v1953_v42 = vmax.f32 %v1556_v19, 0.0  ;;  %v1558_v43 = vadd.f32 %v1557_v41, %v256_v37  ;;  %v1955_v45 = vmax.f32 %v1609_v40, 0.0  ;;  %v1611_v46 = vadd.f32 %v1610_v44, %v264_v39 }
 0x129   :  { %v1559_v47 = vpop.f32.mrf.mxu0  ;;  %v1612_v50 = vpop.f32.mrf.mxu1  ;;  %v272_v40 = vrot.slane %v3429_v32, %v3389_v27 }
 0x12a   :  { %v1954_v48 = vmax.f32 %v1558_v43, 0.0  ;;  %v1560_v49 = vadd.f32 %v1559_v47, %v252_v34  ;;  %v1956_v51 = vmax.f32 %v1611_v46, 0.0  ;;  %v1613_v21 = vadd.f32 %v1612_v50, %v260_v36 }
 0x12b   :  { %v1561_v52 = vpop.f32.mrf.mxu0  ;;  %v1614_v55 = vpop.f32.mrf.mxu1 }
 0x12c   :  { %v2627_v53 = vpack.c.bf16 %v1954_v48, %v1953_v42  ;;  %v1562_v54 = vadd.f32 %v1561_v52, %v256_v37  ;;  %v2628_v56 = vpack.c.bf16 %v1956_v51, %v1955_v45  ;;  %v1615_v57 = vadd.f32 %v1614_v55, %v264_v39 }
 0x12d   :  { %v1565_v58 = vpop.f32.mrf.mxu0  ;;  %v1977_v59 = vmax.f32 %v1560_v49, 0.0  ;;  %v1618_v62 = vpop.f32.mrf.mxu1  ;;  %v1979_v63 = vmax.f32 %v1613_v21, 0.0  ;;  %v280_v42 = vrot.slane %v3429_v32, %v3392_v28 }
 0x12e   :  { %2333 = vst [vmem:[%s3567_s3 + $0x20] sm:$0xff] %v2627_v53  ;;  %v1978_v60 = vmax.f32 %v1562_v54, 0.0  ;;  %v1566_v61 = vadd.f32 %v1565_v58, %v252_v34  ;;  %2334 = vst [vmem:[%s3567_s3 + $0x28] sm:$0xff] %v2628_v56  ;;  %v1980_v0 = vmax.f32 %v1615_v57, 0.0  ;;  %v1619_v1 = vadd.f32 %v1618_v62, %v260_v36 }
 0x12f   :  { %v1567_v2 = vpop.f32.mrf.mxu0  ;;  %v1620_v7 = vpop.f32.mrf.mxu1 }
 0x130   :  { %v2639_v4 = vpack.c.bf16 %v1978_v60, %v1977_v59  ;;  %v2001_v5 = vmax.f32 %v1566_v61, 0.0  ;;  %v1568_v6 = vadd.f32 %v1567_v2, %v256_v37  ;;  %v2640_v8 = vpack.c.bf16 %v1980_v0, %v1979_v63 }
 0x131   :  { %v2003_v9 = vmax.f32 %v1619_v1, 0.0  ;;  %v1621_v11 = vadd.f32 %v1620_v7, %v264_v39  ;;  %v1569_v12 = vpop.f32.mrf.mxu0  ;;  %v1622_v15 = vpop.f32.mrf.mxu1 }
 0x132   :  { %2345 = vst [vmem:[%s3567_s3 + $0x80] sm:$0xff] %v2639_v4  ;;  %v2002_v13 = vmax.f32 %v1568_v6, 0.0  ;;  %v1570_v14 = vadd.f32 %v1569_v12, %v252_v34  ;;  %2346 = vst [vmem:[%s3567_s3 + $0x88] sm:$0xff] %v2640_v8  ;;  %v1623_v17 = vadd.f32 %v1622_v15, %v260_v36 }
 0x133   :  { %v2004_v16 = vmax.f32 %v1621_v11, 0.0  ;;  %v1571_v18 = vpop.f32.mrf.mxu0  ;;  %v1624_v33 = vpop.f32.mrf.mxu1 }
 0x134   :  { %v2651_v29 = vpack.c.bf16 %v2002_v13, %v2001_v5  ;;  %v2025_v24 = vmax.f32 %v1570_v14, 0.0  ;;  %v1572_v30 = vadd.f32 %v1571_v18, %v256_v37  ;;  %v2027_v31 = vmax.f32 %v1623_v17, 0.0 }
 0x135   :  { %v2652_v35 = vpack.c.bf16 %v2004_v16, %v2003_v9  ;;  %v1625_v38 = vadd.f32 %v1624_v33, %v264_v39  ;;  %v268_v37 = vrot.slane %v3429_v32, %v3383_v25  ;;  %v276_v39 = vrot.slane %v3429_v32, %v3386_v26 }
 0x136   :  { %2357 = vst [vmem:[%s3567_s3 + $0xe0] sm:$0xff] %v2651_v29  ;;  %v2026_v34 = vmax.f32 %v1572_v30, 0.0 }
 0x137   :  { %2358 = vst [vmem:[%s3567_s3 + $0xe8] sm:$0xff] %v2652_v35  ;;  %v2028_v19 = vmax.f32 %v1625_v38, 0.0 }
 0x138   :  { %v2663_v10 = vpack.c.bf16 %v2026_v34, %v2025_v24 }
 0x139   :  { %v2664_v36 = vpack.c.bf16 %v2028_v19, %v2027_v31 }
 0x13a   :  { %2369 = vst [vmem:[%s3567_s3 + $0x140] sm:$0xff] %v2663_v10 }
 0x13b   :  { %2370 = vst [vmem:[%s3567_s3 + $0x148] sm:$0xff] %v2664_v36 }
 0x145   :  { %v1661_v41 = vpop.f32.mrf.mxu0  ;;  %v1714_v44 = vpop.f32.mrf.mxu1 }
 0x146   :  { %v1662_v43 = vadd.f32 %v1661_v41, %v268_v37  ;;  %v1715_v45 = vadd.f32 %v1714_v44, %v276_v39 }
 0x147   :  { %v1663_v46 = vpop.f32.mrf.mxu0  ;;  %v1716_v49 = vpop.f32.mrf.mxu1 }
 0x148   :  { %v1957_v47 = vmax.f32 %v1662_v43, 0.0  ;;  %v1664_v48 = vadd.f32 %v1663_v46, %v272_v40  ;;  %v1959_v50 = vmax.f32 %v1715_v45, 0.0  ;;  %v1717_v51 = vadd.f32 %v1716_v49, %v280_v42 }
 0x149   :  { %v1665_v21 = vpop.f32.mrf.mxu0  ;;  %v1718_v54 = vpop.f32.mrf.mxu1 }
 0x14a   :  { %v1958_v52 = vmax.f32 %v1664_v48, 0.0  ;;  %v1666_v53 = vadd.f32 %v1665_v21, %v268_v37  ;;  %v1960_v55 = vmax.f32 %v1717_v51, 0.0  ;;  %v1719_v56 = vadd.f32 %v1718_v54, %v276_v39 }
 0x14b   :  { %v1667_v57 = vpop.f32.mrf.mxu0  ;;  %v1720_v60 = vpop.f32.mrf.mxu1 }
 0x14c   :  { %v2629_v58 = vpack.c.bf16 %v1958_v52, %v1957_v47  ;;  %v1668_v59 = vadd.f32 %v1667_v57, %v272_v40  ;;  %v2630_v32 = vpack.c.bf16 %v1960_v55, %v1959_v50  ;;  %v1721_v61 = vadd.f32 %v1720_v60, %v280_v42 }
 0x14d   :  { %v1671_v62 = vpop.f32.mrf.mxu0  ;;  %v1981_v63 = vmax.f32 %v1666_v53, 0.0  ;;  %v1724_v2 = vpop.f32.mrf.mxu1  ;;  %v1983_v4 = vmax.f32 %v1719_v56, 0.0 }
 0x14e   :  { %2335 = vst [vmem:[%s3567_s3 + $0x30] sm:$0xff] %v2629_v58  ;;  %v1982_v0 = vmax.f32 %v1668_v59, 0.0  ;;  %v1672_v1 = vadd.f32 %v1671_v62, %v268_v37  ;;  %2336 = vst [vmem:[%s3567_s3 + $0x38] sm:$0xff] %v2630_v32  ;;  %v1984_v5 = vmax.f32 %v1721_v61, 0.0  ;;  %v1725_v6 = vadd.f32 %v1724_v2, %v276_v39 }
 0x14f   :  { %v1673_v7 = vpop.f32.mrf.mxu0  ;;  %v1726_v12 = vpop.f32.mrf.mxu1 }
 0x150   :  { %v2641_v8 = vpack.c.bf16 %v1982_v0, %v1981_v63  ;;  %v2005_v9 = vmax.f32 %v1672_v1, 0.0  ;;  %v1674_v11 = vadd.f32 %v1673_v7, %v272_v40  ;;  %v2642_v13 = vpack.c.bf16 %v1984_v5, %v1983_v4 }
 0x151   :  { %v2007_v14 = vmax.f32 %v1725_v6, 0.0  ;;  %v1727_v15 = vadd.f32 %v1726_v12, %v280_v42  ;;  %v1675_v16 = vpop.f32.mrf.mxu0  ;;  %v1728_v29 = vpop.f32.mrf.mxu1 }
 0x152   :  { %2347 = vst [vmem:[%s3567_s3 + $0x90] sm:$0xff] %v2641_v8  ;;  %v2006_v17 = vmax.f32 %v1674_v11, 0.0  ;;  %v1676_v18 = vadd.f32 %v1675_v16, %v268_v37  ;;  %2348 = vst [vmem:[%s3567_s3 + $0x98] sm:$0xff] %v2642_v13  ;;  %v1729_v30 = vadd.f32 %v1728_v29, %v276_v39 }
 0x153   :  { %v2008_v24 = vmax.f32 %v1727_v15, 0.0  ;;  %v1677_v33 = vpop.f32.mrf.mxu0  ;;  %v1730_v34 = vpop.f32.mrf.mxu1 }
 0x154   :  { %v2653_v35 = vpack.c.bf16 %v2006_v17, %v2005_v9  ;;  %v2029_v31 = vmax.f32 %v1676_v18, 0.0  ;;  %v1678_v38 = vadd.f32 %v1677_v33, %v272_v40  ;;  %v2031_v10 = vmax.f32 %v1729_v30, 0.0  ;;  %v3498_v40 = vld [vmem:[%s3566_s2 + $0x10] sm:$0xff] }
 0x155   :  { %v2654_v19 = vpack.c.bf16 %v2008_v24, %v2007_v14  ;;  %v1731_v36 = vadd.f32 %v1730_v34, %v280_v42  ;;  %v284_v42 = vrot.slane %v3498_v40, %v3334_v20  ;;  %v292_v44 = vrot.slane %v3498_v40, %v3342_v22 }
 0x156   :  { %2359 = vst [vmem:[%s3567_s3 + $0xf0] sm:$0xff] %v2653_v35  ;;  %v2030_v37 = vmax.f32 %v1678_v38, 0.0  ;;  %v288_v45 = vrot.slane %v3498_v40, %v3345_v3  ;;  %v296_v47 = vrot.slane %v3498_v40, %v3348_v23 }
 0x157   :  { %2360 = vst [vmem:[%s3567_s3 + $0xf8] sm:$0xff] %v2654_v19  ;;  %v2032_v41 = vmax.f32 %v1731_v36, 0.0 }
 0x158   :  { %v2665_v43 = vpack.c.bf16 %v2030_v37, %v2029_v31 }
 0x159   :  { %v2666_v39 = vpack.c.bf16 %v2032_v41, %v2031_v10 }
 0x15a   :  { %2371 = vst [vmem:[%s3567_s3 + $0x150] sm:$0xff] %v2665_v43 }
 0x15b   :  { %2372 = vst [vmem:[%s3567_s3 + $0x158] sm:$0xff] %v2666_v39 }
 0x165   :  { %v1767_v46 = vpop.f32.mrf.mxu0  ;;  %v1820_v49 = vpop.f32.mrf.mxu1 }
 0x166   :  { %v1768_v48 = vadd.f32 %v1767_v46, %v284_v42  ;;  %v1821_v50 = vadd.f32 %v1820_v49, %v292_v44  ;;  %v304_v46 = vrot.slane %v3498_v40, %v3389_v27 }
 0x167   :  { %v1769_v51 = vpop.f32.mrf.mxu0  ;;  %v1822_v53 = vpop.f32.mrf.mxu1 }
 0x168   :  { %v1961_v21 = vmax.f32 %v1768_v48, 0.0  ;;  %v1770_v52 = vadd.f32 %v1769_v51, %v288_v45  ;;  %v1963_v54 = vmax.f32 %v1821_v50, 0.0  ;;  %v1823_v55 = vadd.f32 %v1822_v53, %v296_v47 }
 0x169   :  { %v1771_v20 = vpop.f32.mrf.mxu0  ;;  %v1824_v22 = vpop.f32.mrf.mxu1  ;;  %v312_v48 = vrot.slane %v3498_v40, %v3392_v28 }
 0x16a   :  { %v1962_v56 = vmax.f32 %v1770_v52, 0.0  ;;  %v1772_v57 = vadd.f32 %v1771_v20, %v284_v42  ;;  %v1964_v58 = vmax.f32 %v1823_v55, 0.0  ;;  %v1825_v59 = vadd.f32 %v1824_v22, %v292_v44 }
 0x16b   :  { %v1773_v3 = vpop.f32.mrf.mxu0  ;;  %v1826_v61 = vpop.f32.mrf.mxu1 }
 0x16c   :  { %v2631_v60 = vpack.c.bf16 %v1962_v56, %v1961_v21  ;;  %v1774_v32 = vadd.f32 %v1773_v3, %v288_v45  ;;  %v2632_v23 = vpack.c.bf16 %v1964_v58, %v1963_v54  ;;  %v1827_v62 = vadd.f32 %v1826_v61, %v296_v47 }
 0x16d   :  { %v1777_v63 = vpop.f32.mrf.mxu0  ;;  %v1985_v0 = vmax.f32 %v1772_v57, 0.0  ;;  %v1830_v4 = vpop.f32.mrf.mxu1  ;;  %v1987_v5 = vmax.f32 %v1825_v59, 0.0 }
 0x16e   :  { %2337 = vst [vmem:[%s3567_s3 + $0x40] sm:$0xff] %v2631_v60  ;;  %v1986_v1 = vmax.f32 %v1774_v32, 0.0  ;;  %v1778_v2 = vadd.f32 %v1777_v63, %v284_v42  ;;  %2338 = vst [vmem:[%s3567_s3 + $0x48] sm:$0xff] %v2632_v23  ;;  %v1988_v6 = vmax.f32 %v1827_v62, 0.0  ;;  %v1831_v7 = vadd.f32 %v1830_v4, %v292_v44 }
 0x16f   :  { %v1779_v8 = vpop.f32.mrf.mxu0  ;;  %v1832_v13 = vpop.f32.mrf.mxu1 }
 0x170   :  { %v2643_v9 = vpack.c.bf16 %v1986_v1, %v1985_v0  ;;  %v2009_v11 = vmax.f32 %v1778_v2, 0.0  ;;  %v1780_v12 = vadd.f32 %v1779_v8, %v288_v45  ;;  %v2644_v14 = vpack.c.bf16 %v1988_v6, %v1987_v5 }
 0x171   :  { %v2011_v15 = vmax.f32 %v1831_v7, 0.0  ;;  %v1833_v16 = vadd.f32 %v1832_v13, %v296_v47  ;;  %v1781_v17 = vpop.f32.mrf.mxu0  ;;  %v1834_v24 = vpop.f32.mrf.mxu1 }
 0x172   :  { %2349 = vst [vmem:[%s3567_s3 + $0xa0] sm:$0xff] %v2643_v9  ;;  %v2010_v18 = vmax.f32 %v1780_v12, 0.0  ;;  %v1782_v29 = vadd.f32 %v1781_v17, %v284_v42  ;;  %2350 = vst [vmem:[%s3567_s3 + $0xa8] sm:$0xff] %v2644_v14  ;;  %v1835_v33 = vadd.f32 %v1834_v24, %v292_v44  ;;  %v300_v44 = vrot.slane %v3498_v40, %v3383_v25 }
 0x173   :  { %v2012_v30 = vmax.f32 %v1833_v16, 0.0  ;;  %v1783_v35 = vpop.f32.mrf.mxu0  ;;  %v1836_v19 = vpop.f32.mrf.mxu1 }
 0x174   :  { %v2655_v31 = vpack.c.bf16 %v2010_v18, %v2009_v11  ;;  %v2033_v38 = vmax.f32 %v1782_v29, 0.0  ;;  %v1784_v34 = vadd.f32 %v1783_v35, %v288_v45  ;;  %v2035_v36 = vmax.f32 %v1835_v33, 0.0 }
 0x175   :  { %v2656_v10 = vpack.c.bf16 %v2012_v30, %v2011_v15  ;;  %v1837_v37 = vadd.f32 %v1836_v19, %v296_v47  ;;  %v308_v45 = vrot.slane %v3498_v40, %v3386_v26 }
 0x176   :  { %2361 = vst [vmem:[%s3567_s3 + $0x100] sm:$0xff] %v2655_v31  ;;  %v2034_v41 = vmax.f32 %v1784_v34, 0.0 }
 0x177   :  { %2362 = vst [vmem:[%s3567_s3 + $0x108] sm:$0xff] %v2656_v10  ;;  %v2036_v43 = vmax.f32 %v1837_v37, 0.0 }
 0x178   :  { %v2667_v39 = vpack.c.bf16 %v2034_v41, %v2033_v38 }
 0x179   :  { %v2668_v42 = vpack.c.bf16 %v2036_v43, %v2035_v36 }
 0x17a   :  { %2373 = vst [vmem:[%s3567_s3 + $0x160] sm:$0xff] %v2667_v39 }
 0x17b   :  { %2374 = vst [vmem:[%s3567_s3 + $0x168] sm:$0xff] %v2668_v42 }
 0x185   :  { %v1873_v47 = vpop.f32.mrf.mxu0  ;;  %v1926_v50 = vpop.f32.mrf.mxu1 }
 0x186   :  { %v1874_v49 = vadd.f32 %v1873_v47, %v300_v44  ;;  %v1927_v51 = vadd.f32 %v1926_v50, %v308_v45 }
 0x187   :  { %v1875_v21 = vpop.f32.mrf.mxu0  ;;  %v1928_v53 = vpop.f32.mrf.mxu1 }
 0x188   :  { %v1876_v52 = vadd.f32 %v1875_v21, %v304_v46  ;;  %v1929_v54 = vadd.f32 %v1928_v53, %v312_v48  ;;  %v1965_v20 = vmax.f32 %v1874_v49, 0.0  ;;  %v1967_v26 = vmax.f32 %v1927_v51, 0.0 }
 0x189   :  { %v1877_v55 = vpop.f32.mrf.mxu0  ;;  %v1930_v57 = vpop.f32.mrf.mxu1 }
 0x18a   :  { %v1966_v25 = vmax.f32 %v1876_v52, 0.0  ;;  %v1878_v56 = vadd.f32 %v1877_v55, %v300_v44  ;;  %v1968_v22 = vmax.f32 %v1929_v54, 0.0  ;;  %v1931_v58 = vadd.f32 %v1930_v57, %v308_v45 }
 0x18b   :  { %v1879_v27 = vpop.f32.mrf.mxu0  ;;  %v1932_v60 = vpop.f32.mrf.mxu1 }
 0x18c   :  { %v2633_v59 = vpack.c.bf16 %v1966_v25, %v1965_v20  ;;  %v1880_v3 = vadd.f32 %v1879_v27, %v304_v46  ;;  %v2634_v28 = vpack.c.bf16 %v1968_v22, %v1967_v26  ;;  %v1933_v40 = vadd.f32 %v1932_v60, %v312_v48 }
 0x18d   :  { %v1883_v32 = vpop.f32.mrf.mxu0  ;;  %v1989_v61 = vmax.f32 %v1878_v56, 0.0  ;;  %v1936_v63 = vpop.f32.mrf.mxu1  ;;  %v1991_v0 = vmax.f32 %v1931_v58, 0.0 }
 0x18e   :  { %2339 = vst [vmem:[%s3567_s3 + $0x50] sm:$0xff] %v2633_v59  ;;  %v1990_v23 = vmax.f32 %v1880_v3, 0.0  ;;  %v1884_v62 = vadd.f32 %v1883_v32, %v300_v44  ;;  %2340 = vst [vmem:[%s3567_s3 + $0x58] sm:$0xff] %v2634_v28  ;;  %v1992_v1 = vmax.f32 %v1933_v40, 0.0  ;;  %v1937_v2 = vadd.f32 %v1936_v63, %v308_v45 }
 0x18f   :  { %v1885_v4 = vpop.f32.mrf.mxu0  ;;  %v1938_v7 = vpop.f32.mrf.mxu1 }
 0x190   :  { %v2645_v5 = vpack.c.bf16 %v1990_v23, %v1989_v61  ;;  %v1886_v6 = vadd.f32 %v1885_v4, %v304_v46  ;;  %v2646_v8 = vpack.c.bf16 %v1992_v1, %v1991_v0  ;;  %v1939_v9 = vadd.f32 %v1938_v7, %v312_v48 }
 0x191   :  { %v1887_v11 = vpop.f32.mrf.mxu0  ;;  %v2013_v12 = vmax.f32 %v1884_v62, 0.0  ;;  %v1940_v15 = vpop.f32.mrf.mxu1  ;;  %v2015_v16 = vmax.f32 %v1937_v2, 0.0 }
 0x192   :  { %2351 = vst [vmem:[%s3567_s3 + $0xb0] sm:$0xff] %v2645_v5  ;;  %v2014_v13 = vmax.f32 %v1886_v6, 0.0  ;;  %v1888_v14 = vadd.f32 %v1887_v11, %v300_v44  ;;  %2352 = vst [vmem:[%s3567_s3 + $0xb8] sm:$0xff] %v2646_v8  ;;  %v2016_v17 = vmax.f32 %v1939_v9, 0.0  ;;  %v1941_v18 = vadd.f32 %v1940_v15, %v308_v45 }
 0x193   :  { %v1889_v29 = vpop.f32.mrf.mxu0  ;;  %v1942_v33 = vpop.f32.mrf.mxu1 }
 0x194   :  { %v2657_v24 = vpack.c.bf16 %v2014_v13, %v2013_v12  ;;  %v1890_v30 = vadd.f32 %v1889_v29, %v304_v46  ;;  %v2658_v35 = vpack.c.bf16 %v2016_v17, %v2015_v16  ;;  %v1943_v31 = vadd.f32 %v1942_v33, %v312_v48 }
 0x195   :  { %v2037_v38 = vmax.f32 %v1888_v14, 0.0  ;;  %v2039_v19 = vmax.f32 %v1941_v18, 0.0 }
 0x196   :  { %2363 = vst [vmem:[%s3567_s3 + $0x110] sm:$0xff] %v2657_v24  ;;  %v2038_v34 = vmax.f32 %v1890_v30, 0.0  ;;  %2364 = vst [vmem:[%s3567_s3 + $0x118] sm:$0xff] %v2658_v35  ;;  %v2040_v10 = vmax.f32 %v1943_v31, 0.0 }
 0x198   :  { %v2669_v36 = vpack.c.bf16 %v2038_v34, %v2037_v38  ;;  %v2670_v37 = vpack.c.bf16 %v2040_v10, %v2039_v19 }
 0x19a   :  { %2375 = vst [vmem:[%s3567_s3 + $0x170] sm:$0xff] %v2669_v36  ;;  %2376 = vst [vmem:[%s3567_s3 + $0x178] sm:$0xff] %v2670_v37 }

// kernel: transformer_forward.31
= control target key start
LH: loop header
LB: loop body
LE: loop exit
PB: predicated region body
PF: predicated region fallthrough
CT: control target
= control target key end

     0   :  { %s1303_s21 = smov 0   ;;  %s1305_s22 = smov 0   ;;  %s1435_s0 = inlined_call_operand.vmem [shape: bf16[32,3072], index: 0, kind: input, shape index: {}]   ;;  %s1436_s1 = inlined_call_operand.vmem [shape: bf16[3072,128], index: 1, kind: input, shape index: {}]   ;;  %s1437_s2 = inlined_call_operand.vmem [shape: f32[1,128], index: 2, kind: input, shape index: {}]   ;;  %s1438_s3 = inlined_call_operand.vmem [shape: bf16[32,128], index: 3, kind: input, shape index: {}]   ;;  %s1439_s4 = inlined_call_operand.vmem [shape: f32[1,128], index: 4, kind: input, shape index: {}]   ;;  %s1440_s5 = inlined_call_operand.vmem [shape: f32[1,128], index: 5, kind: input, shape index: {}]   ;;  %s1441_s6 = inlined_call_operand.vmem [shape: bf16[32,128], index: 6, kind: output, shape index: {}]  }
   0x1   :  { %s1307_s23 = smov 0   ;;  %s1309_s24 = smov 0  }
   0x2   :  { %s1311_s25 = smov 0  }
   0x3 LB: > { %s25_s26 = sadd.s32 1, %s1261_s24  ;;  %p44_p1 = scmp.ne.s32.totalorder %s1253_s22, %s1249_s21  ;;  %s1265_s25 = sphi %s1311_s25, %s16_s25   ;;  %s1261_s24 = sphi %s1309_s24, %s1445_s24   ;;  %s1257_s23 = sphi %s1307_s23, %s1444_s23   ;;  %s1253_s22 = sphi %s1305_s22, %s1443_s22   ;;  %s1249_s21 = sphi %s1303_s21, %s1442_s21  }
   0x4   : > { %p26_p0 = scmp.ge.s32.totalorder %s25_s26, 6  ;;  %p45_p2 = scmp.eq.s32.totalorder %s1265_s25, 0 }
   0x5   : > { %s37_s28 = sadd.s32 1, %s1253_s22  ;;  %p992_p5 = scmp.ge.s32.totalorder %s1265_s25, 6 }
   0x6   : > { %s1447_s26 = smov (%p26_p0, %s25_s26), 0  ;;  %p46_p3 = por %p45_p2, %p44_p1 }
   0x7   : > { %s33_s27 = ssub.s32 %s1261_s24, %s1447_s26  ;;  %229 = sbr.rel (%p992_p5) target bundleno = 20 (0x14), region = 32 }
   0x8   : > { %p35_p4 = scmp.eq.s32.totalorder %s33_s27, 0 }
   0xa   : > { %s1338_s29 = scalar_select %p35_p4, %s1253_s22, %s37_s28  }
   0xc   : > { %232 = sbr.rel (!%p46_p3) target bundleno = 20 (0x14), region = 36  ;;  %s234_s30 = sand.u32 (%p46_p3), 1, %s1253_s22  }
   0xd   : > { %s1053_s7 = sshll.u32 (%p46_p3), %s1261_s24, 4  ;;  %s993_s8 = sshll.u32 (%p46_p3), %s234_s30, 6 }
   0xe   : > { %s242_s11 = scalar_lea.vmem (%p46_p3), %s1435_s0, %s1053_s7  ;;  %s236_s12 = scalar_lea.vmem (%p46_p3), [#allocation3], %s993_s8 }
   0xf   : > { %v255_v0 = vld [vmem:[%s242_s11] sm:$0xff] (%p46_p3)  ;;  %v257_v1 = vld [vmem:[%s242_s11 + $0x8] sm:$0xff] (%p46_p3) }
  0x10   : > { %v259_v2 = vld [vmem:[%s242_s11 + $0x60] sm:$0xff] (%p46_p3)  ;;  %256 = vst [vmem:[%s236_s12] sm:$0xff] (%p46_p3), %v255_v0  ;;  %258 = vst [vmem:[%s236_s12 + $0x8] sm:$0xff] (%p46_p3), %v257_v1  ;;  %v261_v3 = vld [vmem:[%s242_s11 + $0x68] sm:$0xff] (%p46_p3) }
  0x11   : > { %260 = vst [vmem:[%s236_s12 + $0x10] sm:$0xff] %v259_v2  ;;  %v263_v4 = vld [vmem:[%s242_s11 + $0xc0] sm:$0xff]  ;;  %v265_v5 = vld [vmem:[%s242_s11 + $0xc8] sm:$0xff]  ;;  %262 = vst [vmem:[%s236_s12 + $0x18] sm:$0xff] %v261_v3 }
  0x12   : > { %264 = vst [vmem:[%s236_s12 + $0x20] sm:$0xff] %v263_v4  ;;  %266 = vst [vmem:[%s236_s12 + $0x28] sm:$0xff] %v265_v5  ;;  %v267_v6 = vld [vmem:[%s242_s11 + $0x120] sm:$0xff]  ;;  %v269_v7 = vld [vmem:[%s242_s11 + $0x128] sm:$0xff] }
  0x13   : > { %268 = vst [vmem:[%s236_s12 + $0x30] sm:$0xff] %v267_v6  ;;  %270 = vst [vmem:[%s236_s12 + $0x38] sm:$0xff] %v269_v7 }
  0x14 PF: > { %p996_p6 = scmp.ge.s32.totalorder %s1265_s25, 1  ;;  %p284_p7 = scmp.lt.s32.totalorder %s1265_s25, 7 }
  0x16   : > { %p285_p8 = pnand %p996_p6, %p284_p7 }
  0x17   : > { %s291_s13 = sand.u32 (!%p285_p8), 1, %s1249_s21   ;;  %s998_s14 = sshll.u32 (!%p285_p8), %s1257_s23, 6 }
  0x18   : > { %288 = sbr.rel (%p285_p8) target bundleno = 609 (0x261), region = 63  ;;  %s997_s15 = sshll.u32 (!%p285_p8), %s291_s13, 6 }
  0x19   : > { %p333_p9 = scmp.lt.s32.totalorder (!%p285_p8), %s998_s14, 383  ;;  %s1355_s20 = scalar_lea.vmem (!%p285_p8), [#allocation3], %s997_s15 }
  0x1a   : > { %p1000_p10 = scmp.ne.s32.totalorder (!%p285_p8), %s1257_s23, 0 }
  0x1d   : > { %s1449_s14 = smov (!%p333_p9, %s998_s14), 383  ;;  %354 = sbr.rel (%p1000_p10) target bundleno = 37 (0x25), region = 71 }
  0x1e   : > { %s999_s16 = sshll.u32 %s1449_s14, 2 }
  0x1f   : > { %s1353_s19 = scalar_lea.vmem %s1436_s1, %s999_s16 }
  0x22   : > { %v1267_v8 = vmov 0.0  }
  0x23   : > { %355 = vst [vmem:[#allocation2 + $0x10] sm:$0xff] %v1267_v8  ;;  %356 = vst [vmem:[#allocation2] sm:$0xff] %v1267_v8 }
  0x24   : > { %357 = vst [vmem:[#allocation2 + $0x18] sm:$0xff] %v1267_v8  ;;  %358 = vst [vmem:[#allocation2 + $0x8] sm:$0xff] %v1267_v8 }
  0x25 PF: > { %v1175_v9 = vld [vmem:[%s1353_s19 + $0x78] sm:$0xff]   ;;  %v1179_v13 = vld [vmem:[%s1353_s19 + $0x70] sm:$0xff]   ;;  %v1183_v17 = vld [vmem:[%s1353_s19 + $0x68] sm:$0xff]   ;;  %p1041_p11 = scmp.ne.s32.totalorder %s1257_s23, 5 }
  0x26   : > { %v1176_v10 = vld [vmem:[%s1353_s19 + $0xf8] sm:$0xff]   ;;  %1078 = vmatprep.subr.bf16.mxu0 %v1175_v9  ;;  %v1180_v14 = vld [vmem:[%s1353_s19 + $0xf0] sm:$0xff]   ;;  %v1184_v18 = vld [vmem:[%s1353_s19 + $0xe8] sm:$0xff]  }
  0x27   : > { %v1177_v11 = vld [vmem:[%s1353_s19 + $0x38] sm:$0xff]   ;;  %1106 = vmatprep.subr.bf16.mxu1 %v1176_v10  ;;  %v1181_v15 = vld [vmem:[%s1353_s19 + $0x30] sm:$0xff]   ;;  %v1185_v19 = vld [vmem:[%s1353_s19 + $0x28] sm:$0xff]  }
  0x28   : > { %v1178_v12 = vld [vmem:[%s1353_s19 + $0xb8] sm:$0xff]   ;;  %1079 = vmatpush3.bf16.msra.mxu0 %v1177_v11  ;;  %v1182_v16 = vld [vmem:[%s1353_s19 + $0xb0] sm:$0xff]   ;;  %v1186_v20 = vld [vmem:[%s1353_s19 + $0xa8] sm:$0xff]  }
  0x29   : > { %1107 = vmatpush3.bf16.msra.mxu1 %v1178_v12  ;;  %1080 = vmatprep.subr.bf16.mxu0 %v1179_v13  ;;  %v1187_v21 = vld [vmem:[%s1353_s19 + $0x60] sm:$0xff]   ;;  %v1191_v25 = vld [vmem:[%s1353_s19 + $0x58] sm:$0xff]   ;;  %v1195_v29 = vld [vmem:[%s1353_s19 + $0x50] sm:$0xff]  }
  0x2a   : > { %1108 = vmatprep.subr.bf16.mxu1 %v1180_v14  ;;  %v1188_v22 = vld [vmem:[%s1353_s19 + $0xe0] sm:$0xff]   ;;  %v1192_v26 = vld [vmem:[%s1353_s19 + $0xd8] sm:$0xff]   ;;  %v1196_v30 = vld [vmem:[%s1353_s19 + $0xd0] sm:$0xff]  }
  0x2b   : > { %v1189_v23 = vld [vmem:[%s1353_s19 + $0x20] sm:$0xff]   ;;  %v1193_v27 = vld [vmem:[%s1353_s19 + $0x18] sm:$0xff]   ;;  %v1197_v31 = vld [vmem:[%s1353_s19 + $0x10] sm:$0xff]  }
  0x2c   : > { %1081 = vmatpush3.bf16.msra.mxu0 %v1181_v15  ;;  %v1190_v24 = vld [vmem:[%s1353_s19 + $0xa0] sm:$0xff]   ;;  %v1194_v28 = vld [vmem:[%s1353_s19 + $0x98] sm:$0xff]   ;;  %v1198_v32 = vld [vmem:[%s1353_s19 + $0x90] sm:$0xff]  }
  0x2d   : > { %1109 = vmatpush3.bf16.msra.mxu1 %v1182_v16  ;;  %1082 = vmatprep.subr.bf16.mxu0 %v1183_v17  ;;  %v1199_v33 = vld [vmem:[%s1353_s19 + $0x48] sm:$0xff]   ;;  %v1203_v37 = vld [vmem:[%s1353_s19 + $0x40] sm:$0xff]   ;;  %v359_v56 = vld [vmem:[#allocation2 + $0x10] sm:$0xff] }
  0x2e   : > { %1110 = vmatprep.subr.bf16.mxu1 %v1184_v18  ;;  %v1200_v34 = vld [vmem:[%s1353_s19 + $0xc8] sm:$0xff]   ;;  %v1204_v38 = vld [vmem:[%s1353_s19 + $0xc0] sm:$0xff]   ;;  %v361_v10 = vld [vmem:[#allocation2 + $0x18] sm:$0xff] }
  0x2f   : > { %v1201_v35 = vld [vmem:[%s1353_s19 + $0x8] sm:$0xff]   ;;  %v1205_v39 = vld [vmem:[%s1353_s19] sm:$0xff]  }
  0x30   : > { %1083 = vmatpush3.bf16.msra.mxu0 %v1185_v19  ;;  %v1202_v36 = vld [vmem:[%s1353_s19 + $0x88] sm:$0xff]   ;;  %v1206_v40 = vld [vmem:[%s1353_s19 + $0x80] sm:$0xff]  }
  0x31   : > { %1111 = vmatpush3.bf16.msra.mxu1 %v1186_v20  ;;  %1084 = vmatprep.subr.bf16.mxu0 %v1187_v21  ;;  %v1207_v41 = vld [vmem:[%s1355_s20] ss:$16 sps:$4 sm:$0xff]   ;;  %v1209_v42 = vld [vmem:[%s1355_s20 + $0x4] ss:$16 sps:$4 sm:$0xff]   ;;  %v1210_v43 = vld [vmem:[%s1355_s20 + $0x8] ss:$16 sps:$4 sm:$0xff]  }
  0x32   : > { %1112 = vmatprep.subr.bf16.mxu1 %v1188_v22  ;;  %v1212_v44 = vld [vmem:[%s1355_s20 + $0xc] ss:$16 sps:$4 sm:$0xff]   ;;  %699 = vmatprep.mubr.bf16.mxu0 %v1209_v42  ;;  %v1213_v45 = vld [vmem:[%s1355_s20 + $0x24] ss:$16 sps:$4 sm:$0xff]   ;;  %v1217_v47 = vld [vmem:[%s1355_s20 + $0x20] ss:$16 sps:$4 sm:$0xff]  }
  0x33   : > { %748 = vmatprep.mubr.bf16.mxu1 %v1212_v44  ;;  %v1215_v46 = vld [vmem:[%s1355_s20 + $0x2c] ss:$16 sps:$4 sm:$0xff]   ;;  %v1218_v48 = vld [vmem:[%s1355_s20 + $0x28] ss:$16 sps:$4 sm:$0xff]   ;;  %v360_v1 = vld [vmem:[#allocation2] sm:$0xff] }
  0x34   : > { %1085 = vmatpush3.bf16.msra.mxu0 %v1189_v23  ;;  %v362_v18 = vld [vmem:[#allocation2 + $0x8] sm:$0xff] }
  0x35   : > { %1113 = vmatpush3.bf16.msra.mxu1 %v1190_v24  ;;  %1086 = vmatprep.subr.bf16.mxu0 %v1191_v25 }
  0x36   : > { %1114 = vmatprep.subr.bf16.mxu1 %v1192_v26 }
  0x38   : > { %1087 = vmatpush3.bf16.msra.mxu0 %v1193_v27 }
  0x39   : > { %1115 = vmatpush3.bf16.msra.mxu1 %v1194_v28  ;;  %1088 = vmatprep.subr.bf16.mxu0 %v1195_v29 }
  0x3a   : > { %1116 = vmatprep.subr.bf16.mxu1 %v1196_v30 }
  0x3c   : > { %1089 = vmatpush3.bf16.msra.mxu0 %v1197_v31 }
  0x3d   : > { %1117 = vmatpush3.bf16.msra.mxu1 %v1198_v32  ;;  %1090 = vmatprep.subr.bf16.mxu0 %v1199_v33 }
  0x3e   : > { %1118 = vmatprep.subr.bf16.mxu1 %v1200_v34 }
  0x40   : > { %1091 = vmatpush3.bf16.msra.mxu0 %v1201_v35 }
  0x41   : > { %1119 = vmatpush3.bf16.msra.mxu1 %v1202_v36  ;;  %1092 = vmatprep.subr.bf16.mxu0 %v1203_v37 }
  0x42   : > { %1120 = vmatprep.subr.bf16.mxu1 %v1204_v38 }
  0x44   : > { %1093 = vmatpush3.bf16.msra.mxu0 %v1205_v39 }
  0x45   : > { %1121 = vmatpush3.bf16.msra.mxu1 %v1206_v40 }
  0x47   : > { %700 = vmatmul.mubr.bf16.vlgmr.msra.gmra.mxu0 %v1207_v41 }
  0x48   : > { %749 = vmatmul.mubr.bf16.vlgmr.msra.gmra.mxu1 %v1210_v43  ;;  %707 = vmatprep.mubr.bf16.mxu0 %v1213_v45 }
  0x49   : > { %756 = vmatprep.mubr.bf16.mxu1 %v1215_v46 }
  0x4f   : > { %708 = vmatmul.mubr.bf16.gmra.mxu0 %v1217_v47 }
  0x50   : > { %757 = vmatmul.mubr.bf16.gmra.mxu1 %v1218_v48 }
 0x107   : > { %v1094_v49 = vpop.f32.mrf.mxu0 }
 0x108   : > { %v1122_v50 = vpop.f32.mrf.mxu1 }
 0x109   : > { %v1095_v51 = vpop.f32.mrf.mxu0 }
 0x10a   : > { %v1096_v52 = vadd.f32 %v1095_v51, %v1094_v49  ;;  %v1123_v53 = vpop.f32.mrf.mxu1 }
 0x10b   : > { %v1124_v54 = vadd.f32 %v1123_v53, %v1122_v50  ;;  %v1097_v55 = vpop.f32.mrf.mxu0 }
 0x10c   : > { %v1125_v57 = vpop.f32.mrf.mxu1 }
 0x10d   : > { %v751_v58 = vadd.f32 %v1124_v54, %v1096_v52  ;;  %v1098_v59 = vpop.f32.mrf.mxu0 }
 0x10e   : > { %v1099_v60 = vadd.f32 %v1098_v59, %v1097_v55  ;;  %v1126_v61 = vpop.f32.mrf.mxu1 }
 0x10f   : > { %v765_v62 = vadd.f32 %v751_v58, %v359_v56  ;;  %v1127_v63 = vadd.f32 %v1126_v61, %v1125_v57  ;;  %v1100_v0 = vpop.f32.mrf.mxu0 }
 0x110   : > { %v1128_v2 = vpop.f32.mrf.mxu1 }
 0x111   : > { %769 = vst [vmem:[#allocation2 + $0x10] sm:$0xff] %v765_v62  ;;  %v754_v3 = vadd.f32 %v1127_v63, %v1099_v60  ;;  %v1101_v4 = vpop.f32.mrf.mxu0 }
 0x112   : > { %v1102_v5 = vadd.f32 %v1101_v4, %v1100_v0  ;;  %v1129_v6 = vpop.f32.mrf.mxu1 }
 0x113   : > { %v766_v7 = vadd.f32 %v754_v3, %v360_v1  ;;  %v1130_v8 = vadd.f32 %v1129_v6, %v1128_v2  ;;  %v1103_v9 = vpop.f32.mrf.mxu0 }
 0x114   : > { %v1131_v11 = vpop.f32.mrf.mxu1 }
 0x115   : > { %770 = vst [vmem:[#allocation2] sm:$0xff] %v766_v7  ;;  %v759_v12 = vadd.f32 %v1130_v8, %v1102_v5  ;;  %v1104_v13 = vpop.f32.mrf.mxu0 }
 0x116   : > { %v1105_v14 = vadd.f32 %v1104_v13, %v1103_v9  ;;  %v1132_v15 = vpop.f32.mrf.mxu1 }
 0x117   : > { %v767_v16 = vadd.f32 %v759_v12, %v361_v10  ;;  %v1133_v17 = vadd.f32 %v1132_v15, %v1131_v11 }
 0x119   : > { %771 = vst [vmem:[#allocation2 + $0x18] sm:$0xff] %v767_v16  ;;  %v762_v19 = vadd.f32 %v1133_v17, %v1105_v14  ;;  %776 = sbr.rel (%p1041_p11) target bundleno = 609 (0x261), region = 75 }
 0x11b   : > { %v768_v20 = vadd.f32 %v762_v19, %v362_v18 }
 0x11d   : > { %772 = vst [vmem:[#allocation2 + $0x8] sm:$0xff] %v768_v20 }
 0x11e   : > { %v777_v21 = vld [vmem:[#allocation2 + $0x10] sm:$0xff]  ;;  %v1042_v22 = vld [vmem:[%s1437_s2] ss:$0 sm:$0xff]  ;;  %v1076_v27 = vld [vmem:[%s1438_s3 + $0x8] sm:$0xff]  }
 0x11f   : > { %v1059_v23 = vld [vmem:[%s1438_s3] sm:$0xff]   ;;  %v788_v24 = vadd.f32 %v1042_v22, %v777_v21  ;;  %v1064_v31 = vunpack.c.l.bf16 %v1076_v27  ;;  %v1065_v34 = vunpack.c.h.bf16 %v1076_v27 }
 0x120   : > { %v1060_v25 = vunpack.c.l.bf16 %v1059_v23  ;;  %v779_v26 = vld [vmem:[#allocation2 + $0x18] sm:$0xff]  ;;  %v778_v28 = vld [vmem:[#allocation2] sm:$0xff]  ;;  %v1061_v29 = vunpack.c.h.bf16 %v1059_v23 }
 0x121   : > { %v790_v30 = vadd.f32 %v1042_v22, %v779_v26  ;;  %v789_v32 = vadd.f32 %v1042_v22, %v778_v28  ;;  %v1043_v6 = vld [vmem:[%s1439_s4] ss:$0 sm:$0xff] }
 0x122   : > { %v800_v35 = vadd.f32 %v1060_v25, %v788_v24  ;;  %v1044_v11 = vld [vmem:[%s1440_s5] ss:$0 sm:$0xff] }
 0x123   : > { %v802_v37 = vadd.f32 %v1064_v31, %v790_v30  ;;  %v801_v38 = vadd.f32 %v1061_v29, %v789_v32 }
 0x124   : > { %v780_v33 = vld [vmem:[#allocation2 + $0x8] sm:$0xff]  ;;  %804 = vadd.xlane.f32.xlu0 %v800_v35 }
 0x125   : > { %v791_v36 = vadd.f32 %v1042_v22, %v780_v33  ;;  %808 = vadd.xlane.f32.xlu1 %v802_v37 }
 0x127   : > { %v803_v39 = vadd.f32 %v1065_v34, %v791_v36 }
 0x128   : > { %806 = vadd.xlane.f32.xlu0 %v801_v38 }
 0x129   : > { %810 = vadd.xlane.f32.xlu1 %v803_v39 }
 0x1ad   : > { %v805_v40 = vpop.xlane.xlu0 %804 }
 0x1ae   : > { %v813_v41 = vmul.f32 0.0078125, %v805_v40  ;;  %v809_v42 = vpop.xlane.xlu1 %808 }
 0x1af   : > { %v815_v43 = vmul.f32 0.0078125, %v809_v42 }
 0x1b0   : > { %v817_v44 = vsub.f32 %v800_v35, %v813_v41 }
 0x1b1   : > { %v819_v45 = vsub.f32 %v802_v37, %v815_v43  ;;  %v807_v46 = vpop.xlane.xlu0 %806 }
 0x1b2   : > { %v814_v47 = vmul.f32 0.0078125, %v807_v46  ;;  %v821_v48 = vmul.f32 %v817_v44, %v817_v44  ;;  %v811_v49 = vpop.xlane.xlu1 %810 }
 0x1b3   : > { %v816_v50 = vmul.f32 0.0078125, %v811_v49  ;;  %v823_v52 = vmul.f32 %v819_v45, %v819_v45 }
 0x1b4   : > { %v818_v51 = vsub.f32 %v801_v38, %v814_v47  ;;  %825 = vadd.xlane.f32.xlu0 %v821_v48 }
 0x1b5   : > { %v820_v53 = vsub.f32 %v803_v39, %v816_v50 }
 0x1b6   : > { %v822_v54 = vmul.f32 %v818_v51, %v818_v51 }
 0x1b7   : > { %v824_v55 = vmul.f32 %v820_v53, %v820_v53 }
 0x1b8   : > { %829 = vadd.xlane.f32.xlu0 %v823_v52  ;;  %827 = vadd.xlane.f32.xlu1 %v822_v54 }
 0x1bc   : > { %831 = vadd.xlane.f32.xlu1 %v824_v55 }
 0x23d   : > { %v826_v56 = vpop.xlane.xlu0 %825 }
 0x23e   : > { %v833_v57 = vmul.f32 0.0078125, %v826_v56 }
 0x240   : > { %v837_v58 = vadd.f32 1e-05, %v833_v57 }
 0x241   : > { %v828_v59 = vpop.xlane.xlu1 %827  ;;  %v830_v60 = vpop.xlane.xlu0 %829 }
 0x242   : > { %1219 = vrsqrt.f32 %v837_v58  ;;  %v834_v61 = vmul.f32 0.0078125, %v828_v59  ;;  %v835_v62 = vmul.f32 0.0078125, %v830_v60 }
 0x244   : > { %v838_v63 = vadd.f32 1e-05, %v834_v61  ;;  %v839_v0 = vadd.f32 1e-05, %v835_v62 }
 0x245   : > { %v832_v1 = vpop.xlane.xlu1 %831 }
 0x246   : > { %1221 = vrsqrt.f32 %v838_v63  ;;  %v836_v2 = vmul.f32 0.0078125, %v832_v1 }
 0x247   : > { %1223 = vrsqrt.f32 %v839_v0 }
 0x248   : > { %v840_v3 = vadd.f32 1e-05, %v836_v2 }
 0x24a   : > { %1225 = vrsqrt.f32 %v840_v3 }
 0x24f   : > { %v1220_v4 = vpop.eup %1219 }
 0x250   : > { %v845_v5 = vmul.f32 %v1220_v4, %v817_v44 }
 0x252   : > { %v856_v9 = vmul.f32 %v1043_v6, %v845_v5 }
 0x253   : > { %v1222_v7 = vpop.eup %1221 }
 0x254   : > { %v1224_v8 = vpop.eup %1223  ;;  %v846_v10 = vmul.f32 %v1222_v7, %v818_v51  ;;  %v867_v15 = vadd.f32 %v1044_v11, %v856_v9 }
 0x255   : > { %v847_v12 = vmul.f32 %v1224_v8, %v819_v45 }
 0x256   : > { %v857_v13 = vmul.f32 %v1043_v6, %v846_v10 }
 0x257   : > { %v1226_v14 = vpop.eup %1225  ;;  %v858_v17 = vmul.f32 %v1043_v6, %v847_v12 }
 0x258   : > { %v868_v16 = vadd.f32 %v1044_v11, %v857_v13  ;;  %v848_v18 = vmul.f32 %v1226_v14, %v820_v53 }
 0x259   : > { %v869_v21 = vadd.f32 %v1044_v11, %v858_v17 }
 0x25a   : > { %v1069_v19 = vpack.c.bf16 %v868_v16, %v867_v15  ;;  %v859_v20 = vmul.f32 %v1043_v6, %v848_v18 }
 0x25c   : > { %1070 = vst [vmem:[%s1441_s6] sm:$0xff] %v1069_v19   ;;  %v870_v22 = vadd.f32 %v1044_v11, %v859_v20 }
 0x25e   : > { %v1074_v23 = vpack.c.bf16 %v870_v22, %v869_v21 }
 0x260   : > { %1077 = vst [vmem:[%s1441_s6 + $0x8] sm:$0xff] %v1074_v23  }
 0x261 PF: > { %s16_s25 = sadd.s32 1, %s1265_s25   ;;  %s1442_s21 = smov %s1253_s22 }
 0x262   : > { %p13_p12 = scmp.ge.s32.totalorder %s16_s25, 8   ;;  %s1443_s22 = smov %s1338_s29 }
 0x263   : > { %s1444_s23 = smov %s1261_s24  ;;  %s1445_s24 = smov %s1447_s26 }
 0x264   :  { %15 = sbr.rel (!%p13_p12) target bundleno = 3 (0x3), region = 116 }

// kernel: transformer_forward.37
= control target key start
LH: loop header
LB: loop body
LE: loop exit
PB: predicated region body
PF: predicated region fallthrough
CT: control target
= control target key end

     0   :  { %s307_s0 = inlined_call_operand.vmem [shape: bf16[32,128], index: 0, kind: input, shape index: {}]   ;;  %s308_s1 = inlined_call_operand.vmem [shape: bf16[128,128], index: 1, kind: input, shape index: {}]   ;;  %s309_s2 = inlined_call_operand.vmem [shape: f32[1,128], index: 2, kind: input, shape index: {}]   ;;  %s310_s3 = inlined_call_operand.hbm [shape: f32[32,128], index: 3, kind: output, shape index: {}]  }
   0x1   :  { %v216_v0 = vld [vmem:[%s308_s1 + $0x38] sm:$0xff]   ;;  %v217_v1 = vld [vmem:[%s308_s1 + $0x30] sm:$0xff]   ;;  %v218_v2 = vld [vmem:[%s308_s1 + $0x28] sm:$0xff]  }
   0x2   :  { %193 = vmatprep.subr.bf16.mxu0 %v216_v0  ;;  %v219_v3 = vld [vmem:[%s308_s1 + $0x20] sm:$0xff]  }
   0x3   :  { %194 = vmatpush3.bf16.msra.mxu0 %v216_v0  ;;  %v224_v4 = vld [vmem:[%s307_s0] sm:$0xff]  }
   0x4   :  { %195 = vmatprep.subr.bf16.mxu0 %v217_v1  ;;  %209 = vmatprep.mubr.bf16.mxu0 %v224_v4 }
   0x7   :  { %196 = vmatpush3.bf16.msra.mxu0 %v217_v1 }
   0x8   :  { %197 = vmatprep.subr.bf16.mxu0 %v218_v2 }
   0x9   :  { %8 = vsyncpa [#allocation3], 0  ;;  %v220_v5 = vld [vmem:[%s308_s1 + $0x18] sm:$0xff]   ;;  %v221_v6 = vld [vmem:[%s308_s1 + $0x10] sm:$0xff]   ;;  %s248_s7 = smov [#allocation2]  }
   0xa   :  { %v222_v7 = vld [vmem:[%s308_s1 + $0x8] sm:$0xff]   ;;  %v223_v8 = vld [vmem:[%s308_s1] sm:$0xff]   ;;  %s161_s8 = sshll.u32 %s248_s7, 4  ;;  %s162_s8 = int_to_ptr.vmem [resolvable:$true] %s161_s8 }
   0xb   :  { %198 = vmatpush3.bf16.msra.mxu0 %v218_v2  ;;  %v225_v9 = vld [vmem:[%s307_s0 + $0x8] sm:$0xff]   ;;  %v172_v10 = vld [vmem:[%s309_s2] ss:$0 sm:$0xff]  ;;  %s226_s0 = scalar_lea.vmem %s162_s8, 512  ;;  %p231_p1 = scmp.lt.s32.totalorder %s162_s8, %s162_s8 }
   0xc   :  { %199 = vmatprep.subr.bf16.mxu0 %v219_v3  ;;  %p227_p0 = scmp.ne.s32.totalorder %s162_s8, %s226_s0  ;;  %p232_p2 = scmp.lt.s32.totalorder %s226_s0, %s226_s0 }
   0xe   :  { %p233_p3 = por %p232_p2, %p231_p1 }
   0xf   :  { %200 = vmatpush3.bf16.msra.mxu0 %v219_v3 }
  0x10   :  { %201 = vmatprep.subr.bf16.mxu0 %v220_v5  ;;  %p234_p4 = pnand %p233_p3, %p227_p0 }
  0x13   :  { %202 = vmatpush3.bf16.msra.mxu0 %v220_v5 }
  0x14   :  { %203 = vmatprep.subr.bf16.mxu0 %v221_v6 }
  0x17   :  { %204 = vmatpush3.bf16.msra.mxu0 %v221_v6 }
  0x18   :  { %205 = vmatprep.subr.bf16.mxu0 %v222_v7 }
  0x1b   :  { %206 = vmatpush3.bf16.msra.mxu0 %v222_v7 }
  0x1c   :  { %207 = vmatprep.subr.bf16.mxu0 %v223_v8 }
  0x1f   :  { %208 = vmatpush3.bf16.msra.mxu0 %v223_v8 }
  0x22   :  { %210 = vmatmul.mubr.bf16.vlgmr.msra.gmra.mxu0 %v225_v9 }
  0xe2   :  { %v211_v11 = vpop.f32.mrf.mxu0 }
  0xe3   :  { %v146_v12 = vadd.f32 %v211_v11, %v172_v10 }
  0xe4   :  { %v137_v13 = vpop.f32.mrf.mxu0 }
  0xe5   :  { %154 = vst [vmem:[#allocation2 + $0x10] sm:$0xff] %v146_v12  ;;  %v138_v14 = vadd.f32 %v172_v10, %v137_v13 }
  0xe6   :  { %v212_v15 = vpop.f32.mrf.mxu0 }
  0xe7   :  { %152 = vst [vmem:[#allocation2] sm:$0xff] %v138_v14  ;;  %v149_v16 = vadd.f32 %v212_v15, %v172_v10 }
  0xe8   :  { %v140_v17 = vpop.f32.mrf.mxu0 }
  0xe9   :  { %155 = vst [vmem:[#allocation2 + $0x18] sm:$0xff] %v149_v16  ;;  %v141_v18 = vadd.f32 %v172_v10, %v140_v17 }
  0xeb   :  { %153 = vst [vmem:[#allocation2 + $0x8] sm:$0xff] %v141_v18 }
  0xec   :  { %237 = shalt.err (!%p234_p4)
}
  0xed   :  { %s249_s1 = smov 128   ;;  %s250_s2 = smov 8  }
  0xee   :  { %167 = dma.vmem_to_hbm [thread:$0]  %s162_s8, 512, %s310_s3, [#allocation3], %s249_s1, %s249_s1, %s250_s2  }
  0xef   :  { %246 = dma.done.wait [#allocation3], 512  }
  0xf0   :  { %247 = vsyncadd [#allocation3], 4294966784 }
  0xf1   :  { %171 = vsyncpa [#allocation3], 1 }

</bundles_post_ra>
